<compile_context>
chip_gen: v7x
topology: tpu7x:2x2x1
jax: 0.10.0
libtpu: 0.0.40
codegen_flags: <defaults>
</compile_context>

<pallas_src>
import jax
import jax.numpy as jnp
import numpy as np
from jax.experimental import pallas as pl
from jax.experimental.pallas import tpu as pltpu

HIDDEN = 32
NUM_HEADS = 8                 # head_dim = 4
HEAD_DIM = HIDDEN // NUM_HEADS
GENE_NUM = 16
REACTION_NUM = 8
METABOLITE_NUM = 8
OUT_CHANNELS = 2              # [:, 0:1] fitness, [:, 1:2] gene_interaction
PATTERN = ["S", "M", "S", "M"]
BATCH_SIZE = 2

NT_GENE, NT_RXN, NT_MET = 0, 1, 2

VMEM_SPEC = pl.BlockSpec(memory_space=pltpu.MemorySpace.VMEM)


# ---------------------------- fused Pallas kernel ----------------------------

def _fused_forward_kernel(
    xg_ref,            # [N, H]   concatenated (cell | batch) gene embeddings
    sab_ref,           # [N, N]   combined SAB mask (block-diag over graphs/batch)
    adj_ref,           # [N, N]   combined gene-gene adjacency mask
    onehot_ref,        # [N, 1+B] combined segment one-hot (col 0 = whole cell)
    head_sel_ref,      # [NH*N, H]     static head block-diagonal selector
    seg_sum_ref,       # [NH*N, NH*N]  static per-head segment-sum matrix
    pre_w_ref, pre_v_ref,
    nsa_wqkv_ref, nsa_bqkv_ref, nsa_wo_ref, nsa_bo_ref,
    post_g_ref, post_b_ref,
    gate_w1_ref, gate_b1_ref, gate_w2_ref, gate_b2_ref,
    trans_w_ref, trans_b_ref, head_w_ref, head_b_ref,
    out_ref,           # [>=8, 128] packed lane-dense output slab
):
    f32 = jnp.float32
    bf16 = jnp.bfloat16
    H = HIDDEN
    NH = NUM_HEADS
    scale = 1.0 / (HEAD_DIM ** 0.5)

    N = xg_ref.shape[0]
    NSEG = onehot_ref.shape[1]

    def mxu(a, b):
        # bf16 operands, f32 accumulate (cheaper MXU passes, halved vreg traffic)
        return jnp.dot(a.astype(bf16), b.astype(bf16), preferred_element_type=f32)

    def layer_norm(x, g, b):
        mu = jnp.mean(x, axis=-1, keepdims=True)
        var = jnp.mean((x - mu) ** 2, axis=-1, keepdims=True)
        return (x - mu) * jax.lax.rsqrt(var + 1e-5) * g + b

    # ---- hoisted constants (computed once, reused by all 4 steps) ----
    head_sel = head_sel_ref[...]                      # [NH*N, H]
    seg_sum = seg_sum_ref[...]                        # [NH*N, NH*N]

    def expand_mask(m):
        keep = jnp.concatenate([m] * NH, axis=1)      # [N, NH*N], tiled over heads
        bias = (keep - 1.0) * 1e9                     # 0 where kept, -1e9 masked
        return keep, bias

    sab_keep, sab_bias = expand_mask(sab_ref[...])
    adj_keep, adj_bias = expand_mask(adj_ref[...])

    # ---- PreProcessor: 2 x [Linear -> LayerNorm(shared) -> ReLU -> Dropout(id)]
    g_ln = pre_v_ref[2:3, :]
    b_ln = pre_v_ref[3:4, :]
    y = mxu(xg_ref[...], pre_w_ref[0]) + pre_v_ref[0:1, :]
    y = jnp.maximum(layer_norm(y, g_ln, b_ln), 0.0)
    y = mxu(y, pre_w_ref[1]) + pre_v_ref[1:2, :]
    xg = jnp.maximum(layer_norm(y, g_ln, b_ln), 0.0)

    # ---- NSA gene branch (rxn/met branches are dead code w.r.t. the outputs) --
    # TODO(synk): if the reference HeteroNSA is ever changed to bidirectional
    # gene<->reaction<->metabolite message passing, the rxn/met branches must be
    # reinstated here.
    def mha(x, keep, bias, s):
        # packed QKV projection
        qkv = mxu(x, nsa_wqkv_ref[s]) + nsa_bqkv_ref[s]          # [N, 3H]
        q = qkv[:, :H]
        k = qkv[:, H:2 * H]
        v = qkv[:, 2 * H:]
        # block-diagonal (per-head) K / V layouts -> lane-dense full-width matmuls
        k_bd = jnp.concatenate([k] * NH, axis=0) * head_sel      # [NH*N, H]
        v_bd = jnp.concatenate([v] * NH, axis=0) * head_sel      # [NH*N, H]
        scores = jnp.einsum("nd,md->nm", q.astype(bf16), k_bd.astype(bf16),
                            preferred_element_type=f32) * scale + bias   # [N, NH*N]
        # per-row shift (softmax is shift-invariant per head segment)
        scores = scores - jnp.max(scores, axis=-1, keepdims=True)
        e = jnp.exp(scores) * keep
        # per-head denominators, already broadcast back over lanes, via one matmul
        denom = jnp.dot(e, seg_sum, preferred_element_type=f32)          # [N, NH*N]
        probs = e * pl.reciprocal(denom + 1e-9, approx=True)
        o = mxu(probs, v_bd)                                             # [N, H]
        return mxu(o, nsa_wo_ref[s]) + nsa_bo_ref[s]

    h = xg
    for s, kind in enumerate(PATTERN):
        if kind == "S":
            h = h + mha(h, sab_keep, sab_bias, s)
        else:  # 'M' : masked attention along gene-gene graph structure
            h = h + mha(h, adj_keep, adj_bias, s)

    # post-NSA residual + LayerNorm (gene node type)
    zg = layer_norm(h + xg, post_g_ref[...], post_b_ref[...])

    # ---- AttentionalAggregation over combined segments (cell | batch elems) ---
    onehot = onehot_ref[...]                                             # [N, NSEG]
    gate_h = jnp.maximum(mxu(zg, gate_w1_ref[...]) + gate_b1_ref[...], 0.0)
    gate = mxu(gate_h, gate_w2_ref[...]) + gate_b2_ref[...]              # [N, 1]
    trans = jnp.maximum(mxu(zg, trans_w_ref[...]) + trans_b_ref[...], 0.0)
    logits = jnp.where(onehot > 0.0, gate, -1e9)                         # [N, NSEG]
    mseg = jnp.max(logits, axis=0, keepdims=True)
    e = jnp.exp(logits - mseg) * onehot
    denom = jnp.sum(e, axis=0, keepdims=True)
    a = e * pl.reciprocal(denom + 1e-9, approx=True)                     # [N, NSEG]
    agg = jnp.einsum("ns,nd->sd", a, trans,
                     preferred_element_type=f32)                         # [NSEG, H]

    bsz = NSEG - 1
    z_w = agg[0:1, :]
    z_i = agg[1:NSEG, :]
    z_w_exp = jnp.broadcast_to(z_w, (bsz, H))
    z_p = z_w_exp - z_i
    pred = mxu(z_p, head_w_ref[...]) + head_b_ref[...]                   # [bsz, 2]

    # ---- single full-tile lane-dense store of the packed output slab ----
    rows, cols = out_ref.shape
    pad_lanes = cols - (3 * H + OUT_CHANNELS)
    slab = jnp.concatenate(
        [z_w_exp, z_i, z_p, pred, jnp.zeros((bsz, pad_lanes), f32)], axis=1)
    slab = jnp.concatenate(
        [slab, jnp.zeros((rows - bsz, cols), f32)], axis=0)
    out_ref[...] = slab


# ---------------------------- parameters ----------------------------

def init_params(key):
    def nrm(k, shape, scl=0.1):
        return scl * jax.random.normal(k, shape, jnp.float32)

    keys = iter(jax.random.split(key, 64))
    p = {}
    p["gene_emb"] = nrm(next(keys), (GENE_NUM, HIDDEN), 1.0)
    p["rxn_emb"] = nrm(next(keys), (REACTION_NUM, HIDDEN), 1.0)
    p["met_emb"] = nrm(next(keys), (METABOLITE_NUM, HIDDEN), 1.0)

    # PreProcessor: 2 x [Linear, shared LayerNorm, ReLU, Dropout(id)]
    p["pre_w"] = jnp.stack([nrm(next(keys), (HIDDEN, HIDDEN)),
                            nrm(next(keys), (HIDDEN, HIDDEN))])            # [2,H,H]
    p["pre_v"] = jnp.stack([jnp.zeros((HIDDEN,), jnp.float32),             # b1
                            jnp.zeros((HIDDEN,), jnp.float32),             # b2
                            jnp.ones((HIDDEN,), jnp.float32),              # ln gamma
                            jnp.zeros((HIDDEN,), jnp.float32)])            # ln beta

    # HeteroNSA weights packed: [step, node_type, ...] with fused QKV.
    ns, nt = len(PATTERN), 3
    p["nsa_wqkv"] = nrm(next(keys), (ns, nt, HIDDEN, 3 * HIDDEN))
    p["nsa_bqkv"] = jnp.zeros((ns, nt, 1, 3 * HIDDEN), jnp.float32)
    p["nsa_wo"] = nrm(next(keys), (ns, nt, HIDDEN, HIDDEN))
    p["nsa_bo"] = jnp.zeros((ns, nt, 1, HIDDEN), jnp.float32)

    # Post-NSA layer norms per node type.
    p["post_g"] = jnp.ones((nt, HIDDEN), jnp.float32)
    p["post_b"] = jnp.zeros((nt, HIDDEN), jnp.float32)

    # AttentionalGraphAggregation.
    p["gate_w1"] = nrm(next(keys), (HIDDEN, HIDDEN // 2))
    p["gate_b1"] = jnp.zeros((1, HIDDEN // 2), jnp.float32)
    p["gate_w2"] = nrm(next(keys), (HIDDEN // 2, 1))
    p["gate_b2"] = jnp.zeros((1, 1), jnp.float32)
    p["trans_w"] = nrm(next(keys), (HIDDEN, HIDDEN))
    p["trans_b"] = jnp.zeros((1, HIDDEN), jnp.float32)

    # Prediction head (num_layers=1): single Linear(H, out_channels).
    p["head_w"] = nrm(next(keys), (HIDDEN, OUT_CHANNELS))
    p["head_b"] = jnp.zeros((1, OUT_CHANNELS), jnp.float32)
    return p


# ---------------------------- model forward ----------------------------

def hetero_cell_nsa_forward(p, cell_graph, batch_graph, batch_onehot):
    H = HIDDEN
    ng_c = cell_graph["n_gene"]
    ng_b = batch_graph["n_gene"]
    B = batch_onehot.shape[1]
    N = ng_c + ng_b

    def lookup(table, n):
        return table[jnp.arange(n) % table.shape[0]]

    # concatenated gene rows: whole-cell graph first, then the batched graph
    xg = jnp.concatenate([lookup(p["gene_emb"], ng_c),
                          lookup(p["gene_emb"], ng_b)], axis=0)          # [N, H]

    def block_diag2(a, b):
        za = jnp.zeros((a.shape[0], b.shape[1]), jnp.float32)
        zb = jnp.zeros((b.shape[0], a.shape[1]), jnp.float32)
        return jnp.concatenate([jnp.concatenate([a, za], axis=1),
                                jnp.concatenate([zb, b], axis=1)], axis=0)

    # combined masks: cell-graph genes never attend to batch-graph genes
    sab = block_diag2(jnp.ones((ng_c, ng_c), jnp.float32), batch_graph["sab_gene"])
    adj = block_diag2(cell_graph["adj_gene"], batch_graph["adj_gene"])

    # combined segment one-hot: segment 0 = whole-cell graph, 1..B = batch graphs
    onehot = jnp.concatenate(
        [jnp.concatenate([jnp.ones((ng_c, 1), jnp.float32),
                          jnp.zeros((ng_c, B), jnp.float32)], axis=1),
         jnp.concatenate([jnp.zeros((ng_b, 1), jnp.float32), batch_onehot], axis=1)],
        axis=0)                                                          # [N, 1+B]

    # static per-head block-diagonal selector and per-head segment-sum matrices
    r = np.arange(NUM_HEADS * N)
    head_sel = jnp.asarray(
        (r[:, None] // N == np.arange(H)[None, :] // HEAD_DIM).astype(np.float32))
    seg_sum = jnp.asarray((r[:, None] // N == r[None, :] // N).astype(np.float32))

    out_rows = max(8, B)
    out_cols = ((3 * H + OUT_CHANNELS + 127) // 128) * 128

    args = (
        xg, sab, adj, onehot, head_sel, seg_sum,
        p["pre_w"], p["pre_v"],
        p["nsa_wqkv"][:, NT_GENE], p["nsa_bqkv"][:, NT_GENE],
        p["nsa_wo"][:, NT_GENE], p["nsa_bo"][:, NT_GENE],
        p["post_g"][NT_GENE:NT_GENE + 1], p["post_b"][NT_GENE:NT_GENE + 1],
        p["gate_w1"], p["gate_b1"], p["gate_w2"], p["gate_b2"],
        p["trans_w"], p["trans_b"], p["head_w"], p["head_b"],
    )

    packed = pl.pallas_call(
        _fused_forward_kernel,
        out_shape=jax.ShapeDtypeStruct((out_rows, out_cols), jnp.float32),
        in_specs=[VMEM_SPEC] * len(args),
        out_specs=VMEM_SPEC,
    )(*args)

    z_w = packed[0:1, 0:H]
    z_i = packed[0:B, H:2 * H]
    z_p = packed[0:B, 2 * H:3 * H]
    predictions = packed[0:B, 3 * H:3 * H + OUT_CHANNELS]
    fitness = predictions[:, 0:1]
    gene_interaction = predictions[:, 1:2]
    return predictions, {"z_w": z_w, "z_i": z_i, "z_p": z_p,
                         "fitness": fitness, "gene_interaction": gene_interaction}


# ---------------------------- synthetic graphs ----------------------------

def make_graphs(key):
    kg, kgpr, krmr = jax.random.split(key, 3)
    ng, nr, nm = GENE_NUM, REACTION_NUM, METABOLITE_NUM

    adj = jax.random.bernoulli(kg, 0.3, (ng, ng)) | jnp.eye(ng, dtype=bool)
    gpr = jax.random.bernoulli(kgpr, 0.3, (nr, ng))
    gpr = gpr.at[jnp.arange(nr), jnp.arange(nr) % ng].set(True)
    rmr = jax.random.bernoulli(krmr, 0.3, (nm, nr))
    rmr = rmr.at[jnp.arange(nm), jnp.arange(nm) % nr].set(True)

    f = lambda m: m.astype(jnp.float32)
    cell_graph = {
        "n_gene": ng, "n_rxn": nr, "n_met": nm,
        "adj_gene": f(adj), "gpr": f(gpr), "rmr": f(rmr),
    }

    B = BATCH_SIZE
    bd = lambda m: jnp.kron(jnp.eye(B, dtype=jnp.float32), f(m))  # block-diag per graph
    batch_graph = {
        "n_gene": ng * B, "n_rxn": nr * B, "n_met": nm * B,
        "adj_gene": bd(adj), "gpr": bd(gpr), "rmr": bd(rmr),
        "sab_gene": bd(jnp.ones((ng, ng), jnp.float32)),
        "sab_rxn": bd(jnp.ones((nr, nr), jnp.float32)),
        "sab_met": bd(jnp.ones((nm, nm), jnp.float32)),
    }

    batch_idx = jnp.repeat(jnp.arange(B), ng)
    batch_onehot = jax.nn.one_hot(batch_idx, B, dtype=jnp.float32)
    return cell_graph, batch_graph, batch_onehot


if __name__ == "__main__":
    key = jax.random.PRNGKey(0)
    kp, kgraph = jax.random.split(key)
    params = init_params(kp)
    cell_graph, batch_graph, batch_onehot = make_graphs(kgraph)

    predictions, aux = hetero_cell_nsa_forward(params, cell_graph, batch_graph, batch_onehot)
    jax.block_until_ready(predictions)
    jax.block_until_ready(aux["z_p"])

    assert predictions.shape == (BATCH_SIZE, OUT_CHANNELS)
    assert aux["z_w"].shape == (1, HIDDEN)
    assert aux["z_i"].shape == (BATCH_SIZE, HIDDEN)
    assert aux["fitness"].shape == (BATCH_SIZE, 1)
    assert aux["gene_interaction"].shape == (BATCH_SIZE, 1)
    assert bool(jnp.all(jnp.isfinite(predictions)))
    print("KERNEL_OK")
</pallas_src>

<mosaic_0001>
module attributes {stable_mosaic.version = 11 : i64} {
  func.func @_fused_forward_kernel(%arg0: memref<48x32xf32, #tpu.memory_space<vmem>>, %arg1: memref<48x48xf32, #tpu.memory_space<vmem>>, %arg2: memref<48x48xf32, #tpu.memory_space<vmem>>, %arg3: memref<48x3xf32, #tpu.memory_space<vmem>>, %arg4: memref<384x32xf32, #tpu.memory_space<vmem>>, %arg5: memref<384x384xf32, #tpu.memory_space<vmem>>, %arg6: memref<2x32x32xf32, #tpu.memory_space<vmem>>, %arg7: memref<4x32xf32, #tpu.memory_space<vmem>>, %arg8: memref<4x32x96xf32, #tpu.memory_space<vmem>>, %arg9: memref<4x1x96xf32, #tpu.memory_space<vmem>>, %arg10: memref<4x32x32xf32, #tpu.memory_space<vmem>>, %arg11: memref<4x1x32xf32, #tpu.memory_space<vmem>>, %arg12: memref<1x32xf32, #tpu.memory_space<vmem>>, %arg13: memref<1x32xf32, #tpu.memory_space<vmem>>, %arg14: memref<32x16xf32, #tpu.memory_space<vmem>>, %arg15: memref<1x16xf32, #tpu.memory_space<vmem>>, %arg16: memref<16x1xf32, #tpu.memory_space<vmem>>, %arg17: memref<1x1xf32, #tpu.memory_space<vmem>>, %arg18: memref<32x32xf32, #tpu.memory_space<vmem>>, %arg19: memref<1x32xf32, #tpu.memory_space<vmem>>, %arg20: memref<32x2xf32, #tpu.memory_space<vmem>>, %arg21: memref<1x2xf32, #tpu.memory_space<vmem>>, %arg22: memref<8x128xf32, #tpu.memory_space<vmem>>) attributes {dimension_semantics = [], scalar_prefetch = 0 : i64, scratch_operands = 0 : i64, tpu.core_type = #tpu.core_type<tc>} {
    %c0 = arith.constant 0 : index
    %c0_0 = arith.constant 0 : index
    %0 = vector.load %arg4[%c0, %c0_0] : memref<384x32xf32, #tpu.memory_space<vmem>>, vector<384x32xf32>
    %c0_1 = arith.constant 0 : index
    %c0_2 = arith.constant 0 : index
    %1 = vector.load %arg5[%c0_1, %c0_2] : memref<384x384xf32, #tpu.memory_space<vmem>>, vector<384x384xf32>
    %c0_3 = arith.constant 0 : index
    %c0_4 = arith.constant 0 : index
    %2 = vector.load %arg1[%c0_3, %c0_4] : memref<48x48xf32, #tpu.memory_space<vmem>>, vector<48x48xf32>
    %3 = tpu.concatenate %2, %2, %2, %2, %2, %2, %2, %2 in 1 : vector<48x48xf32>, vector<48x48xf32>, vector<48x48xf32>, vector<48x48xf32>, vector<48x48xf32>, vector<48x48xf32>, vector<48x48xf32>, vector<48x48xf32> -> vector<48x384xf32>
    %cst = arith.constant 1.000000e+00 : f32
    %4 = vector.broadcast %cst : f32 to vector<48x384xf32>
    %5 = arith.subf %3, %4 : vector<48x384xf32>
    %cst_5 = arith.constant 1.000000e+09 : f32
    %6 = vector.broadcast %cst_5 : f32 to vector<48x384xf32>
    %7 = arith.mulf %5, %6 : vector<48x384xf32>
    %c0_6 = arith.constant 0 : index
    %c0_7 = arith.constant 0 : index
    %8 = vector.load %arg2[%c0_6, %c0_7] : memref<48x48xf32, #tpu.memory_space<vmem>>, vector<48x48xf32>
    %9 = tpu.concatenate %8, %8, %8, %8, %8, %8, %8, %8 in 1 : vector<48x48xf32>, vector<48x48xf32>, vector<48x48xf32>, vector<48x48xf32>, vector<48x48xf32>, vector<48x48xf32>, vector<48x48xf32>, vector<48x48xf32> -> vector<48x384xf32>
    %cst_8 = arith.constant 1.000000e+00 : f32
    %10 = vector.broadcast %cst_8 : f32 to vector<48x384xf32>
    %11 = arith.subf %9, %10 : vector<48x384xf32>
    %cst_9 = arith.constant 1.000000e+09 : f32
    %12 = vector.broadcast %cst_9 : f32 to vector<48x384xf32>
    %13 = arith.mulf %11, %12 : vector<48x384xf32>
    %c2 = arith.constant 2 : index
    %c0_10 = arith.constant 0 : index
    %14 = vector.load %arg7[%c2, %c0_10] : memref<4x32xf32, #tpu.memory_space<vmem>>, vector<1x32xf32>
    %c3 = arith.constant 3 : index
    %c0_11 = arith.constant 0 : index
    %15 = vector.load %arg7[%c3, %c0_11] : memref<4x32xf32, #tpu.memory_space<vmem>>, vector<1x32xf32>
    %c0_12 = arith.constant 0 : index
    %c0_13 = arith.constant 0 : index
    %16 = vector.load %arg0[%c0_12, %c0_13] : memref<48x32xf32, #tpu.memory_space<vmem>>, vector<48x32xf32>
    %c0_14 = arith.constant 0 : index
    %c0_15 = arith.constant 0 : index
    %c0_16 = arith.constant 0 : index
    %17 = vector.load %arg6[%c0_14, %c0_15, %c0_16] : memref<2x32x32xf32, #tpu.memory_space<vmem>>, vector<1x32x32xf32>
    %18 = vector.shape_cast %17 : vector<1x32x32xf32> to vector<32x32xf32>
    %19 = arith.truncf %16 : vector<48x32xf32> to vector<48x32xbf16>
    %20 = arith.truncf %18 : vector<32x32xf32> to vector<32x32xbf16>
    %cst_17 = arith.constant dense<0.000000e+00> : vector<48x32xf32>
    %21 = tpu.matmul %19, %20, %cst_17 {dimension_numbers = #tpu.dot_dimension_numbers<[1], [0], [0], [1], [0, 0, 1, 1], [], []>} : vector<48x32xbf16>, vector<32x32xbf16>, vector<48x32xf32> -> vector<48x32xf32>
    %c0_18 = arith.constant 0 : index
    %c0_19 = arith.constant 0 : index
    %22 = vector.load %arg7[%c0_18, %c0_19] : memref<4x32xf32, #tpu.memory_space<vmem>>, vector<1x32xf32>
    %23 = vector.broadcast %22 : vector<1x32xf32> to vector<48x32xf32>
    %24 = arith.addf %21, %23 : vector<48x32xf32>
    %cst_20 = arith.constant dense<0.000000e+00> : vector<48xf32>
    %25 = vector.multi_reduction <add>, %24, %cst_20 [1] : vector<48x32xf32> to vector<48xf32>
    %26 = vector.shape_cast %25 : vector<48xf32> to vector<48x1xf32>
    %cst_21 = arith.constant 3.200000e+01 : f32
    %27 = vector.broadcast %cst_21 : f32 to vector<48x1xf32>
    %28 = arith.divf %26, %27 : vector<48x1xf32>
    %29 = vector.broadcast %28 : vector<48x1xf32> to vector<48x32xf32>
    %30 = arith.subf %24, %29 : vector<48x32xf32>
    %31 = arith.mulf %30, %30 : vector<48x32xf32>
    %cst_22 = arith.constant dense<0.000000e+00> : vector<48xf32>
    %32 = vector.multi_reduction <add>, %31, %cst_22 [1] : vector<48x32xf32> to vector<48xf32>
    %33 = vector.shape_cast %32 : vector<48xf32> to vector<48x1xf32>
    %cst_23 = arith.constant 3.200000e+01 : f32
    %34 = vector.broadcast %cst_23 : f32 to vector<48x1xf32>
    %35 = arith.divf %33, %34 : vector<48x1xf32>
    %36 = vector.broadcast %28 : vector<48x1xf32> to vector<48x32xf32>
    %37 = arith.subf %24, %36 : vector<48x32xf32>
    %cst_24 = arith.constant 9.99999974E-6 : f32
    %38 = vector.broadcast %cst_24 : f32 to vector<48x1xf32>
    %39 = arith.addf %35, %38 : vector<48x1xf32>
    %40 = math.rsqrt %39 : vector<48x1xf32>
    %41 = vector.broadcast %40 : vector<48x1xf32> to vector<48x32xf32>
    %42 = arith.mulf %37, %41 : vector<48x32xf32>
    %43 = vector.broadcast %14 : vector<1x32xf32> to vector<48x32xf32>
    %44 = arith.mulf %42, %43 : vector<48x32xf32>
    %45 = vector.broadcast %15 : vector<1x32xf32> to vector<48x32xf32>
    %46 = arith.addf %44, %45 : vector<48x32xf32>
    %cst_25 = arith.constant 0.000000e+00 : f32
    %47 = vector.broadcast %cst_25 : f32 to vector<48x32xf32>
    %48 = arith.maximumf %46, %47 : vector<48x32xf32>
    %c1 = arith.constant 1 : index
    %c0_26 = arith.constant 0 : index
    %c0_27 = arith.constant 0 : index
    %49 = vector.load %arg6[%c1, %c0_26, %c0_27] : memref<2x32x32xf32, #tpu.memory_space<vmem>>, vector<1x32x32xf32>
    %50 = vector.shape_cast %49 : vector<1x32x32xf32> to vector<32x32xf32>
    %51 = arith.truncf %48 : vector<48x32xf32> to vector<48x32xbf16>
    %52 = arith.truncf %50 : vector<32x32xf32> to vector<32x32xbf16>
    %cst_28 = arith.constant dense<0.000000e+00> : vector<48x32xf32>
    %53 = tpu.matmul %51, %52, %cst_28 {dimension_numbers = #tpu.dot_dimension_numbers<[1], [0], [0], [1], [0, 0, 1, 1], [], []>} : vector<48x32xbf16>, vector<32x32xbf16>, vector<48x32xf32> -> vector<48x32xf32>
    %c1_29 = arith.constant 1 : index
    %c0_30 = arith.constant 0 : index
    %54 = vector.load %arg7[%c1_29, %c0_30] : memref<4x32xf32, #tpu.memory_space<vmem>>, vector<1x32xf32>
    %55 = vector.broadcast %54 : vector<1x32xf32> to vector<48x32xf32>
    %56 = arith.addf %53, %55 : vector<48x32xf32>
    %cst_31 = arith.constant dense<0.000000e+00> : vector<48xf32>
    %57 = vector.multi_reduction <add>, %56, %cst_31 [1] : vector<48x32xf32> to vector<48xf32>
    %58 = vector.shape_cast %57 : vector<48xf32> to vector<48x1xf32>
    %cst_32 = arith.constant 3.200000e+01 : f32
    %59 = vector.broadcast %cst_32 : f32 to vector<48x1xf32>
    %60 = arith.divf %58, %59 : vector<48x1xf32>
    %61 = vector.broadcast %60 : vector<48x1xf32> to vector<48x32xf32>
    %62 = arith.subf %56, %61 : vector<48x32xf32>
    %63 = arith.mulf %62, %62 : vector<48x32xf32>
    %cst_33 = arith.constant dense<0.000000e+00> : vector<48xf32>
    %64 = vector.multi_reduction <add>, %63, %cst_33 [1] : vector<48x32xf32> to vector<48xf32>
    %65 = vector.shape_cast %64 : vector<48xf32> to vector<48x1xf32>
    %cst_34 = arith.constant 3.200000e+01 : f32
    %66 = vector.broadcast %cst_34 : f32 to vector<48x1xf32>
    %67 = arith.divf %65, %66 : vector<48x1xf32>
    %68 = vector.broadcast %60 : vector<48x1xf32> to vector<48x32xf32>
    %69 = arith.subf %56, %68 : vector<48x32xf32>
    %cst_35 = arith.constant 9.99999974E-6 : f32
    %70 = vector.broadcast %cst_35 : f32 to vector<48x1xf32>
    %71 = arith.addf %67, %70 : vector<48x1xf32>
    %72 = math.rsqrt %71 : vector<48x1xf32>
    %73 = vector.broadcast %72 : vector<48x1xf32> to vector<48x32xf32>
    %74 = arith.mulf %69, %73 : vector<48x32xf32>
    %75 = vector.broadcast %14 : vector<1x32xf32> to vector<48x32xf32>
    %76 = arith.mulf %74, %75 : vector<48x32xf32>
    %77 = vector.broadcast %15 : vector<1x32xf32> to vector<48x32xf32>
    %78 = arith.addf %76, %77 : vector<48x32xf32>
    %cst_36 = arith.constant 0.000000e+00 : f32
    %79 = vector.broadcast %cst_36 : f32 to vector<48x32xf32>
    %80 = arith.maximumf %78, %79 : vector<48x32xf32>
    %c0_37 = arith.constant 0 : index
    %c0_38 = arith.constant 0 : index
    %c0_39 = arith.constant 0 : index
    %81 = vector.load %arg8[%c0_37, %c0_38, %c0_39] : memref<4x32x96xf32, #tpu.memory_space<vmem>>, vector<1x32x96xf32>
    %82 = vector.shape_cast %81 : vector<1x32x96xf32> to vector<32x96xf32>
    %83 = arith.truncf %80 : vector<48x32xf32> to vector<48x32xbf16>
    %84 = arith.truncf %82 : vector<32x96xf32> to vector<32x96xbf16>
    %cst_40 = arith.constant dense<0.000000e+00> : vector<48x96xf32>
    %85 = tpu.matmul %83, %84, %cst_40 {dimension_numbers = #tpu.dot_dimension_numbers<[1], [0], [0], [1], [0, 0, 1, 1], [], []>} : vector<48x32xbf16>, vector<32x96xbf16>, vector<48x96xf32> -> vector<48x96xf32>
    %c0_41 = arith.constant 0 : index
    %c0_42 = arith.constant 0 : index
    %c0_43 = arith.constant 0 : index
    %86 = vector.load %arg9[%c0_41, %c0_42, %c0_43] : memref<4x1x96xf32, #tpu.memory_space<vmem>>, vector<1x1x96xf32>
    %87 = vector.shape_cast %86 : vector<1x1x96xf32> to vector<1x96xf32>
    %88 = vector.broadcast %87 : vector<1x96xf32> to vector<48x96xf32>
    %89 = arith.addf %85, %88 : vector<48x96xf32>
    %90 = vector.extract_strided_slice %89 {offsets = [0, 0], sizes = [48, 32], strides = [1, 1]} : vector<48x96xf32> to vector<48x32xf32>
    %91 = vector.extract_strided_slice %89 {offsets = [0, 32], sizes = [48, 32], strides = [1, 1]} : vector<48x96xf32> to vector<48x32xf32>
    %92 = vector.extract_strided_slice %89 {offsets = [0, 64], sizes = [48, 32], strides = [1, 1]} : vector<48x96xf32> to vector<48x32xf32>
    %93 = tpu.concatenate %91, %91, %91, %91, %91, %91, %91, %91 in 0 : vector<48x32xf32>, vector<48x32xf32>, vector<48x32xf32>, vector<48x32xf32>, vector<48x32xf32>, vector<48x32xf32>, vector<48x32xf32>, vector<48x32xf32> -> vector<384x32xf32>
    %94 = arith.mulf %93, %0 : vector<384x32xf32>
    %95 = tpu.concatenate %92, %92, %92, %92, %92, %92, %92, %92 in 0 : vector<48x32xf32>, vector<48x32xf32>, vector<48x32xf32>, vector<48x32xf32>, vector<48x32xf32>, vector<48x32xf32>, vector<48x32xf32>, vector<48x32xf32> -> vector<384x32xf32>
    %96 = arith.mulf %95, %0 : vector<384x32xf32>
    %97 = arith.truncf %90 : vector<48x32xf32> to vector<48x32xbf16>
    %98 = arith.truncf %94 : vector<384x32xf32> to vector<384x32xbf16>
    "tpu.trace_start"() <{level = 10 : i32, message = "nd,md->nm"}> : () -> ()
    %cst_44 = arith.constant dense<0.000000e+00> : vector<48x384xf32>
    %99 = tpu.matmul %97, %98, %cst_44 {dimension_numbers = #tpu.dot_dimension_numbers<[1], [1], [0], [0], [0, 0, 1, 0], [], []>} : vector<48x32xbf16>, vector<384x32xbf16>, vector<48x384xf32> -> vector<48x384xf32>
    "tpu.trace_stop"() : () -> ()
    %cst_45 = arith.constant 5.000000e-01 : f32
    %100 = vector.broadcast %cst_45 : f32 to vector<48x384xf32>
    %101 = arith.mulf %99, %100 : vector<48x384xf32>
    %102 = arith.addf %101, %7 : vector<48x384xf32>
    %cst_46 = arith.constant dense<0xFF800000> : vector<48xf32>
    %103 = vector.multi_reduction <maximumf>, %102, %cst_46 [1] : vector<48x384xf32> to vector<48xf32>
    %104 = vector.shape_cast %103 : vector<48xf32> to vector<48x1xf32>
    %105 = vector.broadcast %104 : vector<48x1xf32> to vector<48x384xf32>
    %106 = arith.subf %102, %105 : vector<48x384xf32>
    %107 = math.exp %106 : vector<48x384xf32>
    %108 = arith.mulf %107, %3 : vector<48x384xf32>
    %cst_47 = arith.constant dense<0.000000e+00> : vector<48x384xf32>
    %109 = tpu.matmul %108, %1, %cst_47 {dimension_numbers = #tpu.dot_dimension_numbers<[1], [0], [0], [1], [0, 0, 1, 1], [], []>} : vector<48x384xf32>, vector<384x384xf32>, vector<48x384xf32> -> vector<48x384xf32>
    %cst_48 = arith.constant 9.99999971E-10 : f32
    %110 = vector.broadcast %cst_48 : f32 to vector<48x384xf32>
    %111 = arith.addf %109, %110 : vector<48x384xf32>
    %112 = tpu.reciprocal %111 {approx = true} : vector<48x384xf32> -> vector<48x384xf32>
    %113 = arith.mulf %108, %112 : vector<48x384xf32>
    %114 = arith.truncf %113 : vector<48x384xf32> to vector<48x384xbf16>
    %115 = arith.truncf %96 : vector<384x32xf32> to vector<384x32xbf16>
    %cst_49 = arith.constant dense<0.000000e+00> : vector<48x32xf32>
    %116 = tpu.matmul %114, %115, %cst_49 {dimension_numbers = #tpu.dot_dimension_numbers<[1], [0], [0], [1], [0, 0, 1, 1], [], []>} : vector<48x384xbf16>, vector<384x32xbf16>, vector<48x32xf32> -> vector<48x32xf32>
    %c0_50 = arith.constant 0 : index
    %c0_51 = arith.constant 0 : index
    %c0_52 = arith.constant 0 : index
    %117 = vector.load %arg10[%c0_50, %c0_51, %c0_52] : memref<4x32x32xf32, #tpu.memory_space<vmem>>, vector<1x32x32xf32>
    %118 = vector.shape_cast %117 : vector<1x32x32xf32> to vector<32x32xf32>
    %119 = arith.truncf %116 : vector<48x32xf32> to vector<48x32xbf16>
    %120 = arith.truncf %118 : vector<32x32xf32> to vector<32x32xbf16>
    %cst_53 = arith.constant dense<0.000000e+00> : vector<48x32xf32>
    %121 = tpu.matmul %119, %120, %cst_53 {dimension_numbers = #tpu.dot_dimension_numbers<[1], [0], [0], [1], [0, 0, 1, 1], [], []>} : vector<48x32xbf16>, vector<32x32xbf16>, vector<48x32xf32> -> vector<48x32xf32>
    %c0_54 = arith.constant 0 : index
    %c0_55 = arith.constant 0 : index
    %c0_56 = arith.constant 0 : index
    %122 = vector.load %arg11[%c0_54, %c0_55, %c0_56] : memref<4x1x32xf32, #tpu.memory_space<vmem>>, vector<1x1x32xf32>
    %123 = vector.shape_cast %122 : vector<1x1x32xf32> to vector<1x32xf32>
    %124 = vector.broadcast %123 : vector<1x32xf32> to vector<48x32xf32>
    %125 = arith.addf %121, %124 : vector<48x32xf32>
    %126 = arith.addf %80, %125 : vector<48x32xf32>
    %c1_57 = arith.constant 1 : index
    %c0_58 = arith.constant 0 : index
    %c0_59 = arith.constant 0 : index
    %127 = vector.load %arg8[%c1_57, %c0_58, %c0_59] : memref<4x32x96xf32, #tpu.memory_space<vmem>>, vector<1x32x96xf32>
    %128 = vector.shape_cast %127 : vector<1x32x96xf32> to vector<32x96xf32>
    %129 = arith.truncf %126 : vector<48x32xf32> to vector<48x32xbf16>
    %130 = arith.truncf %128 : vector<32x96xf32> to vector<32x96xbf16>
    %cst_60 = arith.constant dense<0.000000e+00> : vector<48x96xf32>
    %131 = tpu.matmul %129, %130, %cst_60 {dimension_numbers = #tpu.dot_dimension_numbers<[1], [0], [0], [1], [0, 0, 1, 1], [], []>} : vector<48x32xbf16>, vector<32x96xbf16>, vector<48x96xf32> -> vector<48x96xf32>
    %c1_61 = arith.constant 1 : index
    %c0_62 = arith.constant 0 : index
    %c0_63 = arith.constant 0 : index
    %132 = vector.load %arg9[%c1_61, %c0_62, %c0_63] : memref<4x1x96xf32, #tpu.memory_space<vmem>>, vector<1x1x96xf32>
    %133 = vector.shape_cast %132 : vector<1x1x96xf32> to vector<1x96xf32>
    %134 = vector.broadcast %133 : vector<1x96xf32> to vector<48x96xf32>
    %135 = arith.addf %131, %134 : vector<48x96xf32>
    %136 = vector.extract_strided_slice %135 {offsets = [0, 0], sizes = [48, 32], strides = [1, 1]} : vector<48x96xf32> to vector<48x32xf32>
    %137 = vector.extract_strided_slice %135 {offsets = [0, 32], sizes = [48, 32], strides = [1, 1]} : vector<48x96xf32> to vector<48x32xf32>
    %138 = vector.extract_strided_slice %135 {offsets = [0, 64], sizes = [48, 32], strides = [1, 1]} : vector<48x96xf32> to vector<48x32xf32>
    %139 = tpu.concatenate %137, %137, %137, %137, %137, %137, %137, %137 in 0 : vector<48x32xf32>, vector<48x32xf32>, vector<48x32xf32>, vector<48x32xf32>, vector<48x32xf32>, vector<48x32xf32>, vector<48x32xf32>, vector<48x32xf32> -> vector<384x32xf32>
    %140 = arith.mulf %139, %0 : vector<384x32xf32>
    %141 = tpu.concatenate %138, %138, %138, %138, %138, %138, %138, %138 in 0 : vector<48x32xf32>, vector<48x32xf32>, vector<48x32xf32>, vector<48x32xf32>, vector<48x32xf32>, vector<48x32xf32>, vector<48x32xf32>, vector<48x32xf32> -> vector<384x32xf32>
    %142 = arith.mulf %141, %0 : vector<384x32xf32>
    %143 = arith.truncf %136 : vector<48x32xf32> to vector<48x32xbf16>
    %144 = arith.truncf %140 : vector<384x32xf32> to vector<384x32xbf16>
    "tpu.trace_start"() <{level = 10 : i32, message = "nd,md->nm"}> : () -> ()
    %cst_64 = arith.constant dense<0.000000e+00> : vector<48x384xf32>
    %145 = tpu.matmul %143, %144, %cst_64 {dimension_numbers = #tpu.dot_dimension_numbers<[1], [1], [0], [0], [0, 0, 1, 0], [], []>} : vector<48x32xbf16>, vector<384x32xbf16>, vector<48x384xf32> -> vector<48x384xf32>
    "tpu.trace_stop"() : () -> ()
    %cst_65 = arith.constant 5.000000e-01 : f32
    %146 = vector.broadcast %cst_65 : f32 to vector<48x384xf32>
    %147 = arith.mulf %145, %146 : vector<48x384xf32>
    %148 = arith.addf %147, %13 : vector<48x384xf32>
    %cst_66 = arith.constant dense<0xFF800000> : vector<48xf32>
    %149 = vector.multi_reduction <maximumf>, %148, %cst_66 [1] : vector<48x384xf32> to vector<48xf32>
    %150 = vector.shape_cast %149 : vector<48xf32> to vector<48x1xf32>
    %151 = vector.broadcast %150 : vector<48x1xf32> to vector<48x384xf32>
    %152 = arith.subf %148, %151 : vector<48x384xf32>
    %153 = math.exp %152 : vector<48x384xf32>
    %154 = arith.mulf %153, %9 : vector<48x384xf32>
    %cst_67 = arith.constant dense<0.000000e+00> : vector<48x384xf32>
    %155 = tpu.matmul %154, %1, %cst_67 {dimension_numbers = #tpu.dot_dimension_numbers<[1], [0], [0], [1], [0, 0, 1, 1], [], []>} : vector<48x384xf32>, vector<384x384xf32>, vector<48x384xf32> -> vector<48x384xf32>
    %cst_68 = arith.constant 9.99999971E-10 : f32
    %156 = vector.broadcast %cst_68 : f32 to vector<48x384xf32>
    %157 = arith.addf %155, %156 : vector<48x384xf32>
    %158 = tpu.reciprocal %157 {approx = true} : vector<48x384xf32> -> vector<48x384xf32>
    %159 = arith.mulf %154, %158 : vector<48x384xf32>
    %160 = arith.truncf %159 : vector<48x384xf32> to vector<48x384xbf16>
    %161 = arith.truncf %142 : vector<384x32xf32> to vector<384x32xbf16>
    %cst_69 = arith.constant dense<0.000000e+00> : vector<48x32xf32>
    %162 = tpu.matmul %160, %161, %cst_69 {dimension_numbers = #tpu.dot_dimension_numbers<[1], [0], [0], [1], [0, 0, 1, 1], [], []>} : vector<48x384xbf16>, vector<384x32xbf16>, vector<48x32xf32> -> vector<48x32xf32>
    %c1_70 = arith.constant 1 : index
    %c0_71 = arith.constant 0 : index
    %c0_72 = arith.constant 0 : index
    %163 = vector.load %arg10[%c1_70, %c0_71, %c0_72] : memref<4x32x32xf32, #tpu.memory_space<vmem>>, vector<1x32x32xf32>
    %164 = vector.shape_cast %163 : vector<1x32x32xf32> to vector<32x32xf32>
    %165 = arith.truncf %162 : vector<48x32xf32> to vector<48x32xbf16>
    %166 = arith.truncf %164 : vector<32x32xf32> to vector<32x32xbf16>
    %cst_73 = arith.constant dense<0.000000e+00> : vector<48x32xf32>
    %167 = tpu.matmul %165, %166, %cst_73 {dimension_numbers = #tpu.dot_dimension_numbers<[1], [0], [0], [1], [0, 0, 1, 1], [], []>} : vector<48x32xbf16>, vector<32x32xbf16>, vector<48x32xf32> -> vector<48x32xf32>
    %c1_74 = arith.constant 1 : index
    %c0_75 = arith.constant 0 : index
    %c0_76 = arith.constant 0 : index
    %168 = vector.load %arg11[%c1_74, %c0_75, %c0_76] : memref<4x1x32xf32, #tpu.memory_space<vmem>>, vector<1x1x32xf32>
    %169 = vector.shape_cast %168 : vector<1x1x32xf32> to vector<1x32xf32>
    %170 = vector.broadcast %169 : vector<1x32xf32> to vector<48x32xf32>
    %171 = arith.addf %167, %170 : vector<48x32xf32>
    %172 = arith.addf %126, %171 : vector<48x32xf32>
    %c2_77 = arith.constant 2 : index
    %c0_78 = arith.constant 0 : index
    %c0_79 = arith.constant 0 : index
    %173 = vector.load %arg8[%c2_77, %c0_78, %c0_79] : memref<4x32x96xf32, #tpu.memory_space<vmem>>, vector<1x32x96xf32>
    %174 = vector.shape_cast %173 : vector<1x32x96xf32> to vector<32x96xf32>
    %175 = arith.truncf %172 : vector<48x32xf32> to vector<48x32xbf16>
    %176 = arith.truncf %174 : vector<32x96xf32> to vector<32x96xbf16>
    %cst_80 = arith.constant dense<0.000000e+00> : vector<48x96xf32>
    %177 = tpu.matmul %175, %176, %cst_80 {dimension_numbers = #tpu.dot_dimension_numbers<[1], [0], [0], [1], [0, 0, 1, 1], [], []>} : vector<48x32xbf16>, vector<32x96xbf16>, vector<48x96xf32> -> vector<48x96xf32>
    %c2_81 = arith.constant 2 : index
    %c0_82 = arith.constant 0 : index
    %c0_83 = arith.constant 0 : index
    %178 = vector.load %arg9[%c2_81, %c0_82, %c0_83] : memref<4x1x96xf32, #tpu.memory_space<vmem>>, vector<1x1x96xf32>
    %179 = vector.shape_cast %178 : vector<1x1x96xf32> to vector<1x96xf32>
    %180 = vector.broadcast %179 : vector<1x96xf32> to vector<48x96xf32>
    %181 = arith.addf %177, %180 : vector<48x96xf32>
    %182 = vector.extract_strided_slice %181 {offsets = [0, 0], sizes = [48, 32], strides = [1, 1]} : vector<48x96xf32> to vector<48x32xf32>
    %183 = vector.extract_strided_slice %181 {offsets = [0, 32], sizes = [48, 32], strides = [1, 1]} : vector<48x96xf32> to vector<48x32xf32>
    %184 = vector.extract_strided_slice %181 {offsets = [0, 64], sizes = [48, 32], strides = [1, 1]} : vector<48x96xf32> to vector<48x32xf32>
    %185 = tpu.concatenate %183, %183, %183, %183, %183, %183, %183, %183 in 0 : vector<48x32xf32>, vector<48x32xf32>, vector<48x32xf32>, vector<48x32xf32>, vector<48x32xf32>, vector<48x32xf32>, vector<48x32xf32>, vector<48x32xf32> -> vector<384x32xf32>
    %186 = arith.mulf %185, %0 : vector<384x32xf32>
    %187 = tpu.concatenate %184, %184, %184, %184, %184, %184, %184, %184 in 0 : vector<48x32xf32>, vector<48x32xf32>, vector<48x32xf32>, vector<48x32xf32>, vector<48x32xf32>, vector<48x32xf32>, vector<48x32xf32>, vector<48x32xf32> -> vector<384x32xf32>
    %188 = arith.mulf %187, %0 : vector<384x32xf32>
    %189 = arith.truncf %182 : vector<48x32xf32> to vector<48x32xbf16>
    %190 = arith.truncf %186 : vector<384x32xf32> to vector<384x32xbf16>
    "tpu.trace_start"() <{level = 10 : i32, message = "nd,md->nm"}> : () -> ()
    %cst_84 = arith.constant dense<0.000000e+00> : vector<48x384xf32>
    %191 = tpu.matmul %189, %190, %cst_84 {dimension_numbers = #tpu.dot_dimension_numbers<[1], [1], [0], [0], [0, 0, 1, 0], [], []>} : vector<48x32xbf16>, vector<384x32xbf16>, vector<48x384xf32> -> vector<48x384xf32>
    "tpu.trace_stop"() : () -> ()
    %cst_85 = arith.constant 5.000000e-01 : f32
    %192 = vector.broadcast %cst_85 : f32 to vector<48x384xf32>
    %193 = arith.mulf %191, %192 : vector<48x384xf32>
    %194 = arith.addf %193, %7 : vector<48x384xf32>
    %cst_86 = arith.constant dense<0xFF800000> : vector<48xf32>
    %195 = vector.multi_reduction <maximumf>, %194, %cst_86 [1] : vector<48x384xf32> to vector<48xf32>
    %196 = vector.shape_cast %195 : vector<48xf32> to vector<48x1xf32>
    %197 = vector.broadcast %196 : vector<48x1xf32> to vector<48x384xf32>
    %198 = arith.subf %194, %197 : vector<48x384xf32>
    %199 = math.exp %198 : vector<48x384xf32>
    %200 = arith.mulf %199, %3 : vector<48x384xf32>
    %cst_87 = arith.constant dense<0.000000e+00> : vector<48x384xf32>
    %201 = tpu.matmul %200, %1, %cst_87 {dimension_numbers = #tpu.dot_dimension_numbers<[1], [0], [0], [1], [0, 0, 1, 1], [], []>} : vector<48x384xf32>, vector<384x384xf32>, vector<48x384xf32> -> vector<48x384xf32>
    %cst_88 = arith.constant 9.99999971E-10 : f32
    %202 = vector.broadcast %cst_88 : f32 to vector<48x384xf32>
    %203 = arith.addf %201, %202 : vector<48x384xf32>
    %204 = tpu.reciprocal %203 {approx = true} : vector<48x384xf32> -> vector<48x384xf32>
    %205 = arith.mulf %200, %204 : vector<48x384xf32>
    %206 = arith.truncf %205 : vector<48x384xf32> to vector<48x384xbf16>
    %207 = arith.truncf %188 : vector<384x32xf32> to vector<384x32xbf16>
    %cst_89 = arith.constant dense<0.000000e+00> : vector<48x32xf32>
    %208 = tpu.matmul %206, %207, %cst_89 {dimension_numbers = #tpu.dot_dimension_numbers<[1], [0], [0], [1], [0, 0, 1, 1], [], []>} : vector<48x384xbf16>, vector<384x32xbf16>, vector<48x32xf32> -> vector<48x32xf32>
    %c2_90 = arith.constant 2 : index
    %c0_91 = arith.constant 0 : index
    %c0_92 = arith.constant 0 : index
    %209 = vector.load %arg10[%c2_90, %c0_91, %c0_92] : memref<4x32x32xf32, #tpu.memory_space<vmem>>, vector<1x32x32xf32>
    %210 = vector.shape_cast %209 : vector<1x32x32xf32> to vector<32x32xf32>
    %211 = arith.truncf %208 : vector<48x32xf32> to vector<48x32xbf16>
    %212 = arith.truncf %210 : vector<32x32xf32> to vector<32x32xbf16>
    %cst_93 = arith.constant dense<0.000000e+00> : vector<48x32xf32>
    %213 = tpu.matmul %211, %212, %cst_93 {dimension_numbers = #tpu.dot_dimension_numbers<[1], [0], [0], [1], [0, 0, 1, 1], [], []>} : vector<48x32xbf16>, vector<32x32xbf16>, vector<48x32xf32> -> vector<48x32xf32>
    %c2_94 = arith.constant 2 : index
    %c0_95 = arith.constant 0 : index
    %c0_96 = arith.constant 0 : index
    %214 = vector.load %arg11[%c2_94, %c0_95, %c0_96] : memref<4x1x32xf32, #tpu.memory_space<vmem>>, vector<1x1x32xf32>
    %215 = vector.shape_cast %214 : vector<1x1x32xf32> to vector<1x32xf32>
    %216 = vector.broadcast %215 : vector<1x32xf32> to vector<48x32xf32>
    %217 = arith.addf %213, %216 : vector<48x32xf32>
    %218 = arith.addf %172, %217 : vector<48x32xf32>
    %c3_97 = arith.constant 3 : index
    %c0_98 = arith.constant 0 : index
    %c0_99 = arith.constant 0 : index
    %219 = vector.load %arg8[%c3_97, %c0_98, %c0_99] : memref<4x32x96xf32, #tpu.memory_space<vmem>>, vector<1x32x96xf32>
    %220 = vector.shape_cast %219 : vector<1x32x96xf32> to vector<32x96xf32>
    %221 = arith.truncf %218 : vector<48x32xf32> to vector<48x32xbf16>
    %222 = arith.truncf %220 : vector<32x96xf32> to vector<32x96xbf16>
    %cst_100 = arith.constant dense<0.000000e+00> : vector<48x96xf32>
    %223 = tpu.matmul %221, %222, %cst_100 {dimension_numbers = #tpu.dot_dimension_numbers<[1], [0], [0], [1], [0, 0, 1, 1], [], []>} : vector<48x32xbf16>, vector<32x96xbf16>, vector<48x96xf32> -> vector<48x96xf32>
    %c3_101 = arith.constant 3 : index
    %c0_102 = arith.constant 0 : index
    %c0_103 = arith.constant 0 : index
    %224 = vector.load %arg9[%c3_101, %c0_102, %c0_103] : memref<4x1x96xf32, #tpu.memory_space<vmem>>, vector<1x1x96xf32>
    %225 = vector.shape_cast %224 : vector<1x1x96xf32> to vector<1x96xf32>
    %226 = vector.broadcast %225 : vector<1x96xf32> to vector<48x96xf32>
    %227 = arith.addf %223, %226 : vector<48x96xf32>
    %228 = vector.extract_strided_slice %227 {offsets = [0, 0], sizes = [48, 32], strides = [1, 1]} : vector<48x96xf32> to vector<48x32xf32>
    %229 = vector.extract_strided_slice %227 {offsets = [0, 32], sizes = [48, 32], strides = [1, 1]} : vector<48x96xf32> to vector<48x32xf32>
    %230 = vector.extract_strided_slice %227 {offsets = [0, 64], sizes = [48, 32], strides = [1, 1]} : vector<48x96xf32> to vector<48x32xf32>
    %231 = tpu.concatenate %229, %229, %229, %229, %229, %229, %229, %229 in 0 : vector<48x32xf32>, vector<48x32xf32>, vector<48x32xf32>, vector<48x32xf32>, vector<48x32xf32>, vector<48x32xf32>, vector<48x32xf32>, vector<48x32xf32> -> vector<384x32xf32>
    %232 = arith.mulf %231, %0 : vector<384x32xf32>
    %233 = tpu.concatenate %230, %230, %230, %230, %230, %230, %230, %230 in 0 : vector<48x32xf32>, vector<48x32xf32>, vector<48x32xf32>, vector<48x32xf32>, vector<48x32xf32>, vector<48x32xf32>, vector<48x32xf32>, vector<48x32xf32> -> vector<384x32xf32>
    %234 = arith.mulf %233, %0 : vector<384x32xf32>
    %235 = arith.truncf %228 : vector<48x32xf32> to vector<48x32xbf16>
    %236 = arith.truncf %232 : vector<384x32xf32> to vector<384x32xbf16>
    "tpu.trace_start"() <{level = 10 : i32, message = "nd,md->nm"}> : () -> ()
    %cst_104 = arith.constant dense<0.000000e+00> : vector<48x384xf32>
    %237 = tpu.matmul %235, %236, %cst_104 {dimension_numbers = #tpu.dot_dimension_numbers<[1], [1], [0], [0], [0, 0, 1, 0], [], []>} : vector<48x32xbf16>, vector<384x32xbf16>, vector<48x384xf32> -> vector<48x384xf32>
    "tpu.trace_stop"() : () -> ()
    %cst_105 = arith.constant 5.000000e-01 : f32
    %238 = vector.broadcast %cst_105 : f32 to vector<48x384xf32>
    %239 = arith.mulf %237, %238 : vector<48x384xf32>
    %240 = arith.addf %239, %13 : vector<48x384xf32>
    %cst_106 = arith.constant dense<0xFF800000> : vector<48xf32>
    %241 = vector.multi_reduction <maximumf>, %240, %cst_106 [1] : vector<48x384xf32> to vector<48xf32>
    %242 = vector.shape_cast %241 : vector<48xf32> to vector<48x1xf32>
    %243 = vector.broadcast %242 : vector<48x1xf32> to vector<48x384xf32>
    %244 = arith.subf %240, %243 : vector<48x384xf32>
    %245 = math.exp %244 : vector<48x384xf32>
    %246 = arith.mulf %245, %9 : vector<48x384xf32>
    %cst_107 = arith.constant dense<0.000000e+00> : vector<48x384xf32>
    %247 = tpu.matmul %246, %1, %cst_107 {dimension_numbers = #tpu.dot_dimension_numbers<[1], [0], [0], [1], [0, 0, 1, 1], [], []>} : vector<48x384xf32>, vector<384x384xf32>, vector<48x384xf32> -> vector<48x384xf32>
    %cst_108 = arith.constant 9.99999971E-10 : f32
    %248 = vector.broadcast %cst_108 : f32 to vector<48x384xf32>
    %249 = arith.addf %247, %248 : vector<48x384xf32>
    %250 = tpu.reciprocal %249 {approx = true} : vector<48x384xf32> -> vector<48x384xf32>
    %251 = arith.mulf %246, %250 : vector<48x384xf32>
    %252 = arith.truncf %251 : vector<48x384xf32> to vector<48x384xbf16>
    %253 = arith.truncf %234 : vector<384x32xf32> to vector<384x32xbf16>
    %cst_109 = arith.constant dense<0.000000e+00> : vector<48x32xf32>
    %254 = tpu.matmul %252, %253, %cst_109 {dimension_numbers = #tpu.dot_dimension_numbers<[1], [0], [0], [1], [0, 0, 1, 1], [], []>} : vector<48x384xbf16>, vector<384x32xbf16>, vector<48x32xf32> -> vector<48x32xf32>
    %c3_110 = arith.constant 3 : index
    %c0_111 = arith.constant 0 : index
    %c0_112 = arith.constant 0 : index
    %255 = vector.load %arg10[%c3_110, %c0_111, %c0_112] : memref<4x32x32xf32, #tpu.memory_space<vmem>>, vector<1x32x32xf32>
    %256 = vector.shape_cast %255 : vector<1x32x32xf32> to vector<32x32xf32>
    %257 = arith.truncf %254 : vector<48x32xf32> to vector<48x32xbf16>
    %258 = arith.truncf %256 : vector<32x32xf32> to vector<32x32xbf16>
    %cst_113 = arith.constant dense<0.000000e+00> : vector<48x32xf32>
    %259 = tpu.matmul %257, %258, %cst_113 {dimension_numbers = #tpu.dot_dimension_numbers<[1], [0], [0], [1], [0, 0, 1, 1], [], []>} : vector<48x32xbf16>, vector<32x32xbf16>, vector<48x32xf32> -> vector<48x32xf32>
    %c3_114 = arith.constant 3 : index
    %c0_115 = arith.constant 0 : index
    %c0_116 = arith.constant 0 : index
    %260 = vector.load %arg11[%c3_114, %c0_115, %c0_116] : memref<4x1x32xf32, #tpu.memory_space<vmem>>, vector<1x1x32xf32>
    %261 = vector.shape_cast %260 : vector<1x1x32xf32> to vector<1x32xf32>
    %262 = vector.broadcast %261 : vector<1x32xf32> to vector<48x32xf32>
    %263 = arith.addf %259, %262 : vector<48x32xf32>
    %264 = arith.addf %218, %263 : vector<48x32xf32>
    %265 = arith.addf %264, %80 : vector<48x32xf32>
    %c0_117 = arith.constant 0 : index
    %c0_118 = arith.constant 0 : index
    %266 = vector.load %arg12[%c0_117, %c0_118] : memref<1x32xf32, #tpu.memory_space<vmem>>, vector<1x32xf32>
    %c0_119 = arith.constant 0 : index
    %c0_120 = arith.constant 0 : index
    %267 = vector.load %arg13[%c0_119, %c0_120] : memref<1x32xf32, #tpu.memory_space<vmem>>, vector<1x32xf32>
    %cst_121 = arith.constant dense<0.000000e+00> : vector<48xf32>
    %268 = vector.multi_reduction <add>, %265, %cst_121 [1] : vector<48x32xf32> to vector<48xf32>
    %269 = vector.shape_cast %268 : vector<48xf32> to vector<48x1xf32>
    %cst_122 = arith.constant 3.200000e+01 : f32
    %270 = vector.broadcast %cst_122 : f32 to vector<48x1xf32>
    %271 = arith.divf %269, %270 : vector<48x1xf32>
    %272 = vector.broadcast %271 : vector<48x1xf32> to vector<48x32xf32>
    %273 = arith.subf %265, %272 : vector<48x32xf32>
    %274 = arith.mulf %273, %273 : vector<48x32xf32>
    %cst_123 = arith.constant dense<0.000000e+00> : vector<48xf32>
    %275 = vector.multi_reduction <add>, %274, %cst_123 [1] : vector<48x32xf32> to vector<48xf32>
    %276 = vector.shape_cast %275 : vector<48xf32> to vector<48x1xf32>
    %cst_124 = arith.constant 3.200000e+01 : f32
    %277 = vector.broadcast %cst_124 : f32 to vector<48x1xf32>
    %278 = arith.divf %276, %277 : vector<48x1xf32>
    %279 = vector.broadcast %271 : vector<48x1xf32> to vector<48x32xf32>
    %280 = arith.subf %265, %279 : vector<48x32xf32>
    %cst_125 = arith.constant 9.99999974E-6 : f32
    %281 = vector.broadcast %cst_125 : f32 to vector<48x1xf32>
    %282 = arith.addf %278, %281 : vector<48x1xf32>
    %283 = math.rsqrt %282 : vector<48x1xf32>
    %284 = vector.broadcast %283 : vector<48x1xf32> to vector<48x32xf32>
    %285 = arith.mulf %280, %284 : vector<48x32xf32>
    %286 = vector.broadcast %266 : vector<1x32xf32> to vector<48x32xf32>
    %287 = arith.mulf %285, %286 : vector<48x32xf32>
    %288 = vector.broadcast %267 : vector<1x32xf32> to vector<48x32xf32>
    %289 = arith.addf %287, %288 : vector<48x32xf32>
    %c0_126 = arith.constant 0 : index
    %c0_127 = arith.constant 0 : index
    %290 = vector.load %arg3[%c0_126, %c0_127] : memref<48x3xf32, #tpu.memory_space<vmem>>, vector<48x3xf32>
    %c0_128 = arith.constant 0 : index
    %c0_129 = arith.constant 0 : index
    %291 = vector.load %arg14[%c0_128, %c0_129] : memref<32x16xf32, #tpu.memory_space<vmem>>, vector<32x16xf32>
    %292 = arith.truncf %289 : vector<48x32xf32> to vector<48x32xbf16>
    %293 = arith.truncf %291 : vector<32x16xf32> to vector<32x16xbf16>
    %cst_130 = arith.constant dense<0.000000e+00> : vector<48x16xf32>
    %294 = tpu.matmul %292, %293, %cst_130 {dimension_numbers = #tpu.dot_dimension_numbers<[1], [0], [0], [1], [0, 0, 1, 1], [], []>} : vector<48x32xbf16>, vector<32x16xbf16>, vector<48x16xf32> -> vector<48x16xf32>
    %c0_131 = arith.constant 0 : index
    %c0_132 = arith.constant 0 : index
    %295 = vector.load %arg15[%c0_131, %c0_132] : memref<1x16xf32, #tpu.memory_space<vmem>>, vector<1x16xf32>
    %296 = vector.broadcast %295 : vector<1x16xf32> to vector<48x16xf32>
    %297 = arith.addf %294, %296 : vector<48x16xf32>
    %cst_133 = arith.constant 0.000000e+00 : f32
    %298 = vector.broadcast %cst_133 : f32 to vector<48x16xf32>
    %299 = arith.maximumf %297, %298 : vector<48x16xf32>
    %c0_134 = arith.constant 0 : index
    %c0_135 = arith.constant 0 : index
    %300 = vector.load %arg16[%c0_134, %c0_135] : memref<16x1xf32, #tpu.memory_space<vmem>>, vector<16x1xf32>
    %301 = arith.truncf %299 : vector<48x16xf32> to vector<48x16xbf16>
    %302 = arith.truncf %300 : vector<16x1xf32> to vector<16x1xbf16>
    %cst_136 = arith.constant dense<0.000000e+00> : vector<48x1xf32>
    %303 = tpu.matmul %301, %302, %cst_136 {dimension_numbers = #tpu.dot_dimension_numbers<[1], [0], [0], [1], [0, 0, 1, 1], [], []>} : vector<48x16xbf16>, vector<16x1xbf16>, vector<48x1xf32> -> vector<48x1xf32>
    %c0_137 = arith.constant 0 : index
    %c0_138 = arith.constant 0 : index
    %304 = vector.load %arg17[%c0_137, %c0_138] : memref<1x1xf32, #tpu.memory_space<vmem>>, vector<1x1xf32>
    %305 = vector.broadcast %304 : vector<1x1xf32> to vector<48x1xf32>
    %306 = arith.addf %303, %305 : vector<48x1xf32>
    %c0_139 = arith.constant 0 : index
    %c0_140 = arith.constant 0 : index
    %307 = vector.load %arg18[%c0_139, %c0_140] : memref<32x32xf32, #tpu.memory_space<vmem>>, vector<32x32xf32>
    %308 = arith.truncf %289 : vector<48x32xf32> to vector<48x32xbf16>
    %309 = arith.truncf %307 : vector<32x32xf32> to vector<32x32xbf16>
    %cst_141 = arith.constant dense<0.000000e+00> : vector<48x32xf32>
    %310 = tpu.matmul %308, %309, %cst_141 {dimension_numbers = #tpu.dot_dimension_numbers<[1], [0], [0], [1], [0, 0, 1, 1], [], []>} : vector<48x32xbf16>, vector<32x32xbf16>, vector<48x32xf32> -> vector<48x32xf32>
    %c0_142 = arith.constant 0 : index
    %c0_143 = arith.constant 0 : index
    %311 = vector.load %arg19[%c0_142, %c0_143] : memref<1x32xf32, #tpu.memory_space<vmem>>, vector<1x32xf32>
    %312 = vector.broadcast %311 : vector<1x32xf32> to vector<48x32xf32>
    %313 = arith.addf %310, %312 : vector<48x32xf32>
    %cst_144 = arith.constant 0.000000e+00 : f32
    %314 = vector.broadcast %cst_144 : f32 to vector<48x32xf32>
    %315 = arith.maximumf %313, %314 : vector<48x32xf32>
    %cst_145 = arith.constant 0.000000e+00 : f32
    %316 = vector.broadcast %cst_145 : f32 to vector<48x3xf32>
    %317 = arith.cmpf ogt, %290, %316 : vector<48x3xf32>
    %cst_146 = arith.constant -1.000000e+09 : f32
    %318 = vector.shape_cast %306 : vector<48x1xf32> to vector<48x1xf32>
    %319 = vector.broadcast %318 : vector<48x1xf32> to vector<48x3xf32>
    %320 = vector.broadcast %cst_146 : f32 to vector<48x3xf32>
    %321 = arith.select %317, %319, %320 : vector<48x3xi1>, vector<48x3xf32>
    %cst_147 = arith.constant dense<0xFF800000> : vector<3xf32>
    %322 = vector.multi_reduction <maximumf>, %321, %cst_147 [0] : vector<48x3xf32> to vector<3xf32>
    %323 = vector.shape_cast %322 : vector<3xf32> to vector<1x3xf32>
    %324 = vector.broadcast %323 : vector<1x3xf32> to vector<48x3xf32>
    %325 = arith.subf %321, %324 : vector<48x3xf32>
    %326 = math.exp %325 : vector<48x3xf32>
    %327 = arith.mulf %326, %290 : vector<48x3xf32>
    %cst_148 = arith.constant dense<0.000000e+00> : vector<3xf32>
    %328 = vector.multi_reduction <add>, %327, %cst_148 [0] : vector<48x3xf32> to vector<3xf32>
    %329 = vector.shape_cast %328 : vector<3xf32> to vector<1x3xf32>
    %cst_149 = arith.constant 9.99999971E-10 : f32
    %330 = vector.broadcast %cst_149 : f32 to vector<1x3xf32>
    %331 = arith.addf %329, %330 : vector<1x3xf32>
    %332 = tpu.reciprocal %331 {approx = true} : vector<1x3xf32> -> vector<1x3xf32>
    %333 = vector.broadcast %332 : vector<1x3xf32> to vector<48x3xf32>
    %334 = arith.mulf %327, %333 : vector<48x3xf32>
    "tpu.trace_start"() <{level = 10 : i32, message = "ns,nd->sd"}> : () -> ()
    %cst_150 = arith.constant dense<0.000000e+00> : vector<3x32xf32>
    %335 = tpu.matmul %334, %315, %cst_150 {dimension_numbers = #tpu.dot_dimension_numbers<[0], [0], [1], [1], [0, 1, 1, 1], [], []>} : vector<48x3xf32>, vector<48x32xf32>, vector<3x32xf32> -> vector<3x32xf32>
    "tpu.trace_stop"() : () -> ()
    %336 = vector.extract_strided_slice %335 {offsets = [0, 0], sizes = [1, 32], strides = [1, 1]} : vector<3x32xf32> to vector<1x32xf32>
    %337 = vector.extract_strided_slice %335 {offsets = [1, 0], sizes = [2, 32], strides = [1, 1]} : vector<3x32xf32> to vector<2x32xf32>
    %338 = vector.shape_cast %336 : vector<1x32xf32> to vector<1x32xf32>
    %339 = vector.broadcast %338 : vector<1x32xf32> to vector<2x32xf32>
    %340 = arith.subf %339, %337 : vector<2x32xf32>
    %c0_151 = arith.constant 0 : index
    %c0_152 = arith.constant 0 : index
    %341 = vector.load %arg20[%c0_151, %c0_152] : memref<32x2xf32, #tpu.memory_space<vmem>>, vector<32x2xf32>
    %342 = arith.truncf %340 : vector<2x32xf32> to vector<2x32xbf16>
    %343 = arith.truncf %341 : vector<32x2xf32> to vector<32x2xbf16>
    %cst_153 = arith.constant dense<0.000000e+00> : vector<2x2xf32>
    %344 = tpu.matmul %342, %343, %cst_153 {dimension_numbers = #tpu.dot_dimension_numbers<[1], [0], [0], [1], [0, 0, 1, 1], [], []>} : vector<2x32xbf16>, vector<32x2xbf16>, vector<2x2xf32> -> vector<2x2xf32>
    %c0_154 = arith.constant 0 : index
    %c0_155 = arith.constant 0 : index
    %345 = vector.load %arg21[%c0_154, %c0_155] : memref<1x2xf32, #tpu.memory_space<vmem>>, vector<1x2xf32>
    %346 = vector.broadcast %345 : vector<1x2xf32> to vector<2x2xf32>
    %347 = arith.addf %344, %346 : vector<2x2xf32>
    %cst_156 = arith.constant 0.000000e+00 : f32
    %348 = vector.broadcast %cst_156 : f32 to vector<2x30xf32>
    %349 = tpu.concatenate %339, %337, %340, %347, %348 in 1 : vector<2x32xf32>, vector<2x32xf32>, vector<2x32xf32>, vector<2x2xf32>, vector<2x30xf32> -> vector<2x128xf32>
    %cst_157 = arith.constant 0.000000e+00 : f32
    %350 = vector.broadcast %cst_157 : f32 to vector<6x128xf32>
    %351 = tpu.concatenate %349, %350 in 0 : vector<2x128xf32>, vector<6x128xf32> -> vector<8x128xf32>
    %c0_158 = arith.constant 0 : index
    %c0_159 = arith.constant 0 : index
    %352 = vector.load %arg22[%c0_158, %c0_159] : memref<8x128xf32, #tpu.memory_space<vmem>>, vector<8x128xf32>
    tpu.vector_store %arg22[%c0_158, %c0_159], %351 {strides = array<i32>} : memref<8x128xf32, #tpu.memory_space<vmem>>, vector<8x128xf32>,
    return
  }
}

</mosaic_0001>

<bundles_post_ra>
// kernel: tpu_custom_call.1
= control target key start
LH: loop header
LB: loop body
LE: loop exit
PB: predicated region body
PF: predicated region fallthrough
CT: control target
= control target key end

     0   :  { %s16278_s0 = inlined_call_operand.vmem [shape: f32[48,32], index: 0, kind: input, shape index: {}]   ;;  %s16279_s1 = inlined_call_operand.vmem [shape: f32[48,48], index: 1, kind: input, shape index: {}]   ;;  %s16280_s2 = inlined_call_operand.vmem [shape: f32[48,48], index: 2, kind: input, shape index: {}]   ;;  %s16281_s3 = inlined_call_operand.vmem [shape: f32[48,3], index: 3, kind: input, shape index: {}]   ;;  %s16282_s4 = inlined_call_operand.vmem [shape: f32[384,32], index: 4, kind: input, shape index: {}]   ;;  %s16283_s5 = inlined_call_operand.hbm [shape: f32[384,384], index: 5, kind: input, shape index: {}]   ;;  %s16284_s6 = inlined_call_operand.vmem [shape: f32[2,32,32], index: 6, kind: input, shape index: {}]   ;;  %s16285_s7 = inlined_call_operand.vmem [shape: f32[4,32], index: 7, kind: input, shape index: {}]   ;;  %s16286_s8 = inlined_call_operand.vmem [shape: f32[4,32,96], index: 8, kind: input, shape index: {}]   ;;  %s16287_s9 = inlined_call_operand.vmem [shape: f32[4,1,96], index: 9, kind: input, shape index: {}]   ;;  %s16288_s10 = inlined_call_operand.vmem [shape: f32[4,32,32], index: 10, kind: input, shape index: {}]   ;;  %s16289_s11 = inlined_call_operand.vmem [shape: f32[4,1,32], index: 11, kind: input, shape index: {}]   ;;  %s16290_s12 = inlined_call_operand.vmem [shape: f32[1,32], index: 12, kind: input, shape index: {}]   ;;  %s16291_s13 = inlined_call_operand.vmem [shape: f32[1,32], index: 13, kind: input, shape index: {}]   ;;  %s16292_s14 = inlined_call_operand.vmem [shape: f32[32,16], index: 14, kind: input, shape index: {}]   ;;  %s16293_s15 = inlined_call_operand.vmem [shape: f32[1,16], index: 15, kind: input, shape index: {}]   ;;  %s16294_s16 = inlined_call_operand.vmem [shape: f32[16,1], index: 16, kind: input, shape index: {}]   ;;  %s16295_s17 = inlined_call_operand.<no memory space> [shape: f32[1,1], index: 17, kind: input, shape index: {}]   ;;  %s16296_s18 = inlined_call_operand.vmem [shape: f32[32,32], index: 18, kind: input, shape index: {}]   ;;  %s16297_s19 = inlined_call_operand.vmem [shape: f32[1,32], index: 19, kind: input, shape index: {}]   ;;  %s16298_s20 = inlined_call_operand.vmem [shape: f32[32,2], index: 20, kind: input, shape index: {}]   ;;  %s16299_s21 = inlined_call_operand.vmem [shape: f32[1,2], index: 21, kind: input, shape index: {}]   ;;  %s16300_s22 = inlined_call_operand.hbm [shape: f32[8,128], index: 22, kind: output, shape index: {}]  }
   0x1   :  { %16865 = sst [smem:[#allocation294_spill]] %s16278_s0  ;;  %v27_v0 = vstv %s16295_s17 }
   0x2   :  { %16866 = sst [smem:[#allocation295_spill]] %s16279_s1  ;;  %28 = vst [vmem:[#allocation2] sm:$0x1] %v27_v0 }
   0x3   :  { %16867 = sst [smem:[#allocation296_spill]] %s16280_s2 }
   0x4   :  { %16868 = sst [smem:[#allocation297_spill]] %s16281_s3 }
   0x5   :  { %16869 = sst [smem:[#allocation298_spill]] %s16282_s4 }
   0x6   :  { %16870 = sst [smem:[#allocation299_spill]] %s16283_s5 }
   0x7   :  { %16871 = sst [smem:[#allocation300_spill]] %s16284_s6 }
   0x8   :  { %29 = vsyncpa [#allocation4], 0 }
   0x9   :  { %30 = vsyncpa [#allocation5], 0  ;;  %s10265_s29 = smov [#allocation3]   ;;  %s16872_s23 = sld [smem:[#allocation299_spill]] }
   0xa   :  { %s46_s30 = sshll.u32 %s10265_s29, 4  ;;  %s47_s30 = int_to_ptr.vmem [resolvable:$true] %s46_s30 }
   0xf   :  { %s10217_s1 = scalar_lea.hbm %s16872_s23, 18432 }
  0x10   :  { %p10218_p0 = scmp.ne.s32.totalorder %s16872_s23, %s10217_s1  ;;  %p10221_p1 = scmp.lt.u32.totalorder %s10217_s1, %s16872_s23 }
  0x12   :  { %p10223_p2 = pnand %p10221_p1, %p10218_p0 }
  0x14   :  { %10226 = shalt.err (!%p10223_p2)
}
  0x15   :  { %s10227_s17 = scalar_lea.vmem %s47_s30, 18432  ;;  %p10232_p4 = scmp.lt.s32.totalorder %s47_s30, %s47_s30 }
  0x16   :  { %p10228_p3 = scmp.ne.s32.totalorder %s47_s30, %s10227_s17  ;;  %p10233_p5 = scmp.lt.s32.totalorder %s10227_s17, %s10227_s17 }
  0x18   :  { %p10234_p6 = por %p10233_p5, %p10232_p4 }
  0x1a   :  { %p10235_p7 = pnand %p10234_p6, %p10228_p3 }
  0x1c   :  { %10238 = shalt.err (!%p10235_p7)
}
  0x1d   :  { %s10266_s26 = smov 384   ;;  %s10267_s2 = smov 24  }
  0x1e   :  { %52 = dma.hbm_to_vmem [thread:$0]  %s16872_s23, 18432, %s47_s30, [#allocation4], %s10266_s26, %s10266_s26, %s10267_s2  }
  0x1f   :  { %10261 = dma.done.wait [#allocation4], 18432  }
  0x20   :  { %10262 = vsyncadd [#allocation4], 4294948864  ;;  %v16308_v1 = vmov 0.0   ;;  %vm10269_vm0 = vmmov 0   ;;  %s16873_s4 = sld [smem:[#allocation300_spill]]  ;;  %s16874_s17 = sld [smem:[#allocation294_spill]] }
  0x21   :  { %8420 = vmatprep.subr.bf16.mxu0 %v16308_v1  ;;  %8424 = vmatprep.mubr.msk.bf16.mxu0 %vm10269_vm0, %v16308_v1  ;;  %vm454_vm1 = vcmask 261120   ;;  %v7629_v17 = vld [vmem:[%s16285_s7] ss:$0 sm:$0xff]  ;;  %s16875_s28 = sld [smem:[#allocation298_spill]]  ;;  %s10270_s29 = smov 32   ;;  %vm433_vm2 = vcmask 130048  }
  0x22   :  { %8436 = vmatprep.subr.bf16.mxu1 %v16308_v1  ;;  %8440 = vmatprep.mubr.msk.bf16.mxu1 %vm10269_vm0, %v16308_v1  ;;  %s10271_s5 = smov 96   ;;  %s16930_s25 = sld [smem:[#allocation295_spill]]  ;;  %vm419_vm3 = vcmask 392192   ;;  %vm440_vm4 = vcmask 523264   ;;  %vm426_vm5 = vcmask 785408   ;;  %vm447_vm6 = vcmask 916480  }
  0x23   :  { %s10273_s26 = smov 48   ;;  %s10274_s2 = smov 64   ;;  %vm461_vm7 = vcmask 654336   ;;  %vm7315_vm13 = vcmask 23552   ;;  %vm7573_vm15 = vcmask 801792  }
  0x24   :  { %s10275_s27 = smov 112   ;;  %s10276_s0 = smov 80  }
  0x25   :  { %s17243_s3 = sld [smem:[#allocation296_spill]]  ;;  %s18036_s1 = sld [smem:[#allocation297_spill]] }
  0x26   :  { %v728_v2 = vld [vmem:[%s16873_s4] sm:$0xff]  ;;  %v729_v3 = vld [vmem:[%s16873_s4 + $0x8] sm:$0xff]  ;;  %v730_v4 = vld [vmem:[%s16873_s4 + $0x10] sm:$0xff] }
  0x27   :  { %v735_v5 = vpack.c.bf16 %v729_v3, %v728_v2  ;;  %v731_v6 = vld [vmem:[%s16873_s4 + $0x18] sm:$0xff]  ;;  %v722_v8 = vld [vmem:[%s16874_s17] sm:$0xff]  ;;  %v723_v9 = vld [vmem:[%s16874_s17 + $0x8] sm:$0xff] }
  0x28   :  { %v736_v7 = vpack.c.bf16 %v731_v6, %v730_v4  ;;  %v732_v10 = vpack.c.bf16 %v723_v9, %v722_v8  ;;  %v724_v11 = vld [vmem:[%s16874_s17 + $0x10] sm:$0xff]  ;;  %v725_v12 = vld [vmem:[%s16874_s17 + $0x18] sm:$0xff]  ;;  %v726_v14 = vld [vmem:[%s16874_s17 + $0x20] sm:$0xff] }
  0x29   :  { %8421 = vmatpush3.bf16.msra.mxu0 %v735_v5  ;;  %v733_v13 = vpack.c.bf16 %v725_v12, %v724_v11  ;;  %v727_v15 = vld [vmem:[%s16874_s17 + $0x28] sm:$0xff]  ;;  %v7635_v9 = vld [vmem:[%s16873_s4 + $0x20] sm:$0xff]  ;;  %v7637_v12 = vld [vmem:[%s16873_s4 + $0x30] sm:$0xff]  ;;  %s10272_s17 = smov 16  }
  0x2a   :  { %8422 = vmatprep.subr.bf16.mxu0 %v16308_v1  ;;  %v734_v16 = vpack.c.bf16 %v727_v15, %v726_v14 }
  0x2d   :  { %8423 = vmatpush3.bf16.msra.mxu0 %v736_v7 }
  0x2e   :  { %8452 = vmatprep.subr.bf16.mxu0 %v16308_v1 }
  0x30   :  { %8425 = vmatmul.mubr.msk.bf16.vlgmr.msra.gmra.mrb[0].mxu0 %vm454_vm1, %v732_v10  ;;  %v7636_v10 = vld [vmem:[%s16873_s4 + $0x28] sm:$0xff] }
  0x31   :  { %8428 = vmatprep.mubr.msk.bf16.mxu0 %vm10269_vm0, %v16308_v1  ;;  %v921_v11 = vpack.c.bf16 %v7636_v10, %v7635_v9 }
  0x33   :  { %8437 = vmatpush3.bf16.msra.mxu1 %v921_v11 }
  0x34   :  { %8438 = vmatprep.subr.bf16.mxu1 %v16308_v1 }
  0x38   :  { %8429 = vmatmul.mubr.msk.bf16.gmra.mrb[4].mxu0 %vm454_vm1, %v733_v13  ;;  %v7638_v13 = vld [vmem:[%s16873_s4 + $0x38] sm:$0xff] }
  0x39   :  { %8432 = vmatprep.mubr.msk.bf16.mxu0 %vm10269_vm0, %v16308_v1  ;;  %v922_v14 = vpack.c.bf16 %v7638_v13, %v7637_v12 }
  0x3b   :  { %8439 = vmatpush3.bf16.msra.mxu1 %v922_v14 }
  0x40   :  { %8433 = vmatmul.mubr.msk.bf16.gmra.mrb[8].mxu0 %vm454_vm1, %v734_v16 }
  0x41   :  { %8456 = vmatprep.mubr.msk.bf16.mxu0 %vm10269_vm0, %v16308_v1 }
 0x103   :  { %v785_v18 = vpop.f32.mrb[0].mxu0 }
 0x104   :  { %v786_v19 = vadd.f32 %v7629_v17, %v785_v18  ;;  %v8426_v20 = vpop.f32.mrb[1].mxu0 }
 0x105   :  { %v788_v21 = vpop.f32.mrb[2].mxu0 }
 0x106   :  { %v789_v22 = vadd.f32 %v7629_v17, %v788_v21  ;;  %v8427_v23 = vpop.f32.mrb[3].mxu0  ;;  %v808_v24 = vsel %vm454_vm1, %v786_v19, 0.0 }
 0x107   :  { %809 = vadd.xlane.f32.xlu0 %v808_v24 }
 0x108   :  { %v811_v25 = vsel %vm454_vm1, %v789_v22, 0.0 }
 0x10b   :  { %812 = vadd.xlane.f32.xlu0 %v811_v25  ;;  %v793_v26 = vpop.f32.mrb[4].mxu0 }
 0x10c   :  { %v794_v27 = vadd.f32 %v7629_v17, %v793_v26  ;;  %v8430_v28 = vpop.f32.mrb[5].mxu0 }
 0x10d   :  { %v796_v29 = vpop.f32.mrb[6].mxu0  ;;  %v10508_v28 = vld [vmem:[%s16285_s7 + $0x2] ss:$0 sm:$0xff] }
 0x10e   :  { %v797_v30 = vadd.f32 %v7629_v17, %v796_v29  ;;  %v8431_v31 = vpop.f32.mrb[7].mxu0  ;;  %v814_v32 = vsel %vm454_vm1, %v794_v27, 0.0 }
 0x10f   :  { %815 = vadd.xlane.f32.xlu1 %v814_v32 }
 0x110   :  { %v817_v33 = vsel %vm454_vm1, %v797_v30, 0.0 }
 0x113   :  { %818 = vadd.xlane.f32.xlu1 %v817_v33  ;;  %v801_v34 = vpop.f32.mrb[8].mxu0 }
 0x114   :  { %v802_v35 = vadd.f32 %v7629_v17, %v801_v34  ;;  %v8434_v36 = vpop.f32.mrb[9].mxu0 }
 0x115   :  { %v804_v37 = vpop.f32.mrb[10].mxu0 }
 0x116   :  { %v805_v38 = vadd.f32 %v7629_v17, %v804_v37  ;;  %v8435_v39 = vpop.f32.mrb[11].mxu0  ;;  %v820_v40 = vsel %vm454_vm1, %v802_v35, 0.0  ;;  %v10514_v37 = vld [vmem:[%s16285_s7 + $0x3] ss:$0 sm:$0xff] }
 0x117   :  { %821 = vadd.xlane.f32.xlu0 %v820_v40 }
 0x118   :  { %v823_v41 = vsel %vm454_vm1, %v805_v38, 0.0 }
 0x119   :  { %824 = vadd.xlane.f32.xlu1 %v823_v41 }
 0x194   :  { %v810_v42 = vpop.xlane.xlu0 %809 }
 0x195   :  { %v827_v43 = vmul.f32 0.03125, %v810_v42 }
 0x197   :  { %v833_v44 = vsub.f32 %v786_v19, %v827_v43 }
 0x198   :  { %v813_v45 = vpop.xlane.xlu0 %812 }
 0x199   :  { %v828_v46 = vmul.f32 0.03125, %v813_v45  ;;  %v839_v47 = vmul.f32 %v833_v44, %v833_v44 }
 0x19b   :  { %v10466_v48 = vsub.f32 %v789_v22, %v828_v46  ;;  %v845_v49 = vsel %vm454_vm1, %v839_v47, 0.0 }
 0x19c   :  { %v816_v50 = vpop.xlane.xlu1 %815  ;;  %846 = vadd.xlane.f32.xlu0 %v845_v49 }
 0x19d   :  { %v829_v51 = vmul.f32 0.03125, %v816_v50  ;;  %v840_v52 = vmul.f32 %v10466_v48, %v10466_v48 }
 0x19f   :  { %v10471_v53 = vsub.f32 %v794_v27, %v829_v51  ;;  %v848_v54 = vsel %vm454_vm1, %v840_v52, 0.0 }
 0x1a0   :  { %v819_v55 = vpop.xlane.xlu1 %818  ;;  %849 = vadd.xlane.f32.xlu1 %v848_v54 }
 0x1a1   :  { %v830_v56 = vmul.f32 0.03125, %v819_v55  ;;  %v841_v57 = vmul.f32 %v10471_v53, %v10471_v53 }
 0x1a3   :  { %v10476_v58 = vsub.f32 %v797_v30, %v830_v56  ;;  %v851_v59 = vsel %vm454_vm1, %v841_v57, 0.0 }
 0x1a4   :  { %852 = vadd.xlane.f32.xlu0 %v851_v59  ;;  %v822_v60 = vpop.xlane.xlu0 %821 }
 0x1a5   :  { %v831_v61 = vmul.f32 0.03125, %v822_v60  ;;  %v842_v62 = vmul.f32 %v10476_v58, %v10476_v58 }
 0x1a6   :  { %v825_v63 = vpop.xlane.xlu1 %824 }
 0x1a7   :  { %v10481_v0 = vsub.f32 %v802_v35, %v831_v61  ;;  %v832_v2 = vmul.f32 0.03125, %v825_v63  ;;  %v854_v3 = vsel %vm454_vm1, %v842_v62, 0.0 }
 0x1a8   :  { %855 = vadd.xlane.f32.xlu1 %v854_v3 }
 0x1a9   :  { %v10484_v4 = vsub.f32 %v805_v38, %v832_v2  ;;  %v843_v5 = vmul.f32 %v10481_v0, %v10481_v0 }
 0x1ab   :  { %v857_v6 = vsel %vm454_vm1, %v843_v5, 0.0  ;;  %v844_v7 = vmul.f32 %v10484_v4, %v10484_v4 }
 0x1ac   :  { %858 = vadd.xlane.f32.xlu0 %v857_v6 }
 0x1ad   :  { %v860_v8 = vsel %vm454_vm1, %v844_v7, 0.0 }
 0x1ae   :  { %861 = vadd.xlane.f32.xlu1 %v860_v8 }
 0x229   :  { %v847_v15 = vpop.xlane.xlu0 %846 }
 0x22a   :  { %v863_v16 = vmul.f32 0.03125, %v847_v15 }
 0x22c   :  { %v869_v17 = vadd.f32 1e-05, %v863_v16 }
 0x22d   :  { %v850_v18 = vpop.xlane.xlu1 %849 }
 0x22e   :  { %9831 = vrsqrt.f32 %v869_v17  ;;  %v864_v19 = vmul.f32 0.03125, %v850_v18 }
 0x230   :  { %v870_v20 = vadd.f32 1e-05, %v864_v19 }
 0x231   :  { %v853_v21 = vpop.xlane.xlu0 %852 }
 0x232   :  { %9833 = vrsqrt.f32 %v870_v20  ;;  %v865_v22 = vmul.f32 0.03125, %v853_v21 }
 0x234   :  { %v871_v23 = vadd.f32 1e-05, %v865_v22 }
 0x235   :  { %v856_v24 = vpop.xlane.xlu1 %855 }
 0x236   :  { %9835 = vrsqrt.f32 %v871_v23  ;;  %v866_v25 = vmul.f32 0.03125, %v856_v24 }
 0x238   :  { %v9832_v26 = vpop.eup %9831  ;;  %v872_v27 = vadd.f32 1e-05, %v866_v25 }
 0x239   :  { %v881_v29 = vmul.f32 %v9832_v26, %v833_v44  ;;  %v859_v30 = vpop.xlane.xlu0 %858 }
 0x23a   :  { %9837 = vrsqrt.f32 %v872_v27  ;;  %v867_v31 = vmul.f32 0.03125, %v859_v30 }
 0x23b   :  { %v862_v32 = vpop.xlane.xlu1 %861  ;;  %v891_v33 = vmul.f32 %v10508_v28, %v881_v29 }
 0x23c   :  { %v9834_v34 = vpop.eup %9833  ;;  %v873_v35 = vadd.f32 1e-05, %v867_v31  ;;  %v868_v36 = vmul.f32 0.03125, %v862_v32 }
 0x23d   :  { %v882_v38 = vmul.f32 %v9834_v34, %v10466_v48  ;;  %v901_v41 = vadd.f32 %v10514_v37, %v891_v33 }
 0x23e   :  { %9839 = vrsqrt.f32 %v873_v35  ;;  %v874_v39 = vadd.f32 1e-05, %v868_v36 }
 0x23f   :  { %v892_v40 = vmul.f32 %v10508_v28, %v882_v38  ;;  %v907_v45 = vmax.f32 %v901_v41, 0.0 }
 0x240   :  { %v9836_v42 = vpop.eup %9835  ;;  %9841 = vrsqrt.f32 %v874_v39 }
 0x241   :  { %v883_v43 = vmul.f32 %v9836_v42, %v10471_v53  ;;  %v902_v44 = vadd.f32 %v10514_v37, %v892_v40 }
 0x243   :  { %v908_v46 = vmax.f32 %v902_v44, 0.0  ;;  %v893_v47 = vmul.f32 %v10508_v28, %v883_v43 }
 0x244   :  { %v9838_v49 = vpop.eup %9837 }
 0x245   :  { %v884_v50 = vmul.f32 %v9838_v49, %v10476_v58  ;;  %v918_v48 = vpack.c.bf16 %v908_v46, %v907_v45  ;;  %v903_v52 = vadd.f32 %v10514_v37, %v893_v47 }
 0x247   :  { %8441 = vmatmul.mubr.msk.bf16.vlgmr.msra.gmra.mrb[0].mxu1 %vm454_vm1, %v918_v48  ;;  %v894_v51 = vmul.f32 %v10508_v28, %v884_v50  ;;  %v909_v59 = vmax.f32 %v903_v52, 0.0 }
 0x248   :  { %v9840_v54 = vpop.eup %9839  ;;  %8444 = vmatprep.mubr.msk.bf16.mxu1 %vm10269_vm0, %v16308_v1 }
 0x249   :  { %v885_v53 = vmul.f32 %v9840_v54, %v10481_v0  ;;  %v904_v55 = vadd.f32 %v10514_v37, %v894_v51 }
 0x24a   :  { %v9842_v56 = vpop.eup %9841 }
 0x24b   :  { %v886_v57 = vmul.f32 %v9842_v56, %v10484_v4  ;;  %v910_v58 = vmax.f32 %v904_v55, 0.0  ;;  %v895_v60 = vmul.f32 %v10508_v28, %v885_v53  ;;  %v7639_v4 = vld [vmem:[%s16285_s7 + $0x1] ss:$0 sm:$0xff] }
 0x24d   :  { %v919_v61 = vpack.c.bf16 %v910_v58, %v909_v59  ;;  %v896_v62 = vmul.f32 %v10508_v28, %v886_v57  ;;  %v905_v63 = vadd.f32 %v10514_v37, %v895_v60 }
 0x24f   :  { %8445 = vmatmul.mubr.msk.bf16.gmra.mrb[4].mxu1 %vm454_vm1, %v919_v61  ;;  %v906_v2 = vadd.f32 %v10514_v37, %v896_v62  ;;  %v911_v3 = vmax.f32 %v905_v63, 0.0  ;;  %v1090_v62 = vld [vmem:[%s16286_s8] sm:$0xff]  ;;  %v1091_v63 = vld [vmem:[%s16286_s8 + $0x8] sm:$0xff] }
 0x250   :  { %8448 = vmatprep.mubr.msk.bf16.mxu1 %vm10269_vm0, %v16308_v1 }
 0x251   :  { %v912_v0 = vmax.f32 %v906_v2, 0.0  ;;  %v1097_v2 = vpack.c.bf16 %v1091_v63, %v1090_v62  ;;  %v136_v63 = vld [vmem:[%s16875_s28 + $0x178] sm:$0xff] }
 0x253   :  { %v920_v5 = vpack.c.bf16 %v912_v0, %v911_v3  ;;  %8453 = vmatpush3.bf16.msra.mxu0 %v1097_v2  ;;  %v1092_v0 = vld [vmem:[%s16286_s8 + $0x10] sm:$0xff]  ;;  %v1093_v3 = vld [vmem:[%s16286_s8 + $0x18] sm:$0xff] }
 0x254   :  { %8454 = vmatprep.subr.bf16.mxu0 %v16308_v1 }
 0x257   :  { %8449 = vmatmul.mubr.msk.bf16.gmra.mrb[8].mxu1 %vm454_vm1, %v920_v5  ;;  %v1098_v5 = vpack.c.bf16 %v1093_v3, %v1092_v0 }
 0x259   :  { %8455 = vmatpush3.bf16.msra.mxu0 %v1098_v5 }
 0x25a   :  { %8468 = vmatprep.subr.bf16.mxu0 %v16308_v1 }
 0x31a   :  { %v971_v6 = vpop.f32.mrb[0].mxu1 }
 0x31b   :  { %v972_v7 = vadd.f32 %v7639_v4, %v971_v6  ;;  %v8442_v8 = vpop.f32.mrb[1].mxu1  ;;  %v89_v6 = vld [vmem:[%s16875_s28] sm:$0xff] }
 0x31c   :  { %v974_v9 = vpop.f32.mrb[2].mxu1  ;;  %v106_v8 = vld [vmem:[%s16875_s28 + $0x88] sm:$0xff] }
 0x31d   :  { %v975_v10 = vadd.f32 %v7639_v4, %v974_v9  ;;  %v8443_v11 = vpop.f32.mrb[3].mxu1  ;;  %v994_v12 = vsel %vm454_vm1, %v972_v7, 0.0  ;;  %v121_v9 = vld [vmem:[%s16875_s28 + $0x100] sm:$0xff] }
 0x31e   :  { %995 = vadd.xlane.f32.xlu0 %v994_v12  ;;  %v91_v11 = vld [vmem:[%s16875_s28 + $0x10] sm:$0xff]  ;;  %v92_v12 = vld [vmem:[%s16875_s28 + $0x18] sm:$0xff] }
 0x31f   :  { %v997_v13 = vsel %vm454_vm1, %v975_v10, 0.0 }
 0x320   :  { %998 = vadd.xlane.f32.xlu1 %v997_v13  ;;  %v107_v13 = vld [vmem:[%s16875_s28 + $0x90] sm:$0xff] }
 0x322   :  { %v979_v14 = vpop.f32.mrb[4].mxu1 }
 0x323   :  { %v980_v15 = vadd.f32 %v7639_v4, %v979_v14  ;;  %v8446_v16 = vpop.f32.mrb[5].mxu1  ;;  %v108_v14 = vld [vmem:[%s16875_s28 + $0x98] sm:$0xff] }
 0x324   :  { %v982_v17 = vpop.f32.mrb[6].mxu1  ;;  %v124_v16 = vld [vmem:[%s16875_s28 + $0x118] sm:$0xff] }
 0x325   :  { %v983_v18 = vadd.f32 %v7639_v4, %v982_v17  ;;  %v8447_v19 = vpop.f32.mrb[7].mxu1  ;;  %v1000_v20 = vsel %vm454_vm1, %v980_v15, 0.0  ;;  %v93_v17 = vld [vmem:[%s16875_s28 + $0x20] sm:$0xff] }
 0x326   :  { %1001 = vadd.xlane.f32.xlu0 %v1000_v20  ;;  %v109_v19 = vld [vmem:[%s16875_s28 + $0xa0] sm:$0xff]  ;;  %v110_v20 = vld [vmem:[%s16875_s28 + $0xa8] sm:$0xff] }
 0x327   :  { %v1003_v21 = vsel %vm454_vm1, %v983_v18, 0.0 }
 0x328   :  { %1004 = vadd.xlane.f32.xlu1 %v1003_v21  ;;  %v125_v21 = vld [vmem:[%s16875_s28 + $0x120] sm:$0xff] }
 0x32a   :  { %v987_v22 = vpop.f32.mrb[8].mxu1 }
 0x32b   :  { %v988_v23 = vadd.f32 %v7639_v4, %v987_v22  ;;  %v8450_v24 = vpop.f32.mrb[9].mxu1  ;;  %v126_v22 = vld [vmem:[%s16875_s28 + $0x128] sm:$0xff] }
 0x32c   :  { %v990_v25 = vpop.f32.mrb[10].mxu1  ;;  %v96_v24 = vld [vmem:[%s16875_s28 + $0x38] sm:$0xff] }
 0x32d   :  { %v991_v26 = vadd.f32 %v7639_v4, %v990_v25  ;;  %v8451_v27 = vpop.f32.mrb[11].mxu1  ;;  %v1006_v29 = vsel %vm454_vm1, %v988_v23, 0.0  ;;  %v90_v4 = vld [vmem:[%s16875_s28 + $0x8] sm:$0xff]  ;;  %v111_v25 = vld [vmem:[%s16875_s28 + $0xb0] sm:$0xff] }
 0x32e   :  { %1007 = vadd.xlane.f32.xlu0 %v1006_v29  ;;  %v127_v27 = vld [vmem:[%s16875_s28 + $0x130] sm:$0xff]  ;;  %v128_v29 = vld [vmem:[%s16875_s28 + $0x138] sm:$0xff] }
 0x32f   :  { %v1009_v30 = vsel %vm454_vm1, %v991_v26, 0.0 }
 0x330   :  { %1010 = vadd.xlane.f32.xlu1 %v1009_v30  ;;  %v97_v30 = vld [vmem:[%s16875_s28 + $0x40] sm:$0xff] }
 0x3ab   :  { %v996_v31 = vpop.xlane.xlu0 %995 }
 0x3ac   :  { %v1012_v32 = vmul.f32 0.03125, %v996_v31  ;;  %v98_v31 = vld [vmem:[%s16875_s28 + $0x48] sm:$0xff] }
 0x3ad   :  { %v999_v33 = vpop.xlane.xlu1 %998 }
 0x3ae   :  { %v10548_v34 = vsub.f32 %v972_v7, %v1012_v32  ;;  %v1013_v35 = vmul.f32 0.03125, %v999_v33  ;;  %v105_v7 = vld [vmem:[%s16875_s28 + $0x80] sm:$0xff]  ;;  %v114_v33 = vld [vmem:[%s16875_s28 + $0xc8] sm:$0xff] }
 0x3af   :  { %v113_v32 = vld [vmem:[%s16875_s28 + $0xc0] sm:$0xff] }
 0x3b0   :  { %v10550_v36 = vsub.f32 %v975_v10, %v1013_v35  ;;  %v1024_v38 = vmul.f32 %v10548_v34, %v10548_v34  ;;  %v122_v10 = vld [vmem:[%s16875_s28 + $0x108] sm:$0xff]  ;;  %v129_v35 = vld [vmem:[%s16875_s28 + $0x140] sm:$0xff] }
 0x3b2   :  { %v1030_v39 = vsel %vm454_vm1, %v1024_v38, 0.0  ;;  %v1025_v40 = vmul.f32 %v10550_v36, %v10550_v36  ;;  %v130_v38 = vld [vmem:[%s16875_s28 + $0x148] sm:$0xff] }
 0x3b3   :  { %v1002_v41 = vpop.xlane.xlu0 %1001  ;;  %1031 = vadd.xlane.f32.xlu0 %v1030_v39  ;;  %v99_v39 = vld [vmem:[%s16875_s28 + $0x50] sm:$0xff] }
 0x3b4   :  { %v1014_v42 = vmul.f32 0.03125, %v1002_v41  ;;  %v1033_v43 = vsel %vm454_vm1, %v1025_v40, 0.0  ;;  %v100_v40 = vld [vmem:[%s16875_s28 + $0x58] sm:$0xff]  ;;  %v115_v41 = vld [vmem:[%s16875_s28 + $0xd0] sm:$0xff] }
 0x3b5   :  { %v1005_v44 = vpop.xlane.xlu1 %1004  ;;  %1034 = vadd.xlane.f32.xlu1 %v1033_v43  ;;  %v131_v43 = vld [vmem:[%s16875_s28 + $0x150] sm:$0xff] }
 0x3b6   :  { %v10558_v45 = vsub.f32 %v980_v15, %v1014_v42  ;;  %v1015_v46 = vmul.f32 0.03125, %v1005_v44  ;;  %v123_v15 = vld [vmem:[%s16875_s28 + $0x110] sm:$0xff]  ;;  %v116_v42 = vld [vmem:[%s16875_s28 + $0xd8] sm:$0xff] }
 0x3b7   :  { %v132_v44 = vld [vmem:[%s16875_s28 + $0x158] sm:$0xff] }
 0x3b8   :  { %v10560_v47 = vsub.f32 %v983_v18, %v1015_v46  ;;  %v1026_v49 = vmul.f32 %v10558_v45, %v10558_v45  ;;  %v94_v18 = vld [vmem:[%s16875_s28 + $0x28] sm:$0xff]  ;;  %v101_v46 = vld [vmem:[%s16875_s28 + $0x60] sm:$0xff] }
 0x3ba   :  { %v1036_v50 = vsel %vm454_vm1, %v1026_v49, 0.0  ;;  %v1027_v48 = vmul.f32 %v10560_v47, %v10560_v47  ;;  %v102_v49 = vld [vmem:[%s16875_s28 + $0x68] sm:$0xff] }
 0x3bb   :  { %1037 = vadd.xlane.f32.xlu0 %v1036_v50  ;;  %v1008_v51 = vpop.xlane.xlu0 %1007  ;;  %v117_v50 = vld [vmem:[%s16875_s28 + $0xe0] sm:$0xff] }
 0x3bc   :  { %v1016_v52 = vmul.f32 0.03125, %v1008_v51  ;;  %v1039_v54 = vsel %vm454_vm1, %v1027_v48, 0.0  ;;  %v118_v48 = vld [vmem:[%s16875_s28 + $0xe8] sm:$0xff]  ;;  %v133_v51 = vld [vmem:[%s16875_s28 + $0x160] sm:$0xff] }
 0x3bd   :  { %1040 = vadd.xlane.f32.xlu1 %v1039_v54  ;;  %v1011_v53 = vpop.xlane.xlu1 %1010  ;;  %v103_v54 = vld [vmem:[%s16875_s28 + $0x70] sm:$0xff] }
 0x3be   :  { %v10568_v55 = vsub.f32 %v988_v23, %v1016_v52  ;;  %v1017_v56 = vmul.f32 0.03125, %v1011_v53  ;;  %v95_v23 = vld [vmem:[%s16875_s28 + $0x30] sm:$0xff]  ;;  %v134_v52 = vld [vmem:[%s16875_s28 + $0x168] sm:$0xff]  ;;  %v104_v53 = vld [vmem:[%s16875_s28 + $0x78] sm:$0xff] }
 0x3c0   :  { %v10570_v57 = vsub.f32 %v991_v26, %v1017_v56  ;;  %v1028_v59 = vmul.f32 %v10568_v55, %v10568_v55  ;;  %v112_v26 = vld [vmem:[%s16875_s28 + $0xb8] sm:$0xff]  ;;  %v119_v56 = vld [vmem:[%s16875_s28 + $0xf0] sm:$0xff] }
 0x3c2   :  { %v1042_v58 = vsel %vm454_vm1, %v1028_v59, 0.0  ;;  %v1029_v60 = vmul.f32 %v10570_v57, %v10570_v57  ;;  %v120_v59 = vld [vmem:[%s16875_s28 + $0xf8] sm:$0xff] }
 0x3c3   :  { %1043 = vadd.xlane.f32.xlu0 %v1042_v58  ;;  %v135_v58 = vld [vmem:[%s16875_s28 + $0x170] sm:$0xff] }
 0x3c4   :  { %v1045_v61 = vsel %vm454_vm1, %v1029_v60, 0.0 }
 0x3c5   :  { %1046 = vadd.xlane.f32.xlu1 %v1045_v61 }
 0x3d6   :  { %1222 = vrot.lane.b32.xlu1 %v90_v4, %s10270_s29 }
 0x3d9   :  { %1220 = vrot.lane.b32.xlu0 %v89_v6, %s10270_s29 }
 0x3da   :  { %1252 = vrot.lane.b32.xlu1 %v105_v7, %s10270_s29 }
 0x3dd   :  { %1284 = vrot.lane.b32.xlu0 %v121_v9, %s10270_s29 }
 0x3de   :  { %1254 = vrot.lane.b32.xlu1 %v106_v8, %s10270_s29 }
 0x3e1   :  { %1224 = vrot.lane.b32.xlu0 %v91_v11, %s10270_s29 }
 0x3e2   :  { %1286 = vrot.lane.b32.xlu1 %v122_v10, %s10270_s29 }
 0x3e5   :  { %1256 = vrot.lane.b32.xlu0 %v107_v13, %s10270_s29 }
 0x3e6   :  { %1226 = vrot.lane.b32.xlu1 %v92_v12, %s10270_s29 }
 0x3e9   :  { %1288 = vrot.lane.b32.xlu0 %v123_v15, %s10270_s29 }
 0x3ea   :  { %1258 = vrot.lane.b32.xlu1 %v108_v14, %s10270_s29 }
 0x3ed   :  { %1228 = vrot.lane.b32.xlu0 %v93_v17, %s10270_s29 }
 0x3ee   :  { %1290 = vrot.lane.b32.xlu1 %v124_v16, %s10270_s29 }
 0x3f1   :  { %1260 = vrot.lane.b32.xlu0 %v109_v19, %s10270_s29 }
 0x3f2   :  { %1230 = vrot.lane.b32.xlu1 %v94_v18, %s10270_s29 }
 0x3f5   :  { %1292 = vrot.lane.b32.xlu0 %v125_v21, %s10270_s29 }
 0x3f6   :  { %1262 = vrot.lane.b32.xlu1 %v110_v20, %s10270_s29 }
 0x3f9   :  { %1232 = vrot.lane.b32.xlu0 %v95_v23, %s10270_s29 }
 0x3fa   :  { %1294 = vrot.lane.b32.xlu1 %v126_v22, %s10270_s29 }
 0x3fd   :  { %1264 = vrot.lane.b32.xlu0 %v111_v25, %s10270_s29 }
 0x3fe   :  { %1234 = vrot.lane.b32.xlu1 %v96_v24, %s10270_s29 }
 0x401   :  { %1296 = vrot.lane.b32.xlu0 %v127_v27, %s10270_s29 }
 0x402   :  { %1266 = vrot.lane.b32.xlu1 %v112_v26, %s10270_s29 }
 0x405   :  { %1236 = vrot.lane.b32.xlu0 %v97_v30, %s10270_s29 }
 0x406   :  { %1298 = vrot.lane.b32.xlu1 %v128_v29, %s10270_s29 }
 0x409   :  { %1268 = vrot.lane.b32.xlu0 %v113_v32, %s10270_s29 }
 0x40a   :  { %1238 = vrot.lane.b32.xlu1 %v98_v31, %s10270_s29 }
 0x40d   :  { %1300 = vrot.lane.b32.xlu0 %v129_v35, %s10270_s29 }
 0x40e   :  { %1270 = vrot.lane.b32.xlu1 %v114_v33, %s10270_s29 }
 0x411   :  { %1240 = vrot.lane.b32.xlu0 %v99_v39, %s10270_s29 }
 0x412   :  { %1302 = vrot.lane.b32.xlu1 %v130_v38, %s10270_s29 }
 0x415   :  { %1272 = vrot.lane.b32.xlu0 %v115_v41, %s10270_s29 }
 0x416   :  { %1242 = vrot.lane.b32.xlu1 %v100_v40, %s10270_s29 }
 0x419   :  { %1304 = vrot.lane.b32.xlu0 %v131_v43, %s10270_s29 }
 0x41a   :  { %1274 = vrot.lane.b32.xlu1 %v116_v42, %s10270_s29 }
 0x41d   :  { %1244 = vrot.lane.b32.xlu0 %v101_v46, %s10270_s29 }
 0x41e   :  { %1306 = vrot.lane.b32.xlu1 %v132_v44, %s10270_s29 }
 0x421   :  { %1276 = vrot.lane.b32.xlu0 %v117_v50, %s10270_s29 }
 0x422   :  { %1246 = vrot.lane.b32.xlu1 %v102_v49, %s10270_s29 }
 0x425   :  { %1308 = vrot.lane.b32.xlu0 %v133_v51, %s10270_s29 }
 0x426   :  { %1278 = vrot.lane.b32.xlu1 %v118_v48, %s10270_s29 }
 0x429   :  { %1248 = vrot.lane.b32.xlu0 %v103_v54, %s10270_s29 }
 0x42a   :  { %1310 = vrot.lane.b32.xlu1 %v134_v52, %s10270_s29 }
 0x42d   :  { %1280 = vrot.lane.b32.xlu0 %v119_v56, %s10270_s29 }
 0x42e   :  { %1250 = vrot.lane.b32.xlu1 %v104_v53, %s10270_s29 }
 0x431   :  { %1312 = vrot.lane.b32.xlu0 %v135_v58, %s10270_s29 }
 0x432   :  { %1282 = vrot.lane.b32.xlu1 %v120_v59, %s10270_s29 }
 0x436   :  { %1314 = vrot.lane.b32.xlu1 %v136_v63, %s10270_s29 }
 0x440   :  { %v1032_v60 = vpop.xlane.xlu0 %1031 }
 0x441   :  { %v1048_v61 = vmul.f32 0.03125, %v1032_v60 }
 0x442   :  { %v1035_v62 = vpop.xlane.xlu1 %1034 }
 0x443   :  { %v1054_v2 = vadd.f32 1e-05, %v1048_v61  ;;  %v1049_v0 = vmul.f32 0.03125, %v1035_v62 }
 0x445   :  { %9843 = vrsqrt.f32 %v1054_v2  ;;  %v1055_v3 = vadd.f32 1e-05, %v1049_v0 }
 0x447   :  { %9845 = vrsqrt.f32 %v1055_v3 }
 0x448   :  { %v1038_v5 = vpop.xlane.xlu0 %1037 }
 0x449   :  { %v1050_v4 = vmul.f32 0.03125, %v1038_v5 }
 0x44a   :  { %v1041_v6 = vpop.xlane.xlu1 %1040 }
 0x44b   :  { %v1056_v7 = vadd.f32 1e-05, %v1050_v4  ;;  %v1051_v8 = vmul.f32 0.03125, %v1041_v6 }
 0x44d   :  { %9847 = vrsqrt.f32 %v1056_v7  ;;  %v1057_v9 = vadd.f32 1e-05, %v1051_v8 }
 0x44f   :  { %v9844_v10 = vpop.eup %9843  ;;  %9849 = vrsqrt.f32 %v1057_v9 }
 0x450   :  { %v1066_v11 = vmul.f32 %v9844_v10, %v10548_v34  ;;  %v1044_v12 = vpop.xlane.xlu0 %1043 }
 0x451   :  { %v9846_v13 = vpop.eup %9845  ;;  %v1052_v14 = vmul.f32 0.03125, %v1044_v12 }
 0x452   :  { %v1072_v15 = vmul.f32 %v10508_v28, %v1066_v11  ;;  %v1067_v16 = vmul.f32 %v9846_v13, %v10550_v36  ;;  %v1047_v17 = vpop.xlane.xlu1 %1046 }
 0x453   :  { %v1058_v18 = vadd.f32 1e-05, %v1052_v14  ;;  %v1053_v19 = vmul.f32 0.03125, %v1047_v17  ;;  %v7643_v14 = vld [vmem:[%s16287_s9] ss:$0 sm:$0xff] }
 0x454   :  { %v1078_v20 = vadd.f32 %v10514_v37, %v1072_v15  ;;  %v1073_v21 = vmul.f32 %v10508_v28, %v1067_v16  ;;  %v10835_v51 = vpop.permute.xlu0 %1220 }
 0x455   :  { %9851 = vrsqrt.f32 %v1058_v18  ;;  %v1059_v22 = vadd.f32 1e-05, %v1053_v19  ;;  %16885 = vst [vmem:[#allocation18_spill] sm:$0xff] %v10835_v51 }
 0x456   :  { %v1079_v23 = vadd.f32 %v10514_v37, %v1073_v21  ;;  %v10790_v34 = vmax.f32 %v1078_v20, 0.0 }
 0x457   :  { %v9848_v24 = vpop.eup %9847  ;;  %9853 = vrsqrt.f32 %v1059_v22 }
 0x458   :  { %16876 = vst [vmem:[#allocation9_spill] sm:$0xff] %v10790_v34  ;;  %v10792_v25 = vmax.f32 %v1079_v23, 0.0  ;;  %v1068_v26 = vmul.f32 %v9848_v24, %v10558_v45  ;;  %v10839_v52 = vpop.permute.xlu0 %1284 }
 0x459   :  { %v9850_v36 = vpop.eup %9849  ;;  %16887 = vst [vmem:[#allocation20_spill] sm:$0xff] %v10839_v52 }
 0x45a   :  { %16877 = vst [vmem:[#allocation10_spill] sm:$0xff] %v10792_v25  ;;  %v1069_v27 = vmul.f32 %v9850_v36, %v10560_v47  ;;  %v1094_v29 = vpack.c.bf16 %v10792_v25, %v10790_v34  ;;  %v1074_v30 = vmul.f32 %v10508_v28, %v1068_v26 }
 0x45c   :  { %8457 = vmatmul.mubr.msk.bf16.vlgmr.msra.gmra.mrb[12].mxu0 %vm454_vm1, %v1094_v29  ;;  %v1075_v31 = vmul.f32 %v10508_v28, %v1069_v27  ;;  %v1080_v32 = vadd.f32 %v10514_v37, %v1074_v30  ;;  %v10843_v53 = vpop.permute.xlu0 %1224 }
 0x45d   :  { %8460 = vmatprep.mubr.msk.bf16.mxu0 %vm10269_vm0, %v16308_v1  ;;  %16889 = vst [vmem:[#allocation22_spill] sm:$0xff] %v10843_v53 }
 0x45e   :  { %v1081_v33 = vadd.f32 %v10514_v37, %v1075_v31  ;;  %v10806_v47 = vmax.f32 %v1080_v32, 0.0 }
 0x45f   :  { %v9852_v45 = vpop.eup %9851 }
 0x460   :  { %v1070_v35 = vmul.f32 %v9852_v45, %v10568_v55  ;;  %16878 = vst [vmem:[#allocation11_spill] sm:$0xff] %v10806_v47  ;;  %v10808_v38 = vmax.f32 %v1081_v33, 0.0  ;;  %v10847_v59 = vpop.permute.xlu0 %1256 }
 0x461   :  { %v9854_v39 = vpop.eup %9853  ;;  %16891 = vst [vmem:[#allocation24_spill] sm:$0xff] %v10847_v59 }
 0x462   :  { %16879 = vst [vmem:[#allocation12_spill] sm:$0xff] %v10808_v38  ;;  %v1071_v40 = vmul.f32 %v9854_v39, %v10570_v57  ;;  %v1095_v41 = vpack.c.bf16 %v10808_v38, %v10806_v47  ;;  %v1076_v42 = vmul.f32 %v10508_v28, %v1070_v35 }
 0x464   :  { %8461 = vmatmul.mubr.msk.bf16.gmra.mrb[16].mxu0 %vm454_vm1, %v1095_v41  ;;  %v1077_v43 = vmul.f32 %v10508_v28, %v1071_v40  ;;  %v1082_v44 = vadd.f32 %v10514_v37, %v1076_v42  ;;  %v10829_v28 = vpop.permute.xlu1 %1222  ;;  %v10851_v60 = vpop.permute.xlu0 %1288 }
 0x465   :  { %8464 = vmatprep.mubr.msk.bf16.mxu0 %vm10269_vm0, %v16308_v1  ;;  %16882 = vst [vmem:[#allocation15_spill] sm:$0xff] %v10829_v28  ;;  %16893 = vst [vmem:[#allocation26_spill] sm:$0xff] %v10851_v60 }
 0x466   :  { %v1083_v55 = vadd.f32 %v10514_v37, %v1077_v43  ;;  %v10820_v46 = vmax.f32 %v1082_v44, 0.0 }
 0x468   :  { %16880 = vst [vmem:[#allocation13_spill] sm:$0xff] %v10820_v46  ;;  %v10822_v49 = vmax.f32 %v1083_v55, 0.0  ;;  %v10831_v50 = vpop.permute.xlu1 %1252  ;;  %v10855_v62 = vpop.permute.xlu0 %1228 }
 0x469   :  { %16883 = vst [vmem:[#allocation16_spill] sm:$0xff] %v10831_v50  ;;  %16895 = vst [vmem:[#allocation28_spill] sm:$0xff] %v10855_v62 }
 0x46a   :  { %16881 = vst [vmem:[#allocation14_spill] sm:$0xff] %v10822_v49  ;;  %v1096_v57 = vpack.c.bf16 %v10822_v49, %v10820_v46 }
 0x46c   :  { %8465 = vmatmul.mubr.msk.bf16.gmra.mrb[20].mxu0 %vm454_vm1, %v1096_v57  ;;  %v10833_v48 = vpop.permute.xlu1 %1254  ;;  %v10859_v2 = vpop.permute.xlu0 %1260 }
 0x46d   :  { %8484 = vmatprep.mubr.msk.bf16.mxu0 %vm10269_vm0, %v16308_v1  ;;  %16884 = vst [vmem:[#allocation17_spill] sm:$0xff] %v10833_v48  ;;  %16897 = vst [vmem:[#allocation30_spill] sm:$0xff] %v10859_v2 }
 0x470   :  { %v10837_v37 = vpop.permute.xlu1 %1286  ;;  %v10863_v3 = vpop.permute.xlu0 %1292 }
 0x471   :  { %16886 = vst [vmem:[#allocation19_spill] sm:$0xff] %v10837_v37  ;;  %16899 = vst [vmem:[#allocation32_spill] sm:$0xff] %v10863_v3 }
 0x474   :  { %v10841_v54 = vpop.permute.xlu1 %1226  ;;  %v10867_v4 = vpop.permute.xlu0 %1232 }
 0x475   :  { %16888 = vst [vmem:[#allocation21_spill] sm:$0xff] %v10841_v54  ;;  %16901 = vst [vmem:[#allocation34_spill] sm:$0xff] %v10867_v4 }
 0x478   :  { %v10845_v56 = vpop.permute.xlu1 %1258  ;;  %v10871_v7 = vpop.permute.xlu0 %1264 }
 0x479   :  { %16890 = vst [vmem:[#allocation23_spill] sm:$0xff] %v10845_v56  ;;  %16903 = vst [vmem:[#allocation36_spill] sm:$0xff] %v10871_v7 }
 0x47c   :  { %v10849_v58 = vpop.permute.xlu1 %1290  ;;  %v10875_v9 = vpop.permute.xlu0 %1296 }
 0x47d   :  { %16892 = vst [vmem:[#allocation25_spill] sm:$0xff] %v10849_v58  ;;  %16905 = vst [vmem:[#allocation38_spill] sm:$0xff] %v10875_v9 }
 0x480   :  { %v10853_v61 = vpop.permute.xlu1 %1230  ;;  %v10879_v11 = vpop.permute.xlu0 %1236 }
 0x481   :  { %16894 = vst [vmem:[#allocation27_spill] sm:$0xff] %v10853_v61  ;;  %16907 = vst [vmem:[#allocation40_spill] sm:$0xff] %v10879_v11 }
 0x484   :  { %v10857_v63 = vpop.permute.xlu1 %1262  ;;  %v10883_v13 = vpop.permute.xlu0 %1268 }
 0x485   :  { %16896 = vst [vmem:[#allocation29_spill] sm:$0xff] %v10857_v63  ;;  %16909 = vst [vmem:[#allocation42_spill] sm:$0xff] %v10883_v13 }
 0x488   :  { %v10861_v0 = vpop.permute.xlu1 %1294  ;;  %v10892_v19 = vpop.permute.xlu0 %1300 }
 0x489   :  { %16898 = vst [vmem:[#allocation31_spill] sm:$0xff] %v10861_v0  ;;  %16911 = vst [vmem:[#allocation44_spill] sm:$0xff] %v10892_v19 }
 0x48c   :  { %v10865_v5 = vpop.permute.xlu1 %1234  ;;  %v10908_v29 = vpop.permute.xlu0 %1240 }
 0x48d   :  { %16900 = vst [vmem:[#allocation33_spill] sm:$0xff] %v10865_v5  ;;  %16913 = vst [vmem:[#allocation46_spill] sm:$0xff] %v10908_v29 }
 0x490   :  { %v10869_v6 = vpop.permute.xlu1 %1266  ;;  %v10921_v42 = vpop.permute.xlu0 %1272 }
 0x491   :  { %16902 = vst [vmem:[#allocation35_spill] sm:$0xff] %v10869_v6  ;;  %16915 = vst [vmem:[#allocation48_spill] sm:$0xff] %v10921_v42 }
 0x494   :  { %v10873_v8 = vpop.permute.xlu1 %1298 }
 0x495   :  { %16904 = vst [vmem:[#allocation37_spill] sm:$0xff] %v10873_v8 }
 0x498   :  { %v10877_v10 = vpop.permute.xlu1 %1238 }
 0x499   :  { %16906 = vst [vmem:[#allocation39_spill] sm:$0xff] %v10877_v10 }
 0x49c   :  { %v10881_v12 = vpop.permute.xlu1 %1270 }
 0x49d   :  { %16908 = vst [vmem:[#allocation41_spill] sm:$0xff] %v10881_v12 }
 0x4a0   :  { %v10888_v15 = vpop.permute.xlu1 %1302 }
 0x4a1   :  { %16910 = vst [vmem:[#allocation43_spill] sm:$0xff] %v10888_v15 }
 0x4a4   :  { %v10904_v36 = vpop.permute.xlu1 %1242 }
 0x4a5   :  { %16912 = vst [vmem:[#allocation45_spill] sm:$0xff] %v10904_v36 }
 0x4a8   :  { %v10915_v39 = vpop.permute.xlu1 %1274 }
 0x4a9   :  { %16914 = vst [vmem:[#allocation47_spill] sm:$0xff] %v10915_v39 }
 0x52f   :  { %v1149_v16 = vpop.f32.mrb[12].mxu0 }
 0x530   :  { %v10890_v17 = vadd.f32 %v7643_v14, %v1149_v16  ;;  %v8458_v18 = vpop.f32.mrb[13].mxu0 }
 0x531   :  { %v1152_v20 = vpop.f32.mrb[14].mxu0 }
 0x532   :  { %v10894_v21 = vadd.f32 %v7643_v14, %v1152_v20  ;;  %v8459_v22 = vpop.f32.mrb[15].mxu0  ;;  %v1364_v24 = vmul.f32 %v10835_v51, %v10890_v17  ;;  %v1382_v18 = vmul.f32 %v10847_v59, %v10890_v17  ;;  %v10930_v20 = vpop.permute.xlu1 %1306  ;;  %v142_v59 = vld [vmem:[#allocation3 + $0x28] sm:$0xff]  ;;  %v192_v51 = vld [vmem:[#allocation3 + $0x1b8] sm:$0xff] }
 0x533   :  { %16916 = vst [vmem:[#allocation49_spill] sm:$0xff] %v10930_v20 }
 0x534   :  { %v10898_v23 = vpack.c.bf16 %v10894_v21, %v10890_v17  ;;  %v1365_v26 = vmul.f32 %v10829_v28, %v10894_v21  ;;  %v1383_v44 = vmul.f32 %v10845_v56, %v10894_v21  ;;  %v147_v28 = vld [vmem:[#allocation3 + $0x50] sm:$0xff] }
 0x536   :  { %7777 = vmatprep.mubr.msk.bf16.mxu1 %vm454_vm1, %v10898_v23  ;;  %v1607_v27 = vpack.c.bf16 %v1365_v26, %v1364_v24 }
 0x537   :  { %v1157_v30 = vpop.f32.mrb[16].mxu0 }
 0x538   :  { %v10910_v31 = vadd.f32 %v7643_v14, %v1157_v30  ;;  %v8462_v32 = vpop.f32.mrb[17].mxu0  ;;  %1655 = vrot.lane.b32.xlu0 %v1607_v27, %s10271_s5  ;;  %v1616_v27 = vpack.c.bf16 %v1383_v44, %v1382_v18  ;;  %v10934_v30 = vpop.permute.xlu0 %1304  ;;  %v1401_v44 = vmul.f32 %v10861_v0, %v10894_v21  ;;  %v1400_v18 = vmul.f32 %v10863_v3, %v10890_v17 }
 0x539   :  { %v1160_v33 = vpop.f32.mrb[18].mxu0  ;;  %16917 = vst [vmem:[#allocation50_spill] sm:$0xff] %v10934_v30 }
 0x53a   :  { %v10913_v45 = vadd.f32 %v7643_v14, %v1160_v33  ;;  %v8463_v35 = vpop.f32.mrb[19].mxu0  ;;  %v1396_v40 = vmul.f32 %v10839_v52, %v10910_v31  ;;  %v138_v52 = vld [vmem:[#allocation3 + $0x8] sm:$0xff] }
 0x53c   :  { %v1397_v41 = vmul.f32 %v10837_v37, %v10913_v45 }
 0x53e   :  { %v1623_v43 = vpack.c.bf16 %v1397_v41, %v1396_v40 }
 0x53f   :  { %v1165_v55 = vpop.f32.mrb[20].mxu0 }
 0x540   :  { %v10925_v57 = vadd.f32 %v7643_v14, %v1165_v55  ;;  %v8466_v16 = vpop.f32.mrb[21].mxu0  ;;  %1687 = vrot.lane.b32.xlu0 %v1623_v43, %s10271_s5  ;;  %v1367_v43 = vmul.f32 %v10841_v54, %v10913_v45  ;;  %v10949_v55 = vpop.permute.xlu1 %1246 }
 0x541   :  { %v1168_v22 = vpop.f32.mrb[22].mxu0  ;;  %16918 = vst [vmem:[#allocation51_spill] sm:$0xff] %v10949_v55  ;;  %v1366_v16 = vmul.f32 %v10843_v53, %v10910_v31 }
 0x542   :  { %v10932_v24 = vadd.f32 %v7643_v14, %v1168_v22  ;;  %v8467_v26 = vpop.f32.mrb[23].mxu0  ;;  %v1380_v32 = vmul.f32 %v10831_v50, %v10925_v57  ;;  %v1368_v35 = vmul.f32 %v10855_v62, %v10925_v57  ;;  %v10957_v22 = vpop.permute.xlu0 %1244 }
 0x543   :  { %16919 = vst [vmem:[#allocation52_spill] sm:$0xff] %v10957_v22  ;;  %v1608_v26 = vpack.c.bf16 %v1367_v43, %v1366_v16  ;;  %v1373_v16 = vmul.f32 %v10877_v10, %v10913_v45 }
 0x544   :  { %1673 = vrot.lane.b32.xlu0 %v1616_v27, %s10271_s5  ;;  %v1381_v33 = vmul.f32 %v10833_v48, %v10932_v24  ;;  %v1369_v40 = vmul.f32 %v10853_v61, %v10932_v24  ;;  %v1625_v27 = vpack.c.bf16 %v1401_v44, %v1400_v18  ;;  %v1385_v44 = vmul.f32 %v10857_v63, %v10913_v45 }
 0x546   :  { %v1615_v14 = vpack.c.bf16 %v1381_v33, %v1380_v32  ;;  %v1609_v41 = vpack.c.bf16 %v1369_v40, %v1368_v35  ;;  %v1399_v32 = vmul.f32 %v10849_v58, %v10932_v24  ;;  %v1387_v33 = vmul.f32 %v10869_v6, %v10932_v24  ;;  %v10975_v18 = vpop.permute.xlu0 %1276 }
 0x547   :  { %v1398_v35 = vmul.f32 %v10851_v60, %v10925_v57  ;;  %v1386_v40 = vmul.f32 %v10871_v7, %v10925_v57  ;;  %16921 = vst [vmem:[#allocation54_spill] sm:$0xff] %v10975_v18 }
 0x548   :  { %1671 = vrot.lane.b32.xlu1 %v1615_v14, %s10271_s5  ;;  %1659 = vrot.lane.b32.xlu0 %v1609_v41, %s10271_s5  ;;  %v10969_v14 = vpop.permute.xlu1 %1278 }
 0x549   :  { %16920 = vst [vmem:[#allocation53_spill] sm:$0xff] %v10969_v14  ;;  %v1624_v41 = vpack.c.bf16 %v1399_v32, %v1398_v35  ;;  %v1618_v43 = vpack.c.bf16 %v1387_v33, %v1386_v40  ;;  %v1371_v35 = vmul.f32 %v10865_v5, %v10894_v21  ;;  %v1405_v40 = vmul.f32 %v10888_v15, %v10932_v24 }
 0x54a   :  { %v1391_v15 = vmul.f32 %v10915_v39, %v10913_v45 }
 0x54c   :  { %1657 = vrot.lane.b32.xlu1 %v1608_v26, %s10271_s5  ;;  %1691 = vrot.lane.b32.xlu0 %v1625_v27, %s10271_s5  ;;  %v1384_v26 = vmul.f32 %v10859_v2, %v10910_v31  ;;  %v1372_v27 = vmul.f32 %v10879_v11, %v10910_v31  ;;  %v10987_v1 = vpop.permute.xlu1 %1310 }
 0x54d   :  { %16922 = vst [vmem:[#allocation55_spill] sm:$0xff] %v10987_v1 }
 0x54e   :  { %v1617_v32 = vpack.c.bf16 %v1385_v44, %v1384_v26  ;;  %v1611_v33 = vpack.c.bf16 %v1373_v16, %v1372_v27  ;;  %v10995_v44 = vpop.permute.xlu0 %1308  ;;  %v1403_v27 = vmul.f32 %v10873_v8, %v10913_v45 }
 0x54f   :  { %16923 = vst [vmem:[#allocation56_spill] sm:$0xff] %v10995_v44 }
 0x550   :  { %1689 = vrot.lane.b32.xlu1 %v1624_v41, %s10271_s5  ;;  %1677 = vrot.lane.b32.xlu0 %v1618_v43, %s10271_s5  ;;  %v1370_v41 = vmul.f32 %v10867_v4, %v10890_v17  ;;  %v1404_v43 = vmul.f32 %v10892_v19, %v10925_v57  ;;  %v11007_v6 = vpop.permute.xlu1 %1250 }
 0x551   :  { %16924 = vst [vmem:[#allocation57_spill] sm:$0xff] %v11007_v6 }
 0x552   :  { %v1610_v16 = vpack.c.bf16 %v1371_v35, %v1370_v41  ;;  %v1627_v26 = vpack.c.bf16 %v1405_v40, %v1404_v43  ;;  %v1389_v41 = vmul.f32 %v10881_v12, %v10894_v21  ;;  %v1377_v43 = vmul.f32 %v10949_v55, %v10894_v21  ;;  %v11013_v58 = vpop.permute.xlu0 %1248  ;;  %v140_v55 = vld [vmem:[#allocation3 + $0x18] sm:$0xff] }
 0x553   :  { %16925 = vst [vmem:[#allocation58_spill] sm:$0xff] %v11013_v58  ;;  %v144_v12 = vld [vmem:[#allocation3 + $0x38] sm:$0xff] }
 0x554   :  { %1675 = vrot.lane.b32.xlu1 %v1617_v32, %s10271_s5  ;;  %1663 = vrot.lane.b32.xlu0 %v1611_v33, %s10271_s5  ;;  %v1402_v32 = vmul.f32 %v10875_v9, %v10910_v31  ;;  %v1390_v33 = vmul.f32 %v10921_v42, %v10910_v31  ;;  %v11025_v61 = vpop.permute.xlu1 %1282 }
 0x555   :  { %16926 = vst [vmem:[#allocation59_spill] sm:$0xff] %v11025_v61 }
 0x556   :  { %v1626_v35 = vpack.c.bf16 %v1403_v27, %v1402_v32  ;;  %v1620_v40 = vpack.c.bf16 %v1391_v15, %v1390_v33  ;;  %v1375_v32 = vmul.f32 %v10904_v36, %v10932_v24  ;;  %v1409_v33 = vmul.f32 %v10987_v1, %v10913_v45 }
 0x557   :  { %v1395_v36 = vmul.f32 %v11025_v61, %v10894_v21  ;;  %v141_v61 = vld [vmem:[#allocation3 + $0x20] sm:$0xff] }
 0x558   :  { %1661 = vrot.lane.b32.xlu1 %v1610_v16, %s10271_s5  ;;  %1695 = vrot.lane.b32.xlu0 %v1627_v26, %s10271_s5  ;;  %v1388_v16 = vmul.f32 %v10883_v13, %v10890_v17  ;;  %v1376_v26 = vmul.f32 %v10957_v22, %v10890_v17  ;;  %v150_v22 = vld [vmem:[#allocation3 + $0x68] sm:$0xff]  ;;  %v153_v13 = vld [vmem:[#allocation3 + $0x80] sm:$0xff] }
 0x559   :  { %v11298_v4 = vpack.c.bf16 %v153_v13, %v150_v22 }
 0x55a   :  { %v1619_v27 = vpack.c.bf16 %v1389_v41, %v1388_v16  ;;  %v1613_v15 = vpack.c.bf16 %v1377_v43, %v1376_v26  ;;  %v11033_v41 = vpop.permute.xlu0 %1280  ;;  %v1407_v26 = vmul.f32 %v10930_v20, %v10894_v21  ;;  %v137_v20 = vld [vmem:[#allocation3] sm:$0xff] }
 0x55b   :  { %16927 = vst [vmem:[#allocation60_spill] sm:$0xff] %v11033_v41  ;;  %v11290_v56 = vpack.c.bf16 %v140_v55, %v137_v20  ;;  %16936 = vst [vmem:[#allocation67_spill] sm:$0xff] %v11298_v4  ;;  %v156_v55 = vld [vmem:[#allocation3 + $0x98] sm:$0xff] }
 0x55c   :  { %1693 = vrot.lane.b32.xlu1 %v1626_v35, %s10271_s5  ;;  %1681 = vrot.lane.b32.xlu0 %v1620_v40, %s10271_s5  ;;  %v1374_v35 = vmul.f32 %v10908_v29, %v10925_v57  ;;  %v1408_v40 = vmul.f32 %v10995_v44, %v10910_v31 }
 0x55d   :  { %16933 = vst [vmem:[#allocation64_spill] sm:$0xff] %v11290_v56 }
 0x55e   :  { %v1612_v43 = vpack.c.bf16 %v1375_v32, %v1374_v35  ;;  %v1629_v16 = vpack.c.bf16 %v1409_v33, %v1408_v40  ;;  %v1393_v32 = vmul.f32 %v10969_v14, %v10932_v24  ;;  %v1392_v33 = vmul.f32 %v10975_v18, %v10925_v57 }
 0x55f   :  { %v1379_v40 = vmul.f32 %v11007_v6, %v10913_v45 }
 0x560   :  { %1679 = vrot.lane.b32.xlu1 %v1619_v27, %s10271_s5  ;;  %1667 = vrot.lane.b32.xlu0 %v1613_v15, %s10271_s5  ;;  %v1406_v27 = vmul.f32 %v10934_v30, %v10890_v17  ;;  %v1394_v15 = vmul.f32 %v11033_v41, %v10890_v17  ;;  %v1621_v35 = vpack.c.bf16 %v1393_v32, %v1392_v33  ;;  %v11086_v32 = vld [vmem:[%s16930_s25 + $0x8] sm:$0xff]  ;;  %v11103_v33 = vld [vmem:[%s16930_s25 + $0x10] sm:$0xff] }
 0x561   :  { %v11283_v41 = vpack.c.bf16 %v141_v61, %v138_v52  ;;  %v11292_v30 = vpack.c.bf16 %v147_v28, %v144_v12  ;;  %v143_v52 = vld [vmem:[#allocation3 + $0x30] sm:$0xff]  ;;  %v146_v61 = vld [vmem:[#allocation3 + $0x48] sm:$0xff]  ;;  %v149_v28 = vld [vmem:[#allocation3 + $0x60] sm:$0xff] }
 0x562   :  { %v1628_v48 = vpack.c.bf16 %v1407_v26, %v1406_v27  ;;  %v1622_v29 = vpack.c.bf16 %v1395_v36, %v1394_v15  ;;  %v1378_v36 = vmul.f32 %v11013_v58, %v10910_v31  ;;  %v11069_v15 = vld [vmem:[%s16930_s25] sm:$0xff] }
 0x563   :  { %16932 = vst [vmem:[#allocation63_spill] sm:$0xff] %v11283_v41  ;;  %16934 = vst [vmem:[#allocation65_spill] sm:$0xff] %v11292_v30  ;;  %v152_v12 = vld [vmem:[#allocation3 + $0x78] sm:$0xff] }
 0x564   :  { %1665 = vrot.lane.b32.xlu1 %v1612_v43, %s10271_s5  ;;  %1699 = vrot.lane.b32.xlu0 %v1629_v16, %s10271_s5  ;;  %v11053_v43 = vpop.permute.xlu1 %1314  ;;  %v11058_v16 = vpop.permute.xlu0 %1312  ;;  %v1614_v26 = vpack.c.bf16 %v1379_v40, %v1378_v36  ;;  %v11124_v40 = vld [vmem:[%s16930_s25 + $0x18] sm:$0xff] }
 0x565   :  { %16928 = vst [vmem:[#allocation61_spill] sm:$0xff] %v11053_v43  ;;  %16929 = vst [vmem:[#allocation62_spill] sm:$0xff] %v11058_v16 }
 0x568   :  { %1697 = vrot.lane.b32.xlu1 %v1628_v48, %s10271_s5  ;;  %1685 = vrot.lane.b32.xlu0 %v1622_v29, %s10271_s5  ;;  %v1411_v48 = vmul.f32 %v11053_v43, %v10932_v24  ;;  %v1410_v29 = vmul.f32 %v11058_v16, %v10925_v57  ;;  %v11146_v16 = vld [vmem:[%s16930_s25 + $0x20] sm:$0xff] }
 0x56a   :  { %v1630_v27 = vpack.c.bf16 %v1411_v48, %v1410_v29  ;;  %v16931_v48 = vmov 0.0  }
 0x56c   :  { %1683 = vrot.lane.b32.xlu1 %v1621_v35, %s10271_s5  ;;  %311 = vrot.lane.b32.xlu0 %v11069_v15, %s10271_s5 }
 0x570   :  { %1669 = vrot.lane.b32.xlu1 %v1614_v26, %s10271_s5  ;;  %293 = vrot.lane.b32.xlu0 %v11069_v15, %s10273_s26 }
 0x574   :  { %1701 = vrot.lane.b32.xlu1 %v1630_v27, %s10271_s5  ;;  %365 = vrot.lane.b32.xlu0 %v11069_v15, %s10275_s27 }
 0x578   :  { %329 = vrot.lane.b32.xlu1 %v11069_v15, %s10272_s17  ;;  %401 = vrot.lane.b32.xlu0 %v11069_v15, %s10276_s0 }
 0x57c   :  { %347 = vrot.lane.b32.xlu1 %v11069_v15, %s10274_s2  ;;  %331 = vrot.lane.b32.xlu0 %v11086_v32, %s10272_s17 }
 0x580   :  { %383 = vrot.lane.b32.xlu1 %v11069_v15, %s10270_s29  ;;  %349 = vrot.lane.b32.xlu0 %v11086_v32, %s10274_s2 }
 0x584   :  { %313 = vrot.lane.b32.xlu1 %v11086_v32, %s10271_s5  ;;  %385 = vrot.lane.b32.xlu0 %v11086_v32, %s10270_s29 }
 0x588   :  { %295 = vrot.lane.b32.xlu1 %v11086_v32, %s10273_s26  ;;  %333 = vrot.lane.b32.xlu0 %v11103_v33, %s10272_s17 }
 0x58c   :  { %367 = vrot.lane.b32.xlu1 %v11086_v32, %s10275_s27  ;;  %297 = vrot.lane.b32.xlu0 %v11103_v33, %s10273_s26 }
 0x590   :  { %315 = vrot.lane.b32.xlu1 %v11103_v33, %s10271_s5  ;;  %369 = vrot.lane.b32.xlu0 %v11103_v33, %s10275_s27 }
 0x594   :  { %403 = vrot.lane.b32.xlu1 %v11086_v32, %s10276_s0  ;;  %317 = vrot.lane.b32.xlu0 %v11124_v40, %s10271_s5 }
 0x598   :  { %351 = vrot.lane.b32.xlu1 %v11103_v33, %s10274_s2  ;;  %405 = vrot.lane.b32.xlu0 %v11103_v33, %s10276_s0 }
 0x59c   :  { %387 = vrot.lane.b32.xlu1 %v11103_v33, %s10270_s29  ;;  %353 = vrot.lane.b32.xlu0 %v11124_v40, %s10274_s2 }
 0x5a0   :  { %335 = vrot.lane.b32.xlu1 %v11124_v40, %s10272_s17  ;;  %389 = vrot.lane.b32.xlu0 %v11124_v40, %s10270_s29 }
 0x5a4   :  { %299 = vrot.lane.b32.xlu1 %v11124_v40, %s10273_s26  ;;  %337 = vrot.lane.b32.xlu0 %v11146_v16, %s10272_s17 }
 0x5a8   :  { %371 = vrot.lane.b32.xlu1 %v11124_v40, %s10275_s27  ;;  %301 = vrot.lane.b32.xlu0 %v11146_v16, %s10273_s26 }
 0x5aa   :  { %v1656_v35 = vpop.permute.xlu0 %1655 }
 0x5ab   :  { %v1713_v43 = vsel %vm454_vm1, %v1656_v35, 0 }
 0x5ac   :  { %319 = vrot.lane.b32.xlu1 %v11146_v16, %s10271_s5  ;;  %373 = vrot.lane.b32.xlu0 %v11146_v16, %s10275_s27 }
 0x5b0   :  { %407 = vrot.lane.b32.xlu1 %v11124_v40, %s10276_s0 }
 0x5b2   :  { %v1688_v36 = vpop.permute.xlu0 %1687 }
 0x5b3   :  { %v1761_v26 = vsel %vm454_vm1, %v1688_v36, 0 }
 0x5b4   :  { %8469 = vmatpush3.bf16.xpose.msra.mxu0 %v1761_v26  ;;  %355 = vrot.lane.b32.xlu1 %v11146_v16, %s10274_s2 }
 0x5b5   :  { %8470 = vmatprep.subr.bf16.mxu0 %v16931_v48 }
 0x5b6   :  { %v1674_v29 = vpop.permute.xlu0 %1673 }
 0x5b8   :  { %391 = vrot.lane.b32.xlu1 %v11146_v16, %s10270_s29 }
 0x5ba   :  { %v1672_v27 = vpop.permute.xlu1 %1671  ;;  %v1660_v36 = vpop.permute.xlu0 %1659 }
 0x5bb   :  { %9782 = vmatprep.subr.msk.bf16.mxu1 %vm454_vm1, %v1672_v27 }
 0x5bc   :  { %7762 = vmatpush3.bf16.xpose.msra.mxu1 %v1713_v43 }
 0x5bd   :  { %9783 = vmatprep.subr.msk.bf16.mxu1 %vm454_vm1, %v1674_v29 }
 0x5be   :  { %v1658_v26 = vpop.permute.xlu1 %1657  ;;  %v1692_v43 = vpop.permute.xlu0 %1691 }
 0x5bf   :  { %v1716_v27 = vsel %vm454_vm1, %v1658_v26, 0 }
 0x5c2   :  { %v1690_v35 = vpop.permute.xlu1 %1689  ;;  %v1678_v18 = vpop.permute.xlu0 %1677 }
 0x5c3   :  { %v1764_v29 = vsel %vm454_vm1, %v1690_v35, 0  ;;  %v1719_v35 = vsel %vm454_vm1, %v1660_v36, 0  ;;  %v11175_v36 = vld [vmem:[%s16930_s25 + $0x28] sm:$0xff] }
 0x5c4   :  { %7764 = vmatpush3.bf16.xpose.msra.mxu1 %v1716_v27  ;;  %8471 = vmatpush3.bf16.xpose.msra.mxu0 %v1764_v29  ;;  %v1767_v27 = vsel %vm454_vm1, %v1692_v43, 0 }
 0x5c5   :  { %8472 = vmatprep.subr.bf16.mxu0 %v16931_v48  ;;  %321 = vrot.lane.b32.xlu0 %v11175_v36, %s10271_s5 }
 0x5c6   :  { %v1676_v14 = vpop.permute.xlu1 %1675  ;;  %v1664_v29 = vpop.permute.xlu0 %1663  ;;  %339 = vrot.lane.b32.xlu1 %v11175_v36, %s10272_s17 }
 0x5c7   :  { %9784 = vmatprep.subr.msk.bf16.mxu1 %vm454_vm1, %v1676_v14 }
 0x5c9   :  { %409 = vrot.lane.b32.xlu0 %v11146_v16, %s10276_s0 }
 0x5ca   :  { %v1662_v26 = vpop.permute.xlu1 %1661  ;;  %303 = vrot.lane.b32.xlu1 %v11175_v36, %s10273_s26 }
 0x5cc   :  { %7766 = vmatpush3.bf16.xpose.msra.mxu1 %v1719_v35  ;;  %8473 = vmatpush3.bf16.xpose.msra.mxu0 %v1767_v27  ;;  %v1696_v27 = vpop.permute.xlu0 %1695 }
 0x5cd   :  { %9785 = vmatprep.subr.msk.bf16.mxu1 %vm454_vm1, %v1678_v18  ;;  %8474 = vmatprep.subr.bf16.mxu0 %v16931_v48  ;;  %v1722_v18 = vsel %vm454_vm1, %v1662_v26, 0  ;;  %v1725_v26 = vsel %vm454_vm1, %v1664_v29, 0 }
 0x5ce   :  { %v1694_v14 = vpop.permute.xlu1 %1693  ;;  %357 = vrot.lane.b32.xlu0 %v11175_v36, %s10274_s2  ;;  %375 = vrot.lane.b32.xlu1 %v11175_v36, %s10275_s27 }
 0x5cf   :  { %v1770_v35 = vsel %vm454_vm1, %v1694_v14, 0  ;;  %v1773_v14 = vsel %vm454_vm1, %v1696_v27, 0 }
 0x5d0   :  { %v1682_v7 = vpop.permute.xlu0 %1681 }
 0x5d2   :  { %v1680_v43 = vpop.permute.xlu1 %1679  ;;  %393 = vrot.lane.b32.xlu0 %v11175_v36, %s10270_s29  ;;  %411 = vrot.lane.b32.xlu1 %v11175_v36, %s10276_s0 }
 0x5d4   :  { %7768 = vmatpush3.bf16.xpose.msra.mxu1 %v1722_v18  ;;  %8475 = vmatpush3.bf16.xpose.msra.mxu0 %v1770_v35  ;;  %v1668_v18 = vpop.permute.xlu0 %1667 }
 0x5d5   :  { %9786 = vmatprep.subr.msk.bf16.mxu1 %vm454_vm1, %v1680_v43  ;;  %8476 = vmatprep.subr.bf16.mxu0 %v16931_v48 }
 0x5d6   :  { %v1666_v19 = vpop.permute.xlu1 %1665 }
 0x5d7   :  { %v1728_v35 = vsel %vm454_vm1, %v1666_v19, 0 }
 0x5da   :  { %v1698_v43 = vpop.permute.xlu1 %1697 }
 0x5db   :  { %v1776_v29 = vsel %vm454_vm1, %v1698_v43, 0 }
 0x5dc   :  { %7770 = vmatpush3.bf16.xpose.msra.mxu1 %v1725_v26  ;;  %8477 = vmatpush3.bf16.xpose.msra.mxu0 %v1773_v14  ;;  %v1731_v26 = vsel %vm454_vm1, %v1668_v18, 0 }
 0x5dd   :  { %9787 = vmatprep.subr.msk.bf16.mxu1 %vm454_vm1, %v1682_v7  ;;  %8478 = vmatprep.subr.bf16.mxu0 %v16931_v48  ;;  %v1700_v7 = vpop.permute.xlu0 %1699 }
 0x5de   :  { %v1684_v60 = vpop.permute.xlu1 %1683  ;;  %v1779_v14 = vsel %vm454_vm1, %v1700_v7, 0 }
 0x5e1   :  { %v1686_v62 = vpop.permute.xlu0 %1685 }
 0x5e2   :  { %v1670_v27 = vpop.permute.xlu1 %1669 }
 0x5e3   :  { %v1734_v43 = vsel %vm454_vm1, %v1670_v27, 0 }
 0x5e4   :  { %7772 = vmatpush3.bf16.xpose.msra.mxu1 %v1728_v35  ;;  %8479 = vmatpush3.bf16.xpose.msra.mxu0 %v1776_v29  ;;  %v1605_v35 = vpack.c.bf16 %v10913_v45, %v10910_v31 }
 0x5e5   :  { %9788 = vmatprep.subr.msk.bf16.mxu1 %vm454_vm1, %v1684_v60  ;;  %8480 = vmatprep.subr.bf16.mxu0 %v16931_v48 }
 0x5e6   :  { %v1702_v19 = vpop.permute.xlu1 %1701 }
 0x5e7   :  { %v1782_v60 = vsel %vm454_vm1, %v1702_v19, 0 }
 0x5ea   :  { %v330_v18 = vpop.permute.xlu1 %329 }
 0x5ec   :  { %7774 = vmatpush3.bf16.xpose.msra.mxu1 %v1731_v26  ;;  %8481 = vmatpush3.bf16.xpose.msra.mxu0 %v1779_v14 }
 0x5ed   :  { %9789 = vmatprep.subr.msk.bf16.mxu1 %vm454_vm1, %v1686_v62  ;;  %8482 = vmatprep.subr.bf16.mxu0 %v16931_v48  ;;  %v1606_v62 = vpack.c.bf16 %v10932_v24, %v10925_v57 }
 0x5ee   :  { %v11233_v7 = vpop.permute.xlu1 %347 }
 0x5f2   :  { %v11237_v26 = vpop.permute.xlu1 %383 }
 0x5f4   :  { %7776 = vmatpush3.bf16.xpose.msra.mxu1 %v1734_v43  ;;  %8483 = vmatpush3.bf16.xpose.msra.mxu0 %v1782_v60 }
 0x5f5   :  { %9038 = vmatprep.subr.bf16.mxu1 %v11283_v41  ;;  %v11296_v41 = vpack.c.bf16 %v146_v61, %v143_v52  ;;  %v159_v52 = vld [vmem:[#allocation3 + $0xb0] sm:$0xff] }
 0x5f6   :  { %v11241_v19 = vpop.permute.xlu1 %313  ;;  %v11310_v22 = vpack.c.bf16 %v159_v52, %v156_v55 }
 0x5f7   :  { %16935 = vst [vmem:[#allocation66_spill] sm:$0xff] %v11296_v41 }
 0x5f8   :  { %16938 = vst [vmem:[#allocation69_spill] sm:$0xff] %v11310_v22 }
 0x5fa   :  { %v11245_v60 = vpop.permute.xlu1 %295 }
 0x5fb   :  { %7778 = vmatmul.mubr.msk.bf16.vlgmr.msra.gmra.mrb[12].mxu1 %vm454_vm1, %v10898_v23  ;;  %8485 = vmatmul.mubr.msk.bf16.vlgmr.msra.gmra.mrb[24].mxu0 %vm454_vm1, %v10898_v23  ;;  %v11229_v23 = vpop.permute.xlu0 %311 }
 0x5fc   :  { %7779 = vmatprep.mubr.msk.bf16.mxu1 %vm454_vm1, %v1605_v35  ;;  %8488 = vmatprep.mubr.msk.bf16.mxu0 %vm10269_vm0, %v16931_v48  ;;  %v434_v13 = vsel %vm433_vm2, %v11229_v23, %v330_v18 }
 0x5fd   :  { %9040 = vmatpush1.bf16.msra.mxu1 %v11290_v56  ;;  %v441_v18 = vsel %vm440_vm4, %v434_v13, %v11233_v7 }
 0x5fe   :  { %9042 = vmatprep.subr.bf16.mxu1 %v11292_v30  ;;  %v11306_v30 = vpack.c.bf16 %v152_v12, %v149_v28  ;;  %v155_v28 = vld [vmem:[#allocation3 + $0x90] sm:$0xff]  ;;  %v158_v12 = vld [vmem:[#allocation3 + $0xa8] sm:$0xff] }
 0x5ff   :  { %v11231_v29 = vpop.permute.xlu0 %293 }
 0x600   :  { %16937 = vst [vmem:[#allocation68_spill] sm:$0xff] %v11306_v30  ;;  %v420_v61 = vsel %vm419_vm3, %v11069_v15, %v11231_v29  ;;  %v11329_v29 = vpack.c.bf16 %v158_v12, %v155_v28 }
 0x601   :  { %9044 = vmatpush1.bf16.msra.mxu1 %v11296_v41  ;;  %v11335_v7 = vsel %vm426_vm5, %v420_v61, %v11229_v23  ;;  %v161_v23 = vld [vmem:[#allocation3 + $0xc0] sm:$0xff]  ;;  %v168_v61 = vld [vmem:[#allocation3 + $0xf8] sm:$0xff] }
 0x602   :  { %9046 = vmatprep.subr.bf16.mxu1 %v11298_v4  ;;  %v162_v4 = vld [vmem:[#allocation3 + $0xc8] sm:$0xff]  ;;  %16939 = vst [vmem:[#allocation70_spill] sm:$0xff] %v11329_v29  ;;  %16941 = vst [vmem:[#allocation72_spill] sm:$0xff] %v11335_v7 }
 0x603   :  { %7780 = vmatmul.mubr.msk.bf16.gmra.mrb[16].mxu1 %vm454_vm1, %v1605_v35  ;;  %8489 = vmatmul.mubr.msk.bf16.gmra.mrb[28].mxu0 %vm454_vm1, %v1605_v35  ;;  %v11235_v27 = vpop.permute.xlu0 %365 }
 0x604   :  { %7781 = vmatprep.mubr.msk.bf16.mxu1 %vm454_vm1, %v1606_v62  ;;  %8492 = vmatprep.mubr.msk.bf16.mxu0 %vm10269_vm0, %v16931_v48  ;;  %v455_v55 = vsel %vm454_vm1, %v11235_v27, %v11237_v26  ;;  %v421_v26 = vsel %vm419_vm3, %v11086_v32, %v11245_v60 }
 0x605   :  { %9048 = vmatpush1.bf16.msra.mxu1 %v11306_v30  ;;  %v11365_v28 = vsel %vm426_vm5, %v421_v26, %v11241_v19 }
 0x606   :  { %9050 = vmatprep.subr.bf16.mxu1 %v11310_v22  ;;  %v165_v22 = vld [vmem:[#allocation3 + $0xe0] sm:$0xff]  ;;  %16945 = vst [vmem:[#allocation76_spill] sm:$0xff] %v11365_v28 }
 0x607   :  { %v11239_v14 = vpop.permute.xlu0 %401  ;;  %v11331_v41 = vpack.c.bf16 %v165_v22, %v162_v4  ;;  %v164_v22 = vld [vmem:[#allocation3 + $0xd8] sm:$0xff] }
 0x608   :  { %v11347_v13 = vsel %vm461_vm7, %v455_v55, %v11239_v14  ;;  %v11361_v60 = vpack.c.bf16 %v164_v22, %v161_v23  ;;  %v174_v23 = vld [vmem:[#allocation3 + $0x128] sm:$0xff] }
 0x609   :  { %16940 = vst [vmem:[#allocation71_spill] sm:$0xff] %v11331_v41  ;;  %9052 = vmatpush1.bf16.msra.mxu1 %v11329_v29  ;;  %16943 = vst [vmem:[#allocation74_spill] sm:$0xff] %v11347_v13 }
 0x60a   :  { %9054 = vmatprep.subr.bf16.mxu1 %v11331_v41  ;;  %16944 = vst [vmem:[#allocation75_spill] sm:$0xff] %v11361_v60 }
 0x60b   :  { %7782 = vmatmul.mubr.msk.bf16.gmra.mrb[20].mxu1 %vm454_vm1, %v1606_v62  ;;  %8493 = vmatmul.mubr.msk.bf16.gmra.mrb[32].mxu0 %vm454_vm1, %v1606_v62  ;;  %v11243_v43 = vpop.permute.xlu0 %331  ;;  %v11249_v62 = vpop.permute.xlu1 %367 }
 0x60c   :  { %v435_v52 = vsel %vm433_vm2, %v11241_v19, %v11243_v43  ;;  %v11343_v43 = vsel %vm447_vm6, %v441_v18, %v11235_v27 }
 0x60d   :  { %16942 = vst [vmem:[#allocation73_spill] sm:$0xff] %v11343_v43  ;;  %9056 = vmatpush1.bf16.msra.mxu1 %v11361_v60 }
 0x60f   :  { %v11247_v35 = vpop.permute.xlu0 %349  ;;  %v11253_v6 = vpop.permute.xlu1 %315 }
 0x610   :  { %v442_v4 = vsel %vm440_vm4, %v435_v52, %v11247_v35  ;;  %v171_v35 = vld [vmem:[#allocation3 + $0x110] sm:$0xff] }
 0x611   :  { %v11371_v18 = vpack.c.bf16 %v171_v35, %v168_v61 }
 0x613   :  { %v11251_v50 = vpop.permute.xlu0 %385  ;;  %v11257_v1 = vpop.permute.xlu1 %403  ;;  %16946 = vst [vmem:[#allocation77_spill] sm:$0xff] %v11371_v18  ;;  %9058 = vmatprep.subr.bf16.mxu1 %v11371_v18  ;;  %v189_v18 = vld [vmem:[#allocation3 + $0x1a0] sm:$0xff] }
 0x614   :  { %v456_v32 = vsel %vm454_vm1, %v11249_v62, %v11251_v50  ;;  %v7593_v50 = vadd.f32 -1.0, %v11335_v7 }
 0x617   :  { %v11255_v58 = vpop.permute.xlu0 %333  ;;  %v11261_v8 = vpop.permute.xlu1 %351 }
 0x618   :  { %v436_v27 = vsel %vm433_vm2, %v11253_v6, %v11255_v58  ;;  %v7595_v58 = vadd.f32 -1.0, %v11347_v13 }
 0x619   :  { %v443_v26 = vsel %vm440_vm4, %v436_v27, %v11261_v8  ;;  %v7596_v8 = vadd.f32 -1.0, %v11365_v28  ;;  %v11410_v27 = vmul.f32 1e+09, %v7593_v50 }
 0x61b   :  { %v11259_v39 = vpop.permute.xlu0 %297  ;;  %v11265_v63 = vpop.permute.xlu1 %387  ;;  %16952 = vst [vmem:[#allocation83_spill] sm:$0xff] %v11410_v27 }
 0x61c   :  { %v422_v55 = vsel %vm419_vm3, %v11103_v33, %v11259_v39  ;;  %v167_v39 = vld [vmem:[#allocation3 + $0xf0] sm:$0xff]  ;;  %v170_v33 = vld [vmem:[#allocation3 + $0x108] sm:$0xff] }
 0x61d   :  { %v11404_v61 = vpack.c.bf16 %v170_v33, %v167_v39  ;;  %v11436_v39 = vmul.f32 1e+09, %v7595_v58  ;;  %v11438_v33 = vmul.f32 1e+09, %v7596_v8 }
 0x61f   :  { %v11263_v10 = vpop.permute.xlu0 %369  ;;  %v11269_v37 = vpop.permute.xlu1 %335  ;;  %16950 = vst [vmem:[#allocation81_spill] sm:$0xff] %v11404_v61  ;;  %9060 = vmatpush1.bf16.msra.mxu1 %v11404_v61  ;;  %16958 = vst [vmem:[#allocation89_spill] sm:$0xff] %v11436_v39 }
 0x620   :  { %v457_v14 = vsel %vm454_vm1, %v11263_v10, %v11265_v63  ;;  %v11376_v63 = vsel %vm447_vm6, %v442_v4, %v11249_v62  ;;  %v7594_v4 = vadd.f32 -1.0, %v11343_v43  ;;  %16959 = vst [vmem:[#allocation90_spill] sm:$0xff] %v11438_v33 }
 0x621   :  { %16947 = vst [vmem:[#allocation78_spill] sm:$0xff] %v11376_v63 }
 0x623   :  { %v11267_v54 = vpop.permute.xlu0 %317  ;;  %v11273_v42 = vpop.permute.xlu1 %299 }
 0x624   :  { %v437_v12 = vsel %vm433_vm2, %v11267_v54, %v11269_v37  ;;  %v11388_v37 = vsel %vm461_vm7, %v456_v32, %v11257_v1  ;;  %v423_v22 = vsel %vm419_vm3, %v11124_v40, %v11273_v42  ;;  %v11408_v32 = vsel %vm426_vm5, %v422_v55, %v11253_v6  ;;  %v173_v55 = vld [vmem:[#allocation3 + $0x120] sm:$0xff] }
 0x625   :  { %16948 = vst [vmem:[#allocation79_spill] sm:$0xff] %v11388_v37  ;;  %16951 = vst [vmem:[#allocation82_spill] sm:$0xff] %v11408_v32  ;;  %v7598_v35 = vadd.f32 -1.0, %v11388_v37  ;;  %v11417_v42 = vsel %vm447_vm6, %v443_v26, %v11263_v10  ;;  %v7597_v40 = vadd.f32 -1.0, %v11376_v63  ;;  %v11433_v10 = vmul.f32 1e+09, %v7594_v4 }
 0x626   :  { %16954 = vst [vmem:[#allocation85_spill] sm:$0xff] %v11417_v42  ;;  %v180_v26 = vld [vmem:[#allocation3 + $0x158] sm:$0xff]  ;;  %v7600_v58 = vadd.f32 -1.0, %v11417_v42 }
 0x627   :  { %v11271_v44 = vpop.permute.xlu0 %405  ;;  %v11277_v11 = vpop.permute.xlu1 %371  ;;  %16957 = vst [vmem:[#allocation88_spill] sm:$0xff] %v11433_v10  ;;  %v11458_v61 = vmul.f32 1e+09, %v7597_v40 }
 0x628   :  { %v11394_v62 = vsel %vm461_vm7, %v457_v14, %v11271_v44  ;;  %v177_v44 = vld [vmem:[#allocation3 + $0x140] sm:$0xff]  ;;  %v11479_v60 = vmul.f32 1e+09, %v7600_v58 }
 0x629   :  { %16949 = vst [vmem:[#allocation80_spill] sm:$0xff] %v11394_v62  ;;  %v11412_v14 = vpack.c.bf16 %v177_v44, %v174_v23  ;;  %v7601_v6 = vadd.f32 -1.0, %v11394_v62  ;;  %16963 = vst [vmem:[#allocation94_spill] sm:$0xff] %v11458_v61 }
 0x62a   :  { %16968 = vst [vmem:[#allocation99_spill] sm:$0xff] %v11479_v60 }
 0x62b   :  { %v11275_v9 = vpop.permute.xlu0 %353  ;;  %v11281_v53 = vpop.permute.xlu1 %319  ;;  %16953 = vst [vmem:[#allocation84_spill] sm:$0xff] %v11412_v14  ;;  %9062 = vmatprep.subr.bf16.mxu1 %v11412_v14 }
 0x62c   :  { %v444_v1 = vsel %vm440_vm4, %v437_v12, %v11275_v9  ;;  %v11427_v12 = vsel %vm426_vm5, %v423_v22, %v11267_v54  ;;  %v7599_v54 = vadd.f32 -1.0, %v11408_v32 }
 0x62d   :  { %16955 = vst [vmem:[#allocation86_spill] sm:$0xff] %v11427_v12  ;;  %v11431_v50 = vsel %vm447_vm6, %v444_v1, %v11277_v11 }
 0x62e   :  { %16956 = vst [vmem:[#allocation87_spill] sm:$0xff] %v11431_v50  ;;  %v11473_v40 = vmul.f32 1e+09, %v7599_v54  ;;  %v11488_v54 = vmul.f32 1e+09, %v7601_v6  ;;  %v188_v6 = vld [vmem:[#allocation3 + $0x198] sm:$0xff] }
 0x62f   :  { %v11279_v2 = vpop.permute.xlu0 %389  ;;  %v11288_v0 = vpop.permute.xlu1 %407 }
 0x630   :  { %v458_v9 = vsel %vm454_vm1, %v11277_v11, %v11279_v2  ;;  %v176_v2 = vld [vmem:[#allocation3 + $0x138] sm:$0xff]  ;;  %v183_v11 = vld [vmem:[#allocation3 + $0x170] sm:$0xff]  ;;  %16966 = vst [vmem:[#allocation97_spill] sm:$0xff] %v11473_v40  ;;  %16971 = vst [vmem:[#allocation102_spill] sm:$0xff] %v11488_v54 }
 0x631   :  { %v11443_v22 = vpack.c.bf16 %v176_v2, %v173_v55  ;;  %v11447_v4 = vsel %vm461_vm7, %v458_v9, %v11288_v0  ;;  %v11453_v8 = vpack.c.bf16 %v183_v11, %v180_v26  ;;  %v7602_v55 = vadd.f32 -1.0, %v11427_v12  ;;  %v186_v9 = vld [vmem:[#allocation3 + $0x188] sm:$0xff] }
 0x632   :  { %16961 = vst [vmem:[#allocation92_spill] sm:$0xff] %v11447_v4  ;;  %v7603_v2 = vadd.f32 -1.0, %v11431_v50  ;;  %v11463_v0 = vmul.f32 1e+09, %v7598_v35  ;;  %v11467_v26 = vadd.f32 -1.0, %v11447_v4  ;;  %v190_v35 = vld [vmem:[#allocation3 + $0x1a8] sm:$0xff]  ;;  %v11481_v41 = vpack.c.bf16 %v189_v18, %v186_v9 }
 0x633   :  { %v11286_v5 = vpop.permute.xlu0 %337  ;;  %v11302_v20 = vpop.permute.xlu1 %355  ;;  %16960 = vst [vmem:[#allocation91_spill] sm:$0xff] %v11443_v22  ;;  %16962 = vst [vmem:[#allocation93_spill] sm:$0xff] %v11453_v8  ;;  %9064 = vmatpush1.bf16.msra.mxu1 %v11443_v22  ;;  %v187_v22 = vld [vmem:[#allocation3 + $0x190] sm:$0xff] }
 0x634   :  { %v438_v14 = vsel %vm433_vm2, %v11281_v53, %v11286_v5  ;;  %16964 = vst [vmem:[#allocation95_spill] sm:$0xff] %v11463_v0  ;;  %9066 = vmatprep.subr.bf16.mxu1 %v11453_v8  ;;  %16969 = vst [vmem:[#allocation100_spill] sm:$0xff] %v11481_v41  ;;  %v11483_v29 = vpack.c.bf16 %v190_v35, %v187_v22  ;;  %v11494_v56 = vmul.f32 1e+09, %v7603_v2  ;;  %v139_v22 = vld [vmem:[#allocation3 + $0x10] sm:$0xff] }
 0x635   :  { %v445_v8 = vsel %vm440_vm4, %v438_v14, %v11302_v20 }
 0x636   :  { %16970 = vst [vmem:[#allocation101_spill] sm:$0xff] %v11483_v29  ;;  %16973 = vst [vmem:[#allocation104_spill] sm:$0xff] %v11494_v56  ;;  %9134 = vmatprep.subr.bf16.mxu0 %v11483_v29 }
 0x637   :  { %v11300_v3 = vpop.permute.xlu0 %301  ;;  %v11327_v15 = vpop.permute.xlu1 %391 }
 0x638   :  { %v424_v1 = vsel %vm419_vm3, %v11146_v16, %v11300_v3  ;;  %v179_v3 = vld [vmem:[#allocation3 + $0x150] sm:$0xff]  ;;  %v182_v16 = vld [vmem:[#allocation3 + $0x168] sm:$0xff] }
 0x639   :  { %v11471_v5 = vsel %vm426_vm5, %v424_v1, %v11281_v53  ;;  %v11475_v11 = vpack.c.bf16 %v182_v16, %v179_v3  ;;  %v11490_v1 = vmul.f32 1e+09, %v7602_v55 }
 0x63a   :  { %16965 = vst [vmem:[#allocation96_spill] sm:$0xff] %v11471_v5  ;;  %v11498_v14 = vadd.f32 -1.0, %v11471_v5 }
 0x63b   :  { %v11325_v30 = vpop.permute.xlu0 %373  ;;  %v11383_v52 = vpop.permute.xlu1 %339  ;;  %16967 = vst [vmem:[#allocation98_spill] sm:$0xff] %v11475_v11  ;;  %16972 = vst [vmem:[#allocation103_spill] sm:$0xff] %v11490_v1  ;;  %9068 = vmatpush1.bf16.msra.mxu1 %v11475_v11 }
 0x63c   :  { %v459_v53 = vsel %vm454_vm1, %v11325_v30, %v11327_v15  ;;  %9070 = vmatprep.subr.bf16.mxu1 %v11481_v41  ;;  %v185_v15 = vld [vmem:[#allocation3 + $0x180] sm:$0xff]  ;;  %v11504_v58 = vsel %vm447_vm6, %v445_v8, %v11325_v30  ;;  %v11514_v30 = vpack.c.bf16 %v142_v59, %v139_v22  ;;  %v195_v8 = vld [vmem:[#allocation3 + $0x1d0] sm:$0xff] }
 0x63d   :  { %16974 = vst [vmem:[#allocation105_spill] sm:$0xff] %v11504_v58  ;;  %v11506_v11 = vpack.c.bf16 %v188_v6, %v185_v15  ;;  %v145_v22 = vld [vmem:[#allocation3 + $0x40] sm:$0xff] }
 0x63e   :  { %16977 = vst [vmem:[#allocation108_spill] sm:$0xff] %v11514_v30  ;;  %9136 = vmatpush3.bf16.msra.mxu0 %v11514_v30  ;;  %v208_v30 = vld [vmem:[#allocation3 + $0x238] sm:$0xff] }
 0x63f   :  { %v11381_v19 = vpop.permute.xlu0 %321  ;;  %v11440_v44 = vpop.permute.xlu1 %303  ;;  %16975 = vst [vmem:[#allocation106_spill] sm:$0xff] %v11506_v11  ;;  %9072 = vmatpush1.bf16.msra.mxu1 %v11506_v11 }
 0x640   :  { %v439_v29 = vsel %vm433_vm2, %v11381_v19, %v11383_v52  ;;  %v425_v25 = vsel %vm419_vm3, %v11175_v36, %v11440_v44 }
 0x643   :  { %v410_v23 = vpop.permute.xlu0 %409  ;;  %v11492_v16 = vpop.permute.xlu1 %375 }
 0x644   :  { %v11512_v38 = vsel %vm461_vm7, %v459_v53, %v410_v23  ;;  %v11527_v23 = vpack.c.bf16 %v195_v8, %v192_v51  ;;  %v198_v51 = vld [vmem:[#allocation3 + $0x1e8] sm:$0xff]  ;;  %v201_v8 = vld [vmem:[#allocation3 + $0x200] sm:$0xff] }
 0x645   :  { %16976 = vst [vmem:[#allocation107_spill] sm:$0xff] %v11512_v38 }
 0x646   :  { %16978 = vst [vmem:[#allocation109_spill] sm:$0xff] %v11527_v23  ;;  %9074 = vmatprep.subr.bf16.mxu1 %v11527_v23 }
 0x647   :  { %v358_v3 = vpop.permute.xlu0 %357 }
 0x64b   :  { %v394_v44 = vpop.permute.xlu0 %393 }
 0x6ce   :  { %v1818_v20 = vpop.f32.mrb[12].mxu1  ;;  %v1881_v18 = vpop.f32.mrb[24].mxu0 }
 0x6cf   :  { %v1904_v55 = vmul.f32 0.5, %v1818_v20  ;;  %v1906_v2 = vmul.f32 0.5, %v1881_v18  ;;  %v1820_v9 = vpop.f32.mrb[13].mxu1  ;;  %v8486_v35 = vpop.f32.mrb[25].mxu0  ;;  %v193_v20 = vld [vmem:[#allocation3 + $0x1c0] sm:$0xff]  ;;  %v196_v18 = vld [vmem:[#allocation3 + $0x1d8] sm:$0xff] }
 0x6d0   :  { %v1905_v49 = vmul.f32 0.5, %v1820_v9  ;;  %v1822_v46 = vpop.f32.mrb[14].mxu1  ;;  %v1884_v41 = vpop.f32.mrb[26].mxu0  ;;  %v11529_v53 = vpack.c.bf16 %v196_v18, %v193_v20 }
 0x6d1   :  { %v11517_v15 = vadd.f32 %v1904_v55, %v11410_v27  ;;  %v1907_v6 = vmul.f32 0.5, %v1822_v46  ;;  %v1909_v35 = vmul.f32 0.5, %v1884_v41  ;;  %v1824_v9 = vpop.f32.mrb[15].mxu1  ;;  %v8487_v47 = vpop.f32.mrb[27].mxu0  ;;  %v191_v46 = vld [vmem:[#allocation3 + $0x1b0] sm:$0xff]  ;;  %v194_v41 = vld [vmem:[#allocation3 + $0x1c8] sm:$0xff] }
 0x6d2   :  { %v11524_v52 = vadd.f32 %v1905_v49, %v11433_v10  ;;  %v1908_v59 = vmul.f32 0.5, %v1824_v9  ;;  %16979 = vst [vmem:[#allocation110_spill] sm:$0xff] %v11529_v53  ;;  %v11532_v47 = vadd.f32 %v1906_v2, %v11436_v39  ;;  %v11538_v49 = vadd.f32 -1.0, %v11504_v58  ;;  %v148_v9 = vld [vmem:[#allocation3 + $0x58] sm:$0xff]  ;;  %9138 = vmatprep.subr.bf16.mxu0 %v11529_v53  ;;  %v412_v10 = vpop.permute.xlu1 %411 }
 0x6d3   :  { %v11535_v36 = vadd.f32 %v1907_v6, %v11438_v33  ;;  %v11540_v55 = vpack.c.bf16 %v194_v41, %v191_v46  ;;  %v11548_v2 = vadd.f32 -1.0, %v11512_v38  ;;  %v11552_v6 = vpack.c.bf16 %v148_v9, %v145_v22  ;;  %v199_v46 = vld [vmem:[#allocation3 + $0x1f0] sm:$0xff]  ;;  %v202_v41 = vld [vmem:[#allocation3 + $0x208] sm:$0xff] }
 0x6d4   :  { %v1940_v20 = vmax.f32 %v11517_v15, %v11524_v52  ;;  %v11545_v18 = vadd.f32 %v1908_v59, %v11458_v61  ;;  %v11556_v39 = vsel %vm426_vm5, %v425_v25, %v11381_v19  ;;  %v446_v33 = vsel %vm440_vm4, %v439_v29, %v358_v3  ;;  %v197_v19 = vld [vmem:[#allocation3 + $0x1e0] sm:$0xff]  ;;  %v200_v3 = vld [vmem:[#allocation3 + $0x1f8] sm:$0xff] }
 0x6d5   :  { %16980 = vst [vmem:[#allocation111_spill] sm:$0xff] %v11540_v55  ;;  %16981 = vst [vmem:[#allocation112_spill] sm:$0xff] %v11552_v6  ;;  %9076 = vmatpush1.bf16.msra.mxu1 %v11540_v55  ;;  %v11560_v59 = vpack.c.bf16 %v201_v8, %v198_v51  ;;  %v11562_v61 = vpack.c.bf16 %v202_v41, %v199_v46  ;;  %v11565_v27 = vadd.f32 %v1909_v35, %v11463_v0  ;;  %v151_v51 = vld [vmem:[#allocation3 + $0x70] sm:$0xff]  ;;  %v154_v55 = vld [vmem:[#allocation3 + $0x88] sm:$0xff] }
 0x6d6   :  { %16982 = vst [vmem:[#allocation113_spill] sm:$0xff] %v11556_v39  ;;  %v1944_v22 = vmax.f32 %v11535_v36, %v11545_v18  ;;  %v1828_v9 = vpop.f32.mrb[16].mxu1  ;;  %v1889_v23 = vpop.f32.mrb[28].mxu0  ;;  %v1941_v25 = vmax.f32 %v1940_v20, %v11532_v47  ;;  %v460_v29 = vsel %vm454_vm1, %v11492_v16, %v394_v44  ;;  %9140 = vmatpush3.bf16.msra.mxu0 %v11552_v6  ;;  %v204_v20 = vld [vmem:[#allocation3 + $0x218] sm:$0xff] }
 0x6d7   :  { %16983 = vst [vmem:[#allocation114_spill] sm:$0xff] %v11560_v59  ;;  %16984 = vst [vmem:[#allocation115_spill] sm:$0xff] %v11562_v61  ;;  %v1910_v8 = vmul.f32 0.5, %v1828_v9  ;;  %v1912_v46 = vmul.f32 0.5, %v1889_v23  ;;  %v1830_v41 = vpop.f32.mrb[17].mxu1  ;;  %v8490_v35 = vpop.f32.mrb[29].mxu0  ;;  %9078 = vmatprep.subr.bf16.mxu1 %v11560_v59  ;;  %9142 = vmatprep.subr.bf16.mxu0 %v11562_v61  ;;  %v11575_v0 = vpack.c.bf16 %v200_v3, %v197_v19 }
 0x6d8   :  { %v1911_v11 = vmul.f32 0.5, %v1830_v41  ;;  %v1832_v53 = vpop.f32.mrb[18].mxu1  ;;  %v1892_v44 = vpop.f32.mrb[30].mxu0  ;;  %1942 = vmax.xlane.f32.xlu0 %v1941_v25  ;;  %v11579_v6 = vsel %vm447_vm6, %v446_v33, %v11492_v16  ;;  %v1945_v23 = vmax.f32 %v1944_v22, %v11565_v27  ;;  %v11582_v9 = vpack.c.bf16 %v154_v55, %v151_v51  ;;  %v207_v35 = vld [vmem:[#allocation3 + $0x230] sm:$0xff]  ;;  %v205_v59 = vld [vmem:[#allocation3 + $0x220] sm:$0xff]  ;;  %v206_v16 = vld [vmem:[#allocation3 + $0x228] sm:$0xff] }
 0x6d9   :  { %16985 = vst [vmem:[#allocation116_spill] sm:$0xff] %v11575_v0  ;;  %16986 = vst [vmem:[#allocation117_spill] sm:$0xff] %v11579_v6  ;;  %v11585_v19 = vadd.f32 %v1910_v8, %v11473_v40  ;;  %v1913_v3 = vmul.f32 0.5, %v1832_v53  ;;  %v1834_v61 = vpop.f32.mrb[19].mxu1  ;;  %v8491_v41 = vpop.f32.mrb[31].mxu0  ;;  %v11588_v34 = vsel %vm461_vm7, %v460_v29, %v412_v10  ;;  %v7608_v25 = vadd.f32 -1.0, %v11556_v39  ;;  %9080 = vmatpush1.bf16.msra.mxu1 %v11575_v0 }
 0x6da   :  { %16987 = vst [vmem:[#allocation118_spill] sm:$0xff] %v11582_v9  ;;  %16988 = vst [vmem:[#allocation119_spill] sm:$0xff] %v11588_v34  ;;  %v203_v33 = vld [vmem:[#allocation3 + $0x210] sm:$0xff]  ;;  %v11593_v55 = vadd.f32 %v1911_v11, %v11479_v60  ;;  %v1914_v22 = vmul.f32 0.5, %v1834_v61  ;;  %1946 = vmax.xlane.f32.xlu1 %v1945_v23  ;;  %9144 = vmatpush3.bf16.msra.mxu0 %v11582_v9  ;;  %v11596_v51 = vpack.c.bf16 %v207_v35, %v204_v20  ;;  %v157_v8 = vld [vmem:[#allocation3 + $0xa0] sm:$0xff] }
 0x6db   :  { %v11598_v53 = vpack.c.bf16 %v208_v30, %v205_v59  ;;  %v160_v10 = vld [vmem:[#allocation3 + $0xb8] sm:$0xff]  ;;  %v11601_v29 = vadd.f32 %v1913_v3, %v11490_v1  ;;  %v7609_v41 = vadd.f32 -1.0, %v11579_v6  ;;  %v11604_v40 = vpack.c.bf16 %v206_v16, %v203_v33 }
 0x6dc   :  { %16989 = vst [vmem:[#allocation120_spill] sm:$0xff] %v11596_v51  ;;  %v11606_v0 = vpack.c.bf16 %v160_v10, %v157_v8  ;;  %v11609_v61 = vadd.f32 %v1912_v46, %v11488_v54  ;;  %v1948_v11 = vmax.f32 %v11585_v19, %v11593_v55  ;;  %v1915_v20 = vmul.f32 0.5, %v1892_v44  ;;  %9082 = vmatprep.subr.bf16.mxu1 %v11596_v51 }
 0x6dd   :  { %16990 = vst [vmem:[#allocation121_spill] sm:$0xff] %v11598_v53  ;;  %16991 = vst [vmem:[#allocation122_spill] sm:$0xff] %v11604_v40  ;;  %v11614_v30 = vadd.f32 %v1914_v22, %v11494_v56  ;;  %9146 = vmatprep.subr.bf16.mxu0 %v11598_v53  ;;  %v11619_v59 = vmul.f32 1e+09, %v11467_v26  ;;  %v7610_v23 = vadd.f32 -1.0, %v11588_v34  ;;  %9084 = vmatpush1.bf16.msra.mxu1 %v11604_v40 }
 0x6de   :  { %16992 = vst [vmem:[#allocation123_spill] sm:$0xff] %v11606_v0  ;;  %v11623_v35 = vmul.f32 1e+09, %v11498_v14  ;;  %v1838_v44 = vpop.f32.mrb[20].mxu1  ;;  %v11629_v3 = vmul.f32 1e+09, %v11548_v2  ;;  %v1949_v26 = vmax.f32 %v1948_v11, %v11609_v61  ;;  %9148 = vmatpush3.bf16.msra.mxu0 %v11606_v0 }
 0x6df   :  { %16993 = vst [vmem:[#allocation124_spill] sm:$0xff] %v11619_v59  ;;  %v1952_v46 = vmax.f32 %v11601_v29, %v11614_v30  ;;  %v1897_v33 = vpop.f32.mrb[32].mxu0  ;;  %v11632_v16 = vmul.f32 1e+09, %v11538_v49  ;;  %v1916_v22 = vmul.f32 0.5, %v1838_v44  ;;  %v1840_v14 = vpop.f32.mrb[21].mxu1  ;;  %v11639_v56 = vadd.f32 %v1915_v20, %v11619_v59 }
 0x6e0   :  { %16994 = vst [vmem:[#allocation125_spill] sm:$0xff] %v11623_v35  ;;  %16995 = vst [vmem:[#allocation126_spill] sm:$0xff] %v11629_v3  ;;  %v8494_v8 = vpop.f32.mrb[33].mxu0  ;;  %v11636_v10 = vmul.f32 1e+09, %v7608_v25  ;;  %v1918_v54 = vmul.f32 0.5, %v1897_v33  ;;  %1950 = vmax.xlane.f32.xlu0 %v1949_v26 }
 0x6e1   :  { %16996 = vst [vmem:[#allocation127_spill] sm:$0xff] %v11632_v16  ;;  %v1917_v1 = vmul.f32 0.5, %v1840_v14  ;;  %v1842_v2 = vpop.f32.mrb[22].mxu1  ;;  %v1900_v60 = vpop.f32.mrb[34].mxu0  ;;  %v11641_v40 = vmul.f32 1e+09, %v7609_v41  ;;  %v11644_v49 = vadd.f32 %v1916_v22, %v11623_v35  ;;  %v1953_v33 = vmax.f32 %v1952_v46, %v11639_v56 }
 0x6e2   :  { %16997 = vst [vmem:[#allocation128_spill] sm:$0xff] %v11636_v10  ;;  %v1919_v11 = vmul.f32 0.5, %v1842_v2  ;;  %v11646_v51 = vmul.f32 1e+09, %v7610_v23  ;;  %v1844_v44 = vpop.f32.mrb[23].mxu1  ;;  %v8495_v8 = vpop.f32.mrb[35].mxu0  ;;  %v11656_v41 = vadd.f32 %v1918_v54, %v11629_v3 }
 0x6e3   :  { %16998 = vst [vmem:[#allocation129_spill] sm:$0xff] %v11641_v40  ;;  %v11649_v25 = vadd.f32 %v1917_v1, %v11632_v16  ;;  %v1921_v20 = vmul.f32 0.5, %v1900_v60  ;;  %v1920_v59 = vmul.f32 0.5, %v1844_v44  ;;  %v210_v54 = vld [vmem:[#allocation3 + $0x248] sm:$0xff]  ;;  %v213_v2 = vld [vmem:[#allocation3 + $0x260] sm:$0xff] }
 0x6e4   :  { %16999 = vst [vmem:[#allocation130_spill] sm:$0xff] %v11646_v51  ;;  %v11653_v14 = vadd.f32 %v1919_v11, %v11636_v10  ;;  %1954 = vmax.xlane.f32.xlu0 %v1953_v33  ;;  %v211_v11 = vld [vmem:[#allocation3 + $0x250] sm:$0xff]  ;;  %v11670_v44 = vpack.c.bf16 %v213_v2, %v210_v54  ;;  %v209_v8 = vld [vmem:[#allocation3 + $0x240] sm:$0xff]  ;;  %v212_v33 = vld [vmem:[#allocation3 + $0x258] sm:$0xff] }
 0x6e5   :  { %v1956_v26 = vmax.f32 %v11644_v49, %v11649_v25  ;;  %v11661_v23 = vadd.f32 %v1920_v59, %v11641_v40  ;;  %v11664_v1 = vadd.f32 %v1921_v20, %v11646_v51  ;;  %v214_v59 = vld [vmem:[#allocation3 + $0x268] sm:$0xff]  ;;  %v11674_v20 = vpack.c.bf16 %v212_v33, %v209_v8  ;;  %v163_v51 = vld [vmem:[#allocation3 + $0xd0] sm:$0xff]  ;;  %v220_v2 = vld [vmem:[#allocation3 + $0x298] sm:$0xff] }
 0x6e6   :  { %17000 = vst [vmem:[#allocation131_spill] sm:$0xff] %v11670_v44  ;;  %v11672_v40 = vpack.c.bf16 %v214_v59, %v211_v11  ;;  %v166_v3 = vld [vmem:[#allocation3 + $0xe8] sm:$0xff]  ;;  %9086 = vmatprep.subr.bf16.mxu1 %v11670_v44  ;;  %v215_v11 = vld [vmem:[#allocation3 + $0x270] sm:$0xff] }
 0x6e7   :  { %v1960_v60 = vmax.f32 %v11653_v14, %v11661_v23  ;;  %v1957_v46 = vmax.f32 %v1956_v26, %v11656_v41  ;;  %17002 = vst [vmem:[#allocation133_spill] sm:$0xff] %v11674_v20  ;;  %v11677_v26 = vpack.c.bf16 %v166_v3, %v163_v51  ;;  %9088 = vmatpush1.bf16.msra.mxu1 %v11674_v20  ;;  %v218_v59 = vld [vmem:[#allocation3 + $0x288] sm:$0xff]  ;;  %v169_v51 = vld [vmem:[#allocation3 + $0x100] sm:$0xff]  ;;  %v172_v3 = vld [vmem:[#allocation3 + $0x118] sm:$0xff] }
 0x6e8   :  { %17001 = vst [vmem:[#allocation132_spill] sm:$0xff] %v11672_v40  ;;  %9150 = vmatprep.subr.bf16.mxu0 %v11672_v40  ;;  %v11686_v33 = vpack.c.bf16 %v218_v59, %v215_v11  ;;  %v11689_v10 = vpack.c.bf16 %v172_v3, %v169_v51  ;;  %v222_v16 = vld [vmem:[#allocation3 + $0x2a8] sm:$0xff]  ;;  %v224_v11 = vld [vmem:[#allocation3 + $0x2b8] sm:$0xff]  ;;  %v175_v51 = vld [vmem:[#allocation3 + $0x130] sm:$0xff] }
 0x6e9   :  { %1958 = vmax.xlane.f32.xlu0 %v1957_v46  ;;  %v1961_v22 = vmax.f32 %v1960_v60, %v11664_v1  ;;  %17003 = vst [vmem:[#allocation134_spill] sm:$0xff] %v11677_v26  ;;  %v216_v60 = vld [vmem:[#allocation3 + $0x278] sm:$0xff]  ;;  %v219_v46 = vld [vmem:[#allocation3 + $0x290] sm:$0xff]  ;;  %9152 = vmatpush3.bf16.msra.mxu0 %v11677_v26  ;;  %v178_v3 = vld [vmem:[#allocation3 + $0x148] sm:$0xff] }
 0x6ea   :  { %v11682_v54 = vpack.c.bf16 %v219_v46, %v216_v60  ;;  %17006 = vst [vmem:[#allocation137_spill] sm:$0xff] %v11686_v33  ;;  %17007 = vst [vmem:[#allocation138_spill] sm:$0xff] %v11689_v10  ;;  %v225_v60 = vld [vmem:[#allocation3 + $0x2c0] sm:$0xff]  ;;  %v223_v46 = vld [vmem:[#allocation3 + $0x2b0] sm:$0xff] }
 0x6eb   :  { %1962 = vmax.xlane.f32.xlu1 %v1961_v22  ;;  %v217_v22 = vld [vmem:[#allocation3 + $0x280] sm:$0xff]  ;;  %v11694_v35 = vpack.c.bf16 %v225_v60, %v222_v16  ;;  %v231_v16 = vld [vmem:[#allocation3 + $0x2f0] sm:$0xff] }
 0x6ec   :  { %17004 = vst [vmem:[#allocation135_spill] sm:$0xff] %v11682_v54  ;;  %v11684_v8 = vpack.c.bf16 %v220_v2, %v217_v22  ;;  %9090 = vmatprep.subr.bf16.mxu1 %v11682_v54  ;;  %v226_v22 = vld [vmem:[#allocation3 + $0x2c8] sm:$0xff]  ;;  %v221_v2 = vld [vmem:[#allocation3 + $0x2a0] sm:$0xff]  ;;  %v11701_v54 = vpack.c.bf16 %v178_v3, %v175_v51  ;;  %v184_v3 = vld [vmem:[#allocation3 + $0x178] sm:$0xff] }
 0x6ed   :  { %9092 = vmatpush1.bf16.msra.mxu1 %v11686_v33  ;;  %17008 = vst [vmem:[#allocation139_spill] sm:$0xff] %v11694_v35  ;;  %v11696_v59 = vpack.c.bf16 %v226_v22, %v223_v46  ;;  %v11698_v20 = vpack.c.bf16 %v224_v11, %v221_v2  ;;  %v228_v33 = vld [vmem:[#allocation3 + $0x2d8] sm:$0xff]  ;;  %v229_v60 = vld [vmem:[#allocation3 + $0x2e0] sm:$0xff]  ;;  %v227_v22 = vld [vmem:[#allocation3 + $0x2d0] sm:$0xff] }
 0x6ee   :  { %17005 = vst [vmem:[#allocation136_spill] sm:$0xff] %v11684_v8  ;;  %9154 = vmatprep.subr.bf16.mxu0 %v11684_v8  ;;  %9094 = vmatprep.subr.bf16.mxu1 %v11694_v35  ;;  %17011 = vst [vmem:[#allocation142_spill] sm:$0xff] %v11701_v54  ;;  %v11706_v44 = vpack.c.bf16 %v231_v16, %v228_v33  ;;  %v232_v46 = vld [vmem:[#allocation3 + $0x2f8] sm:$0xff]  ;;  %v230_v2 = vld [vmem:[#allocation3 + $0x2e8] sm:$0xff] }
 0x6ef   :  { %9156 = vmatpush3.bf16.msra.mxu0 %v11689_v10  ;;  %17009 = vst [vmem:[#allocation140_spill] sm:$0xff] %v11696_v59  ;;  %17010 = vst [vmem:[#allocation141_spill] sm:$0xff] %v11698_v20  ;;  %v11708_v11 = vpack.c.bf16 %v232_v46, %v229_v60  ;;  %v11710_v10 = vpack.c.bf16 %v230_v2, %v227_v22  ;;  %v181_v51 = vld [vmem:[#allocation3 + $0x160] sm:$0xff]  ;;  %v234_v33 = vld [vmem:[#allocation3 + $0x308] sm:$0xff] }
 0x6f0   :  { %9158 = vmatprep.subr.bf16.mxu0 %v11696_v59  ;;  %17012 = vst [vmem:[#allocation143_spill] sm:$0xff] %v11706_v44  ;;  %v11713_v35 = vpack.c.bf16 %v184_v3, %v181_v51  ;;  %v237_v16 = vld [vmem:[#allocation3 + $0x320] sm:$0xff]  ;;  %v235_v60 = vld [vmem:[#allocation3 + $0x310] sm:$0xff]  ;;  %v238_v22 = vld [vmem:[#allocation3 + $0x328] sm:$0xff] }
 0x6f1   :  { %9096 = vmatpush1.bf16.msra.mxu1 %v11698_v20  ;;  %17013 = vst [vmem:[#allocation144_spill] sm:$0xff] %v11708_v11  ;;  %17014 = vst [vmem:[#allocation145_spill] sm:$0xff] %v11710_v10  ;;  %v10169_v20 = vld [vmem:[%s16875_s28 + $0x88] sm:$0xff]  ;;  %v11722_v46 = vpack.c.bf16 %v237_v16, %v234_v33  ;;  %v11724_v2 = vpack.c.bf16 %v238_v22, %v235_v60  ;;  %v10170_v51 = vld [vmem:[%s16875_s28 + $0x80] sm:$0xff] }
 0x6f2   :  { %9098 = vmatprep.subr.bf16.mxu1 %v11706_v44  ;;  %17015 = vst [vmem:[#allocation146_spill] sm:$0xff] %v11713_v35  ;;  %v10172_v3 = vld [vmem:[%s16875_s28 + $0x90] sm:$0xff]  ;;  %v10173_v33 = vld [vmem:[%s16875_s28 + $0x8] sm:$0xff]  ;;  %v10174_v16 = vld [vmem:[%s16875_s28 + $0x100] sm:$0xff] }
 0x6f3   :  { %9160 = vmatpush3.bf16.msra.mxu0 %v11701_v54  ;;  %17016 = vst [vmem:[#allocation147_spill] sm:$0xff] %v11722_v46  ;;  %17017 = vst [vmem:[#allocation148_spill] sm:$0xff] %v11724_v2  ;;  %v10175_v60 = vld [vmem:[%s16875_s28 + $0x98] sm:$0xff]  ;;  %v10176_v22 = vld [vmem:[%s16875_s28 + $0x10] sm:$0xff] }
 0x6f4   :  { %9162 = vmatprep.subr.bf16.mxu0 %v11708_v11  ;;  %v240_v11 = vld [vmem:[#allocation3 + $0x338] sm:$0xff]  ;;  %v239_v40 = vld [vmem:[#allocation3 + $0x330] sm:$0xff] }
 0x6f5   :  { %9100 = vmatpush1.bf16.msra.mxu1 %v11710_v10  ;;  %v244_v54 = vld [vmem:[#allocation3 + $0x358] sm:$0xff] }
 0x6f6   :  { %9102 = vmatprep.subr.bf16.mxu1 %v11722_v46 }
 0x6f7   :  { %9164 = vmatpush3.bf16.msra.mxu0 %v11713_v35 }
 0x6f8   :  { %9166 = vmatprep.subr.bf16.mxu0 %v11724_v2 }
 0x6fc   :  { %1446 = vrot.lane.b32.xlu1 %v10169_v20, %s10274_s2  ;;  %v10171_v20 = vld [vmem:[%s16875_s28] sm:$0xff] }
 0x6ff   :  { %1444 = vrot.lane.b32.xlu0 %v10170_v51, %s10274_s2  ;;  %v10177_v51 = vld [vmem:[%s16875_s28 + $0x108] sm:$0xff] }
 0x700   :  { %1412 = vrot.lane.b32.xlu1 %v10171_v20, %s10274_s2  ;;  %v10178_v20 = vld [vmem:[%s16875_s28 + $0xa0] sm:$0xff] }
 0x703   :  { %1448 = vrot.lane.b32.xlu0 %v10172_v3, %s10274_s2  ;;  %v10179_v3 = vld [vmem:[%s16875_s28 + $0x18] sm:$0xff] }
 0x704   :  { %1414 = vrot.lane.b32.xlu1 %v10173_v33, %s10274_s2  ;;  %v10180_v33 = vld [vmem:[%s16875_s28 + $0x110] sm:$0xff] }
 0x707   :  { %1476 = vrot.lane.b32.xlu0 %v10174_v16, %s10274_s2  ;;  %v10181_v16 = vld [vmem:[%s16875_s28 + $0xa8] sm:$0xff] }
 0x708   :  { %1450 = vrot.lane.b32.xlu1 %v10175_v60, %s10274_s2  ;;  %v10182_v60 = vld [vmem:[%s16875_s28 + $0x20] sm:$0xff] }
 0x70b   :  { %1416 = vrot.lane.b32.xlu0 %v10176_v22, %s10274_s2  ;;  %v10183_v22 = vld [vmem:[%s16875_s28 + $0x118] sm:$0xff] }
 0x70c   :  { %1478 = vrot.lane.b32.xlu1 %v10177_v51, %s10274_s2  ;;  %v10184_v51 = vld [vmem:[%s16875_s28 + $0xb0] sm:$0xff] }
 0x70f   :  { %1452 = vrot.lane.b32.xlu0 %v10178_v20, %s10274_s2  ;;  %v10185_v20 = vld [vmem:[%s16875_s28 + $0x28] sm:$0xff] }
 0x710   :  { %1418 = vrot.lane.b32.xlu1 %v10179_v3, %s10274_s2  ;;  %v10186_v3 = vld [vmem:[%s16875_s28 + $0x120] sm:$0xff] }
 0x713   :  { %1480 = vrot.lane.b32.xlu0 %v10180_v33, %s10274_s2  ;;  %v10187_v33 = vld [vmem:[%s16875_s28 + $0xb8] sm:$0xff] }
 0x714   :  { %1454 = vrot.lane.b32.xlu1 %v10181_v16, %s10274_s2  ;;  %v10188_v16 = vld [vmem:[%s16875_s28 + $0x30] sm:$0xff] }
 0x717   :  { %1420 = vrot.lane.b32.xlu0 %v10182_v60, %s10274_s2  ;;  %v10189_v60 = vld [vmem:[%s16875_s28 + $0x128] sm:$0xff] }
 0x718   :  { %1482 = vrot.lane.b32.xlu1 %v10183_v22, %s10274_s2  ;;  %v10190_v22 = vld [vmem:[%s16875_s28 + $0xc0] sm:$0xff] }
 0x71b   :  { %1456 = vrot.lane.b32.xlu0 %v10184_v51, %s10274_s2  ;;  %v10191_v51 = vld [vmem:[%s16875_s28 + $0x38] sm:$0xff] }
 0x71c   :  { %1422 = vrot.lane.b32.xlu1 %v10185_v20, %s10274_s2  ;;  %v10192_v20 = vld [vmem:[%s16875_s28 + $0x130] sm:$0xff] }
 0x71f   :  { %1484 = vrot.lane.b32.xlu0 %v10186_v3, %s10274_s2  ;;  %v10193_v3 = vld [vmem:[%s16875_s28 + $0xc8] sm:$0xff] }
 0x720   :  { %1458 = vrot.lane.b32.xlu1 %v10187_v33, %s10274_s2  ;;  %v10194_v33 = vld [vmem:[%s16875_s28 + $0x40] sm:$0xff] }
 0x723   :  { %1424 = vrot.lane.b32.xlu0 %v10188_v16, %s10274_s2  ;;  %v10195_v16 = vld [vmem:[%s16875_s28 + $0x138] sm:$0xff] }
 0x724   :  { %1486 = vrot.lane.b32.xlu1 %v10189_v60, %s10274_s2  ;;  %v10196_v60 = vld [vmem:[%s16875_s28 + $0xd0] sm:$0xff] }
 0x727   :  { %1460 = vrot.lane.b32.xlu0 %v10190_v22, %s10274_s2  ;;  %v10197_v22 = vld [vmem:[%s16875_s28 + $0x48] sm:$0xff] }
 0x728   :  { %1426 = vrot.lane.b32.xlu1 %v10191_v51, %s10274_s2  ;;  %v10198_v51 = vld [vmem:[%s16875_s28 + $0x140] sm:$0xff] }
 0x72b   :  { %1488 = vrot.lane.b32.xlu0 %v10192_v20, %s10274_s2  ;;  %v10199_v20 = vld [vmem:[%s16875_s28 + $0xd8] sm:$0xff] }
 0x72c   :  { %1462 = vrot.lane.b32.xlu1 %v10193_v3, %s10274_s2  ;;  %v10200_v3 = vld [vmem:[%s16875_s28 + $0x50] sm:$0xff] }
 0x72f   :  { %1428 = vrot.lane.b32.xlu0 %v10194_v33, %s10274_s2  ;;  %v10201_v33 = vld [vmem:[%s16875_s28 + $0x148] sm:$0xff] }
 0x730   :  { %1490 = vrot.lane.b32.xlu1 %v10195_v16, %s10274_s2  ;;  %v10202_v16 = vld [vmem:[%s16875_s28 + $0xe0] sm:$0xff] }
 0x733   :  { %1464 = vrot.lane.b32.xlu0 %v10196_v60, %s10274_s2  ;;  %v10203_v60 = vld [vmem:[%s16875_s28 + $0x58] sm:$0xff] }
 0x734   :  { %1430 = vrot.lane.b32.xlu1 %v10197_v22, %s10274_s2  ;;  %v10204_v22 = vld [vmem:[%s16875_s28 + $0x150] sm:$0xff] }
 0x737   :  { %1492 = vrot.lane.b32.xlu0 %v10198_v51, %s10274_s2  ;;  %v10205_v51 = vld [vmem:[%s16875_s28 + $0xe8] sm:$0xff] }
 0x738   :  { %1466 = vrot.lane.b32.xlu1 %v10199_v20, %s10274_s2  ;;  %v10206_v20 = vld [vmem:[%s16875_s28 + $0x60] sm:$0xff] }
 0x73b   :  { %1432 = vrot.lane.b32.xlu0 %v10200_v3, %s10274_s2  ;;  %v10207_v3 = vld [vmem:[%s16875_s28 + $0x158] sm:$0xff] }
 0x73c   :  { %1494 = vrot.lane.b32.xlu1 %v10201_v33, %s10274_s2  ;;  %v10208_v33 = vld [vmem:[%s16875_s28 + $0xf0] sm:$0xff] }
 0x73f   :  { %1468 = vrot.lane.b32.xlu0 %v10202_v16, %s10274_s2  ;;  %v10209_v16 = vld [vmem:[%s16875_s28 + $0x68] sm:$0xff] }
 0x740   :  { %1434 = vrot.lane.b32.xlu1 %v10203_v60, %s10274_s2  ;;  %v10210_v60 = vld [vmem:[%s16875_s28 + $0x160] sm:$0xff] }
 0x743   :  { %1496 = vrot.lane.b32.xlu0 %v10204_v22, %s10274_s2  ;;  %v10211_v22 = vld [vmem:[%s16875_s28 + $0xf8] sm:$0xff] }
 0x744   :  { %1470 = vrot.lane.b32.xlu1 %v10205_v51, %s10274_s2  ;;  %v10212_v51 = vld [vmem:[%s16875_s28 + $0x70] sm:$0xff] }
 0x747   :  { %1436 = vrot.lane.b32.xlu0 %v10206_v20, %s10274_s2  ;;  %v10213_v20 = vld [vmem:[%s16875_s28 + $0x168] sm:$0xff] }
 0x748   :  { %1498 = vrot.lane.b32.xlu1 %v10207_v3, %s10274_s2  ;;  %v10214_v3 = vld [vmem:[%s16875_s28 + $0x170] sm:$0xff] }
 0x74b   :  { %1472 = vrot.lane.b32.xlu0 %v10208_v33, %s10274_s2  ;;  %v10215_v33 = vld [vmem:[%s16875_s28 + $0x78] sm:$0xff] }
 0x74c   :  { %1438 = vrot.lane.b32.xlu1 %v10209_v16, %s10274_s2  ;;  %v10216_v16 = vld [vmem:[%s16875_s28 + $0x178] sm:$0xff] }
 0x74f   :  { %1500 = vrot.lane.b32.xlu0 %v10210_v60, %s10274_s2 }
 0x750   :  { %1474 = vrot.lane.b32.xlu1 %v10211_v22, %s10274_s2 }
 0x753   :  { %1440 = vrot.lane.b32.xlu0 %v10212_v51, %s10274_s2 }
 0x754   :  { %1502 = vrot.lane.b32.xlu1 %v10213_v20, %s10274_s2 }
 0x757   :  { %1504 = vrot.lane.b32.xlu0 %v10214_v3, %s10274_s2 }
 0x758   :  { %1442 = vrot.lane.b32.xlu1 %v10215_v33, %s10274_s2 }
 0x75c   :  { %1506 = vrot.lane.b32.xlu1 %v10216_v16, %s10274_s2 }
 0x765   :  { %v11916_v60 = vpop.xlane.xlu0 %1942 }
 0x766   :  { %v1964_v22 = vsub.f32 %v11517_v15, %v11916_v60  ;;  %v1965_v51 = vsub.f32 %v11524_v52, %v11916_v60 }
 0x767   :  { %v11922_v20 = vpop.xlane.xlu1 %1946 }
 0x768   :  { %v1982_v3 = vmul.f32 1.442695, %v1964_v22  ;;  %v1984_v46 = vmul.f32 1.442695, %v1965_v51  ;;  %v1967_v33 = vsub.f32 %v11535_v36, %v11922_v20  ;;  %v1968_v10 = vsub.f32 %v11545_v18, %v11922_v20 }
 0x76a   :  { %9855 = vpow2.f32 %v1982_v3  ;;  %v1988_v16 = vmul.f32 1.442695, %v1967_v33  ;;  %v1990_v44 = vmul.f32 1.442695, %v1968_v10  ;;  %v236_v33 = vld [vmem:[#allocation3 + $0x318] sm:$0xff] }
 0x76b   :  { %9857 = vpow2.f32 %v1984_v46 }
 0x76c   :  { %9859 = vpow2.f32 %v1990_v44  ;;  %v233_v44 = vld [vmem:[#allocation3 + $0x300] sm:$0xff] }
 0x76d   :  { %v11928_v35 = vpop.xlane.xlu0 %1950  ;;  %9861 = vpow2.f32 %v1988_v16 }
 0x76e   :  { %v1970_v15 = vsub.f32 %v11585_v19, %v11928_v35  ;;  %v1971_v52 = vsub.f32 %v11593_v55, %v11928_v35 }
 0x770   :  { %v1994_v22 = vmul.f32 1.442695, %v1970_v15  ;;  %v1996_v51 = vmul.f32 1.442695, %v1971_v52  ;;  %v243_v15 = vld [vmem:[#allocation3 + $0x350] sm:$0xff]  ;;  %v241_v52 = vld [vmem:[#allocation3 + $0x340] sm:$0xff] }
 0x771   :  { %v11934_v36 = vpop.xlane.xlu0 %1954  ;;  %v11956_v26 = vpack.c.bf16 %v243_v15, %v240_v11 }
 0x772   :  { %9863 = vpow2.f32 %v1994_v22  ;;  %v1973_v18 = vsub.f32 %v11601_v29, %v11934_v36  ;;  %v1974_v10 = vsub.f32 %v11614_v30, %v11934_v36 }
 0x773   :  { %9865 = vpow2.f32 %v1996_v51  ;;  %17019 = vst [vmem:[#allocation150_spill] sm:$0xff] %v11956_v26 }
 0x774   :  { %v9856_v46 = vpop.eup %9855  ;;  %v2000_v3 = vmul.f32 1.442695, %v1973_v18  ;;  %v2002_v19 = vmul.f32 1.442695, %v1974_v10  ;;  %v11954_v10 = vpack.c.bf16 %v236_v33, %v233_v44  ;;  %v249_v33 = vld [vmem:[#allocation3 + $0x380] sm:$0xff] }
 0x775   :  { %v9858_v55 = vpop.eup %9857  ;;  %v11947_v22 = vmul.f32 %v9856_v46, %v11335_v7  ;;  %v1966_v46 = vsub.f32 %v11532_v47, %v11916_v60  ;;  %v250_v60 = vld [vmem:[#allocation3 + $0x388] sm:$0xff] }
 0x776   :  { %v11940_v16 = vpop.xlane.xlu0 %1958  ;;  %9867 = vpow2.f32 %v2000_v3  ;;  %v11952_v18 = vmul.f32 %v9858_v55, %v11343_v43  ;;  %17018 = vst [vmem:[#allocation149_spill] sm:$0xff] %v11954_v10  ;;  %v9860_v59 = vpop.eup %9859 }
 0x777   :  { %v1976_v29 = vsub.f32 %v11644_v49, %v11940_v16  ;;  %v1977_v30 = vsub.f32 %v11649_v25, %v11940_v16  ;;  %9869 = vpow2.f32 %v2002_v19  ;;  %v11958_v49 = vpack.c.bf16 %v244_v54, %v241_v52  ;;  %v242_v25 = vld [vmem:[#allocation3 + $0x348] sm:$0xff]  ;;  %v9862_v0 = vpop.eup %9861 }
 0x778   :  { %v11949_v51 = vpop.xlane.xlu1 %1962  ;;  %2100 = vmatprep.mubr.f32.mxu1 %v11952_v18  ;;  %2302 = vmatprep.mubr.f32.mxu0 %v11952_v18  ;;  %v246_v54 = vld [vmem:[#allocation3 + $0x368] sm:$0xff]  ;;  %v11973_v47 = vmul.f32 %v9860_v59, %v11376_v63  ;;  %v11979_v15 = vpack.c.bf16 %v242_v25, %v239_v40  ;;  %v1986_v43 = vmul.f32 1.442695, %v1966_v46 }
 0x779   :  { %v2006_v8 = vmul.f32 1.442695, %v1976_v29  ;;  %v2008_v3 = vmul.f32 1.442695, %v1977_v30  ;;  %17020 = vst [vmem:[#allocation151_spill] sm:$0xff] %v11958_v49  ;;  %v1979_v19 = vsub.f32 %v11653_v14, %v11949_v51  ;;  %v1980_v44 = vsub.f32 %v11661_v23, %v11949_v51  ;;  %2101 = vmatmul.mubr.f32.vlgmr.msra.gmra.mrb[24].mxu1 %v11947_v22  ;;  %2303 = vmatmul.mubr.f32.vlgmr.msra.gmra.mrb[36].mxu0 %v11947_v22  ;;  %v247_v14 = vld [vmem:[#allocation3 + $0x370] sm:$0xff] }
 0x77a   :  { %v11968_v11 = vpop.permute.xlu0 %1444  ;;  %9104 = vmatpush1.bf16.msra.mxu1 %v11954_v10  ;;  %9168 = vmatpush3.bf16.msra.mxu0 %v11724_v2  ;;  %17023 = vst [vmem:[#allocation154_spill] sm:$0xff] %v11979_v15  ;;  %v11986_v29 = vmul.f32 %v9862_v0, %v11365_v28  ;;  %v11988_v30 = vpack.c.bf16 %v249_v33, %v246_v54  ;;  %v252_v54 = vld [vmem:[#allocation3 + $0x398] sm:$0xff]  ;;  %v255_v33 = vld [vmem:[#allocation3 + $0x3b0] sm:$0xff] }
 0x77b   :  { %17021 = vst [vmem:[#allocation152_spill] sm:$0xff] %v11968_v11  ;;  %9871 = vpow2.f32 %v2006_v8  ;;  %v2014_v23 = vmul.f32 1.442695, %v1980_v44  ;;  %v2012_v52 = vmul.f32 1.442695, %v1979_v19  ;;  %2106 = vmatprep.mubr.f32.mxu1 %v11973_v47  ;;  %2307 = vmatprep.mubr.f32.mxu0 %v11973_v47  ;;  %v248_v44 = vld [vmem:[#allocation3 + $0x378] sm:$0xff]  ;;  %v11994_v25 = vpack.c.bf16 %v250_v60, %v247_v14 }
 0x77c   :  { %9873 = vpow2.f32 %v2008_v3  ;;  %v11977_v55 = vpop.permute.xlu1 %1446  ;;  %v9864_v8 = vpop.eup %9863  ;;  %17024 = vst [vmem:[#allocation155_spill] sm:$0xff] %v11988_v30  ;;  %v245_v3 = vld [vmem:[#allocation3 + $0x360] sm:$0xff]  ;;  %9106 = vmatprep.subr.bf16.mxu1 %v11956_v26  ;;  %9170 = vmatprep.subr.bf16.mxu0 %v11958_v49  ;;  %v1572_v19 = vmul.f32 %v11968_v11, %v10925_v57  ;;  %v256_v28 = vld [vmem:[#allocation3 + $0x3b8] sm:$0xff] }
 0x77d   :  { %17022 = vst [vmem:[#allocation153_spill] sm:$0xff] %v11977_v55  ;;  %v1573_v59 = vmul.f32 %v11977_v55, %v10932_v24  ;;  %v9866_v63 = vpop.eup %9865  ;;  %17026 = vst [vmem:[#allocation157_spill] sm:$0xff] %v11994_v25  ;;  %9875 = vpow2.f32 %v2014_v23  ;;  %2107 = vmatmul.mubr.f32.gmra.mrb[26].mxu1 %v11986_v29  ;;  %2308 = vmatmul.mubr.f32.gmra.mrb[38].mxu0 %v11986_v29  ;;  %v12004_v46 = vmul.f32 %v9864_v8, %v11408_v32  ;;  %v253_v23 = vld [vmem:[#allocation3 + $0x3a0] sm:$0xff]  ;;  %v251_v8 = vld [vmem:[#allocation3 + $0x390] sm:$0xff] }
 0x77e   :  { %v11992_v40 = vpop.permute.xlu0 %1448  ;;  %v12001_v0 = vmul.f32 %v9866_v63, %v11417_v42  ;;  %9108 = vmatpush1.bf16.msra.mxu1 %v11979_v15  ;;  %9172 = vmatpush3.bf16.msra.mxu0 %v11958_v49  ;;  %v12010_v60 = vpack.c.bf16 %v248_v44, %v245_v3  ;;  %9877 = vpow2.f32 %v2012_v52  ;;  %v254_v32 = vld [vmem:[#allocation3 + $0x3a8] sm:$0xff]  ;;  %v12018_v3 = vpack.c.bf16 %v255_v33, %v252_v54  ;;  %v265_v26 = vld [vmem:[#allocation3 + $0x400] sm:$0xff]  ;;  %v268_v10 = vld [vmem:[#allocation3 + $0x418] sm:$0xff] }
 0x77f   :  { %17025 = vst [vmem:[#allocation156_spill] sm:$0xff] %v11992_v40  ;;  %9110 = vmatprep.subr.bf16.mxu1 %v11988_v30  ;;  %v2481_v63 = vpack.c.bf16 %v1573_v59, %v1572_v19  ;;  %9174 = vmatprep.subr.bf16.mxu0 %v11994_v25  ;;  %9879 = vpow2.f32 %v1986_v43  ;;  %v12025_v59 = vpack.c.bf16 %v256_v28, %v253_v23  ;;  %v258_v19 = vld [vmem:[#allocation3 + $0x3c8] sm:$0xff]  ;;  %v261_v30 = vld [vmem:[#allocation3 + $0x3e0] sm:$0xff] }
 0x780   :  { %v12008_v14 = vpop.permute.xlu1 %1412  ;;  %17028 = vst [vmem:[#allocation159_spill] sm:$0xff] %v12010_v60  ;;  %v9868_v7 = vpop.eup %9867  ;;  %2112 = vmatprep.mubr.f32.mxu1 %v12001_v0  ;;  %2312 = vmatprep.mubr.f32.mxu0 %v12001_v0  ;;  %17030 = vst [vmem:[#allocation161_spill] sm:$0xff] %v12018_v3  ;;  %v1969_v49 = vsub.f32 %v11565_v27, %v11922_v20  ;;  %v12036_v54 = vpack.c.bf16 %v254_v32, %v251_v8  ;;  %v262_v33 = vld [vmem:[#allocation3 + $0x3e8] sm:$0xff] }
 0x781   :  { %17027 = vst [vmem:[#allocation158_spill] sm:$0xff] %v12008_v14  ;;  %v9870_v42 = vpop.eup %9869  ;;  %2113 = vmatmul.mubr.f32.gmra.mrb[28].mxu1 %v12004_v46  ;;  %2313 = vmatmul.mubr.f32.gmra.mrb[40].mxu0 %v12004_v46  ;;  %17031 = vst [vmem:[#allocation162_spill] sm:$0xff] %v12025_v59  ;;  %v12028_v44 = vmul.f32 %v9868_v7, %v11427_v12  ;;  %v1972_v7 = vsub.f32 %v11609_v61, %v11928_v35  ;;  %v257_v61 = vld [vmem:[#allocation3 + $0x3c0] sm:$0xff]  ;;  %v260_v35 = vld [vmem:[#allocation3 + $0x3d8] sm:$0xff] }
 0x782   :  { %v12016_v15 = vpop.permute.xlu0 %1476  ;;  %v12023_v52 = vmul.f32 %v9870_v42, %v11431_v50  ;;  %9112 = vmatpush1.bf16.msra.mxu1 %v12010_v60  ;;  %9176 = vmatpush3.bf16.msra.mxu0 %v11994_v25  ;;  %17033 = vst [vmem:[#allocation164_spill] sm:$0xff] %v12036_v54  ;;  %v259_v42 = vld [vmem:[#allocation3 + $0x3d0] sm:$0xff]  ;;  %v1556_v23 = vmul.f32 %v12008_v14, %v10890_v17  ;;  %v264_v60 = vld [vmem:[#allocation3 + $0x3f8] sm:$0xff] }
 0x783   :  { %17029 = vst [vmem:[#allocation160_spill] sm:$0xff] %v12016_v15  ;;  %2537 = vrot.lane.b32.xlu0 %v2481_v63, %s10274_s2  ;;  %9114 = vmatprep.subr.bf16.mxu1 %v12018_v3  ;;  %v12050_v8 = vpack.c.bf16 %v261_v30, %v258_v19  ;;  %v12057_v12 = vpack.c.bf16 %v262_v33, %v259_v42  ;;  %v1992_v3 = vmul.f32 1.442695, %v1969_v49  ;;  %v267_v25 = vld [vmem:[#allocation3 + $0x410] sm:$0xff] }
 0x784   :  { %v12034_v43 = vpop.permute.xlu1 %1414  ;;  %2118 = vmatprep.mubr.f32.mxu1 %v12023_v52  ;;  %2317 = vmatprep.mubr.f32.mxu0 %v12023_v52  ;;  %v1975_v42 = vsub.f32 %v11639_v56, %v11934_v36  ;;  %v12070_v49 = vpack.c.bf16 %v260_v35, %v257_v61  ;;  %v263_v33 = vld [vmem:[#allocation3 + $0x3f0] sm:$0xff]  ;;  %v12085_v61 = vpack.c.bf16 %v267_v25, %v264_v60 }
 0x785   :  { %17032 = vst [vmem:[#allocation163_spill] sm:$0xff] %v12034_v43  ;;  %v9872_v28 = vpop.eup %9871  ;;  %v1557_v27 = vmul.f32 %v12034_v43, %v10894_v21  ;;  %17035 = vst [vmem:[#allocation166_spill] sm:$0xff] %v12050_v8  ;;  %9178 = vmatprep.subr.bf16.mxu0 %v12025_v59  ;;  %2119 = vmatmul.mubr.f32.gmra.mrb[30].mxu1 %v12028_v44  ;;  %9881 = vpow2.f32 %v1992_v3  ;;  %v1574_v35 = vmul.f32 %v11992_v40, %v10890_v17  ;;  %v269_v3 = vld [vmem:[#allocation3 + $0x420] sm:$0xff] }
 0x786   :  { %v9874_v20 = vpop.eup %9873  ;;  %v12048_v32 = vpop.permute.xlu0 %1416  ;;  %17036 = vst [vmem:[#allocation167_spill] sm:$0xff] %v12057_v12  ;;  %9116 = vmatpush1.bf16.msra.mxu1 %v12036_v54  ;;  %2318 = vmatmul.mubr.f32.gmra.mrb[42].mxu0 %v12028_v44  ;;  %v12064_v19 = vmul.f32 %v9872_v28, %v11471_v5  ;;  %17038 = vst [vmem:[#allocation169_spill] sm:$0xff] %v12070_v49  ;;  %v1978_v28 = vsub.f32 %v11656_v41, %v11940_v16  ;;  %v270_v16 = vld [vmem:[#allocation3 + $0x428] sm:$0xff]  ;;  %v273_v5 = vld [vmem:[#allocation3 + $0x440] sm:$0xff] }
 0x787   :  { %17034 = vst [vmem:[#allocation165_spill] sm:$0xff] %v12048_v32  ;;  %v12055_v63 = vmul.f32 %v9874_v20, %v11504_v58  ;;  %v2473_v50 = vpack.c.bf16 %v1557_v27, %v1556_v23  ;;  %v9876_v2 = vpop.eup %9875  ;;  %v1998_v20 = vmul.f32 1.442695, %v1972_v7  ;;  %9180 = vmatpush3.bf16.msra.mxu0 %v12025_v59  ;;  %v266_v23 = vld [vmem:[#allocation3 + $0x408] sm:$0xff]  ;;  %9118 = vmatprep.subr.bf16.mxu1 %v12050_v8  ;;  %17040 = vst [vmem:[#allocation171_spill] sm:$0xff] %v12085_v61  ;;  %v271_v58 = vld [vmem:[#allocation3 + $0x430] sm:$0xff] }
 0x788   :  { %v12061_v30 = vpop.permute.xlu1 %1450  ;;  %v12079_v56 = vmul.f32 %v9876_v2, %v11579_v6  ;;  %v9878_v7 = vpop.eup %9877  ;;  %9182 = vmatprep.subr.bf16.mxu0 %v12057_v12  ;;  %v12087_v41 = vpack.c.bf16 %v268_v10, %v265_v26  ;;  %v12095_v6 = vpack.c.bf16 %v266_v23, %v263_v33  ;;  %v2004_v26 = vmul.f32 1.442695, %v1975_v42  ;;  %v272_v8 = vld [vmem:[#allocation3 + $0x438] sm:$0xff]  ;;  %v277_v54 = vld [vmem:[#allocation3 + $0x460] sm:$0xff] }
 0x789   :  { %17037 = vst [vmem:[#allocation168_spill] sm:$0xff] %v12061_v30  ;;  %2124 = vmatprep.mubr.f32.mxu1 %v12055_v63  ;;  %v1575_v27 = vmul.f32 %v12061_v30, %v10894_v21  ;;  %2322 = vmatprep.mubr.f32.mxu0 %v12055_v63  ;;  %v9880_v25 = vpop.eup %9879  ;;  %9883 = vpow2.f32 %v1998_v20  ;;  %v1981_v10 = vsub.f32 %v11664_v1, %v11949_v51  ;;  %v2010_v33 = vmul.f32 1.442695, %v1978_v28  ;;  %v276_v42 = vld [vmem:[#allocation3 + $0x458] sm:$0xff] }
 0x78a   :  { %v12081_v36 = vpop.permute.xlu0 %1452  ;;  %2521 = vrot.lane.b32.xlu1 %v2473_v50, %s10274_s2  ;;  %17041 = vst [vmem:[#allocation172_spill] sm:$0xff] %v12087_v41  ;;  %2125 = vmatmul.mubr.f32.gmra.mrb[32].mxu1 %v12064_v19  ;;  %17043 = vst [vmem:[#allocation174_spill] sm:$0xff] %v12095_v6  ;;  %v274_v50 = vld [vmem:[#allocation3 + $0x448] sm:$0xff]  ;;  %v1588_v23 = vmul.f32 %v12016_v15, %v10910_v31  ;;  %v12108_v20 = vmul.f32 %v9878_v7, %v11556_v39  ;;  %v280_v59 = vld [vmem:[#allocation3 + $0x478] sm:$0xff]  ;;  %9885 = vpow2.f32 %v2004_v26 }
 0x78b   :  { %17039 = vst [vmem:[#allocation170_spill] sm:$0xff] %v12081_v36  ;;  %2323 = vmatmul.mubr.f32.gmra.mrb[44].mxu0 %v12064_v19  ;;  %9120 = vmatpush1.bf16.msra.mxu1 %v12070_v49  ;;  %v2482_v1 = vpack.c.bf16 %v1575_v27, %v1574_v35  ;;  %v12114_v49 = vpack.c.bf16 %v273_v5, %v270_v16  ;;  %v2016_v5 = vmul.f32 1.442695, %v1981_v10  ;;  %9887 = vpow2.f32 %v2010_v33  ;;  %v275_v26 = vld [vmem:[#allocation3 + $0x450] sm:$0xff]  ;;  %v278_v10 = vld [vmem:[#allocation3 + $0x468] sm:$0xff] }
 0x78c   :  { %v12093_v2 = vpop.permute.xlu1 %1478  ;;  %9184 = vmatpush3.bf16.msra.mxu0 %v12057_v12  ;;  %2130 = vmatprep.mubr.f32.mxu1 %v12079_v56  ;;  %v12116_v28 = vpack.c.bf16 %v274_v50, %v271_v58  ;;  %v279_v12 = vld [vmem:[#allocation3 + $0x470] sm:$0xff]  ;;  %v12121_v27 = vmul.f32 %v9880_v25, %v11347_v13  ;;  %v12125_v35 = vpack.c.bf16 %v272_v8, %v269_v3 }
 0x78d   :  { %17042 = vst [vmem:[#allocation173_spill] sm:$0xff] %v12093_v2  ;;  %v1589_v60 = vmul.f32 %v12093_v2, %v10913_v45  ;;  %2327 = vmatprep.mubr.f32.mxu0 %v12079_v56  ;;  %9122 = vmatprep.subr.bf16.mxu1 %v12085_v61  ;;  %17045 = vst [vmem:[#allocation176_spill] sm:$0xff] %v12114_v49  ;;  %v1558_v58 = vmul.f32 %v12048_v32, %v10910_v31  ;;  %9889 = vpow2.f32 %v2016_v5 }
 0x78e   :  { %v12110_v51 = vpop.permute.xlu0 %1480  ;;  %9186 = vmatprep.subr.bf16.mxu0 %v12087_v41  ;;  %17046 = vst [vmem:[#allocation177_spill] sm:$0xff] %v12116_v28  ;;  %2131 = vmatmul.mubr.f32.gmra.mrb[34].mxu1 %v12108_v20  ;;  %17048 = vst [vmem:[#allocation179_spill] sm:$0xff] %v12125_v35  ;;  %v12137_v50 = vpack.c.bf16 %v279_v12, %v276_v42  ;;  %v12139_v25 = vpack.c.bf16 %v280_v59, %v277_v54 }
 0x78f   :  { %17044 = vst [vmem:[#allocation175_spill] sm:$0xff] %v12110_v51  ;;  %2328 = vmatmul.mubr.f32.gmra.mrb[46].mxu0 %v12108_v20  ;;  %v2489_v39 = vpack.c.bf16 %v1589_v60, %v1588_v23  ;;  %9124 = vmatpush1.bf16.msra.mxu1 %v12095_v6  ;;  %v1576_v12 = vmul.f32 %v12081_v36, %v10910_v31  ;;  %v9882_v33 = vpop.eup %9881 }
 0x790   :  { %v12123_v7 = vpop.permute.xlu1 %1418  ;;  %9188 = vmatpush3.bf16.msra.mxu0 %v12087_v41  ;;  %2539 = vrot.lane.b32.xlu0 %v2482_v1, %s10274_s2  ;;  %17050 = vst [vmem:[#allocation181_spill] sm:$0xff] %v12137_v50  ;;  %17051 = vst [vmem:[#allocation182_spill] sm:$0xff] %v12139_v25  ;;  %v12153_v54 = vpack.c.bf16 %v278_v10, %v275_v26  ;;  %v1590_v5 = vmul.f32 %v12110_v51, %v10925_v57 }
 0x791   :  { %17047 = vst [vmem:[#allocation178_spill] sm:$0xff] %v12123_v7  ;;  %v1559_v16 = vmul.f32 %v12123_v7, %v10913_v45  ;;  %8528 = vmatprep.mubr.f32.mxu0 %v12121_v27  ;;  %9126 = vmatprep.subr.bf16.mxu1 %v12114_v49 }
 0x792   :  { %v12135_v8 = vpop.permute.xlu0 %1420  ;;  %9190 = vmatprep.subr.bf16.mxu0 %v12116_v28  ;;  %2553 = vrot.lane.b32.xlu1 %v2489_v39, %s10274_s2  ;;  %17053 = vst [vmem:[#allocation184_spill] sm:$0xff] %v12153_v54 }
 0x793   :  { %17049 = vst [vmem:[#allocation180_spill] sm:$0xff] %v12135_v8  ;;  %v2474_v60 = vpack.c.bf16 %v1559_v16, %v1558_v58  ;;  %2201 = vmatprep.mubr.f32.mxu1 %v16931_v48  ;;  %9128 = vmatpush1.bf16.msra.mxu1 %v12125_v35  ;;  %v9884_v23 = vpop.eup %9883  ;;  %v12169_v16 = vmul.f32 %v9882_v33, %v11388_v37 }
 0x794   :  { %v12144_v3 = vpop.permute.xlu1 %1454  ;;  %9192 = vmatpush3.bf16.msra.mxu0 %v12116_v28  ;;  %9130 = vmatprep.subr.bf16.mxu1 %v12137_v50  ;;  %v9886_v10 = vpop.eup %9885  ;;  %v1560_v33 = vmul.f32 %v12135_v8, %v10925_v57 }
 0x795   :  { %17052 = vst [vmem:[#allocation183_spill] sm:$0xff] %v12144_v3  ;;  %v1577_v59 = vmul.f32 %v12144_v3, %v10913_v45  ;;  %9194 = vmatprep.subr.bf16.mxu0 %v12139_v25  ;;  %2523 = vrot.lane.b32.xlu0 %v2474_v60, %s10274_s2  ;;  %v12176_v60 = vmul.f32 %v9884_v23, %v11394_v62 }
 0x796   :  { %v12157_v39 = vpop.permute.xlu0 %1456  ;;  %v12189_v23 = vmul.f32 %v9886_v10, %v11447_v4 }
 0x797   :  { %17054 = vst [vmem:[#allocation185_spill] sm:$0xff] %v12157_v39  ;;  %v2483_v1 = vpack.c.bf16 %v1577_v59, %v1576_v12  ;;  %9132 = vmatpush1.bf16.msra.mxu1 %v12153_v54  ;;  %v9888_v59 = vpop.eup %9887 }
 0x798   :  { %v12160_v42 = vpop.permute.xlu1 %1482  ;;  %9196 = vmatpush3.bf16.msra.mxu0 %v12139_v25  ;;  %8537 = vmatprep.subr.bf16.mxu1 %v16931_v48  ;;  %v12195_v62 = vmul.f32 %v9888_v59, %v11512_v38  ;;  %v1578_v25 = vmul.f32 %v12157_v39, %v10925_v57 }
 0x799   :  { %17055 = vst [vmem:[#allocation186_spill] sm:$0xff] %v12160_v42  ;;  %v1591_v58 = vmul.f32 %v12160_v42, %v10932_v24  ;;  %2541 = vrot.lane.b32.xlu1 %v2483_v1, %s10274_s2 }
 0x79a   :  { %v12172_v26 = vpop.permute.xlu0 %1484  ;;  %2202 = vmatmul.mubr.f32.vlgmr.msra.gmra.mrb[24].mxu1 %v12121_v27 }
 0x79b   :  { %17056 = vst [vmem:[#allocation187_spill] sm:$0xff] %v12172_v26  ;;  %v2490_v12 = vpack.c.bf16 %v1591_v58, %v1590_v5  ;;  %8529 = vmatmul.mubr.f32.vlgmr.msra.gmra.mrb[48].mxu0 %v12169_v16  ;;  %2207 = vmatprep.mubr.f32.mxu1 %v16931_v48  ;;  %v9890_v58 = vpop.eup %9889  ;;  %v1592_v38 = vmul.f32 %v12172_v26, %v10890_v17 }
 0x79c   :  { %v12180_v13 = vpop.permute.xlu1 %1422  ;;  %8531 = vmatprep.mubr.f32.mxu0 %v12176_v60 }
 0x79d   :  { %17057 = vst [vmem:[#allocation188_spill] sm:$0xff] %v12180_v13  ;;  %v1561_v1 = vmul.f32 %v12180_v13, %v10932_v24  ;;  %2555 = vrot.lane.b32.xlu0 %v2490_v12, %s10274_s2  ;;  %v12208_v12 = vmul.f32 %v9890_v58, %v11588_v34 }
 0x79e   :  { %v12192_v5 = vpop.permute.xlu0 %1424  ;;  %2208 = vmatmul.mubr.f32.gmra.mrb[26].mxu1 %v12169_v16 }
 0x79f   :  { %17058 = vst [vmem:[#allocation189_spill] sm:$0xff] %v12192_v5  ;;  %v2475_v37 = vpack.c.bf16 %v1561_v1, %v1560_v33  ;;  %8532 = vmatmul.mubr.f32.gmra.mrb[50].mxu0 %v12189_v23  ;;  %2213 = vmatprep.mubr.f32.mxu1 %v16931_v48 }
 0x7a0   :  { %v12199_v54 = vpop.permute.xlu1 %1458  ;;  %8534 = vmatprep.mubr.f32.mxu0 %v12195_v62 }
 0x7a1   :  { %17059 = vst [vmem:[#allocation190_spill] sm:$0xff] %v12199_v54  ;;  %v1579_v10 = vmul.f32 %v12199_v54, %v10932_v24  ;;  %2525 = vrot.lane.b32.xlu1 %v2475_v37, %s10274_s2 }
 0x7a2   :  { %v12211_v59 = vpop.permute.xlu0 %1460  ;;  %2214 = vmatmul.mubr.f32.gmra.mrb[28].mxu1 %v12176_v60 }
 0x7a3   :  { %17060 = vst [vmem:[#allocation191_spill] sm:$0xff] %v12211_v59  ;;  %v2484_v33 = vpack.c.bf16 %v1579_v10, %v1578_v25  ;;  %8535 = vmatmul.mubr.f32.gmra.mrb[52].mxu0 %v12208_v12  ;;  %2219 = vmatprep.mubr.f32.mxu1 %v16931_v48  ;;  %v1562_v10 = vmul.f32 %v12192_v5, %v10890_v17 }
 0x7a4   :  { %v12215_v1 = vpop.permute.xlu1 %1486 }
 0x7a5   :  { %17061 = vst [vmem:[#allocation192_spill] sm:$0xff] %v12215_v1  ;;  %v1593_v58 = vmul.f32 %v12215_v1, %v10894_v21  ;;  %2543 = vrot.lane.b32.xlu0 %v2484_v33, %s10274_s2 }
 0x7a6   :  { %v12223_v37 = vpop.permute.xlu0 %1488  ;;  %2220 = vmatmul.mubr.f32.gmra.mrb[30].mxu1 %v12189_v23 }
 0x7a7   :  { %17062 = vst [vmem:[#allocation193_spill] sm:$0xff] %v12223_v37  ;;  %v2491_v34 = vpack.c.bf16 %v1593_v58, %v1592_v38  ;;  %2225 = vmatprep.mubr.f32.mxu1 %v16931_v48  ;;  %v1580_v58 = vmul.f32 %v12211_v59, %v10890_v17 }
 0x7a8   :  { %v12226_v25 = vpop.permute.xlu1 %1426 }
 0x7a9   :  { %17063 = vst [vmem:[#allocation194_spill] sm:$0xff] %v12226_v25  ;;  %v1563_v4 = vmul.f32 %v12226_v25, %v10894_v21  ;;  %2557 = vrot.lane.b32.xlu1 %v2491_v34, %s10274_s2 }
 0x7aa   :  { %v12234_v50 = vpop.permute.xlu0 %1428  ;;  %2226 = vmatmul.mubr.f32.gmra.mrb[32].mxu1 %v12195_v62 }
 0x7ab   :  { %17064 = vst [vmem:[#allocation195_spill] sm:$0xff] %v12234_v50  ;;  %v2476_v33 = vpack.c.bf16 %v1563_v4, %v1562_v10  ;;  %2231 = vmatprep.mubr.f32.mxu1 %v16931_v48  ;;  %v1594_v10 = vmul.f32 %v12223_v37, %v10910_v31 }
 0x7ac   :  { %v12237_v38 = vpop.permute.xlu1 %1462 }
 0x7ad   :  { %17065 = vst [vmem:[#allocation196_spill] sm:$0xff] %v12237_v38  ;;  %v1581_v35 = vmul.f32 %v12237_v38, %v10894_v21  ;;  %2527 = vrot.lane.b32.xlu0 %v2476_v33, %s10274_s2 }
 0x7ae   :  { %v12245_v28 = vpop.permute.xlu0 %1464  ;;  %2232 = vmatmul.mubr.f32.gmra.mrb[34].mxu1 %v12208_v12 }
 0x7af   :  { %17066 = vst [vmem:[#allocation197_spill] sm:$0xff] %v12245_v28  ;;  %v2485_v34 = vpack.c.bf16 %v1581_v35, %v1580_v58  ;;  %8553 = vmatprep.mubr.msk.bf16.mxu1 %vm10269_vm0, %v16931_v48  ;;  %v1564_v35 = vmul.f32 %v12234_v50, %v10910_v31  ;;  %v1582_v9 = vmul.f32 %v12245_v28, %v10910_v31 }
 0x7b0   :  { %v12248_v4 = vpop.permute.xlu1 %1490 }
 0x7b1   :  { %17067 = vst [vmem:[#allocation198_spill] sm:$0xff] %v12248_v4  ;;  %v1595_v49 = vmul.f32 %v12248_v4, %v10913_v45  ;;  %2545 = vrot.lane.b32.xlu1 %v2485_v34, %s10274_s2 }
 0x7b2   :  { %v12257_v6 = vpop.permute.xlu0 %1492 }
 0x7b3   :  { %17068 = vst [vmem:[#allocation199_spill] sm:$0xff] %v12257_v6  ;;  %v2492_v33 = vpack.c.bf16 %v1595_v49, %v1594_v10 }
 0x7b4   :  { %v12259_v41 = vpop.permute.xlu1 %1430 }
 0x7b5   :  { %17069 = vst [vmem:[#allocation200_spill] sm:$0xff] %v12259_v41  ;;  %v1565_v58 = vmul.f32 %v12259_v41, %v10913_v45  ;;  %2559 = vrot.lane.b32.xlu0 %v2492_v33, %s10274_s2  ;;  %v1596_v33 = vmul.f32 %v12257_v6, %v10925_v57 }
 0x7b6   :  { %v12266_v61 = vpop.permute.xlu0 %1432 }
 0x7b7   :  { %17070 = vst [vmem:[#allocation201_spill] sm:$0xff] %v12266_v61  ;;  %v2477_v53 = vpack.c.bf16 %v1565_v58, %v1564_v35 }
 0x7b8   :  { %v12268_v34 = vpop.permute.xlu1 %1466 }
 0x7b9   :  { %17071 = vst [vmem:[#allocation202_spill] sm:$0xff] %v12268_v34  ;;  %v1583_v49 = vmul.f32 %v12268_v34, %v10913_v45  ;;  %2529 = vrot.lane.b32.xlu1 %v2477_v53, %s10274_s2  ;;  %v1566_v53 = vmul.f32 %v12266_v61, %v10925_v57 }
 0x7ba   :  { %v12275_v10 = vpop.permute.xlu0 %1468 }
 0x7bb   :  { %17072 = vst [vmem:[#allocation203_spill] sm:$0xff] %v12275_v10  ;;  %v2486_v50 = vpack.c.bf16 %v1583_v49, %v1582_v9 }
 0x7bc   :  { %v12277_v38 = vpop.permute.xlu1 %1494 }
 0x7bd   :  { %17073 = vst [vmem:[#allocation204_spill] sm:$0xff] %v12277_v38  ;;  %v1597_v35 = vmul.f32 %v12277_v38, %v10932_v24  ;;  %2547 = vrot.lane.b32.xlu0 %v2486_v50, %s10274_s2  ;;  %v1584_v50 = vmul.f32 %v12275_v10, %v10925_v57 }
 0x7be   :  { %v12284_v58 = vpop.permute.xlu0 %1496 }
 0x7bf   :  { %17074 = vst [vmem:[#allocation205_spill] sm:$0xff] %v12284_v58  ;;  %v2493_v41 = vpack.c.bf16 %v1597_v35, %v1596_v33 }
 0x7c0   :  { %v12286_v28 = vpop.permute.xlu1 %1434 }
 0x7c1   :  { %17075 = vst [vmem:[#allocation206_spill] sm:$0xff] %v12286_v28  ;;  %v1567_v9 = vmul.f32 %v12286_v28, %v10932_v24  ;;  %2561 = vrot.lane.b32.xlu1 %v2493_v41, %s10274_s2  ;;  %v1598_v41 = vmul.f32 %v12284_v58, %v10890_v17 }
 0x7c2   :  { %v12293_v49 = vpop.permute.xlu0 %1436 }
 0x7c3   :  { %17076 = vst [vmem:[#allocation207_spill] sm:$0xff] %v12293_v49  ;;  %v2478_v6 = vpack.c.bf16 %v1567_v9, %v1566_v53 }
 0x7c4   :  { %v12295_v34 = vpop.permute.xlu1 %1470 }
 0x7c5   :  { %17077 = vst [vmem:[#allocation208_spill] sm:$0xff] %v12295_v34  ;;  %v1585_v33 = vmul.f32 %v12295_v34, %v10932_v24  ;;  %2531 = vrot.lane.b32.xlu0 %v2478_v6, %s10274_s2  ;;  %v1568_v34 = vmul.f32 %v12293_v49, %v10890_v17 }
 0x7c6   :  { %v12302_v38 = vpop.permute.xlu0 %1472 }
 0x7c7   :  { %v2487_v35 = vpack.c.bf16 %v1585_v33, %v1584_v50  ;;  %17078 = vst [vmem:[#allocation209_spill] sm:$0xff] %v12302_v38 }
 0x7c8   :  { %v12304_v61 = vpop.permute.xlu1 %1498 }
 0x7c9   :  { %17079 = vst [vmem:[#allocation210_spill] sm:$0xff] %v12304_v61  ;;  %v1599_v53 = vmul.f32 %v12304_v61, %v10894_v21  ;;  %2549 = vrot.lane.b32.xlu1 %v2487_v35, %s10274_s2  ;;  %v1586_v61 = vmul.f32 %v12302_v38, %v10890_v17 }
 0x7ca   :  { %v12318_v50 = vpop.permute.xlu0 %1500 }
 0x7cb   :  { %v2494_v9 = vpack.c.bf16 %v1599_v53, %v1598_v41  ;;  %17081 = vst [vmem:[#allocation212_spill] sm:$0xff] %v12318_v50 }
 0x7cc   :  { %v12311_v10 = vpop.permute.xlu1 %1438 }
 0x7cd   :  { %17080 = vst [vmem:[#allocation211_spill] sm:$0xff] %v12311_v10  ;;  %v1569_v6 = vmul.f32 %v12311_v10, %v10894_v21  ;;  %2563 = vrot.lane.b32.xlu0 %v2494_v9, %s10274_s2  ;;  %v1600_v9 = vmul.f32 %v12318_v50, %v10910_v31 }
 0x7ce   :  { %v12327_v53 = vpop.permute.xlu0 %1440 }
 0x7cf   :  { %v2479_v33 = vpack.c.bf16 %v1569_v6, %v1568_v34  ;;  %17083 = vst [vmem:[#allocation214_spill] sm:$0xff] %v12327_v53 }
 0x7d0   :  { %v12320_v58 = vpop.permute.xlu1 %1474 }
 0x7d1   :  { %17082 = vst [vmem:[#allocation213_spill] sm:$0xff] %v12320_v58  ;;  %v1587_v35 = vmul.f32 %v12320_v58, %v10894_v21  ;;  %2533 = vrot.lane.b32.xlu1 %v2479_v33, %s10274_s2  ;;  %v1570_v21 = vmul.f32 %v12327_v53, %v10910_v31 }
 0x7d2   :  { %v12343_v33 = vpop.permute.xlu0 %1504 }
 0x7d3   :  { %v2488_v41 = vpack.c.bf16 %v1587_v35, %v1586_v61  ;;  %17086 = vst [vmem:[#allocation217_spill] sm:$0xff] %v12343_v33 }
 0x7d4   :  { %v12329_v49 = vpop.permute.xlu1 %1502 }
 0x7d5   :  { %17084 = vst [vmem:[#allocation215_spill] sm:$0xff] %v12329_v49  ;;  %v1601_v34 = vmul.f32 %v12329_v49, %v10913_v45  ;;  %2551 = vrot.lane.b32.xlu0 %v2488_v41, %s10274_s2  ;;  %v1602_v49 = vmul.f32 %v12343_v33, %v10925_v57 }
 0x7d7   :  { %v2495_v6 = vpack.c.bf16 %v1601_v34, %v1600_v9 }
 0x7d8   :  { %v12336_v17 = vpop.permute.xlu1 %1442 }
 0x7d9   :  { %17085 = vst [vmem:[#allocation216_spill] sm:$0xff] %v12336_v17  ;;  %v1571_v61 = vmul.f32 %v12336_v17, %v10913_v45  ;;  %2565 = vrot.lane.b32.xlu1 %v2495_v6, %s10274_s2 }
 0x7db   :  { %v2480_v35 = vpack.c.bf16 %v1571_v61, %v1570_v21 }
 0x7dc   :  { %v12345_v50 = vpop.permute.xlu1 %1506 }
 0x7dd   :  { %17087 = vst [vmem:[#allocation218_spill] sm:$0xff] %v12345_v50  ;;  %v1603_v41 = vmul.f32 %v12345_v50, %v10932_v24  ;;  %2535 = vrot.lane.b32.xlu0 %v2480_v35, %s10274_s2 }
 0x7df   :  { %v2496_v9 = vpack.c.bf16 %v1603_v41, %v1602_v49 }
 0x7e1   :  { %2567 = vrot.lane.b32.xlu1 %v2496_v9, %s10274_s2 }
 0x7f5   :  { %v2538_v31 = vpop.permute.xlu0 %2537 }
 0x7f6   :  { %7866 = vmatprep.subr.bf16.mxu0 %v2538_v31 }
 0x7fc   :  { %v2522_v45 = vpop.permute.xlu1 %2521 }
 0x7fd   :  { %7867 = vmatpush3.bf16.msra.mxu0 %v2522_v45 }
 0x802   :  { %v2540_v34 = vpop.permute.xlu0 %2539 }
 0x803   :  { %7868 = vmatprep.subr.bf16.mxu0 %v2540_v34 }
 0x804   :  { %v2554_v6 = vpop.permute.xlu1 %2553 }
 0x805   :  { %8538 = vmatpush3.bf16.msra.mxu1 %v2554_v6 }
 0x806   :  { %8539 = vmatprep.subr.bf16.mxu1 %v16931_v48 }
 0x807   :  { %v2524_v21 = vpop.permute.xlu0 %2523 }
 0x808   :  { %7869 = vmatpush3.bf16.msra.mxu0 %v2524_v21 }
 0x80b   :  { %v2542_v57 = vpop.permute.xlu1 %2541 }
 0x80c   :  { %7870 = vmatprep.subr.bf16.mxu0 %v2542_v57 }
 0x80f   :  { %v2556_v24 = vpop.permute.xlu0 %2555 }
 0x810   :  { %8540 = vmatpush3.bf16.msra.mxu1 %v2556_v24 }
 0x811   :  { %8541 = vmatprep.subr.bf16.mxu1 %v16931_v48 }
 0x813   :  { %v2526_v49 = vpop.permute.xlu1 %2525 }
 0x814   :  { %7871 = vmatpush3.bf16.msra.mxu0 %v2526_v49 }
 0x817   :  { %v2544_v61 = vpop.permute.xlu0 %2543 }
 0x818   :  { %7872 = vmatprep.subr.bf16.mxu0 %v2544_v61 }
 0x81b   :  { %v2558_v35 = vpop.permute.xlu1 %2557 }
 0x81c   :  { %8542 = vmatpush3.bf16.msra.mxu1 %v2558_v35 }
 0x81d   :  { %8543 = vmatprep.subr.bf16.mxu1 %v16931_v48 }
 0x81f   :  { %v2528_v41 = vpop.permute.xlu0 %2527 }
 0x820   :  { %7873 = vmatpush3.bf16.msra.mxu0 %v2528_v41 }
 0x823   :  { %v2546_v9 = vpop.permute.xlu1 %2545 }
 0x824   :  { %7874 = vmatprep.subr.bf16.mxu0 %v2546_v9 }
 0x827   :  { %v2560_v31 = vpop.permute.xlu0 %2559 }
 0x828   :  { %8544 = vmatpush3.bf16.msra.mxu1 %v2560_v31 }
 0x829   :  { %8545 = vmatprep.subr.bf16.mxu1 %v16931_v48 }
 0x82b   :  { %v2530_v45 = vpop.permute.xlu1 %2529 }
 0x82c   :  { %7875 = vmatpush3.bf16.msra.mxu0 %v2530_v45 }
 0x82f   :  { %v2548_v34 = vpop.permute.xlu0 %2547 }
 0x830   :  { %7876 = vmatprep.subr.bf16.mxu0 %v2548_v34 }
 0x833   :  { %v2562_v6 = vpop.permute.xlu1 %2561 }
 0x834   :  { %8546 = vmatpush3.bf16.msra.mxu1 %v2562_v6 }
 0x835   :  { %8547 = vmatprep.subr.bf16.mxu1 %v16931_v48 }
 0x837   :  { %v2532_v21 = vpop.permute.xlu0 %2531 }
 0x838   :  { %7877 = vmatpush3.bf16.msra.mxu0 %v2532_v21 }
 0x83b   :  { %v2550_v57 = vpop.permute.xlu1 %2549 }
 0x83c   :  { %7878 = vmatprep.subr.bf16.mxu0 %v2550_v57 }
 0x83f   :  { %v2564_v24 = vpop.permute.xlu0 %2563 }
 0x840   :  { %8548 = vmatpush3.bf16.msra.mxu1 %v2564_v24 }
 0x841   :  { %8549 = vmatprep.subr.bf16.mxu1 %v16931_v48 }
 0x843   :  { %v2534_v49 = vpop.permute.xlu1 %2533 }
 0x844   :  { %7879 = vmatpush3.bf16.msra.mxu0 %v2534_v49 }
 0x847   :  { %v2552_v61 = vpop.permute.xlu0 %2551 }
 0x848   :  { %7880 = vmatprep.subr.bf16.mxu0 %v2552_v61 }
 0x84b   :  { %v2566_v35 = vpop.permute.xlu1 %2565 }
 0x84c   :  { %8550 = vmatpush3.bf16.msra.mxu1 %v2566_v35  ;;  %v7826_v41 = vpop.f32.mrb[36].mxu0 }
 0x84d   :  { %8551 = vmatprep.subr.bf16.mxu1 %v16931_v48  ;;  %v7827_v9 = vpop.f32.mrb[37].mxu0 }
 0x84e   :  { %v7828_v45 = vadd.f32 %v7827_v9, %v7826_v41 }
 0x84f   :  { %v2536_v31 = vpop.permute.xlu0 %2535 }
 0x850   :  { %7881 = vmatpush3.bf16.msra.mxu0 %v2536_v31  ;;  %v7829_v34 = vpop.f32.mrb[38].mxu0  ;;  %v2305_v38 = vadd.f32 1e-09, %v7828_v45 }
 0x851   :  { %8565 = vmatprep.subr.bf16.mxu0 %v16931_v48  ;;  %v7830_v6 = vpop.f32.mrb[39].mxu0 }
 0x852   :  { %v7831_v57 = vadd.f32 %v7830_v6, %v7829_v34 }
 0x853   :  { %v2568_v21 = vpop.permute.xlu1 %2567 }
 0x854   :  { %8552 = vmatpush3.bf16.msra.mxu1 %v2568_v21  ;;  %v7832_v24 = vpop.f32.mrb[40].mxu0  ;;  %v2310_v58 = vadd.f32 1e-09, %v7831_v57 }
 0x855   :  { %8581 = vmatprep.subr.bf16.mxu1 %v16931_v48  ;;  %v7833_v49 = vpop.f32.mrb[41].mxu0 }
 0x856   :  { %v7834_v61 = vadd.f32 %v7833_v49, %v7832_v24 }
 0x858   :  { %v2315_v49 = vadd.f32 1e-09, %v7834_v61 }
 0x859   :  { %v7835_v35 = vpop.f32.mrb[42].mxu0 }
 0x85a   :  { %v7836_v50 = vpop.f32.mrb[43].mxu0 }
 0x85b   :  { %v7837_v33 = vadd.f32 %v7836_v50, %v7835_v35 }
 0x85d   :  { %v2320_v24 = vadd.f32 1e-09, %v7837_v33 }
 0x85e   :  { %v7838_v17 = vpop.f32.mrb[44].mxu0 }
 0x85f   :  { %v7839_v53 = vpop.f32.mrb[45].mxu0 }
 0x860   :  { %v7840_v10 = vadd.f32 %v7839_v53, %v7838_v17 }
 0x862   :  { %v7841_v41 = vpop.f32.mrb[46].mxu0 }
 0x863   :  { %v7842_v9 = vpop.f32.mrb[47].mxu0 }
 0x864   :  { %v7843_v31 = vadd.f32 %v7842_v9, %v7841_v41 }
 0x86d   :  { %v2203_v28 = vpop.f32.mrb[24].mxu1 }
 0x86e   :  { %v8530_v59 = vpop.f32.mrb[48].mxu0  ;;  %v9686_v34 = vadd.f32 1e-09, %v2203_v28  ;;  %v2205_v21 = vpop.f32.mrb[25].mxu1  ;;  %v2330_v28 = vadd.f32 1e-09, %v7843_v31 }
 0x86f   :  { %v2405_v6 = vadd.f32 %v8530_v59, %v2310_v58  ;;  %v2399_v4 = vpop.f32.mrb[49].mxu0  ;;  %v9687_v37 = vadd.f32 1e-09, %v2205_v21  ;;  %v2325_v59 = vadd.f32 1e-09, %v7840_v10 }
 0x870   :  { %v2400_v1 = vadd.f32 %v2399_v4, %v2305_v38  ;;  %9891 = vrcp.f32 %v9686_v34 }
 0x871   :  { %9893 = vrcp.f32 %v2405_v6  ;;  %v2209_v50 = vpop.f32.mrb[26].mxu1 }
 0x872   :  { %v8533_v35 = vpop.f32.mrb[50].mxu0  ;;  %9895 = vrcp.f32 %v9687_v37  ;;  %v9688_v53 = vadd.f32 1e-09, %v2209_v50  ;;  %v2211_v41 = vpop.f32.mrb[27].mxu1 }
 0x873   :  { %v2415_v17 = vadd.f32 %v8533_v35, %v2320_v24  ;;  %v2409_v57 = vpop.f32.mrb[51].mxu0  ;;  %9897 = vrcp.f32 %v2400_v1  ;;  %v9689_v45 = vadd.f32 1e-09, %v2211_v41 }
 0x874   :  { %v2410_v9 = vadd.f32 %v2409_v57, %v2315_v49  ;;  %9899 = vrcp.f32 %v9688_v53 }
 0x875   :  { %9901 = vrcp.f32 %v2415_v17  ;;  %v2215_v58 = vpop.f32.mrb[28].mxu1 }
 0x876   :  { %v8536_v38 = vpop.f32.mrb[52].mxu0  ;;  %9903 = vrcp.f32 %v9689_v45  ;;  %v9690_v4 = vadd.f32 1e-09, %v2215_v58  ;;  %v2217_v61 = vpop.f32.mrb[29].mxu1 }
 0x877   :  { %v2425_v33 = vadd.f32 %v8536_v38, %v2330_v28  ;;  %v2419_v34 = vpop.f32.mrb[53].mxu0  ;;  %9905 = vrcp.f32 %v2410_v9  ;;  %v9691_v37 = vadd.f32 1e-09, %v2217_v61 }
 0x878   :  { %v2420_v6 = vadd.f32 %v2419_v34, %v2325_v59  ;;  %9907 = vrcp.f32 %v9690_v4 }
 0x879   :  { %9909 = vrcp.f32 %v2425_v33  ;;  %v2221_v21 = vpop.f32.mrb[30].mxu1 }
 0x87a   :  { %v9892_v1 = vpop.eup %9891  ;;  %9911 = vrcp.f32 %v9691_v37  ;;  %v9692_v24 = vadd.f32 1e-09, %v2221_v21  ;;  %v2223_v31 = vpop.f32.mrb[31].mxu1 }
 0x87b   :  { %v9894_v49 = vpop.eup %9893  ;;  %9913 = vrcp.f32 %v2420_v6  ;;  %v9693_v10 = vadd.f32 1e-09, %v2223_v31  ;;  %v2446_v59 = vmul.f32 %v9892_v1, %v11947_v22 }
 0x87c   :  { %v9896_v50 = vpop.eup %9895  ;;  %v2451_v35 = vmul.f32 %v9894_v49, %v12169_v16  ;;  %9915 = vrcp.f32 %v9692_v24  ;;  %v2707_v16 = vld [vmem:[%s16288_s10] sm:$0xff] }
 0x87d   :  { %v9898_v53 = vpop.eup %9897  ;;  %9917 = vrcp.f32 %v9693_v10  ;;  %v2227_v17 = vpop.f32.mrb[32].mxu1  ;;  %v2447_v6 = vmul.f32 %v9896_v50, %v11952_v18 }
 0x87e   :  { %v9900_v41 = vpop.eup %9899  ;;  %v2448_v57 = vmul.f32 %v9898_v53, %v12121_v27  ;;  %v9694_v45 = vadd.f32 1e-09, %v2227_v17  ;;  %v2229_v9 = vpop.f32.mrb[33].mxu1  ;;  %v2708_v27 = vld [vmem:[%s16288_s10 + $0x8] sm:$0xff] }
 0x87f   :  { %v9902_v28 = vpop.eup %9901  ;;  %v2449_v58 = vmul.f32 %v9900_v41, %v11986_v29  ;;  %v9695_v38 = vadd.f32 1e-09, %v2229_v9 }
 0x880   :  { %v9904_v4 = vpop.eup %9903  ;;  %v2466_v33 = vpack.c.bf16 %v2451_v35, %v2448_v57  ;;  %v2457_v61 = vmul.f32 %v9902_v28, %v12189_v23  ;;  %9919 = vrcp.f32 %v9694_v45  ;;  %v2714_v35 = vpack.c.bf16 %v2708_v27, %v2707_v16  ;;  %v7658_v27 = vld [vmem:[%s16286_s8 + $0x28] sm:$0xff] }
 0x881   :  { %v9906_v34 = vpop.eup %9905  ;;  %v2233_v37 = vpop.f32.mrb[34].mxu1  ;;  %v2450_v22 = vmul.f32 %v9904_v4, %v11973_v47  ;;  %v2464_v29 = vpack.c.bf16 %v2449_v58, %v2446_v59  ;;  %9921 = vrcp.f32 %v9695_v38 }
 0x882   :  { %v9908_v21 = vpop.eup %9907  ;;  %8554 = vmatmul.mubr.bf16.vlgmr.msra.gmra.mrb[36].mxu1 %v2466_v33  ;;  %v9696_v1 = vadd.f32 1e-09, %v2233_v37  ;;  %v2235_v23 = vpop.f32.mrb[35].mxu1  ;;  %v2454_v24 = vmul.f32 %v9906_v34, %v12176_v60  ;;  %v7659_v34 = vld [vmem:[%s16286_s8 + $0x30] sm:$0xff] }
 0x883   :  { %v9910_v31 = vpop.eup %9909  ;;  %v9697_v49 = vadd.f32 1e-09, %v2235_v23  ;;  %v2465_v10 = vpack.c.bf16 %v2450_v22, %v2447_v6  ;;  %8557 = vmatprep.mubr.msk.bf16.mxu1 %vm10269_vm0, %v16931_v48  ;;  %v2452_v57 = vmul.f32 %v9908_v21, %v12004_v46  ;;  %v7660_v6 = vld [vmem:[%s16286_s8 + $0x38] sm:$0xff] }
 0x884   :  { %v9912_v53 = vpop.eup %9911  ;;  %9923 = vrcp.f32 %v9696_v1  ;;  %v2469_v18 = vpack.c.bf16 %v2457_v61, %v2454_v24  ;;  %v2463_v47 = vmul.f32 %v9910_v31, %v12208_v12  ;;  %v2804_v22 = vpack.c.bf16 %v7660_v6, %v7659_v34 }
 0x885   :  { %v9914_v50 = vpop.eup %9913  ;;  %9925 = vrcp.f32 %v9697_v49  ;;  %2625 = vmatprep.mubr.bf16.mxu0 %v2465_v10  ;;  %v2453_v9 = vmul.f32 %v9912_v53, %v12001_v0 }
 0x886   :  { %v9916_v17 = vpop.eup %9915  ;;  %2626 = vmatmul.mubr.bf16.vlgmr.msra.gmra.mrb[56].mxu0 %v2464_v29  ;;  %v2460_v60 = vmul.f32 %v9914_v50, %v12195_v62 }
 0x887   :  { %v9918_v41 = vpop.eup %9917  ;;  %v2455_v45 = vmul.f32 %v9916_v17, %v12028_v44  ;;  %8566 = vmatpush3.bf16.msra.mxu0 %v2714_v35 }
 0x888   :  { %v2456_v28 = vmul.f32 %v9918_v41, %v12023_v52  ;;  %v2472_v59 = vpack.c.bf16 %v2463_v47, %v2460_v60  ;;  %8567 = vmatprep.subr.bf16.mxu0 %v16931_v48 }
 0x889   :  { %v2467_v12 = vpack.c.bf16 %v2455_v45, %v2452_v57 }
 0x88a   :  { %8558 = vmatmul.mubr.bf16.gmra.mrb[40].mxu1 %v2469_v18  ;;  %v2468_v58 = vpack.c.bf16 %v2456_v28, %v2453_v9  ;;  %v9920_v62 = vpop.eup %9919 }
 0x88b   :  { %8561 = vmatprep.mubr.msk.bf16.mxu1 %vm10269_vm0, %v16931_v48  ;;  %v9922_v38 = vpop.eup %9921  ;;  %v2458_v4 = vmul.f32 %v9920_v62, %v12064_v19  ;;  %v2709_v19 = vld [vmem:[%s16288_s10 + $0x10] sm:$0xff] }
 0x88c   :  { %2633 = vmatprep.mubr.bf16.mxu0 %v2468_v58  ;;  %v2459_v52 = vmul.f32 %v9922_v38, %v12055_v63  ;;  %v2710_v63 = vld [vmem:[%s16288_s10 + $0x18] sm:$0xff] }
 0x88e   :  { %v9924_v46 = vpop.eup %9923  ;;  %2634 = vmatmul.mubr.bf16.gmra.mrb[60].mxu0 %v2467_v12 }
 0x88f   :  { %v9926_v44 = vpop.eup %9925  ;;  %v2461_v0 = vmul.f32 %v9924_v46, %v12108_v20  ;;  %v7657_v20 = vld [vmem:[%s16286_s8 + $0x20] sm:$0xff] }
 0x890   :  { %v2462_v33 = vmul.f32 %v9926_v44, %v12079_v56  ;;  %v2715_v56 = vpack.c.bf16 %v2710_v63, %v2709_v19  ;;  %v2803_v37 = vpack.c.bf16 %v7658_v27, %v7657_v20 }
 0x891   :  { %v2470_v61 = vpack.c.bf16 %v2461_v0, %v2458_v4 }
 0x892   :  { %8562 = vmatmul.mubr.bf16.gmra.mrb[44].mxu1 %v2472_v59  ;;  %v2471_v16 = vpack.c.bf16 %v2462_v33, %v2459_v52  ;;  %8568 = vmatpush3.bf16.msra.mxu0 %v2715_v56 }
 0x893   :  { %8585 = vmatprep.mubr.msk.bf16.mxu1 %vm10269_vm0, %v16931_v48  ;;  %8582 = vmatpush3.bf16.msra.mxu1 %v2803_v37  ;;  %v7653_v37 = vld [vmem:[%s16289_s11] ss:$0 sm:$0xff] }
 0x894   :  { %2641 = vmatprep.mubr.bf16.mxu0 %v2471_v16  ;;  %8583 = vmatprep.subr.bf16.mxu1 %v16931_v48 }
 0x896   :  { %2642 = vmatmul.mubr.bf16.gmra.mrb[64].mxu0 %v2470_v61 }
 0x897   :  { %8569 = vmatprep.mubr.msk.bf16.mxu0 %vm10269_vm0, %v16931_v48  ;;  %8584 = vmatpush3.bf16.msra.mxu1 %v2804_v22 }
 0x898   :  { %8597 = vmatprep.subr.bf16.mxu1 %v16931_v48 }
 0x955   :  { %v2684_v29 = vpop.f32.mrb[36].mxu1 }
 0x956   :  { %v8555_v21 = vpop.f32.mrb[37].mxu1 }
 0x957   :  { %v2687_v1 = vpop.f32.mrb[38].mxu1 }
 0x958   :  { %v8556_v23 = vpop.f32.mrb[39].mxu1 }
 0x959   :  { %v7882_v24 = vpop.f32.mrb[56].mxu0 }
 0x95a   :  { %v7883_v31 = vpop.f32.mrb[57].mxu0 }
 0x95b   :  { %v7884_v49 = vadd.f32 %v7883_v31, %v7882_v24  ;;  %v7885_v10 = vpop.f32.mrb[58].mxu0  ;;  %v17088_v24 = vld [vmem:[#allocation9_spill] sm:$0xff] }
 0x95c   :  { %v7886_v35 = vpop.f32.mrb[59].mxu0 }
 0x95d   :  { %v2685_v53 = vadd.f32 %v7884_v49, %v2684_v29  ;;  %v7887_v18 = vadd.f32 %v7886_v35, %v7885_v10  ;;  %v2692_v47 = vpop.f32.mrb[40].mxu1  ;;  %v17090_v49 = vld [vmem:[#allocation10_spill] sm:$0xff] }
 0x95e   :  { %v8559_v50 = vpop.f32.mrb[41].mxu1 }
 0x95f   :  { %v2688_v17 = vadd.f32 %v7887_v18, %v2687_v1  ;;  %v2695_v60 = vpop.f32.mrb[42].mxu1 }
 0x960   :  { %v8560_v41 = vpop.f32.mrb[43].mxu1 }
 0x961   :  { %v2711_v57 = vpack.c.bf16 %v2688_v17, %v2685_v53  ;;  %v7888_v45 = vpop.f32.mrb[60].mxu0  ;;  %v17092_v41 = vld [vmem:[#allocation11_spill] sm:$0xff] }
 0x962   :  { %v7889_v9 = vpop.f32.mrb[61].mxu0 }
 0x963   :  { %v7890_v28 = vadd.f32 %v7889_v9, %v7888_v45  ;;  %v7891_v59 = vpop.f32.mrb[62].mxu0  ;;  %8570 = vmatmul.mubr.msk.bf16.vlgmr.msra.gmra.mrb[68].mxu0 %vm454_vm1, %v2711_v57  ;;  %v17094_v45 = vld [vmem:[#allocation12_spill] sm:$0xff] }
 0x964   :  { %v7892_v12 = vpop.f32.mrb[63].mxu0  ;;  %8573 = vmatprep.mubr.msk.bf16.mxu0 %vm10269_vm0, %v16931_v48 }
 0x965   :  { %v2693_v58 = vadd.f32 %v7890_v28, %v2692_v47  ;;  %v7893_v62 = vadd.f32 %v7892_v12, %v7891_v59  ;;  %v2700_v38 = vpop.f32.mrb[44].mxu1 }
 0x966   :  { %v8563_v46 = vpop.f32.mrb[45].mxu1 }
 0x967   :  { %v2696_v44 = vadd.f32 %v7893_v62, %v2695_v60  ;;  %v2703_v4 = vpop.f32.mrb[46].mxu1 }
 0x968   :  { %v8564_v0 = vpop.f32.mrb[47].mxu1 }
 0x969   :  { %v2712_v52 = vpack.c.bf16 %v2696_v44, %v2693_v58  ;;  %v7894_v33 = vpop.f32.mrb[64].mxu0  ;;  %v17096_v44 = vld [vmem:[#allocation13_spill] sm:$0xff]  ;;  %v17098_v0 = vld [vmem:[#allocation14_spill] sm:$0xff] }
 0x96a   :  { %v7895_v61 = vpop.f32.mrb[65].mxu0 }
 0x96b   :  { %v7896_v16 = vadd.f32 %v7895_v61, %v7894_v33  ;;  %v7897_v19 = vpop.f32.mrb[66].mxu0  ;;  %8574 = vmatmul.mubr.msk.bf16.gmra.mrb[72].mxu0 %vm454_vm1, %v2712_v52  ;;  %v12461_v61 = vld [vmem:[%s16287_s9 + $0x1] ss:$0 sm:$0xff] }
 0x96c   :  { %v7898_v63 = vpop.f32.mrb[67].mxu0  ;;  %8577 = vmatprep.mubr.msk.bf16.mxu0 %vm10269_vm0, %v16931_v48 }
 0x96d   :  { %v2701_v56 = vadd.f32 %v7896_v16, %v2700_v38  ;;  %v7899_v20 = vadd.f32 %v7898_v63, %v7897_v19 }
 0x96f   :  { %v2704_v27 = vadd.f32 %v7899_v20, %v2703_v4 }
 0x971   :  { %v2713_v34 = vpack.c.bf16 %v2704_v27, %v2701_v56 }
 0x973   :  { %8578 = vmatmul.mubr.msk.bf16.gmra.mrb[76].mxu0 %vm454_vm1, %v2713_v34  ;;  %v17100_v34 = vld [vmem:[#allocation18_spill] sm:$0xff] }
 0xa36   :  { %v2766_v6 = vpop.f32.mrb[68].mxu0 }
 0xa37   :  { %v2767_v22 = vadd.f32 %v7653_v37, %v2766_v6  ;;  %v8571_v29 = vpop.f32.mrb[69].mxu0  ;;  %v17101_v6 = vld [vmem:[#allocation24_spill] sm:$0xff] }
 0xa38   :  { %v2769_v21 = vpop.f32.mrb[70].mxu0  ;;  %v17102_v29 = vld [vmem:[#allocation32_spill] sm:$0xff] }
 0xa39   :  { %v2770_v1 = vadd.f32 %v7653_v37, %v2769_v21  ;;  %v8572_v23 = vpop.f32.mrb[71].mxu0  ;;  %v12426_v31 = vadd.f32 %v2767_v22, %v17088_v24  ;;  %v17119_v24 = vld [vmem:[#allocation60_spill] sm:$0xff] }
 0xa3b   :  { %17089 = vst [vmem:[#allocation219_spill] sm:$0xff] %v12426_v31  ;;  %v12429_v10 = vadd.f32 %v2770_v1, %v17090_v49  ;;  %v17103_v1 = vld [vmem:[#allocation34_spill] sm:$0xff] }
 0xa3d   :  { %17091 = vst [vmem:[#allocation220_spill] sm:$0xff] %v12429_v10  ;;  %v2800_v35 = vpack.c.bf16 %v12429_v10, %v12426_v31 }
 0xa3e   :  { %v2774_v53 = vpop.f32.mrb[72].mxu0 }
 0xa3f   :  { %v2775_v18 = vadd.f32 %v7653_v37, %v2774_v53  ;;  %v8575_v47 = vpop.f32.mrb[73].mxu0  ;;  %8586 = vmatmul.mubr.msk.bf16.vlgmr.msra.gmra.mrb[48].mxu1 %vm454_vm1, %v2800_v35  ;;  %v17104_v35 = vld [vmem:[#allocation42_spill] sm:$0xff] }
 0xa40   :  { %v2777_v50 = vpop.f32.mrb[74].mxu0  ;;  %8589 = vmatprep.mubr.msk.bf16.mxu1 %vm10269_vm0, %v16931_v48 }
 0xa41   :  { %v2778_v17 = vadd.f32 %v7653_v37, %v2777_v50  ;;  %v8576_v60 = vpop.f32.mrb[75].mxu0  ;;  %v12437_v57 = vadd.f32 %v2775_v18, %v17092_v41  ;;  %v17105_v18 = vld [vmem:[#allocation52_spill] sm:$0xff]  ;;  %v17107_v50 = vld [vmem:[#allocation50_spill] sm:$0xff] }
 0xa43   :  { %17093 = vst [vmem:[#allocation221_spill] sm:$0xff] %v12437_v57  ;;  %v12440_v9 = vadd.f32 %v2778_v17, %v17094_v45 }
 0xa45   :  { %17095 = vst [vmem:[#allocation222_spill] sm:$0xff] %v12440_v9  ;;  %v2801_v28 = vpack.c.bf16 %v12440_v9, %v12437_v57 }
 0xa46   :  { %v2782_v59 = vpop.f32.mrb[76].mxu0 }
 0xa47   :  { %v2783_v12 = vadd.f32 %v7653_v37, %v2782_v59  ;;  %v8579_v58 = vpop.f32.mrb[77].mxu0  ;;  %8590 = vmatmul.mubr.msk.bf16.gmra.mrb[52].mxu1 %vm454_vm1, %v2801_v28  ;;  %v17110_v28 = vld [vmem:[#allocation15_spill] sm:$0xff] }
 0xa48   :  { %v2785_v62 = vpop.f32.mrb[78].mxu0  ;;  %8593 = vmatprep.mubr.msk.bf16.mxu1 %vm10269_vm0, %v16931_v48 }
 0xa49   :  { %v2786_v38 = vadd.f32 %v7653_v37, %v2785_v62  ;;  %v8580_v46 = vpop.f32.mrb[79].mxu0  ;;  %v12448_v4 = vadd.f32 %v2783_v12, %v17096_v44  ;;  %v17111_v12 = vld [vmem:[#allocation23_spill] sm:$0xff] }
 0xa4a   :  { %v17112_v62 = vld [vmem:[#allocation31_spill] sm:$0xff]  ;;  %v17113_v46 = vld [vmem:[#allocation33_spill] sm:$0xff] }
 0xa4b   :  { %17097 = vst [vmem:[#allocation223_spill] sm:$0xff] %v12448_v4  ;;  %v12451_v52 = vadd.f32 %v2786_v38, %v17098_v0  ;;  %v17117_v0 = vld [vmem:[#allocation49_spill] sm:$0xff] }
 0xa4d   :  { %17099 = vst [vmem:[#allocation224_spill] sm:$0xff] %v12451_v52  ;;  %v2802_v33 = vpack.c.bf16 %v12451_v52, %v12448_v4 }
 0xa4f   :  { %8594 = vmatmul.mubr.msk.bf16.gmra.mrb[56].mxu1 %vm454_vm1, %v2802_v33 }
 0xa50   :  { %8613 = vmatprep.mubr.msk.bf16.mxu1 %vm10269_vm0, %v16931_v48  ;;  %v17152_v48 = vld [vmem:[#allocation46_spill] sm:$0xff] }
 0xb12   :  { %v2856_v16 = vpop.f32.mrb[48].mxu1 }
 0xb13   :  { %v12464_v19 = vadd.f32 %v12461_v61, %v2856_v16  ;;  %v8587_v63 = vpop.f32.mrb[49].mxu1  ;;  %v17114_v16 = vld [vmem:[#allocation41_spill] sm:$0xff] }
 0xb14   :  { %v2859_v56 = vpop.f32.mrb[50].mxu1 }
 0xb15   :  { %v12467_v20 = vadd.f32 %v12461_v61, %v2859_v56  ;;  %v8588_v27 = vpop.f32.mrb[51].mxu1  ;;  %v2879_v37 = vmul.f32 %v12464_v19, %v17100_v34  ;;  %v12473_v22 = vmul.f32 %v12464_v19, %v17101_v6  ;;  %v12477_v21 = vmul.f32 %v12464_v19, %v17102_v29  ;;  %v17115_v56 = vld [vmem:[#allocation51_spill] sm:$0xff]  ;;  %v17137_v29 = vld [vmem:[#allocation21_spill] sm:$0xff] }
 0xb16   :  { %v12481_v23 = vmul.f32 %v12464_v19, %v17103_v1  ;;  %v12485_v53 = vmul.f32 %v12464_v19, %v17104_v35  ;;  %v12489_v47 = vmul.f32 %v12464_v19, %v17105_v18  ;;  %v12493_v17 = vmul.f32 %v12464_v19, %v17107_v50  ;;  %v17136_v1 = vld [vmem:[#allocation19_spill] sm:$0xff] }
 0xb17   :  { %v12497_v60 = vpack.c.bf16 %v12467_v20, %v12464_v19  ;;  %v2880_v59 = vmul.f32 %v12467_v20, %v17110_v28  ;;  %v12503_v58 = vmul.f32 %v12467_v20, %v17111_v12  ;;  %v12507_v38 = vmul.f32 %v12467_v20, %v17112_v62  ;;  %v17129_v12 = vld [vmem:[#allocation22_spill] sm:$0xff] }
 0xb18   :  { %17106 = vst [vmem:[#allocation225_spill] sm:$0xff] %v12489_v47  ;;  %17108 = vst [vmem:[#allocation226_spill] sm:$0xff] %v12493_v17  ;;  %v12511_v33 = vmul.f32 %v12467_v20, %v17113_v46  ;;  %v12515_v63 = vmul.f32 %v12467_v20, %v17114_v16  ;;  %v12519_v27 = vmul.f32 %v12467_v20, %v17115_v56 }
 0xb19   :  { %17109 = vst [vmem:[#allocation227_spill] sm:$0xff] %v12497_v60  ;;  %v12523_v44 = vmul.f32 %v12467_v20, %v17117_v0  ;;  %7937 = vmatprep.mubr.msk.bf16.mxu0 %vm454_vm1, %v12497_v60  ;;  %v2978_v45 = vpack.c.bf16 %v2880_v59, %v2879_v37  ;;  %v12533_v16 = vmul.f32 %v12464_v19, %v17119_v24  ;;  %v17121_v24 = vld [vmem:[#allocation59_spill] sm:$0xff]  ;;  %v17151_v60 = vld [vmem:[#allocation44_spill] sm:$0xff] }
 0xb1a   :  { %17116 = vst [vmem:[#allocation228_spill] sm:$0xff] %v12519_v27  ;;  %v2864_v56 = vpop.f32.mrb[52].mxu1  ;;  %v12549_v62 = vmul.f32 %v12467_v20, %v17121_v24  ;;  %v12553_v46 = vmul.f32 %v12464_v19, %v12008_v14  ;;  %v12557_v37 = vmul.f32 %v12467_v20, %v12034_v43  ;;  %v12573_v59 = vmul.f32 %v12467_v20, %v12226_v25  ;;  %v17128_v24 = vld [vmem:[#allocation20_spill] sm:$0xff]  ;;  %v17132_v25 = vld [vmem:[#allocation38_spill] sm:$0xff] }
 0xb1b   :  { %17118 = vst [vmem:[#allocation229_spill] sm:$0xff] %v12523_v44  ;;  %17120 = vst [vmem:[#allocation230_spill] sm:$0xff] %v12533_v16  ;;  %v12544_v41 = vadd.f32 %v12461_v61, %v2864_v56  ;;  %3026 = vrot.lane.b32.xlu0 %v2978_v45, %s10271_s5  ;;  %v8591_v49 = vpop.f32.mrb[53].mxu1  ;;  %v12561_v56 = vmul.f32 %v12464_v19, %v11992_v40  ;;  %v12569_v45 = vmul.f32 %v12464_v19, %v12192_v5  ;;  %v17131_v5 = vld [vmem:[#allocation40_spill] sm:$0xff]  ;;  %v17157_v16 = vld [vmem:[#allocation25_spill] sm:$0xff] }
 0xb1c   :  { %17122 = vst [vmem:[#allocation231_spill] sm:$0xff] %v12549_v62  ;;  %17123 = vst [vmem:[#allocation232_spill] sm:$0xff] %v12553_v46  ;;  %v2867_v0 = vpop.f32.mrb[54].mxu1  ;;  %v12565_v49 = vmul.f32 %v12467_v20, %v12061_v30  ;;  %v17130_v30 = vld [vmem:[#allocation30_spill] sm:$0xff]  ;;  %v17147_v46 = vld [vmem:[#allocation16_spill] sm:$0xff] }
 0xb1d   :  { %17124 = vst [vmem:[#allocation233_spill] sm:$0xff] %v12557_v37  ;;  %17125 = vst [vmem:[#allocation234_spill] sm:$0xff] %v12561_v56  ;;  %v12576_v43 = vadd.f32 %v12461_v61, %v2867_v0  ;;  %v8592_v14 = vpop.f32.mrb[55].mxu1  ;;  %v2911_v40 = vmul.f32 %v12544_v41, %v17128_v24  ;;  %v12582_v28 = vmul.f32 %v12544_v41, %v17129_v12  ;;  %v17134_v24 = vld [vmem:[#allocation56_spill] sm:$0xff]  ;;  %v17159_v44 = vld [vmem:[#allocation43_spill] sm:$0xff] }
 0xb1e   :  { %17126 = vst [vmem:[#allocation235_spill] sm:$0xff] %v12565_v49  ;;  %17127 = vst [vmem:[#allocation236_spill] sm:$0xff] %v12569_v45  ;;  %v12586_v50 = vmul.f32 %v12544_v41, %v17130_v30  ;;  %v12590_v18 = vmul.f32 %v12544_v41, %v17131_v5  ;;  %v12594_v0 = vmul.f32 %v12544_v41, %v17132_v25  ;;  %v17133_v14 = vld [vmem:[#allocation48_spill] sm:$0xff]  ;;  %v17138_v5 = vld [vmem:[#allocation29_spill] sm:$0xff] }
 0xb1f   :  { %v12598_v35 = vmul.f32 %v12544_v41, %v17133_v14  ;;  %v12602_v12 = vmul.f32 %v12544_v41, %v17134_v24  ;;  %v2912_v30 = vmul.f32 %v12576_v43, %v17136_v1  ;;  %v12608_v6 = vmul.f32 %v12576_v43, %v17137_v29  ;;  %v17139_v25 = vld [vmem:[#allocation39_spill] sm:$0xff]  ;;  %v17140_v14 = vld [vmem:[#allocation37_spill] sm:$0xff]  ;;  %v17162_v27 = vld [vmem:[#allocation62_spill] sm:$0xff] }
 0xb20   :  { %v12612_v34 = vmul.f32 %v12576_v43, %v17138_v5  ;;  %v12616_v52 = vmul.f32 %v12576_v43, %v17139_v25  ;;  %v12620_v4 = vmul.f32 %v12576_v43, %v17140_v14  ;;  %v17141_v24 = vld [vmem:[#allocation47_spill] sm:$0xff]  ;;  %v17145_v14 = vld [vmem:[#allocation57_spill] sm:$0xff] }
 0xb21   :  { %17135 = vst [vmem:[#allocation237_spill] sm:$0xff] %v12602_v12  ;;  %v12624_v9 = vmul.f32 %v12576_v43, %v17141_v24  ;;  %v17142_v1 = vld [vmem:[#allocation55_spill] sm:$0xff]  ;;  %v2994_v57 = vpack.c.bf16 %v2912_v30, %v2911_v40  ;;  %v2979_v25 = vpack.c.bf16 %v12608_v6, %v12582_v28  ;;  %v17144_v40 = vld [vmem:[#allocation58_spill] sm:$0xff]  ;;  %v12654_v10 = vmul.f32 %v12576_v43, %v17145_v14  ;;  %v17160_v12 = vld [vmem:[#allocation45_spill] sm:$0xff] }
 0xb22   :  { %v12628_v29 = vmul.f32 %v12576_v43, %v17142_v1  ;;  %v2872_v31 = vpop.f32.mrb[56].mxu1  ;;  %v12646_v30 = vmul.f32 %v12544_v41, %v17144_v40  ;;  %v12658_v1 = vpack.c.bf16 %v12576_v43, %v12544_v41  ;;  %v17148_v40 = vld [vmem:[#allocation28_spill] sm:$0xff] }
 0xb23   :  { %v12649_v6 = vadd.f32 %v12461_v61, %v2872_v31  ;;  %3058 = vrot.lane.b32.xlu0 %v2994_v57, %s10271_s5  ;;  %v8595_v28 = vpop.f32.mrb[57].mxu1  ;;  %v12666_v31 = vmul.f32 %v12544_v41, %v12048_v32  ;;  %v12670_v57 = vmul.f32 %v12576_v43, %v12123_v7  ;;  %v17149_v32 = vld [vmem:[#allocation26_spill] sm:$0xff] }
 0xb24   :  { %17143 = vst [vmem:[#allocation238_spill] sm:$0xff] %v12628_v29  ;;  %17146 = vst [vmem:[#allocation239_spill] sm:$0xff] %v12658_v1  ;;  %v2875_v24 = vpop.f32.mrb[58].mxu1  ;;  %v12674_v28 = vmul.f32 %v12544_v41, %v12016_v15  ;;  %v17150_v1 = vld [vmem:[#allocation36_spill] sm:$0xff] }
 0xb25   :  { %v12677_v14 = vadd.f32 %v12461_v61, %v2875_v24  ;;  %v8596_v5 = vpop.f32.mrb[59].mxu1  ;;  %v2895_v37 = vmul.f32 %v12649_v6, %v17147_v46  ;;  %v2883_v56 = vmul.f32 %v12649_v6, %v17148_v40  ;;  %v2913_v49 = vmul.f32 %v12649_v6, %v17149_v32  ;;  %v17155_v32 = vld [vmem:[#allocation17_spill] sm:$0xff]  ;;  %v17156_v46 = vld [vmem:[#allocation27_spill] sm:$0xff] }
 0xb26   :  { %v2901_v7 = vmul.f32 %v12649_v6, %v17150_v1  ;;  %v12689_v15 = vmul.f32 %v12649_v6, %v17151_v60  ;;  %v12693_v24 = vmul.f32 %v12649_v6, %v17152_v48  ;;  %v17153_v5 = vld [vmem:[#allocation54_spill] sm:$0xff]  ;;  %v17154_v40 = vpack.c.bf16 %v12503_v58, %v12473_v22  ;;  %v17158_v48 = vld [vmem:[#allocation35_spill] sm:$0xff]  ;;  %v17161_v58 = vld [vmem:[#allocation53_spill] sm:$0xff] }
 0xb27   :  { %v12697_v61 = vmul.f32 %v12649_v6, %v17153_v5  ;;  %v2896_v1 = vmul.f32 %v12677_v14, %v17155_v32  ;;  %v2884_v60 = vmul.f32 %v12677_v14, %v17156_v46  ;;  %v2914_v62 = vmul.f32 %v12677_v14, %v17157_v16 }
 0xb28   :  { %3044 = vrot.lane.b32.xlu0 %v17154_v40, %s10271_s5  ;;  %v2902_v17 = vmul.f32 %v12677_v14, %v17158_v48  ;;  %v12713_v5 = vmul.f32 %v12677_v14, %v17159_v44  ;;  %v12717_v22 = vmul.f32 %v12677_v14, %v17160_v12  ;;  %v12721_v40 = vmul.f32 %v12677_v14, %v17161_v58  ;;  %v17168_v12 = vld [vmem:[#allocation193_spill] sm:$0xff] }
 0xb29   :  { %v2986_v32 = vpack.c.bf16 %v2896_v1, %v2895_v37  ;;  %v2980_v16 = vpack.c.bf16 %v2884_v60, %v2883_v56  ;;  %v2995_v29 = vpack.c.bf16 %v2914_v62, %v2913_v49  ;;  %v12733_v58 = vmul.f32 %v12649_v6, %v17162_v27  ;;  %v17163_v1 = vld [vmem:[#allocation61_spill] sm:$0xff] }
 0xb2a   :  { %v2989_v47 = vpack.c.bf16 %v2902_v17, %v2901_v7  ;;  %v12739_v7 = vmul.f32 %v12677_v14, %v17163_v1  ;;  %v12743_v17 = vpack.c.bf16 %v12677_v14, %v12649_v6  ;;  %v12747_v60 = vmul.f32 %v12649_v6, %v11968_v11  ;;  %v17182_v11 = vld [vmem:[#allocation200_spill] sm:$0xff]  ;;  %v17186_v1 = vld [vmem:[#allocation206_spill] sm:$0xff] }
 0xb2b   :  { %3042 = vrot.lane.b32.xlu1 %v2986_v32, %s10271_s5  ;;  %v12751_v62 = vmul.f32 %v12677_v14, %v11977_v55  ;;  %v12761_v37 = vmul.f32 %v12649_v6, %v12110_v51  ;;  %v12767_v49 = vmul.f32 %v12677_v14, %v12160_v42  ;;  %v12771_v46 = vmul.f32 %v12544_v41, %v12081_v36 }
 0xb2c   :  { %3030 = vrot.lane.b32.xlu0 %v2980_v16, %s10271_s5  ;;  %v12757_v16 = vmul.f32 %v12576_v43, %v12093_v2  ;;  %v12775_v32 = vmul.f32 %v12576_v43, %v12144_v3  ;;  %v12783_v56 = vmul.f32 %v12649_v6, %v12157_v39  ;;  %v12787_v48 = vmul.f32 %v12677_v14, %v12199_v54  ;;  %v17170_v54 = vld [vmem:[#allocation198_spill] sm:$0xff] }
 0xb2d   :  { %v17164_v3 = vpack.c.bf16 %v12507_v38, %v12477_v21  ;;  %v12800_v39 = vmul.f32 %v12649_v6, %v12135_v8  ;;  %v12812_v21 = vmul.f32 %v12464_v19, %v12172_v26  ;;  %v17166_v38 = vld [vmem:[#allocation192_spill] sm:$0xff]  ;;  %v12820_v8 = vmul.f32 %v12544_v41, %v17168_v12  ;;  %v17178_v12 = vld [vmem:[#allocation202_spill] sm:$0xff] }
 0xb2e   :  { %v12816_v44 = vmul.f32 %v12467_v20, %v17166_v38  ;;  %v12824_v36 = vmul.f32 %v12576_v43, %v17170_v54  ;;  %v17174_v26 = vld [vmem:[#allocation196_spill] sm:$0xff]  ;;  %v17176_v38 = vld [vmem:[#allocation197_spill] sm:$0xff]  ;;  %v12842_v55 = vmul.f32 %v12576_v43, %v17178_v12 }
 0xb2f   :  { %3028 = vrot.lane.b32.xlu1 %v2979_v25, %s10271_s5  ;;  %v12806_v25 = vmul.f32 %v12677_v14, %v12180_v13  ;;  %17165 = vst [vmem:[#allocation240_spill] sm:$0xff] %v12812_v21  ;;  %17169 = vst [vmem:[#allocation242_spill] sm:$0xff] %v12820_v8  ;;  %v17172_v13 = vld [vmem:[#allocation191_spill] sm:$0xff]  ;;  %v12834_v51 = vmul.f32 %v12467_v20, %v17174_v26  ;;  %v12838_v2 = vmul.f32 %v12544_v41, %v17176_v38  ;;  %v17190_v38 = vld [vmem:[#allocation204_spill] sm:$0xff] }
 0xb30   :  { %3062 = vrot.lane.b32.xlu0 %v17164_v3, %s10271_s5  ;;  %17167 = vst [vmem:[#allocation241_spill] sm:$0xff] %v12816_v44  ;;  %17171 = vst [vmem:[#allocation243_spill] sm:$0xff] %v12824_v36  ;;  %v12828_v42 = vmul.f32 %v12464_v19, %v17172_v13  ;;  %v17180_v26 = vld [vmem:[#allocation195_spill] sm:$0xff]  ;;  %v12868_v3 = vmul.f32 %v12677_v14, %v17186_v1  ;;  %v17192_v12 = vld [vmem:[#allocation205_spill] sm:$0xff] }
 0xb31   :  { %17175 = vst [vmem:[#allocation245_spill] sm:$0xff] %v12834_v51  ;;  %17177 = vst [vmem:[#allocation246_spill] sm:$0xff] %v12838_v2  ;;  %v12852_v54 = vmul.f32 %v12544_v41, %v17180_v26  ;;  %v17188_v26 = vld [vmem:[#allocation199_spill] sm:$0xff]  ;;  %v17194_v2 = vld [vmem:[#allocation210_spill] sm:$0xff] }
 0xb32   :  { %17173 = vst [vmem:[#allocation244_spill] sm:$0xff] %v12828_v42  ;;  %17179 = vst [vmem:[#allocation247_spill] sm:$0xff] %v12842_v55  ;;  %v12872_v27 = vmul.f32 %v12649_v6, %v17188_v26  ;;  %v12876_v42 = vmul.f32 %v12677_v14, %v17190_v38  ;;  %v12886_v55 = vmul.f32 %v12467_v20, %v17194_v2  ;;  %v17196_v1 = vld [vmem:[#allocation203_spill] sm:$0xff]  ;;  %v17198_v26 = vld [vmem:[#allocation208_spill] sm:$0xff] }
 0xb33   :  { %3060 = vrot.lane.b32.xlu1 %v2995_v29, %s10271_s5  ;;  %17181 = vst [vmem:[#allocation248_spill] sm:$0xff] %v12852_v54  ;;  %v12860_v29 = vmul.f32 %v12576_v43, %v17182_v11  ;;  %17187 = vst [vmem:[#allocation251_spill] sm:$0xff] %v12868_v3  ;;  %v12880_v11 = vmul.f32 %v12464_v19, %v17192_v12  ;;  %v12890_v51 = vmul.f32 %v12649_v6, %v17196_v1  ;;  %v17202_v38 = vld [vmem:[#allocation209_spill] sm:$0xff]  ;;  %v17210_v2 = vld [vmem:[#allocation214_spill] sm:$0xff] }
 0xb34   :  { %3048 = vrot.lane.b32.xlu0 %v2989_v47, %s10271_s5  ;;  %v17184_v47 = vld [vmem:[#allocation201_spill] sm:$0xff]  ;;  %17189 = vst [vmem:[#allocation252_spill] sm:$0xff] %v12872_v27  ;;  %17191 = vst [vmem:[#allocation253_spill] sm:$0xff] %v12876_v42  ;;  %v12894_v8 = vmul.f32 %v12677_v14, %v17198_v26  ;;  %v17200_v12 = vpack.c.bf16 %v12612_v34, %v12586_v50  ;;  %v12910_v26 = vmul.f32 %v12464_v19, %v17202_v38  ;;  %v17212_v54 = vld [vmem:[#allocation216_spill] sm:$0xff] }
 0xb35   :  { %17183 = vst [vmem:[#allocation249_spill] sm:$0xff] %v12860_v29  ;;  %v12864_v13 = vmul.f32 %v12649_v6, %v17184_v47  ;;  %17193 = vst [vmem:[#allocation254_spill] sm:$0xff] %v12880_v11  ;;  %v17201_v47 = vpack.c.bf16 %v12616_v52, %v12590_v18  ;;  %v17204_v50 = vld [vmem:[#allocation213_spill] sm:$0xff]  ;;  %v17206_v18 = vld [vmem:[#allocation207_spill] sm:$0xff]  ;;  %v12930_v38 = vmul.f32 %v12544_v41, %v17210_v2 }
 0xb36   :  { %17195 = vst [vmem:[#allocation255_spill] sm:$0xff] %v12886_v55  ;;  %17197 = vst [vmem:[#allocation256_spill] sm:$0xff] %v12890_v51  ;;  %v12918_v52 = vmul.f32 %v12467_v20, %v17204_v50  ;;  %v12934_v11 = vmul.f32 %v12576_v43, %v17212_v54  ;;  %v17214_v34 = vld [vmem:[#allocation212_spill] sm:$0xff]  ;;  %v17220_v2 = vld [vmem:[#allocation218_spill] sm:$0xff] }
 0xb37   :  { %17185 = vst [vmem:[#allocation250_spill] sm:$0xff] %v12864_v13  ;;  %17199 = vst [vmem:[#allocation257_spill] sm:$0xff] %v12894_v8  ;;  %3046 = vrot.lane.b32.xlu1 %v17200_v12, %s10271_s5  ;;  %v12922_v12 = vmul.f32 %v12464_v19, %v17206_v18  ;;  %v12938_v50 = vmul.f32 %v12544_v41, %v17214_v34  ;;  %v17216_v18 = vld [vmem:[#allocation215_spill] sm:$0xff]  ;;  %v12952_v8 = vmul.f32 %v12677_v14, %v17220_v2  ;;  %v17259_v2 = vld [vmem:[#allocation69_spill] sm:$0xff] }
 0xb38   :  { %3034 = vrot.lane.b32.xlu0 %v17201_v47, %s10271_s5  ;;  %17203 = vst [vmem:[#allocation258_spill] sm:$0xff] %v12910_v26  ;;  %17205 = vst [vmem:[#allocation259_spill] sm:$0xff] %v12918_v52  ;;  %v17208_v47 = vld [vmem:[#allocation211_spill] sm:$0xff]  ;;  %v12944_v51 = vmul.f32 %v12576_v43, %v17216_v18  ;;  %v17222_v41 = vpack.c.bf16 %v12511_v33, %v12481_v23  ;;  %v17223_v19 = vpack.c.bf16 %v12713_v5, %v12689_v15  ;;  %v17227_v5 = vld [vmem:[#allocation228_spill] sm:$0xff] }
 0xb39   :  { %17207 = vst [vmem:[#allocation260_spill] sm:$0xff] %v12922_v12  ;;  %v12926_v1 = vmul.f32 %v12467_v20, %v17208_v47  ;;  %17211 = vst [vmem:[#allocation262_spill] sm:$0xff] %v12930_v38  ;;  %v17218_v20 = vld [vmem:[#allocation217_spill] sm:$0xff]  ;;  %v17224_v23 = vpack.c.bf16 %v12620_v4, %v12594_v0  ;;  %v17225_v15 = vpack.c.bf16 %v12624_v9, %v12598_v35  ;;  %v17231_v0 = vld [vmem:[#allocation238_spill] sm:$0xff] }
 0xb3a   :  { %17213 = vst [vmem:[#allocation263_spill] sm:$0xff] %v12934_v11  ;;  %17215 = vst [vmem:[#allocation264_spill] sm:$0xff] %v12938_v50  ;;  %v12948_v47 = vmul.f32 %v12649_v6, %v17218_v20  ;;  %v17226_v33 = vpack.c.bf16 %v12515_v63, %v12485_v53  ;;  %v17230_v4 = vpack.c.bf16 %v12717_v22, %v12693_v24  ;;  %v17234_v35 = vld [vmem:[#allocation229_spill] sm:$0xff]  ;;  %v17237_v63 = vld [vmem:[#allocation231_spill] sm:$0xff] }
 0xb3b   :  { %17209 = vst [vmem:[#allocation261_spill] sm:$0xff] %v12926_v1  ;;  %17217 = vst [vmem:[#allocation265_spill] sm:$0xff] %v12944_v51  ;;  %3032 = vrot.lane.b32.xlu1 %v17222_v41, %s10271_s5  ;;  %v17240_v24 = vpack.c.bf16 %v12721_v40, %v12697_v61  ;;  %v17241_v22 = vpack.c.bf16 %v12654_v10, %v12646_v30  ;;  %v13034_v10 = vld [vmem:[%s17243_s3 + $0x8] sm:$0xff]  ;;  %v13051_v30 = vld [vmem:[%s17243_s3 + $0x10] sm:$0xff] }
 0xb3c   :  { %17219 = vst [vmem:[#allocation266_spill] sm:$0xff] %v12948_v47  ;;  %17221 = vst [vmem:[#allocation267_spill] sm:$0xff] %v12952_v8  ;;  %3066 = vrot.lane.b32.xlu0 %v17223_v19, %s10271_s5  ;;  %v17228_v19 = vld [vmem:[#allocation225_spill] sm:$0xff]  ;;  %v17261_v6 = vld [vmem:[#allocation70_spill] sm:$0xff] }
 0xb3d   :  { %v17229_v41 = vpack.c.bf16 %v17227_v5, %v17228_v19  ;;  %v17242_v19 = vpack.c.bf16 %v12739_v7, %v12733_v58  ;;  %v13072_v58 = vld [vmem:[%s17243_s3 + $0x18] sm:$0xff]  ;;  %v17260_v14 = vld [vmem:[#allocation121_spill] sm:$0xff] }
 0xb3e   :  { %v17262_v43 = vld [vmem:[#allocation123_spill] sm:$0xff] }
 0xb3f   :  { %3064 = vrot.lane.b32.xlu1 %v17224_v23, %s10271_s5  ;;  %v17232_v23 = vld [vmem:[#allocation237_spill] sm:$0xff] }
 0xb40   :  { %3052 = vrot.lane.b32.xlu0 %v17225_v15, %s10271_s5  ;;  %v17233_v9 = vpack.c.bf16 %v17231_v0, %v17232_v23  ;;  %v17235_v15 = vld [vmem:[#allocation226_spill] sm:$0xff] }
 0xb41   :  { %v17236_v53 = vpack.c.bf16 %v17234_v35, %v17235_v15 }
 0xb43   :  { %3050 = vrot.lane.b32.xlu1 %v17226_v33, %s10271_s5  ;;  %v17238_v33 = vld [vmem:[#allocation230_spill] sm:$0xff] }
 0xb44   :  { %3038 = vrot.lane.b32.xlu0 %v17229_v41, %s10271_s5  ;;  %v17239_v5 = vpack.c.bf16 %v17237_v63, %v17238_v33  ;;  %v13017_v41 = vld [vmem:[%s17243_s3] sm:$0xff] }
 0xb47   :  { %3036 = vrot.lane.b32.xlu1 %v17230_v4, %s10271_s5  ;;  %v17244_v4 = vmov 0.0  }
 0xb48   :  { %3070 = vrot.lane.b32.xlu0 %v17233_v9, %s10271_s5 }
 0xb4b   :  { %3068 = vrot.lane.b32.xlu1 %v17236_v53, %s10271_s5  ;;  %v13094_v53 = vld [vmem:[%s17243_s3 + $0x20] sm:$0xff] }
 0xb4c   :  { %3056 = vrot.lane.b32.xlu0 %v17239_v5, %s10271_s5 }
 0xb4f   :  { %3054 = vrot.lane.b32.xlu1 %v17240_v24, %s10271_s5 }
 0xb50   :  { %534 = vrot.lane.b32.xlu0 %v13017_v41, %s10271_s5 }
 0xb53   :  { %3040 = vrot.lane.b32.xlu1 %v17241_v22, %s10271_s5 }
 0xb54   :  { %516 = vrot.lane.b32.xlu0 %v13017_v41, %s10273_s26 }
 0xb57   :  { %3072 = vrot.lane.b32.xlu1 %v17242_v19, %s10271_s5 }
 0xb58   :  { %588 = vrot.lane.b32.xlu0 %v13017_v41, %s10275_s27 }
 0xb5b   :  { %552 = vrot.lane.b32.xlu1 %v13017_v41, %s10272_s17 }
 0xb5c   :  { %624 = vrot.lane.b32.xlu0 %v13017_v41, %s10276_s0 }
 0xb5f   :  { %570 = vrot.lane.b32.xlu1 %v13017_v41, %s10274_s2 }
 0xb60   :  { %554 = vrot.lane.b32.xlu0 %v13034_v10, %s10272_s17 }
 0xb63   :  { %606 = vrot.lane.b32.xlu1 %v13017_v41, %s10270_s29 }
 0xb64   :  { %572 = vrot.lane.b32.xlu0 %v13034_v10, %s10274_s2 }
 0xb67   :  { %536 = vrot.lane.b32.xlu1 %v13034_v10, %s10271_s5 }
 0xb68   :  { %608 = vrot.lane.b32.xlu0 %v13034_v10, %s10270_s29 }
 0xb6b   :  { %518 = vrot.lane.b32.xlu1 %v13034_v10, %s10273_s26 }
 0xb6c   :  { %556 = vrot.lane.b32.xlu0 %v13051_v30, %s10272_s17 }
 0xb6f   :  { %590 = vrot.lane.b32.xlu1 %v13034_v10, %s10275_s27 }
 0xb70   :  { %520 = vrot.lane.b32.xlu0 %v13051_v30, %s10273_s26 }
 0xb73   :  { %538 = vrot.lane.b32.xlu1 %v13051_v30, %s10271_s5 }
 0xb74   :  { %592 = vrot.lane.b32.xlu0 %v13051_v30, %s10275_s27 }
 0xb77   :  { %626 = vrot.lane.b32.xlu1 %v13034_v10, %s10276_s0 }
 0xb78   :  { %540 = vrot.lane.b32.xlu0 %v13072_v58, %s10271_s5 }
 0xb7b   :  { %574 = vrot.lane.b32.xlu1 %v13051_v30, %s10274_s2 }
 0xb7c   :  { %628 = vrot.lane.b32.xlu0 %v13051_v30, %s10276_s0 }
 0xb7f   :  { %610 = vrot.lane.b32.xlu1 %v13051_v30, %s10270_s29 }
 0xb80   :  { %576 = vrot.lane.b32.xlu0 %v13072_v58, %s10274_s2 }
 0xb83   :  { %558 = vrot.lane.b32.xlu1 %v13072_v58, %s10272_s17 }
 0xb84   :  { %612 = vrot.lane.b32.xlu0 %v13072_v58, %s10270_s29 }
 0xb87   :  { %522 = vrot.lane.b32.xlu1 %v13072_v58, %s10273_s26 }
 0xb88   :  { %560 = vrot.lane.b32.xlu0 %v13094_v53, %s10272_s17 }
 0xb8b   :  { %594 = vrot.lane.b32.xlu1 %v13072_v58, %s10275_s27 }
 0xb8c   :  { %524 = vrot.lane.b32.xlu0 %v13094_v53, %s10273_s26 }
 0xb8d   :  { %v3027_v61 = vpop.permute.xlu0 %3026 }
 0xb8e   :  { %v3084_v9 = vsel %vm454_vm1, %v3027_v61, 0 }
 0xb8f   :  { %542 = vrot.lane.b32.xlu1 %v13094_v53, %s10271_s5 }
 0xb90   :  { %596 = vrot.lane.b32.xlu0 %v13094_v53, %s10275_s27 }
 0xb93   :  { %630 = vrot.lane.b32.xlu1 %v13072_v58, %s10276_s0 }
 0xb95   :  { %v3059_v40 = vpop.permute.xlu0 %3058 }
 0xb96   :  { %v3132_v7 = vsel %vm454_vm1, %v3059_v40, 0 }
 0xb97   :  { %8598 = vmatpush3.bf16.xpose.msra.mxu1 %v3132_v7  ;;  %578 = vrot.lane.b32.xlu1 %v13094_v53, %s10274_s2 }
 0xb98   :  { %8599 = vmatprep.subr.bf16.mxu1 %v17244_v4 }
 0xb9a   :  { %v3045_v0 = vpop.permute.xlu0 %3044 }
 0xb9b   :  { %614 = vrot.lane.b32.xlu1 %v13094_v53, %s10270_s29 }
 0xb9d   :  { %v3043_v23 = vpop.permute.xlu1 %3042 }
 0xb9e   :  { %9790 = vmatprep.subr.msk.bf16.mxu0 %vm454_vm1, %v3043_v23  ;;  %v3031_v35 = vpop.permute.xlu0 %3030 }
 0xb9f   :  { %7922 = vmatpush3.bf16.xpose.msra.mxu0 %v3084_v9  ;;  %v3090_v40 = vsel %vm454_vm1, %v3031_v35, 0  ;;  %v13123_v9 = vld [vmem:[%s17243_s3 + $0x28] sm:$0xff] }
 0xba0   :  { %9791 = vmatprep.subr.msk.bf16.mxu0 %vm454_vm1, %v3045_v0  ;;  %544 = vrot.lane.b32.xlu0 %v13123_v9, %s10271_s5 }
 0xba1   :  { %v3029_v15 = vpop.permute.xlu1 %3028  ;;  %562 = vrot.lane.b32.xlu1 %v13123_v9, %s10272_s17 }
 0xba2   :  { %v3063_v63 = vpop.permute.xlu0 %3062  ;;  %v3087_v5 = vsel %vm454_vm1, %v3029_v15, 0 }
 0xba3   :  { %v3138_v7 = vsel %vm454_vm1, %v3063_v63, 0 }
 0xba4   :  { %632 = vrot.lane.b32.xlu0 %v13094_v53, %s10276_s0 }
 0xba5   :  { %v3061_v33 = vpop.permute.xlu1 %3060  ;;  %526 = vrot.lane.b32.xlu1 %v13123_v9, %s10273_s26 }
 0xba6   :  { %v3135_v24 = vsel %vm454_vm1, %v3061_v33, 0  ;;  %v3049_v19 = vpop.permute.xlu0 %3048 }
 0xba7   :  { %7924 = vmatpush3.bf16.xpose.msra.mxu0 %v3087_v5  ;;  %8600 = vmatpush3.bf16.xpose.msra.mxu1 %v3135_v24 }
 0xba8   :  { %8601 = vmatprep.subr.bf16.mxu1 %v17244_v4  ;;  %580 = vrot.lane.b32.xlu0 %v13123_v9, %s10274_s2 }
 0xba9   :  { %v3047_v22 = vpop.permute.xlu1 %3046  ;;  %598 = vrot.lane.b32.xlu1 %v13123_v9, %s10275_s27 }
 0xbaa   :  { %9792 = vmatprep.subr.msk.bf16.mxu0 %vm454_vm1, %v3047_v22  ;;  %v3035_v0 = vpop.permute.xlu0 %3034 }
 0xbab   :  { %v3096_v22 = vsel %vm454_vm1, %v3035_v0, 0 }
 0xbac   :  { %616 = vrot.lane.b32.xlu0 %v13123_v9, %s10270_s29 }
 0xbad   :  { %v3033_v61 = vpop.permute.xlu1 %3032  ;;  %634 = vrot.lane.b32.xlu1 %v13123_v9, %s10276_s0 }
 0xbae   :  { %v3093_v15 = vsel %vm454_vm1, %v3033_v61, 0  ;;  %v3067_v33 = vpop.permute.xlu0 %3066 }
 0xbaf   :  { %7926 = vmatpush3.bf16.xpose.msra.mxu0 %v3090_v40  ;;  %8602 = vmatpush3.bf16.xpose.msra.mxu1 %v3138_v7 }
 0xbb0   :  { %9793 = vmatprep.subr.msk.bf16.mxu0 %vm454_vm1, %v3049_v19  ;;  %8603 = vmatprep.subr.bf16.mxu1 %v17244_v4  ;;  %v3144_v19 = vsel %vm454_vm1, %v3067_v33, 0 }
 0xbb1   :  { %v3065_v23 = vpop.permute.xlu1 %3064 }
 0xbb2   :  { %v3141_v63 = vsel %vm454_vm1, %v3065_v23, 0  ;;  %v3053_v24 = vpop.permute.xlu0 %3052 }
 0xbb5   :  { %v3051_v35 = vpop.permute.xlu1 %3050 }
 0xbb6   :  { %v3039_v40 = vpop.permute.xlu0 %3038 }
 0xbb7   :  { %7928 = vmatpush3.bf16.xpose.msra.mxu0 %v3093_v15  ;;  %8604 = vmatpush3.bf16.xpose.msra.mxu1 %v3141_v63  ;;  %v3102_v63 = vsel %vm454_vm1, %v3039_v40, 0  ;;  %v17247_v40 = vld [vmem:[#allocation227_spill] sm:$0xff] }
 0xbb8   :  { %9794 = vmatprep.subr.msk.bf16.mxu0 %vm454_vm1, %v3051_v35  ;;  %8605 = vmatprep.subr.bf16.mxu1 %v17244_v4 }
 0xbb9   :  { %v3037_v5 = vpop.permute.xlu1 %3036 }
 0xbba   :  { %v3099_v7 = vsel %vm454_vm1, %v3037_v5, 0  ;;  %v3071_v35 = vpop.permute.xlu0 %3070 }
 0xbbb   :  { %v3150_v33 = vsel %vm454_vm1, %v3071_v35, 0  ;;  %v17250_v35 = vld [vmem:[#allocation108_spill] sm:$0xff] }
 0xbbd   :  { %v3069_v61 = vpop.permute.xlu1 %3068 }
 0xbbe   :  { %v3147_v0 = vsel %vm454_vm1, %v3069_v61, 0  ;;  %v17245_v61 = vld [vmem:[#allocation63_spill] sm:$0xff] }
 0xbbf   :  { %7930 = vmatpush3.bf16.xpose.msra.mxu0 %v3096_v22  ;;  %8606 = vmatpush3.bf16.xpose.msra.mxu1 %v3144_v19 }
 0xbc0   :  { %9795 = vmatprep.subr.msk.bf16.mxu0 %vm454_vm1, %v3053_v24  ;;  %8607 = vmatprep.subr.bf16.mxu1 %v17244_v4  ;;  %v3057_v24 = vpop.permute.xlu0 %3056 }
 0xbc1   :  { %v3055_v23 = vpop.permute.xlu1 %3054 }
 0xbc5   :  { %v3041_v15 = vpop.permute.xlu1 %3040 }
 0xbc6   :  { %v3105_v22 = vsel %vm454_vm1, %v3041_v15, 0  ;;  %v17251_v15 = vld [vmem:[#allocation65_spill] sm:$0xff] }
 0xbc7   :  { %7932 = vmatpush3.bf16.xpose.msra.mxu0 %v3099_v7  ;;  %8608 = vmatpush3.bf16.xpose.msra.mxu1 %v3147_v0  ;;  %v17246_v7 = vld [vmem:[#allocation101_spill] sm:$0xff]  ;;  %v17248_v0 = vld [vmem:[#allocation239_spill] sm:$0xff] }
 0xbc8   :  { %9796 = vmatprep.subr.msk.bf16.mxu0 %vm454_vm1, %v3055_v23  ;;  %8609 = vmatprep.subr.bf16.mxu1 %v17244_v4  ;;  %v17249_v23 = vld [vmem:[#allocation64_spill] sm:$0xff] }
 0xbc9   :  { %v3073_v5 = vpop.permute.xlu1 %3072 }
 0xbca   :  { %v3153_v19 = vsel %vm454_vm1, %v3073_v5, 0  ;;  %v17255_v5 = vld [vmem:[#allocation67_spill] sm:$0xff] }
 0xbcf   :  { %7934 = vmatpush3.bf16.xpose.msra.mxu0 %v3102_v63  ;;  %8610 = vmatpush3.bf16.xpose.msra.mxu1 %v3150_v33  ;;  %v17252_v63 = vld [vmem:[#allocation110_spill] sm:$0xff] }
 0xbd0   :  { %9797 = vmatprep.subr.msk.bf16.mxu0 %vm454_vm1, %v3057_v24  ;;  %8611 = vmatprep.subr.bf16.mxu1 %v17244_v4  ;;  %v17253_v33 = vld [vmem:[#allocation66_spill] sm:$0xff]  ;;  %v17254_v24 = vld [vmem:[#allocation112_spill] sm:$0xff] }
 0xbd7   :  { %7936 = vmatpush3.bf16.xpose.msra.mxu0 %v3105_v22  ;;  %8612 = vmatpush3.bf16.xpose.msra.mxu1 %v3153_v19  ;;  %v17256_v22 = vld [vmem:[#allocation115_spill] sm:$0xff]  ;;  %v17257_v19 = vld [vmem:[#allocation68_spill] sm:$0xff] }
 0xbd8   :  { %9198 = vmatprep.subr.bf16.mxu0 %v17245_v61  ;;  %9294 = vmatprep.subr.bf16.mxu1 %v17246_v7 }
 0xbde   :  { %7938 = vmatmul.mubr.msk.bf16.vlgmr.msra.gmra.mrb[80].mxu0 %vm454_vm1, %v17247_v40  ;;  %8614 = vmatmul.mubr.msk.bf16.vlgmr.msra.gmra.mrb[60].mxu1 %vm454_vm1, %v17247_v40  ;;  %v17258_v40 = vld [vmem:[#allocation118_spill] sm:$0xff] }
 0xbdf   :  { %7939 = vmatprep.mubr.msk.bf16.mxu0 %vm454_vm1, %v17248_v0  ;;  %8617 = vmatprep.mubr.msk.bf16.mxu1 %vm10269_vm0, %v17244_v4 }
 0xbe0   :  { %9200 = vmatpush1.bf16.msra.mxu0 %v17249_v23  ;;  %9296 = vmatpush3.bf16.msra.mxu1 %v17250_v35 }
 0xbe1   :  { %9202 = vmatprep.subr.bf16.mxu0 %v17251_v15  ;;  %9298 = vmatprep.subr.bf16.mxu1 %v17252_v63 }
 0xbe4   :  { %9204 = vmatpush1.bf16.msra.mxu0 %v17253_v33  ;;  %9300 = vmatpush3.bf16.msra.mxu1 %v17254_v24  ;;  %v17274_v24 = vld [vmem:[#allocation142_spill] sm:$0xff]  ;;  %v17291_v33 = vld [vmem:[#allocation137_spill] sm:$0xff] }
 0xbe5   :  { %9206 = vmatprep.subr.bf16.mxu0 %v17255_v5  ;;  %9302 = vmatprep.subr.bf16.mxu1 %v17256_v22  ;;  %v17263_v22 = vld [vmem:[#allocation71_spill] sm:$0xff] }
 0xbe6   :  { %7940 = vmatmul.mubr.msk.bf16.gmra.mrb[84].mxu0 %vm454_vm1, %v17248_v0  ;;  %8618 = vmatmul.mubr.msk.bf16.gmra.mrb[64].mxu1 %vm454_vm1, %v17248_v0  ;;  %v17264_v0 = vld [vmem:[#allocation132_spill] sm:$0xff]  ;;  %v17273_v5 = vld [vmem:[#allocation91_spill] sm:$0xff] }
 0xbe7   :  { %7941 = vmatprep.mubr.msk.bf16.mxu0 %vm454_vm1, %v12743_v17  ;;  %8621 = vmatprep.mubr.msk.bf16.mxu1 %vm10269_vm0, %v17244_v4 }
 0xbe8   :  { %9208 = vmatpush1.bf16.msra.mxu0 %v17257_v19  ;;  %9304 = vmatpush3.bf16.msra.mxu1 %v17258_v40  ;;  %v17265_v19 = vld [vmem:[#allocation75_spill] sm:$0xff]  ;;  %v17266_v40 = vld [vmem:[#allocation134_spill] sm:$0xff] }
 0xbe9   :  { %9210 = vmatprep.subr.bf16.mxu0 %v17259_v2  ;;  %9306 = vmatprep.subr.bf16.mxu1 %v17260_v14  ;;  %v17267_v2 = vld [vmem:[#allocation77_spill] sm:$0xff]  ;;  %v17268_v14 = vld [vmem:[#allocation136_spill] sm:$0xff] }
 0xbec   :  { %9212 = vmatpush1.bf16.msra.mxu0 %v17261_v6  ;;  %9308 = vmatpush3.bf16.msra.mxu1 %v17262_v43  ;;  %v17269_v6 = vld [vmem:[#allocation81_spill] sm:$0xff]  ;;  %v17270_v43 = vld [vmem:[#allocation138_spill] sm:$0xff] }
 0xbed   :  { %9214 = vmatprep.subr.bf16.mxu0 %v17263_v22  ;;  %9310 = vmatprep.subr.bf16.mxu1 %v17264_v0  ;;  %v17271_v22 = vld [vmem:[#allocation84_spill] sm:$0xff] }
 0xbee   :  { %7942 = vmatmul.mubr.msk.bf16.gmra.mrb[88].mxu0 %vm454_vm1, %v12743_v17  ;;  %8622 = vmatmul.mubr.msk.bf16.gmra.mrb[68].mxu1 %vm454_vm1, %v12743_v17  ;;  %v17272_v0 = vld [vmem:[#allocation140_spill] sm:$0xff]  ;;  %v17275_v17 = vld [vmem:[#allocation93_spill] sm:$0xff] }
 0xbf0   :  { %9216 = vmatpush1.bf16.msra.mxu0 %v17265_v19  ;;  %9312 = vmatpush3.bf16.msra.mxu1 %v17266_v40  ;;  %v17276_v19 = vld [vmem:[#allocation144_spill] sm:$0xff]  ;;  %v17277_v40 = vld [vmem:[#allocation98_spill] sm:$0xff] }
 0xbf1   :  { %9218 = vmatprep.subr.bf16.mxu0 %v17267_v2  ;;  %9314 = vmatprep.subr.bf16.mxu1 %v17268_v14  ;;  %v17278_v2 = vld [vmem:[#allocation146_spill] sm:$0xff]  ;;  %v17279_v14 = vld [vmem:[#allocation100_spill] sm:$0xff] }
 0xbf4   :  { %9220 = vmatpush1.bf16.msra.mxu0 %v17269_v6  ;;  %9316 = vmatpush3.bf16.msra.mxu1 %v17270_v43  ;;  %v17280_v6 = vld [vmem:[#allocation148_spill] sm:$0xff]  ;;  %v17281_v43 = vld [vmem:[#allocation106_spill] sm:$0xff] }
 0xbf5   :  { %9222 = vmatprep.subr.bf16.mxu0 %v17271_v22  ;;  %9318 = vmatprep.subr.bf16.mxu1 %v17272_v0  ;;  %v17282_v22 = vld [vmem:[#allocation109_spill] sm:$0xff]  ;;  %v17283_v0 = vld [vmem:[#allocation111_spill] sm:$0xff] }
 0xbf8   :  { %9224 = vmatpush1.bf16.msra.mxu0 %v17273_v5  ;;  %9320 = vmatpush3.bf16.msra.mxu1 %v17274_v24  ;;  %v17284_v5 = vld [vmem:[#allocation114_spill] sm:$0xff]  ;;  %v17285_v24 = vld [vmem:[#allocation116_spill] sm:$0xff] }
 0xbf9   :  { %9226 = vmatprep.subr.bf16.mxu0 %v17275_v17  ;;  %9322 = vmatprep.subr.bf16.mxu1 %v17276_v19  ;;  %v17286_v17 = vld [vmem:[#allocation120_spill] sm:$0xff]  ;;  %v17287_v19 = vld [vmem:[#allocation122_spill] sm:$0xff] }
 0xbfc   :  { %9228 = vmatpush1.bf16.msra.mxu0 %v17277_v40  ;;  %9324 = vmatpush3.bf16.msra.mxu1 %v17278_v2  ;;  %v17288_v40 = vld [vmem:[#allocation131_spill] sm:$0xff]  ;;  %v17289_v2 = vld [vmem:[#allocation133_spill] sm:$0xff] }
 0xbfd   :  { %9230 = vmatprep.subr.bf16.mxu0 %v17279_v14  ;;  %9326 = vmatprep.subr.bf16.mxu1 %v17280_v6  ;;  %v17290_v14 = vld [vmem:[#allocation135_spill] sm:$0xff] }
 0xc00   :  { %9232 = vmatpush1.bf16.msra.mxu0 %v17281_v43  ;;  %v17292_v43 = vld [vmem:[#allocation139_spill] sm:$0xff] }
 0xc01   :  { %9234 = vmatprep.subr.bf16.mxu0 %v17282_v22  ;;  %v17293_v22 = vld [vmem:[#allocation141_spill] sm:$0xff] }
 0xc04   :  { %9236 = vmatpush1.bf16.msra.mxu0 %v17283_v0  ;;  %v17294_v0 = vld [vmem:[#allocation143_spill] sm:$0xff] }
 0xc05   :  { %9238 = vmatprep.subr.bf16.mxu0 %v17284_v5  ;;  %v17295_v5 = vld [vmem:[#allocation145_spill] sm:$0xff] }
 0xc08   :  { %9240 = vmatpush1.bf16.msra.mxu0 %v17285_v24  ;;  %v17296_v24 = vld [vmem:[#allocation147_spill] sm:$0xff] }
 0xc09   :  { %9242 = vmatprep.subr.bf16.mxu0 %v17286_v17  ;;  %v535_v17 = vpop.permute.xlu0 %534 }
 0xc0c   :  { %9244 = vmatpush1.bf16.msra.mxu0 %v17287_v19  ;;  %v553_v19 = vpop.permute.xlu1 %552 }
 0xc0d   :  { %9246 = vmatprep.subr.bf16.mxu0 %v17288_v40  ;;  %v517_v63 = vpop.permute.xlu0 %516  ;;  %v654_v27 = vsel %vm433_vm2, %v535_v17, %v553_v19 }
 0xc0e   :  { %v642_v42 = vsel %vm419_vm3, %v13017_v41, %v517_v63 }
 0xc0f   :  { %v13248_v45 = vsel %vm426_vm5, %v642_v42, %v535_v17 }
 0xc10   :  { %9248 = vmatpush1.bf16.msra.mxu0 %v17289_v2  ;;  %v571_v40 = vpop.permute.xlu1 %570  ;;  %17297 = vst [vmem:[#allocation228_spill] sm:$0xff] %v13248_v45 }
 0xc11   :  { %9250 = vmatprep.subr.bf16.mxu0 %v17290_v14  ;;  %v589_v15 = vpop.permute.xlu0 %588  ;;  %v660_v36 = vsel %vm440_vm4, %v654_v27, %v571_v40 }
 0xc14   :  { %9252 = vmatpush1.bf16.msra.mxu0 %v17291_v33  ;;  %v607_v2 = vpop.permute.xlu1 %606 }
 0xc15   :  { %9254 = vmatprep.subr.bf16.mxu0 %v17292_v43  ;;  %v625_v35 = vpop.permute.xlu0 %624  ;;  %v672_v21 = vsel %vm454_vm1, %v589_v15, %v607_v2 }
 0xc16   :  { %v13256_v63 = vsel %vm461_vm7, %v672_v21, %v625_v35 }
 0xc17   :  { %17299 = vst [vmem:[#allocation238_spill] sm:$0xff] %v13256_v63 }
 0xc18   :  { %9256 = vmatpush1.bf16.msra.mxu0 %v17293_v22  ;;  %v537_v14 = vpop.permute.xlu1 %536 }
 0xc19   :  { %9258 = vmatprep.subr.bf16.mxu0 %v17294_v0  ;;  %v555_v23 = vpop.permute.xlu0 %554 }
 0xc1a   :  { %v655_v13 = vsel %vm433_vm2, %v537_v14, %v555_v23  ;;  %v13253_v23 = vsel %vm447_vm6, %v660_v36, %v589_v15 }
 0xc1b   :  { %17298 = vst [vmem:[#allocation225_spill] sm:$0xff] %v13253_v23 }
 0xc1c   :  { %9260 = vmatpush1.bf16.msra.mxu0 %v17295_v5  ;;  %v519_v33 = vpop.permute.xlu1 %518 }
 0xc1d   :  { %9262 = vmatprep.subr.bf16.mxu0 %v17296_v24  ;;  %v573_v7 = vpop.permute.xlu0 %572  ;;  %v643_v44 = vsel %vm419_vm3, %v13034_v10, %v519_v33 }
 0xc1e   :  { %v661_v19 = vsel %vm440_vm4, %v655_v13, %v573_v7  ;;  %v13259_v27 = vsel %vm426_vm5, %v643_v44, %v537_v14  ;;  %v7613_v44 = vadd.f32 -1.0, %v13256_v63  ;;  %v7612_v14 = vadd.f32 -1.0, %v13253_v23 }
 0xc1f   :  { %17300 = vst [vmem:[#allocation237_spill] sm:$0xff] %v13259_v27  ;;  %v7614_v35 = vadd.f32 -1.0, %v13259_v27 }
 0xc20   :  { %v591_v43 = vpop.permute.xlu1 %590 }
 0xc21   :  { %v609_v61 = vpop.permute.xlu0 %608  ;;  %v13265_v42 = vsel %vm447_vm6, %v661_v19, %v591_v43 }
 0xc22   :  { %v673_v41 = vsel %vm454_vm1, %v591_v43, %v609_v61  ;;  %17301 = vst [vmem:[#allocation229_spill] sm:$0xff] %v13265_v42  ;;  %v7611_v61 = vadd.f32 -1.0, %v13248_v45 }
 0xc24   :  { %v539_v22 = vpop.permute.xlu1 %538 }
 0xc25   :  { %v557_v20 = vpop.permute.xlu0 %556 }
 0xc26   :  { %v656_v2 = vsel %vm433_vm2, %v539_v22, %v557_v20 }
 0xc28   :  { %v627_v0 = vpop.permute.xlu1 %626 }
 0xc29   :  { %v521_v18 = vpop.permute.xlu0 %520  ;;  %v13268_v13 = vsel %vm461_vm7, %v673_v41, %v627_v0  ;;  %v13299_v0 = vmul.f32 1e+09, %v7612_v14 }
 0xc2a   :  { %v644_v10 = vsel %vm419_vm3, %v13051_v30, %v521_v18  ;;  %17302 = vst [vmem:[#allocation226_spill] sm:$0xff] %v13268_v13  ;;  %v7616_v15 = vadd.f32 -1.0, %v13268_v13 }
 0xc2b   :  { %v13278_v18 = vsel %vm426_vm5, %v644_v10, %v539_v22  ;;  %v13291_v22 = vmul.f32 1e+09, %v7611_v61  ;;  %17308 = vst [vmem:[#allocation269_spill] sm:$0xff] %v13299_v0 }
 0xc2c   :  { %v575_v5 = vpop.permute.xlu1 %574  ;;  %17303 = vst [vmem:[#allocation231_spill] sm:$0xff] %v13278_v18 }
 0xc2d   :  { %v593_v34 = vpop.permute.xlu0 %592  ;;  %v662_v43 = vsel %vm440_vm4, %v656_v2, %v575_v5  ;;  %17305 = vst [vmem:[#allocation227_spill] sm:$0xff] %v13291_v22 }
 0xc2e   :  { %v13294_v5 = vsel %vm447_vm6, %v662_v43, %v593_v34 }
 0xc2f   :  { %17306 = vst [vmem:[#allocation239_spill] sm:$0xff] %v13294_v5 }
 0xc30   :  { %v611_v24 = vpop.permute.xlu1 %610 }
 0xc31   :  { %v541_v54 = vpop.permute.xlu0 %540  ;;  %v674_v36 = vsel %vm454_vm1, %v593_v34, %v611_v24  ;;  %v7615_v24 = vadd.f32 -1.0, %v13265_v42 }
 0xc33   :  { %v13317_v61 = vmul.f32 1e+09, %v7615_v24 }
 0xc34   :  { %v559_v4 = vpop.permute.xlu1 %558 }
 0xc35   :  { %v629_v6 = vpop.permute.xlu0 %628  ;;  %v657_v20 = vsel %vm433_vm2, %v541_v54, %v559_v4  ;;  %17314 = vst [vmem:[#allocation275_spill] sm:$0xff] %v13317_v61 }
 0xc36   :  { %v13285_v33 = vsel %vm461_vm7, %v674_v36, %v629_v6  ;;  %v7617_v6 = vadd.f32 -1.0, %v13278_v18  ;;  %v13315_v36 = vmul.f32 1e+09, %v7616_v15 }
 0xc37   :  { %17304 = vst [vmem:[#allocation230_spill] sm:$0xff] %v13285_v33  ;;  %v7619_v17 = vadd.f32 -1.0, %v13285_v33 }
 0xc38   :  { %v523_v47 = vpop.permute.xlu1 %522  ;;  %17313 = vst [vmem:[#allocation274_spill] sm:$0xff] %v13315_v36 }
 0xc39   :  { %v577_v8 = vpop.permute.xlu0 %576  ;;  %v645_v4 = vsel %vm419_vm3, %v13072_v58, %v523_v47  ;;  %v13305_v47 = vmul.f32 1e+09, %v7613_v44 }
 0xc3a   :  { %v663_v40 = vsel %vm440_vm4, %v657_v20, %v577_v8  ;;  %v13307_v8 = vmul.f32 1e+09, %v7614_v35  ;;  %v13310_v34 = vsel %vm426_vm5, %v645_v4, %v541_v54  ;;  %v7618_v54 = vadd.f32 -1.0, %v13294_v5 }
 0xc3b   :  { %17309 = vst [vmem:[#allocation270_spill] sm:$0xff] %v13305_v47  ;;  %17311 = vst [vmem:[#allocation272_spill] sm:$0xff] %v13310_v34 }
 0xc3c   :  { %v595_v50 = vpop.permute.xlu1 %594  ;;  %17310 = vst [vmem:[#allocation271_spill] sm:$0xff] %v13307_v8 }
 0xc3d   :  { %v613_v51 = vpop.permute.xlu0 %612 }
 0xc3e   :  { %v675_v30 = vsel %vm454_vm1, %v595_v50, %v613_v51 }
 0xc40   :  { %v13229_v38 = vpop.permute.xlu1 %542 }
 0xc41   :  { %v561_v11 = vpop.permute.xlu0 %560 }
 0xc42   :  { %v658_v19 = vsel %vm433_vm2, %v13229_v38, %v561_v11 }
 0xc44   :  { %v631_v12 = vpop.permute.xlu1 %630 }
 0xc45   :  { %v525_v1 = vpop.permute.xlu0 %524  ;;  %v13297_v51 = vsel %vm461_vm7, %v675_v30, %v631_v12  ;;  %v13313_v12 = vsel %vm447_vm6, %v663_v40, %v595_v50  ;;  %v13326_v40 = vmul.f32 1e+09, %v7617_v6 }
 0xc46   :  { %17307 = vst [vmem:[#allocation268_spill] sm:$0xff] %v13297_v51  ;;  %17312 = vst [vmem:[#allocation273_spill] sm:$0xff] %v13313_v12  ;;  %v13320_v11 = vadd.f32 -1.0, %v13297_v51  ;;  %v646_v44 = vsel %vm419_vm3, %v13094_v53, %v525_v1  ;;  %v7620_v1 = vadd.f32 -1.0, %v13310_v34  ;;  %v7621_v53 = vadd.f32 -1.0, %v13313_v12 }
 0xc47   :  { %17315 = vst [vmem:[#allocation276_spill] sm:$0xff] %v13326_v40 }
 0xc48   :  { %v579_v26 = vpop.permute.xlu1 %578 }
 0xc49   :  { %v13231_v52 = vpop.permute.xlu0 %596  ;;  %v664_v50 = vsel %vm440_vm4, %v658_v19, %v579_v26 }
 0xc4c   :  { %v13233_v55 = vpop.permute.xlu1 %614 }
 0xc4d   :  { %v13239_v3 = vpop.permute.xlu0 %544 }
 0xc50   :  { %v13241_v29 = vpop.permute.xlu1 %562 }
 0xc51   :  { %v13272_v21 = vpop.permute.xlu0 %632  ;;  %v659_v19 = vsel %vm433_vm2, %v13239_v3, %v13241_v29 }
 0xc54   :  { %v527_v7 = vpop.permute.xlu1 %526 }
 0xc55   :  { %v581_v58 = vpop.permute.xlu0 %580 }
 0xc58   :  { %v599_v41 = vpop.permute.xlu1 %598 }
 0xcb1   :  { %v3189_v2 = vpop.f32.mrb[80].mxu0  ;;  %v3252_v10 = vpop.f32.mrb[60].mxu1 }
 0xcb2   :  { %v3275_v20 = vmul.f32 0.5, %v3189_v2  ;;  %v3191_v14 = vpop.f32.mrb[81].mxu0  ;;  %v8615_v43 = vpop.f32.mrb[61].mxu1  ;;  %v3277_v30 = vmul.f32 0.5, %v3252_v10  ;;  %v13341_v10 = vsel %vm426_vm5, %v646_v44, %v13229_v38  ;;  %v647_v38 = vsel %vm419_vm3, %v13123_v9, %v527_v7 }
 0xcb3   :  { %v3276_v35 = vmul.f32 0.5, %v3191_v14  ;;  %v3193_v4 = vpop.f32.mrb[82].mxu0  ;;  %v3255_v15 = vpop.f32.mrb[62].mxu1  ;;  %17316 = vst [vmem:[#allocation277_spill] sm:$0xff] %v13341_v10  ;;  %v13349_v14 = vmul.f32 1e+09, %v7618_v54  ;;  %v665_v54 = vsel %vm440_vm4, %v659_v19, %v581_v58 }
 0xcb4   :  { %v13329_v24 = vadd.f32 %v3275_v20, %v13291_v22  ;;  %v3278_v51 = vmul.f32 0.5, %v3193_v4  ;;  %v3195_v33 = vpop.f32.mrb[83].mxu0  ;;  %v8616_v13 = vpop.f32.mrb[63].mxu1  ;;  %v3280_v26 = vmul.f32 0.5, %v3255_v15  ;;  %v13352_v43 = vadd.f32 %v3277_v30, %v13305_v47 }
 0xcb5   :  { %v13334_v2 = vadd.f32 %v3276_v35, %v13299_v0  ;;  %v3279_v6 = vmul.f32 0.5, %v3195_v33  ;;  %v676_v13 = vsel %vm454_vm1, %v13231_v52, %v13233_v55  ;;  %17317 = vst [vmem:[#allocation278_spill] sm:$0xff] %v13349_v14  ;;  %v617_v44 = vpop.permute.xlu0 %616  ;;  %v13363_v55 = vsel %vm447_vm6, %v664_v50, %v13231_v52  ;;  %v635_v35 = vpop.permute.xlu1 %634 }
 0xcb6   :  { %v13347_v20 = vadd.f32 %v3278_v51, %v13307_v8  ;;  %17318 = vst [vmem:[#allocation279_spill] sm:$0xff] %v13363_v55  ;;  %v13365_v51 = vmul.f32 1e+09, %v7619_v17  ;;  %v13368_v30 = vmul.f32 1e+09, %v7620_v1  ;;  %v13371_v4 = vadd.f32 %v3280_v26, %v13315_v36 }
 0xcb7   :  { %v3311_v29 = vmax.f32 %v13329_v24, %v13334_v2  ;;  %v13357_v33 = vadd.f32 %v3279_v6, %v13317_v61  ;;  %v13376_v61 = vmul.f32 1e+09, %v7621_v53  ;;  %v13380_v52 = vsel %vm461_vm7, %v676_v13, %v13272_v21 }
 0xcb8   :  { %17319 = vst [vmem:[#allocation280_spill] sm:$0xff] %v13365_v51  ;;  %17320 = vst [vmem:[#allocation281_spill] sm:$0xff] %v13368_v30  ;;  %v13384_v17 = vsel %vm426_vm5, %v647_v38, %v13239_v3  ;;  %v677_v26 = vsel %vm454_vm1, %v599_v41, %v617_v44  ;;  %v13388_v53 = vsel %vm447_vm6, %v665_v54, %v599_v41  ;;  %v7624_v44 = vadd.f32 -1.0, %v13363_v55 }
 0xcb9   :  { %v3315_v15 = vmax.f32 %v13347_v20, %v13357_v33  ;;  %v3199_v6 = vpop.f32.mrb[84].mxu0  ;;  %v3260_v9 = vpop.f32.mrb[64].mxu1  ;;  %v3312_v7 = vmax.f32 %v3311_v29, %v13352_v43  ;;  %17321 = vst [vmem:[#allocation282_spill] sm:$0xff] %v13376_v61  ;;  %17322 = vst [vmem:[#allocation283_spill] sm:$0xff] %v13380_v52  ;;  %v13401_v41 = vsel %vm461_vm7, %v677_v26, %v635_v35  ;;  %v13417_v35 = vmul.f32 1e+09, %v13320_v11 }
 0xcba   :  { %17323 = vst [vmem:[#allocation284_spill] sm:$0xff] %v13384_v17  ;;  %v3281_v58 = vmul.f32 0.5, %v3199_v6  ;;  %v3201_v50 = vpop.f32.mrb[85].mxu0  ;;  %v8619_v1 = vpop.f32.mrb[65].mxu1  ;;  %v3283_v19 = vmul.f32 0.5, %v3260_v9  ;;  %17324 = vst [vmem:[#allocation285_spill] sm:$0xff] %v13388_v53 }
 0xcbb   :  { %v3282_v36 = vmul.f32 0.5, %v3201_v50  ;;  %v3263_v47 = vpop.f32.mrb[66].mxu1  ;;  %3313 = vmax.xlane.f32.xlu0 %v3312_v7  ;;  %v3203_v29 = vpop.f32.mrb[86].mxu0  ;;  %v3316_v21 = vmax.f32 %v3315_v15, %v13371_v4  ;;  %v7623_v1 = vadd.f32 -1.0, %v13341_v10  ;;  %v7625_v9 = vadd.f32 -1.0, %v13380_v52  ;;  %17325 = vst [vmem:[#allocation286_spill] sm:$0xff] %v13401_v41 }
 0xcbc   :  { %v13392_v13 = vadd.f32 %v3281_v58, %v13326_v40  ;;  %v3284_v3 = vmul.f32 0.5, %v3203_v29  ;;  %v3205_v38 = vpop.f32.mrb[87].mxu0  ;;  %v8620_v6 = vpop.f32.mrb[67].mxu1  ;;  %v7626_v15 = vadd.f32 -1.0, %v13384_v17  ;;  %v7627_v58 = vadd.f32 -1.0, %v13388_v53  ;;  %17326 = vst [vmem:[#allocation287_spill] sm:$0xff] %v13417_v35 }
 0xcbd   :  { %v13398_v7 = vadd.f32 %v3282_v36, %v13349_v14  ;;  %v3285_v50 = vmul.f32 0.5, %v3205_v38  ;;  %3317 = vmax.xlane.f32.xlu1 %v3316_v21  ;;  %v13409_v29 = vadd.f32 %v3283_v19, %v13365_v51  ;;  %v3286_v36 = vmul.f32 0.5, %v3263_v47 }
 0xcbe   :  { %v13404_v54 = vadd.f32 %v3284_v3, %v13368_v30  ;;  %v7628_v26 = vadd.f32 -1.0, %v13401_v41  ;;  %v13420_v21 = vmul.f32 1e+09, %v7623_v1  ;;  %v13424_v19 = vmul.f32 1e+09, %v7625_v9 }
 0xcbf   :  { %v3319_v6 = vmax.f32 %v13392_v13, %v13398_v7  ;;  %v13414_v38 = vadd.f32 %v3285_v50, %v13376_v61  ;;  %v13426_v14 = vmul.f32 1e+09, %v7624_v44  ;;  %v13429_v11 = vmul.f32 1e+09, %v7626_v15 }
 0xcc0   :  { %17327 = vst [vmem:[#allocation288_spill] sm:$0xff] %v13420_v21  ;;  %17328 = vst [vmem:[#allocation289_spill] sm:$0xff] %v13424_v19  ;;  %v13432_v8 = vadd.f32 %v3286_v36, %v13417_v35  ;;  %v13434_v9 = vmul.f32 1e+09, %v7627_v58  ;;  %v13439_v52 = vmul.f32 1e+09, %v7628_v26 }
 0xcc1   :  { %v3323_v3 = vmax.f32 %v13404_v54, %v13414_v38  ;;  %v3209_v30 = vpop.f32.mrb[88].mxu0  ;;  %v3268_v51 = vpop.f32.mrb[68].mxu1  ;;  %17329 = vst [vmem:[#allocation290_spill] sm:$0xff] %v13426_v14  ;;  %v3320_v47 = vmax.f32 %v3319_v6, %v13409_v29  ;;  %17330 = vst [vmem:[#allocation291_spill] sm:$0xff] %v13429_v11 }
 0xcc2   :  { %v3287_v50 = vmul.f32 0.5, %v3209_v30  ;;  %v3211_v61 = vpop.f32.mrb[89].mxu0  ;;  %v8623_v40 = vpop.f32.mrb[69].mxu1  ;;  %v3289_v1 = vmul.f32 0.5, %v3268_v51  ;;  %17331 = vst [vmem:[#allocation292_spill] sm:$0xff] %v13434_v9  ;;  %17332 = vst [vmem:[#allocation293_spill] sm:$0xff] %v13439_v52 }
 0xcc3   :  { %v3288_v0 = vmul.f32 0.5, %v3211_v61  ;;  %v3271_v22 = vpop.f32.mrb[70].mxu1  ;;  %3321 = vmax.xlane.f32.xlu0 %v3320_v47  ;;  %v3213_v41 = vpop.f32.mrb[90].mxu0  ;;  %v3324_v61 = vmax.f32 %v3323_v3, %v13432_v8 }
 0xcc4   :  { %v13437_v44 = vadd.f32 %v3287_v50, %v13420_v21  ;;  %v3290_v30 = vmul.f32 0.5, %v3213_v41  ;;  %v3215_v6 = vpop.f32.mrb[91].mxu0  ;;  %v8624_v40 = vpop.f32.mrb[71].mxu1  ;;  %v3292_v36 = vmul.f32 0.5, %v3271_v22  ;;  %v13449_v58 = vadd.f32 %v3289_v1, %v13424_v19  ;;  %v17333_v50 = vld [vmem:[#allocation233_spill] sm:$0xff]  ;;  %v17334_v1 = vld [vmem:[#allocation232_spill] sm:$0xff] }
 0xcc5   :  { %v13442_v15 = vadd.f32 %v3288_v0, %v13426_v14  ;;  %v3291_v35 = vmul.f32 0.5, %v3215_v6  ;;  %v17337_v6 = vld [vmem:[#allocation235_spill] sm:$0xff]  ;;  %v17338_v40 = vld [vmem:[#allocation234_spill] sm:$0xff] }
 0xcc6   :  { %v13446_v51 = vadd.f32 %v3290_v30, %v13429_v11  ;;  %v13457_v0 = vadd.f32 %v3292_v36, %v13439_v52  ;;  %v17335_v30 = vpack.c.bf16 %v17333_v50, %v17334_v1  ;;  %v17339_v36 = vpack.c.bf16 %v17337_v6, %v17338_v40  ;;  %v17360_v50 = vld [vmem:[#allocation249_spill] sm:$0xff]  ;;  %v17361_v1 = vld [vmem:[#allocation248_spill] sm:$0xff]  ;;  %v17364_v6 = vld [vmem:[#allocation250_spill] sm:$0xff] }
 0xcc7   :  { %v3327_v26 = vmax.f32 %v13437_v44, %v13442_v15  ;;  %v13454_v41 = vadd.f32 %v3291_v35, %v13434_v9  ;;  %3325 = vmax.xlane.f32.xlu0 %v3324_v61  ;;  %v17336_v35 = vpack.c.bf16 %v12751_v62, %v12747_v60  ;;  %v17340_v61 = vpack.c.bf16 %v12670_v57, %v12666_v31 }
 0xcc8   :  { %v17342_v60 = vpack.c.bf16 %v12767_v49, %v12761_v37  ;;  %v17343_v62 = vpack.c.bf16 %v12775_v32, %v12771_v46  ;;  %v17344_v31 = vpack.c.bf16 %v12787_v48, %v12783_v56  ;;  %v17345_v57 = vpack.c.bf16 %v12806_v25, %v12800_v39  ;;  %v17348_v37 = vld [vmem:[#allocation241_spill] sm:$0xff]  ;;  %v17349_v49 = vld [vmem:[#allocation240_spill] sm:$0xff]  ;;  %v17351_v32 = vld [vmem:[#allocation243_spill] sm:$0xff] }
 0xcc9   :  { %v3331_v22 = vmax.f32 %v13446_v51, %v13454_v41  ;;  %v3328_v3 = vmax.f32 %v3327_v26, %v13449_v58  ;;  %v17341_v26 = vpack.c.bf16 %v12757_v16, %v12674_v28  ;;  %v17346_v28 = vld [vmem:[#allocation236_spill] sm:$0xff]  ;;  %v17350_v46 = vpack.c.bf16 %v17348_v37, %v17349_v49  ;;  %v17354_v56 = vld [vmem:[#allocation245_spill] sm:$0xff]  ;;  %v17357_v25 = vld [vmem:[#allocation247_spill] sm:$0xff] }
 0xcca   :  { %v17347_v16 = vpack.c.bf16 %v12573_v59, %v17346_v28  ;;  %v17373_v28 = vld [vmem:[#allocation256_spill] sm:$0xff]  ;;  %v17375_v37 = vld [vmem:[#allocation259_spill] sm:$0xff]  ;;  %v17376_v49 = vld [vmem:[#allocation258_spill] sm:$0xff] }
 0xccb   :  { %3329 = vmax.xlane.f32.xlu0 %v3328_v3  ;;  %v3332_v47 = vmax.f32 %v3331_v22, %v13457_v0  ;;  %v17352_v22 = vld [vmem:[#allocation242_spill] sm:$0xff]  ;;  %v17355_v3 = vld [vmem:[#allocation244_spill] sm:$0xff] }
 0xccc   :  { %v17353_v48 = vpack.c.bf16 %v17351_v32, %v17352_v22  ;;  %v17356_v39 = vpack.c.bf16 %v17354_v56, %v17355_v3  ;;  %v17378_v32 = vld [vmem:[#allocation261_spill] sm:$0xff]  ;;  %v17379_v22 = vld [vmem:[#allocation260_spill] sm:$0xff]  ;;  %v17381_v56 = vld [vmem:[#allocation263_spill] sm:$0xff] }
 0xccd   :  { %3333 = vmax.xlane.f32.xlu1 %v3332_v47  ;;  %v17358_v47 = vld [vmem:[#allocation246_spill] sm:$0xff] }
 0xcce   :  { %v17359_v59 = vpack.c.bf16 %v17357_v25, %v17358_v47  ;;  %v17382_v3 = vld [vmem:[#allocation262_spill] sm:$0xff]  ;;  %v17384_v25 = vld [vmem:[#allocation265_spill] sm:$0xff]  ;;  %v17385_v47 = vld [vmem:[#allocation264_spill] sm:$0xff] }
 0xcde   :  { %3892 = vrot.lane.b32.xlu1 %v17335_v30, %s10274_s2  ;;  %v17362_v30 = vpack.c.bf16 %v17360_v50, %v17361_v1  ;;  %v17387_v50 = vld [vmem:[#allocation267_spill] sm:$0xff]  ;;  %v17388_v1 = vld [vmem:[#allocation266_spill] sm:$0xff] }
 0xce1   :  { %3908 = vrot.lane.b32.xlu0 %v17336_v35, %s10274_s2  ;;  %v17363_v35 = vld [vmem:[#allocation251_spill] sm:$0xff] }
 0xce2   :  { %3910 = vrot.lane.b32.xlu1 %v17339_v36, %s10274_s2  ;;  %v17365_v40 = vpack.c.bf16 %v17363_v35, %v17364_v6  ;;  %v17366_v36 = vld [vmem:[#allocation253_spill] sm:$0xff] }
 0xce5   :  { %3894 = vrot.lane.b32.xlu0 %v17340_v61, %s10274_s2  ;;  %v17367_v61 = vld [vmem:[#allocation252_spill] sm:$0xff] }
 0xce6   :  { %3924 = vrot.lane.b32.xlu1 %v17341_v26, %s10274_s2  ;;  %v17368_v26 = vpack.c.bf16 %v17366_v36, %v17367_v61 }
 0xce9   :  { %3926 = vrot.lane.b32.xlu0 %v17342_v60, %s10274_s2  ;;  %v17369_v60 = vld [vmem:[#allocation255_spill] sm:$0xff] }
 0xcea   :  { %3912 = vrot.lane.b32.xlu1 %v17343_v62, %s10274_s2  ;;  %v17370_v62 = vld [vmem:[#allocation254_spill] sm:$0xff] }
 0xced   :  { %3914 = vrot.lane.b32.xlu0 %v17344_v31, %s10274_s2  ;;  %v17371_v31 = vpack.c.bf16 %v17369_v60, %v17370_v62 }
 0xcee   :  { %3896 = vrot.lane.b32.xlu1 %v17345_v57, %s10274_s2  ;;  %v17372_v57 = vld [vmem:[#allocation257_spill] sm:$0xff] }
 0xcf1   :  { %3898 = vrot.lane.b32.xlu0 %v17347_v16, %s10274_s2  ;;  %v17374_v16 = vpack.c.bf16 %v17372_v57, %v17373_v28 }
 0xcf2   :  { %3928 = vrot.lane.b32.xlu1 %v17350_v46, %s10274_s2  ;;  %v17377_v46 = vpack.c.bf16 %v17375_v37, %v17376_v49 }
 0xcf5   :  { %3930 = vrot.lane.b32.xlu0 %v17353_v48, %s10274_s2  ;;  %v17380_v48 = vpack.c.bf16 %v17378_v32, %v17379_v22 }
 0xcf6   :  { %3916 = vrot.lane.b32.xlu1 %v17356_v39, %s10274_s2  ;;  %v17383_v39 = vpack.c.bf16 %v17381_v56, %v17382_v3 }
 0xcf9   :  { %3918 = vrot.lane.b32.xlu0 %v17359_v59, %s10274_s2  ;;  %v17386_v59 = vpack.c.bf16 %v17384_v25, %v17385_v47 }
 0xcfa   :  { %3900 = vrot.lane.b32.xlu1 %v17362_v30, %s10274_s2  ;;  %v17389_v30 = vpack.c.bf16 %v17387_v50, %v17388_v1 }
 0xcfd   :  { %3902 = vrot.lane.b32.xlu0 %v17365_v40, %s10274_s2 }
 0xcfe   :  { %3932 = vrot.lane.b32.xlu1 %v17368_v26, %s10274_s2 }
 0xd01   :  { %3934 = vrot.lane.b32.xlu0 %v17371_v31, %s10274_s2 }
 0xd02   :  { %3920 = vrot.lane.b32.xlu1 %v17374_v16, %s10274_s2 }
 0xd05   :  { %3922 = vrot.lane.b32.xlu0 %v17377_v46, %s10274_s2 }
 0xd06   :  { %3904 = vrot.lane.b32.xlu1 %v17380_v48, %s10274_s2 }
 0xd09   :  { %3906 = vrot.lane.b32.xlu0 %v17383_v39, %s10274_s2 }
 0xd0a   :  { %3936 = vrot.lane.b32.xlu1 %v17386_v59, %s10274_s2 }
 0xd0e   :  { %3938 = vrot.lane.b32.xlu1 %v17389_v30, %s10274_s2 }
 0xd48   :  { %v3314_v35 = vpop.xlane.xlu0 %3313 }
 0xd49   :  { %v3335_v6 = vsub.f32 %v13329_v24, %v3314_v35  ;;  %v3336_v40 = vsub.f32 %v13334_v2, %v3314_v35  ;;  %v3337_v50 = vsub.f32 %v13352_v43, %v3314_v35 }
 0xd4a   :  { %v13561_v36 = vpop.xlane.xlu1 %3317 }
 0xd4b   :  { %v3353_v61 = vmul.f32 1.442695, %v3335_v6  ;;  %v3355_v26 = vmul.f32 1.442695, %v3336_v40  ;;  %v3338_v60 = vsub.f32 %v13347_v20, %v13561_v36  ;;  %v3339_v62 = vsub.f32 %v13357_v33, %v13561_v36  ;;  %v17390_v6 = vld [vmem:[#allocation149_spill] sm:$0xff]  ;;  %v17391_v40 = vld [vmem:[#allocation148_spill] sm:$0xff] }
 0xd4d   :  { %9927 = vpow2.f32 %v3353_v61  ;;  %v3359_v31 = vmul.f32 1.442695, %v3338_v60  ;;  %v3361_v57 = vmul.f32 1.442695, %v3339_v62  ;;  %v3357_v60 = vmul.f32 1.442695, %v3337_v50 }
 0xd4e   :  { %9929 = vpow2.f32 %v3355_v26  ;;  %v17392_v62 = vld [vmem:[#allocation150_spill] sm:$0xff] }
 0xd4f   :  { %9931 = vpow2.f32 %v3361_v57 }
 0xd50   :  { %v13567_v28 = vpop.xlane.xlu0 %3321  ;;  %9933 = vpow2.f32 %v3359_v31  ;;  %v17393_v31 = vld [vmem:[#allocation151_spill] sm:$0xff] }
 0xd51   :  { %v3341_v24 = vsub.f32 %v13392_v13, %v13567_v28  ;;  %v3342_v2 = vsub.f32 %v13398_v7, %v13567_v28 }
 0xd53   :  { %v3365_v16 = vmul.f32 1.442695, %v3341_v24  ;;  %v3367_v37 = vmul.f32 1.442695, %v3342_v2  ;;  %v17394_v2 = vld [vmem:[#allocation154_spill] sm:$0xff] }
 0xd54   :  { %v13573_v20 = vpop.xlane.xlu0 %3325 }
 0xd55   :  { %9935 = vpow2.f32 %v3365_v16  ;;  %v3344_v33 = vsub.f32 %v13404_v54, %v13573_v20  ;;  %v3345_v49 = vsub.f32 %v13414_v38, %v13573_v20 }
 0xd56   :  { %9937 = vpow2.f32 %v3367_v37 }
 0xd57   :  { %v9928_v46 = vpop.eup %9927  ;;  %v3371_v32 = vmul.f32 1.442695, %v3344_v33  ;;  %v3373_v22 = vmul.f32 1.442695, %v3345_v49  ;;  %v17395_v49 = vld [vmem:[#allocation155_spill] sm:$0xff] }
 0xd58   :  { %v9930_v13 = vpop.eup %9929  ;;  %v13579_v48 = vpop.xlane.xlu0 %3329  ;;  %v13586_v3 = vmul.f32 %v9928_v46, %v13248_v45 }
 0xd59   :  { %9939 = vpow2.f32 %v3371_v32  ;;  %v3347_v7 = vsub.f32 %v13437_v44, %v13579_v48  ;;  %v3348_v56 = vsub.f32 %v13442_v15, %v13579_v48  ;;  %v13589_v54 = vmul.f32 %v9930_v13, %v13253_v23  ;;  %v9932_v39 = vpop.eup %9931  ;;  %v17396_v32 = vld [vmem:[#allocation157_spill] sm:$0xff]  ;;  %v17415_v23 = vld [vmem:[#allocation230_spill] sm:$0xff] }
 0xd5a   :  { %9941 = vpow2.f32 %v3373_v22  ;;  %v13591_v38 = vpop.xlane.xlu1 %3333  ;;  %v9934_v59 = vpop.eup %9933  ;;  %v13603_v1 = vmul.f32 %v9932_v39, %v13265_v42 }
 0xd5b   :  { %v3377_v25 = vmul.f32 1.442695, %v3347_v7  ;;  %v3379_v47 = vmul.f32 1.442695, %v3348_v56  ;;  %3471 = vmatprep.mubr.f32.mxu0 %v13589_v54  ;;  %3673 = vmatprep.mubr.f32.mxu1 %v13589_v54  ;;  %v3350_v44 = vsub.f32 %v13446_v51, %v13591_v38  ;;  %v3351_v15 = vsub.f32 %v13454_v41, %v13591_v38  ;;  %v17397_v56 = vld [vmem:[#allocation159_spill] sm:$0xff] }
 0xd5c   :  { %3472 = vmatmul.mubr.f32.vlgmr.msra.gmra.mrb[54].mxu0 %v13586_v3  ;;  %3674 = vmatmul.mubr.f32.vlgmr.msra.gmra.mrb[72].mxu1 %v13586_v3  ;;  %v13605_v30 = vpop.permute.xlu0 %3908  ;;  %v13614_v61 = vmul.f32 %v9934_v59, %v13259_v27  ;;  %v3340_v7 = vsub.f32 %v13371_v4, %v13561_v36  ;;  %v17398_v59 = vld [vmem:[#allocation161_spill] sm:$0xff] }
 0xd5d   :  { %9943 = vpow2.f32 %v3377_v25  ;;  %v3383_v43 = vmul.f32 1.442695, %v3350_v44  ;;  %v3385_v35 = vmul.f32 1.442695, %v3351_v15  ;;  %9264 = vmatpush1.bf16.msra.mxu0 %v17390_v6  ;;  %9328 = vmatpush3.bf16.msra.mxu1 %v17391_v40  ;;  %v17399_v44 = vld [vmem:[#allocation162_spill] sm:$0xff]  ;;  %v3346_v15 = vsub.f32 %v13432_v8, %v13573_v20  ;;  %v17493_v6 = vld [vmem:[#allocation43_spill] sm:$0xff] }
 0xd5e   :  { %9945 = vpow2.f32 %v3379_v47  ;;  %v13609_v51 = vpop.permute.xlu1 %3892  ;;  %3477 = vmatprep.mubr.f32.mxu0 %v13603_v1  ;;  %3678 = vmatprep.mubr.f32.mxu1 %v13603_v1  ;;  %v3343_v47 = vsub.f32 %v13409_v29, %v13567_v28  ;;  %v3363_v28 = vmul.f32 1.442695, %v3340_v7  ;;  %v17402_v7 = vld [vmem:[#allocation167_spill] sm:$0xff] }
 0xd5f   :  { %v9936_v41 = vpop.eup %9935  ;;  %9266 = vmatprep.subr.bf16.mxu0 %v17392_v62  ;;  %9330 = vmatprep.subr.bf16.mxu1 %v17393_v31  ;;  %9947 = vpow2.f32 %v3385_v35 }
 0xd60   :  { %v9938_v26 = vpop.eup %9937  ;;  %3478 = vmatmul.mubr.f32.gmra.mrb[92].mxu0 %v13614_v61  ;;  %3679 = vmatmul.mubr.f32.gmra.mrb[74].mxu1 %v13614_v61  ;;  %v13624_v24 = vmul.f32 %v9936_v41, %v13278_v18  ;;  %9949 = vpow2.f32 %v3383_v43  ;;  %v13630_v33 = vpop.permute.xlu0 %3894  ;;  %v17400_v43 = vld [vmem:[#allocation164_spill] sm:$0xff] }
 0xd61   :  { %v13621_v57 = vmul.f32 %v9938_v26, %v13294_v5  ;;  %9268 = vmatpush1.bf16.msra.mxu0 %v17394_v2  ;;  %9332 = vmatpush3.bf16.msra.mxu1 %v17393_v31  ;;  %9951 = vpow2.f32 %v3357_v60  ;;  %v3369_v26 = vmul.f32 1.442695, %v3343_v47  ;;  %v3349_v60 = vsub.f32 %v13449_v58, %v13579_v48  ;;  %v17403_v48 = vld [vmem:[#allocation169_spill] sm:$0xff]  ;;  %v17414_v5 = vld [vmem:[#allocation226_spill] sm:$0xff] }
 0xd62   :  { %v13628_v16 = vpop.permute.xlu1 %3910  ;;  %9270 = vmatprep.subr.bf16.mxu0 %v17395_v49  ;;  %9334 = vmatprep.subr.bf16.mxu1 %v17396_v32  ;;  %9953 = vpow2.f32 %v3363_v28  ;;  %v3352_v58 = vsub.f32 %v13457_v0, %v13591_v38  ;;  %v17405_v0 = vld [vmem:[#allocation172_spill] sm:$0xff]  ;;  %v17486_v49 = vld [vmem:[#allocation46_spill] sm:$0xff]  ;;  %v17491_v2 = vld [vmem:[#allocation25_spill] sm:$0xff] }
 0xd63   :  { %v9940_v37 = vpop.eup %9939  ;;  %3483 = vmatprep.mubr.f32.mxu0 %v13621_v57  ;;  %3683 = vmatprep.mubr.f32.mxu1 %v13621_v57  ;;  %9955 = vpow2.f32 %v3369_v26 }
 0xd64   :  { %v9942_v46 = vpop.eup %9941  ;;  %3484 = vmatmul.mubr.f32.gmra.mrb[94].mxu0 %v13624_v24  ;;  %3684 = vmatmul.mubr.f32.gmra.mrb[76].mxu1 %v13624_v24  ;;  %v13642_v13 = vmul.f32 %v9940_v37, %v13310_v34  ;;  %v13656_v4 = vpop.permute.xlu0 %3926  ;;  %v17401_v37 = vld [vmem:[#allocation166_spill] sm:$0xff]  ;;  %v3387_v26 = vmul.f32 1.442695, %v3352_v58  ;;  %v17411_v58 = vld [vmem:[#allocation181_spill] sm:$0xff] }
 0xd65   :  { %v13639_v22 = vmul.f32 %v9942_v46, %v13313_v12  ;;  %9272 = vmatpush1.bf16.msra.mxu0 %v17397_v56  ;;  %9336 = vmatpush3.bf16.msra.mxu1 %v17396_v32  ;;  %v17413_v12 = vld [vmem:[#allocation184_spill] sm:$0xff] }
 0xd66   :  { %v13648_v39 = vpop.permute.xlu1 %3924  ;;  %9274 = vmatprep.subr.bf16.mxu0 %v17398_v59  ;;  %9338 = vmatprep.subr.bf16.mxu1 %v17399_v44  ;;  %v17484_v56 = vld [vmem:[#allocation36_spill] sm:$0xff] }
 0xd67   :  { %v9944_v25 = vpop.eup %9943  ;;  %3489 = vmatprep.mubr.f32.mxu0 %v13639_v22  ;;  %3688 = vmatprep.mubr.f32.mxu1 %v13639_v22  ;;  %v17485_v32 = vld [vmem:[#allocation44_spill] sm:$0xff] }
 0xd68   :  { %v9946_v50 = vpop.eup %9945  ;;  %3490 = vmatmul.mubr.f32.gmra.mrb[96].mxu0 %v13642_v13  ;;  %3689 = vmatmul.mubr.f32.gmra.mrb[78].mxu1 %v13642_v13  ;;  %v13664_v29 = vmul.f32 %v9944_v25, %v13341_v10  ;;  %v3375_v25 = vmul.f32 1.442695, %v3346_v15  ;;  %v17404_v15 = vld [vmem:[#allocation171_spill] sm:$0xff]  ;;  %v17409_v10 = vmov 0.0  }
 0xd69   :  { %v13661_v36 = vmul.f32 %v9946_v50, %v13363_v55  ;;  %9276 = vmatpush1.bf16.msra.mxu0 %v17400_v43  ;;  %9340 = vmatpush3.bf16.msra.mxu1 %v17399_v44  ;;  %v9948_v41 = vpop.eup %9947  ;;  %v3381_v50 = vmul.f32 1.442695, %v3349_v60  ;;  %v17406_v60 = vld [vmem:[#allocation174_spill] sm:$0xff] }
 0xd6a   :  { %v13670_v35 = vpop.permute.xlu1 %3912  ;;  %9278 = vmatprep.subr.bf16.mxu0 %v17401_v37  ;;  %v9950_v46 = vpop.eup %9949  ;;  %9342 = vmatprep.subr.bf16.mxu1 %v17402_v7  ;;  %v13679_v8 = vmul.f32 %v9948_v41, %v13388_v53  ;;  %9957 = vpow2.f32 %v3375_v25  ;;  %v17481_v37 = vld [vmem:[#allocation16_spill] sm:$0xff] }
 0xd6b   :  { %3495 = vmatprep.mubr.f32.mxu0 %v13661_v36  ;;  %3693 = vmatprep.mubr.f32.mxu1 %v13661_v36  ;;  %v9952_v20 = vpop.eup %9951  ;;  %v13689_v41 = vpop.permute.xlu0 %3914  ;;  %v13694_v28 = vmul.f32 %v9950_v46, %v13384_v17  ;;  %9959 = vpow2.f32 %v3381_v50  ;;  %v17407_v46 = vld [vmem:[#allocation176_spill] sm:$0xff]  ;;  %v17408_v17 = vld [vmem:[#allocation177_spill] sm:$0xff] }
 0xd6c   :  { %3496 = vmatmul.mubr.f32.gmra.mrb[98].mxu0 %v13664_v29  ;;  %3694 = vmatmul.mubr.f32.gmra.mrb[80].mxu1 %v13664_v29  ;;  %v13701_v38 = vmul.f32 %v9952_v20, %v13256_v63  ;;  %9961 = vpow2.f32 %v3387_v26  ;;  %v17410_v20 = vld [vmem:[#allocation179_spill] sm:$0xff]  ;;  %v17412_v63 = vld [vmem:[#allocation182_spill] sm:$0xff]  ;;  %v9954_v50 = vpop.eup %9953 }
 0xd6d   :  { %9280 = vmatpush1.bf16.msra.mxu0 %v17403_v48  ;;  %9344 = vmatpush3.bf16.msra.mxu1 %v17402_v7  ;;  %v9956_v34 = vpop.eup %9955  ;;  %v13717_v26 = vmul.f32 %v9954_v50, %v17414_v5 }
 0xd6e   :  { %v13687_v47 = vpop.permute.xlu1 %3896  ;;  %3501 = vmatprep.mubr.f32.mxu0 %v13679_v8  ;;  %3698 = vmatprep.mubr.f32.mxu1 %v13679_v8  ;;  %v13721_v45 = vmul.f32 %v9956_v34, %v17415_v23  ;;  %v17417_v34 = vld [vmem:[#allocation283_spill] sm:$0xff] }
 0xd6f   :  { %9282 = vmatprep.subr.bf16.mxu0 %v17404_v15  ;;  %9346 = vmatprep.subr.bf16.mxu1 %v17405_v0  ;;  %v3899_v55 = vpop.permute.xlu0 %3898 }
 0xd70   :  { %3502 = vmatmul.mubr.f32.gmra.mrb[100].mxu0 %v13694_v28  ;;  %3699 = vmatmul.mubr.f32.gmra.mrb[82].mxu1 %v13694_v28 }
 0xd71   :  { %9284 = vmatpush1.bf16.msra.mxu0 %v17406_v60  ;;  %9348 = vmatpush3.bf16.msra.mxu1 %v17405_v0 }
 0xd72   :  { %v3929_v53 = vpop.permute.xlu1 %3928  ;;  %8657 = vmatprep.mubr.f32.mxu1 %v13701_v38  ;;  %9286 = vmatprep.subr.bf16.mxu0 %v17407_v46 }
 0xd73   :  { %9350 = vmatprep.subr.bf16.mxu1 %v17408_v17  ;;  %3572 = vmatprep.mubr.f32.mxu0 %v17409_v10  ;;  %v3931_v18 = vpop.permute.xlu0 %3930 }
 0xd74   :  { %v9958_v27 = vpop.eup %9957 }
 0xd75   :  { %9288 = vmatpush1.bf16.msra.mxu0 %v17410_v20  ;;  %9352 = vmatpush3.bf16.msra.mxu1 %v17408_v17  ;;  %v9960_v52 = vpop.eup %9959 }
 0xd76   :  { %v3917_v25 = vpop.permute.xlu1 %3916  ;;  %9290 = vmatprep.subr.bf16.mxu0 %v17411_v58  ;;  %9354 = vmatprep.subr.bf16.mxu1 %v17412_v63  ;;  %v9962_v5 = vpop.eup %9961  ;;  %v13735_v23 = vmul.f32 %v9960_v52, %v17417_v34 }
 0xd77   :  { %v3919_v9 = vpop.permute.xlu0 %3918 }
 0xd79   :  { %9292 = vmatpush1.bf16.msra.mxu0 %v17413_v12  ;;  %9356 = vmatpush3.bf16.msra.mxu1 %v17412_v63 }
 0xd7a   :  { %8026 = vmatprep.subr.bf16.mxu1 %v13605_v30  ;;  %8666 = vmatprep.subr.bf16.mxu0 %v17409_v10  ;;  %v3901_v42 = vpop.permute.xlu1 %3900  ;;  %v17416_v30 = vld [vmem:[#allocation268_spill] sm:$0xff] }
 0xd7b   :  { %v13730_v50 = vmul.f32 %v9958_v27, %v17416_v30  ;;  %v17418_v27 = vld [vmem:[#allocation286_spill] sm:$0xff]  ;;  %v3903_v52 = vpop.permute.xlu0 %3902 }
 0xd7c   :  { %3573 = vmatmul.mubr.f32.vlgmr.msra.gmra.mrb[54].mxu0 %v13701_v38  ;;  %8658 = vmatmul.mubr.f32.vlgmr.msra.gmra.mrb[84].mxu1 %v13717_v26 }
 0xd7d   :  { %8660 = vmatprep.mubr.f32.mxu1 %v13721_v45  ;;  %8027 = vmatpush3.bf16.msra.mxu1 %v13609_v51 }
 0xd7e   :  { %8667 = vmatpush3.bf16.msra.mxu0 %v13648_v39  ;;  %8028 = vmatprep.subr.bf16.mxu1 %v13628_v16  ;;  %v3933_v51 = vpop.permute.xlu1 %3932  ;;  %v13744_v16 = vmul.f32 %v9962_v5, %v17418_v27 }
 0xd7f   :  { %3578 = vmatprep.mubr.f32.mxu0 %v17409_v10  ;;  %8668 = vmatprep.subr.bf16.mxu0 %v17409_v10  ;;  %v3935_v5 = vpop.permute.xlu0 %3934 }
 0xd80   :  { %3579 = vmatmul.mubr.f32.gmra.mrb[92].mxu0 %v13717_v26  ;;  %8661 = vmatmul.mubr.f32.gmra.mrb[86].mxu1 %v13730_v50 }
 0xd81   :  { %8663 = vmatprep.mubr.f32.mxu1 %v13735_v23  ;;  %8029 = vmatpush3.bf16.msra.mxu1 %v13630_v33 }
 0xd82   :  { %8669 = vmatpush3.bf16.msra.mxu0 %v13656_v4  ;;  %8030 = vmatprep.subr.bf16.mxu1 %v13670_v35  ;;  %v3921_v33 = vpop.permute.xlu1 %3920 }
 0xd83   :  { %3584 = vmatprep.mubr.f32.mxu0 %v17409_v10  ;;  %8670 = vmatprep.subr.bf16.mxu0 %v17409_v10 }
 0xd84   :  { %3585 = vmatmul.mubr.f32.gmra.mrb[94].mxu0 %v13721_v45  ;;  %8664 = vmatmul.mubr.f32.gmra.mrb[88].mxu1 %v13744_v16 }
 0xd85   :  { %8031 = vmatpush3.bf16.msra.mxu1 %v13687_v47  ;;  %3590 = vmatprep.mubr.f32.mxu0 %v17409_v10 }
 0xd86   :  { %8671 = vmatpush3.bf16.msra.mxu0 %v3929_v53  ;;  %8032 = vmatprep.subr.bf16.mxu1 %v13689_v41  ;;  %v3905_v39 = vpop.permute.xlu1 %3904 }
 0xd87   :  { %8672 = vmatprep.subr.bf16.mxu0 %v17409_v10 }
 0xd88   :  { %3591 = vmatmul.mubr.f32.gmra.mrb[96].mxu0 %v13730_v50 }
 0xd89   :  { %8033 = vmatpush3.bf16.msra.mxu1 %v3899_v55  ;;  %3596 = vmatprep.mubr.f32.mxu0 %v17409_v10 }
 0xd8a   :  { %8673 = vmatpush3.bf16.msra.mxu0 %v3931_v18  ;;  %8034 = vmatprep.subr.bf16.mxu1 %v3917_v25  ;;  %v3923_v18 = vpop.permute.xlu0 %3922  ;;  %v3937_v55 = vpop.permute.xlu1 %3936 }
 0xd8b   :  { %8674 = vmatprep.subr.bf16.mxu0 %v17409_v10 }
 0xd8c   :  { %3597 = vmatmul.mubr.f32.gmra.mrb[98].mxu0 %v13735_v23 }
 0xd8d   :  { %8035 = vmatpush3.bf16.msra.mxu1 %v3901_v42  ;;  %3602 = vmatprep.mubr.f32.mxu0 %v17409_v10 }
 0xd8e   :  { %8675 = vmatpush3.bf16.msra.mxu0 %v3933_v51  ;;  %8036 = vmatprep.subr.bf16.mxu1 %v3919_v9  ;;  %v3907_v42 = vpop.permute.xlu0 %3906  ;;  %v3939_v53 = vpop.permute.xlu1 %3938 }
 0xd8f   :  { %8676 = vmatprep.subr.bf16.mxu0 %v17409_v10 }
 0xd90   :  { %3603 = vmatmul.mubr.f32.gmra.mrb[100].mxu0 %v13744_v16 }
 0xd91   :  { %8037 = vmatpush3.bf16.msra.mxu1 %v3903_v52  ;;  %8682 = vmatprep.mubr.msk.bf16.mxu0 %vm10269_vm0, %v17409_v10 }
 0xd92   :  { %8677 = vmatpush3.bf16.msra.mxu0 %v3935_v5  ;;  %8038 = vmatprep.subr.bf16.mxu1 %v3921_v33 }
 0xd93   :  { %8678 = vmatprep.subr.bf16.mxu0 %v17409_v10 }
 0xd95   :  { %8039 = vmatpush3.bf16.msra.mxu1 %v3905_v39 }
 0xd96   :  { %8679 = vmatpush3.bf16.msra.mxu0 %v3937_v55  ;;  %8040 = vmatprep.subr.bf16.mxu1 %v3923_v18 }
 0xd97   :  { %8680 = vmatprep.subr.bf16.mxu0 %v17409_v10 }
 0xd99   :  { %8041 = vmatpush3.bf16.msra.mxu1 %v3907_v42 }
 0xd9a   :  { %8681 = vmatpush3.bf16.msra.mxu0 %v3939_v53  ;;  %8694 = vmatprep.subr.bf16.mxu1 %v17409_v10 }
 0xd9b   :  { %8710 = vmatprep.subr.bf16.mxu0 %v17409_v10 }
 0xe2f   :  { %v7986_v9 = vpop.f32.mrb[72].mxu1 }
 0xe30   :  { %v7987_v4 = vpop.f32.mrb[73].mxu1 }
 0xe31   :  { %v7988_v35 = vadd.f32 %v7987_v4, %v7986_v9 }
 0xe33   :  { %v7989_v47 = vpop.f32.mrb[74].mxu1  ;;  %v3676_v11 = vadd.f32 1e-09, %v7988_v35 }
 0xe34   :  { %v7990_v41 = vpop.f32.mrb[75].mxu1 }
 0xe35   :  { %v7991_v25 = vadd.f32 %v7990_v41, %v7989_v47 }
 0xe37   :  { %v7992_v51 = vpop.f32.mrb[76].mxu1  ;;  %v3681_v19 = vadd.f32 1e-09, %v7991_v25 }
 0xe38   :  { %v7993_v52 = vpop.f32.mrb[77].mxu1 }
 0xe39   :  { %v7994_v33 = vadd.f32 %v7993_v52, %v7992_v51 }
 0xe3b   :  { %v7995_v5 = vpop.f32.mrb[78].mxu1  ;;  %v3686_v52 = vadd.f32 1e-09, %v7994_v33 }
 0xe3c   :  { %v7996_v39 = vpop.f32.mrb[79].mxu1 }
 0xe3d   :  { %v7997_v18 = vadd.f32 %v7996_v39, %v7995_v5 }
 0xe3f   :  { %v7998_v55 = vpop.f32.mrb[80].mxu1  ;;  %v3691_v51 = vadd.f32 1e-09, %v7997_v18 }
 0xe40   :  { %v7999_v27 = vpop.f32.mrb[81].mxu1 }
 0xe41   :  { %v8000_v42 = vadd.f32 %v7999_v27, %v7998_v55 }
 0xe43   :  { %v8001_v53 = vpop.f32.mrb[82].mxu1 }
 0xe44   :  { %v8002_v34 = vpop.f32.mrb[83].mxu1 }
 0xe45   :  { %v8003_v30 = vadd.f32 %v8002_v34, %v8001_v53 }
 0xe4f   :  { %v3574_v14 = vpop.f32.mrb[54].mxu0  ;;  %v8659_v21 = vpop.f32.mrb[84].mxu1 }
 0xe50   :  { %v9698_v9 = vadd.f32 1e-09, %v3574_v14  ;;  %v3776_v4 = vadd.f32 %v8659_v21, %v3681_v19  ;;  %v3576_v12 = vpop.f32.mrb[55].mxu0  ;;  %v3770_v47 = vpop.f32.mrb[85].mxu1  ;;  %v3701_v14 = vadd.f32 1e-09, %v8003_v30 }
 0xe51   :  { %v9699_v41 = vadd.f32 1e-09, %v3576_v12  ;;  %v3771_v63 = vadd.f32 %v3770_v47, %v3676_v11  ;;  %v3696_v21 = vadd.f32 1e-09, %v8000_v42 }
 0xe52   :  { %9963 = vrcp.f32 %v9698_v9 }
 0xe53   :  { %9965 = vrcp.f32 %v3776_v4  ;;  %v3580_v5 = vpop.f32.mrb[92].mxu0  ;;  %v8662_v39 = vpop.f32.mrb[86].mxu1 }
 0xe54   :  { %9967 = vrcp.f32 %v9699_v41  ;;  %v9700_v27 = vadd.f32 1e-09, %v3580_v5  ;;  %v3786_v55 = vadd.f32 %v8662_v39, %v3691_v51  ;;  %v3582_v34 = vpop.f32.mrb[93].mxu0  ;;  %v3780_v25 = vpop.f32.mrb[87].mxu1 }
 0xe55   :  { %9969 = vrcp.f32 %v3771_v63  ;;  %v9701_v35 = vadd.f32 1e-09, %v3582_v34  ;;  %v3781_v53 = vadd.f32 %v3780_v25, %v3686_v52 }
 0xe56   :  { %9971 = vrcp.f32 %v9700_v27 }
 0xe57   :  { %9973 = vrcp.f32 %v3786_v55  ;;  %v3586_v12 = vpop.f32.mrb[94].mxu0  ;;  %v8665_v19 = vpop.f32.mrb[88].mxu1 }
 0xe58   :  { %9975 = vrcp.f32 %v9701_v35  ;;  %v9702_v11 = vadd.f32 1e-09, %v3586_v12  ;;  %v3796_v33 = vadd.f32 %v8665_v19, %v3701_v14  ;;  %v3588_v18 = vpop.f32.mrb[95].mxu0  ;;  %v3790_v9 = vpop.f32.mrb[89].mxu1 }
 0xe59   :  { %9977 = vrcp.f32 %v3781_v53  ;;  %v9703_v4 = vadd.f32 1e-09, %v3588_v18  ;;  %v3791_v47 = vadd.f32 %v3790_v9, %v3696_v21 }
 0xe5a   :  { %9979 = vrcp.f32 %v9702_v11 }
 0xe5b   :  { %9981 = vrcp.f32 %v3796_v33  ;;  %v3592_v41 = vpop.f32.mrb[96].mxu0 }
 0xe5c   :  { %v9964_v63 = vpop.eup %9963  ;;  %9983 = vrcp.f32 %v9703_v4  ;;  %v9704_v51 = vadd.f32 1e-09, %v3592_v41  ;;  %v3594_v30 = vpop.f32.mrb[97].mxu0 }
 0xe5d   :  { %v9966_v52 = vpop.eup %9965  ;;  %9985 = vrcp.f32 %v3791_v47  ;;  %v9705_v42 = vadd.f32 1e-09, %v3594_v30  ;;  %v3817_v21 = vmul.f32 %v9964_v63, %v13586_v3 }
 0xe5e   :  { %v9968_v5 = vpop.eup %9967  ;;  %v3822_v39 = vmul.f32 %v9966_v52, %v13717_v26  ;;  %9987 = vrcp.f32 %v9704_v51  ;;  %v7672_v26 = vld [vmem:[%s16288_s10 + $0x20] sm:$0xff] }
 0xe5f   :  { %v9970_v27 = vpop.eup %9969  ;;  %9989 = vrcp.f32 %v9705_v42  ;;  %v3598_v55 = vpop.f32.mrb[98].mxu0  ;;  %v3818_v47 = vmul.f32 %v9968_v5, %v13589_v54 }
 0xe60   :  { %v9972_v34 = vpop.eup %9971  ;;  %v3819_v25 = vmul.f32 %v9970_v27, %v13701_v38  ;;  %v9706_v35 = vadd.f32 1e-09, %v3598_v55  ;;  %v3600_v53 = vpop.f32.mrb[99].mxu0  ;;  %v7673_v38 = vld [vmem:[%s16288_s10 + $0x28] sm:$0xff] }
 0xe61   :  { %v9974_v14 = vpop.eup %9973  ;;  %v3820_v12 = vmul.f32 %v9972_v34, %v13614_v61  ;;  %v9707_v19 = vadd.f32 1e-09, %v3600_v53 }
 0xe62   :  { %v9976_v11 = vpop.eup %9975  ;;  %v3837_v33 = vpack.c.bf16 %v3822_v39, %v3819_v25  ;;  %v3828_v18 = vmul.f32 %v9974_v14, %v13730_v50  ;;  %9991 = vrcp.f32 %v9706_v35  ;;  %v4086_v39 = vpack.c.bf16 %v7673_v38, %v7672_v26  ;;  %v7682_v38 = vld [vmem:[%s16286_s8 + $0x48] sm:$0xff] }
 0xe63   :  { %v9978_v9 = vpop.eup %9977  ;;  %v3604_v4 = vpop.f32.mrb[100].mxu0  ;;  %v3821_v3 = vmul.f32 %v9976_v11, %v13603_v1  ;;  %v3835_v61 = vpack.c.bf16 %v3820_v12, %v3817_v21  ;;  %9993 = vrcp.f32 %v9707_v19 }
 0xe64   :  { %v9980_v41 = vpop.eup %9979  ;;  %8683 = vmatmul.mubr.bf16.vlgmr.msra.gmra.mrb[104].mxu0 %v3837_v33  ;;  %v9708_v63 = vadd.f32 1e-09, %v3604_v4  ;;  %v3606_v50 = vpop.f32.mrb[101].mxu0  ;;  %v3825_v51 = vmul.f32 %v9978_v9, %v13721_v45  ;;  %v7683_v9 = vld [vmem:[%s16286_s8 + $0x50] sm:$0xff] }
 0xe65   :  { %v9982_v30 = vpop.eup %9981  ;;  %v9709_v52 = vadd.f32 1e-09, %v3606_v50  ;;  %v3836_v42 = vpack.c.bf16 %v3821_v3, %v3818_v47  ;;  %8686 = vmatprep.mubr.msk.bf16.mxu0 %vm10269_vm0, %v17409_v10  ;;  %v3823_v25 = vmul.f32 %v9980_v41, %v13624_v24  ;;  %v7684_v47 = vld [vmem:[%s16286_s8 + $0x58] sm:$0xff] }
 0xe66   :  { %v9984_v27 = vpop.eup %9983  ;;  %9995 = vrcp.f32 %v9708_v63  ;;  %v3840_v54 = vpack.c.bf16 %v3828_v18, %v3825_v51  ;;  %v3834_v1 = vmul.f32 %v9982_v30, %v13744_v16  ;;  %v4177_v3 = vpack.c.bf16 %v7684_v47, %v7683_v9 }
 0xe67   :  { %v9986_v5 = vpop.eup %9985  ;;  %9997 = vrcp.f32 %v9709_v52  ;;  %3996 = vmatprep.mubr.bf16.mxu1 %v3836_v42  ;;  %v3824_v53 = vmul.f32 %v9984_v27, %v13621_v57 }
 0xe68   :  { %v9988_v55 = vpop.eup %9987  ;;  %3997 = vmatmul.mubr.bf16.vlgmr.msra.gmra.mrb[92].mxu1 %v3835_v61  ;;  %v3831_v45 = vmul.f32 %v9986_v5, %v13735_v23 }
 0xe69   :  { %v9990_v34 = vpop.eup %9989  ;;  %v3826_v35 = vmul.f32 %v9988_v55, %v13642_v13  ;;  %8695 = vmatpush3.bf16.msra.mxu1 %v4086_v39 }
 0xe6a   :  { %v3827_v14 = vmul.f32 %v9990_v34, %v13639_v22  ;;  %v3843_v21 = vpack.c.bf16 %v3834_v1, %v3831_v45  ;;  %8696 = vmatprep.subr.bf16.mxu1 %v17409_v10 }
 0xe6b   :  { %v3838_v16 = vpack.c.bf16 %v3826_v35, %v3823_v25 }
 0xe6c   :  { %8687 = vmatmul.mubr.bf16.gmra.mrb[108].mxu0 %v3840_v54  ;;  %v3839_v12 = vpack.c.bf16 %v3827_v14, %v3824_v53  ;;  %v9992_v23 = vpop.eup %9991 }
 0xe6d   :  { %8690 = vmatprep.mubr.msk.bf16.mxu0 %vm10269_vm0, %v17409_v10  ;;  %v9994_v19 = vpop.eup %9993  ;;  %v3829_v11 = vmul.f32 %v9992_v23, %v13664_v29  ;;  %v7674_v29 = vld [vmem:[%s16288_s10 + $0x30] sm:$0xff] }
 0xe6e   :  { %4004 = vmatprep.mubr.bf16.mxu1 %v3839_v12  ;;  %v3830_v22 = vmul.f32 %v9994_v19, %v13661_v36  ;;  %v7675_v36 = vld [vmem:[%s16288_s10 + $0x38] sm:$0xff] }
 0xe70   :  { %v9996_v24 = vpop.eup %9995  ;;  %4005 = vmatmul.mubr.bf16.gmra.mrb[96].mxu1 %v3838_v16 }
 0xe71   :  { %v9998_v13 = vpop.eup %9997  ;;  %v3832_v57 = vmul.f32 %v9996_v24, %v13694_v28  ;;  %v7681_v28 = vld [vmem:[%s16286_s8 + $0x40] sm:$0xff] }
 0xe72   :  { %v3833_v33 = vmul.f32 %v9998_v13, %v13679_v8  ;;  %v4087_v8 = vpack.c.bf16 %v7675_v36, %v7674_v29  ;;  %v4176_v4 = vpack.c.bf16 %v7682_v38, %v7681_v28 }
 0xe73   :  { %v3841_v18 = vpack.c.bf16 %v3832_v57, %v3829_v11 }
 0xe74   :  { %8691 = vmatmul.mubr.bf16.gmra.mrb[112].mxu0 %v3843_v21  ;;  %v3842_v26 = vpack.c.bf16 %v3833_v33, %v3830_v22  ;;  %8697 = vmatpush3.bf16.msra.mxu1 %v4087_v8 }
 0xe75   :  { %8714 = vmatprep.mubr.msk.bf16.mxu0 %vm10269_vm0, %v17409_v10  ;;  %8711 = vmatpush3.bf16.msra.mxu0 %v4176_v4  ;;  %v7677_v4 = vld [vmem:[%s16289_s11 + $0x1] ss:$0 sm:$0xff] }
 0xe76   :  { %4012 = vmatprep.mubr.bf16.mxu1 %v3842_v26  ;;  %8712 = vmatprep.subr.bf16.mxu0 %v17409_v10 }
 0xe78   :  { %4013 = vmatmul.mubr.bf16.gmra.mrb[100].mxu1 %v3841_v18 }
 0xe79   :  { %8698 = vmatprep.mubr.msk.bf16.mxu1 %vm10269_vm0, %v17409_v10  ;;  %8713 = vmatpush3.bf16.msra.mxu0 %v4177_v3 }
 0xe7a   :  { %8726 = vmatprep.subr.bf16.mxu0 %v17409_v10 }
 0xf37   :  { %v4055_v61 = vpop.f32.mrb[104].mxu0 }
 0xf38   :  { %v8684_v41 = vpop.f32.mrb[105].mxu0 }
 0xf39   :  { %v4058_v63 = vpop.f32.mrb[106].mxu0 }
 0xf3a   :  { %v8685_v50 = vpop.f32.mrb[107].mxu0 }
 0xf3b   :  { %v8042_v51 = vpop.f32.mrb[92].mxu1 }
 0xf3c   :  { %v8043_v30 = vpop.f32.mrb[93].mxu1 }
 0xf3d   :  { %v8044_v52 = vadd.f32 %v8043_v30, %v8042_v51  ;;  %v8045_v42 = vpop.f32.mrb[94].mxu1  ;;  %v17419_v51 = vld [vmem:[#allocation219_spill] sm:$0xff] }
 0xf3e   :  { %v8046_v39 = vpop.f32.mrb[95].mxu1 }
 0xf3f   :  { %v4056_v27 = vadd.f32 %v8044_v52, %v4055_v61  ;;  %v8047_v54 = vadd.f32 %v8046_v39, %v8045_v42  ;;  %v4063_v1 = vpop.f32.mrb[108].mxu0  ;;  %v17421_v52 = vld [vmem:[#allocation220_spill] sm:$0xff] }
 0xf40   :  { %v8688_v5 = vpop.f32.mrb[109].mxu0 }
 0xf41   :  { %v4059_v55 = vadd.f32 %v8047_v54, %v4058_v63  ;;  %v4066_v45 = vpop.f32.mrb[110].mxu0 }
 0xf42   :  { %v8689_v34 = vpop.f32.mrb[111].mxu0 }
 0xf43   :  { %v4083_v25 = vpack.c.bf16 %v4059_v55, %v4056_v27  ;;  %v8048_v35 = vpop.f32.mrb[96].mxu1  ;;  %v17423_v34 = vld [vmem:[#allocation221_spill] sm:$0xff] }
 0xf44   :  { %v8049_v53 = vpop.f32.mrb[97].mxu1 }
 0xf45   :  { %v8050_v14 = vadd.f32 %v8049_v53, %v8048_v35  ;;  %v8051_v21 = vpop.f32.mrb[98].mxu1  ;;  %8699 = vmatmul.mubr.msk.bf16.vlgmr.msra.gmra.mrb[104].mxu1 %vm454_vm1, %v4083_v25  ;;  %v17425_v35 = vld [vmem:[#allocation222_spill] sm:$0xff] }
 0xf46   :  { %v8052_v16 = vpop.f32.mrb[99].mxu1  ;;  %8702 = vmatprep.mubr.msk.bf16.mxu1 %vm10269_vm0, %v17409_v10 }
 0xf47   :  { %v4064_v12 = vadd.f32 %v8050_v14, %v4063_v1  ;;  %v8053_v23 = vadd.f32 %v8052_v16, %v8051_v21  ;;  %v4071_v19 = vpop.f32.mrb[112].mxu0 }
 0xf48   :  { %v8692_v24 = vpop.f32.mrb[113].mxu0 }
 0xf49   :  { %v4067_v13 = vadd.f32 %v8053_v23, %v4066_v45  ;;  %v4074_v11 = vpop.f32.mrb[114].mxu0 }
 0xf4a   :  { %v8693_v57 = vpop.f32.mrb[115].mxu0 }
 0xf4b   :  { %v4084_v22 = vpack.c.bf16 %v4067_v13, %v4064_v12  ;;  %v8054_v33 = vpop.f32.mrb[100].mxu1  ;;  %v17427_v13 = vld [vmem:[#allocation223_spill] sm:$0xff]  ;;  %v17429_v57 = vld [vmem:[#allocation224_spill] sm:$0xff] }
 0xf4c   :  { %v8055_v18 = vpop.f32.mrb[101].mxu1 }
 0xf4d   :  { %v8056_v26 = vadd.f32 %v8055_v18, %v8054_v33  ;;  %v8057_v29 = vpop.f32.mrb[102].mxu1  ;;  %8703 = vmatmul.mubr.msk.bf16.gmra.mrb[108].mxu1 %vm454_vm1, %v4084_v22  ;;  %v13866_v18 = vld [vmem:[%s16287_s9 + $0x2] ss:$0 sm:$0xff] }
 0xf4e   :  { %v8058_v36 = vpop.f32.mrb[103].mxu1  ;;  %8706 = vmatprep.mubr.msk.bf16.mxu1 %vm10269_vm0, %v17409_v10 }
 0xf4f   :  { %v4072_v8 = vadd.f32 %v8056_v26, %v4071_v19  ;;  %v8059_v28 = vadd.f32 %v8058_v36, %v8057_v29 }
 0xf51   :  { %v4075_v38 = vadd.f32 %v8059_v28, %v4074_v11 }
 0xf53   :  { %v4085_v9 = vpack.c.bf16 %v4075_v38, %v4072_v8 }
 0xf55   :  { %8707 = vmatmul.mubr.msk.bf16.gmra.mrb[112].mxu1 %vm454_vm1, %v4085_v9  ;;  %v17431_v9 = vld [vmem:[#allocation18_spill] sm:$0xff] }
0x1018   :  { %v4139_v47 = vpop.f32.mrb[104].mxu1 }
0x1019   :  { %v4140_v3 = vadd.f32 %v7677_v4, %v4139_v47  ;;  %v8700_v61 = vpop.f32.mrb[105].mxu1  ;;  %v17432_v47 = vld [vmem:[#allocation24_spill] sm:$0xff] }
0x101a   :  { %v4142_v41 = vpop.f32.mrb[106].mxu1  ;;  %v17433_v61 = vld [vmem:[#allocation32_spill] sm:$0xff] }
0x101b   :  { %v4143_v63 = vadd.f32 %v7677_v4, %v4142_v41  ;;  %v8701_v50 = vpop.f32.mrb[107].mxu1  ;;  %v13831_v30 = vadd.f32 %v4140_v3, %v17419_v51  ;;  %v17435_v51 = vld [vmem:[#allocation42_spill] sm:$0xff] }
0x101d   :  { %17420 = vst [vmem:[#allocation233_spill] sm:$0xff] %v13831_v30  ;;  %v13834_v42 = vadd.f32 %v4143_v63, %v17421_v52  ;;  %v17434_v63 = vld [vmem:[#allocation34_spill] sm:$0xff] }
0x101f   :  { %17422 = vst [vmem:[#allocation232_spill] sm:$0xff] %v13834_v42  ;;  %v4173_v39 = vpack.c.bf16 %v13834_v42, %v13831_v30 }
0x1020   :  { %v4147_v27 = vpop.f32.mrb[108].mxu1 }
0x1021   :  { %v4148_v54 = vadd.f32 %v7677_v4, %v4147_v27  ;;  %v8704_v1 = vpop.f32.mrb[109].mxu1  ;;  %8715 = vmatmul.mubr.msk.bf16.vlgmr.msra.gmra.mrb[116].mxu0 %vm454_vm1, %v4173_v39  ;;  %v17436_v39 = vld [vmem:[#allocation52_spill] sm:$0xff] }
0x1022   :  { %v4150_v5 = vpop.f32.mrb[110].mxu1  ;;  %8718 = vmatprep.mubr.msk.bf16.mxu0 %vm10269_vm0, %v17409_v10 }
0x1023   :  { %v4151_v55 = vadd.f32 %v7677_v4, %v4150_v5  ;;  %v8705_v45 = vpop.f32.mrb[111].mxu1  ;;  %v13842_v25 = vadd.f32 %v4148_v54, %v17423_v34  ;;  %v17437_v54 = vld [vmem:[#allocation50_spill] sm:$0xff]  ;;  %v17439_v34 = vld [vmem:[#allocation23_spill] sm:$0xff] }
0x1025   :  { %17424 = vst [vmem:[#allocation235_spill] sm:$0xff] %v13842_v25  ;;  %v13845_v53 = vadd.f32 %v4151_v55, %v17425_v35  ;;  %v17438_v55 = vld [vmem:[#allocation15_spill] sm:$0xff] }
0x1027   :  { %17426 = vst [vmem:[#allocation234_spill] sm:$0xff] %v13845_v53  ;;  %v4174_v14 = vpack.c.bf16 %v13845_v53, %v13842_v25  ;;  %v17466_v53 = vld [vmem:[#allocation19_spill] sm:$0xff]  ;;  %v17467_v25 = vld [vmem:[#allocation21_spill] sm:$0xff] }
0x1028   :  { %v4155_v21 = vpop.f32.mrb[112].mxu1 }
0x1029   :  { %v4156_v16 = vadd.f32 %v7677_v4, %v4155_v21  ;;  %v8708_v12 = vpop.f32.mrb[113].mxu1  ;;  %8719 = vmatmul.mubr.msk.bf16.gmra.mrb[120].mxu0 %vm454_vm1, %v4174_v14  ;;  %v17440_v14 = vld [vmem:[#allocation31_spill] sm:$0xff] }
0x102a   :  { %v4158_v23 = vpop.f32.mrb[114].mxu1  ;;  %8722 = vmatprep.mubr.msk.bf16.mxu0 %vm10269_vm0, %v17409_v10 }
0x102b   :  { %v4159_v19 = vadd.f32 %v7677_v4, %v4158_v23  ;;  %v8709_v24 = vpop.f32.mrb[115].mxu1  ;;  %v13853_v11 = vadd.f32 %v4156_v16, %v17427_v13  ;;  %v17441_v16 = vld [vmem:[#allocation33_spill] sm:$0xff] }
0x102c   :  { %v17442_v23 = vld [vmem:[#allocation41_spill] sm:$0xff]  ;;  %v17443_v24 = vld [vmem:[#allocation51_spill] sm:$0xff] }
0x102d   :  { %17428 = vst [vmem:[#allocation236_spill] sm:$0xff] %v13853_v11  ;;  %v13856_v22 = vadd.f32 %v4159_v19, %v17429_v57  ;;  %v17444_v57 = vld [vmem:[#allocation49_spill] sm:$0xff] }
0x102f   :  { %17430 = vst [vmem:[#allocation241_spill] sm:$0xff] %v13856_v22  ;;  %v4175_v33 = vpack.c.bf16 %v13856_v22, %v13853_v11 }
0x1031   :  { %8723 = vmatmul.mubr.msk.bf16.gmra.mrb[124].mxu0 %vm454_vm1, %v4175_v33 }
0x1032   :  { %8742 = vmatprep.mubr.msk.bf16.mxu0 %vm10269_vm0, %v17409_v10 }
0x10f4   :  { %v4229_v26 = vpop.f32.mrb[116].mxu0 }
0x10f5   :  { %v13869_v29 = vadd.f32 %v13866_v18, %v4229_v26  ;;  %v8716_v36 = vpop.f32.mrb[117].mxu0 }
0x10f6   :  { %v4232_v8 = vpop.f32.mrb[118].mxu0 }
0x10f7   :  { %v13872_v28 = vadd.f32 %v13866_v18, %v4232_v8  ;;  %v8717_v38 = vpop.f32.mrb[119].mxu0  ;;  %v4252_v4 = vmul.f32 %v13869_v29, %v17431_v9  ;;  %v13878_v3 = vmul.f32 %v13869_v29, %v17432_v47  ;;  %v13882_v41 = vmul.f32 %v13869_v29, %v17433_v61  ;;  %v17460_v61 = vld [vmem:[#allocation22_spill] sm:$0xff] }
0x10f8   :  { %v13886_v50 = vmul.f32 %v13869_v29, %v17434_v63  ;;  %v13890_v52 = vmul.f32 %v13869_v29, %v17435_v51  ;;  %v13894_v27 = vmul.f32 %v13869_v29, %v17436_v39  ;;  %v13898_v1 = vmul.f32 %v13869_v29, %v17437_v54  ;;  %v17445_v38 = vld [vmem:[#allocation60_spill] sm:$0xff]  ;;  %v17457_v39 = vld [vmem:[#allocation194_spill] sm:$0xff] }
0x10f9   :  { %v13902_v5 = vpack.c.bf16 %v13872_v28, %v13869_v29  ;;  %v4253_v45 = vmul.f32 %v13872_v28, %v17438_v55  ;;  %v13908_v35 = vmul.f32 %v13872_v28, %v17439_v34  ;;  %v13912_v21 = vmul.f32 %v13872_v28, %v17440_v14  ;;  %v17453_v54 = vld [vmem:[#allocation168_spill] sm:$0xff] }
0x10fa   :  { %v13916_v12 = vmul.f32 %v13872_v28, %v17441_v16  ;;  %v13920_v19 = vmul.f32 %v13872_v28, %v17442_v23  ;;  %v13924_v13 = vmul.f32 %v13872_v28, %v17443_v24  ;;  %v13928_v33 = vmul.f32 %v13872_v28, %v17444_v57  ;;  %v17447_v16 = vld [vmem:[#allocation158_spill] sm:$0xff]  ;;  %v17449_v57 = vld [vmem:[#allocation163_spill] sm:$0xff]  ;;  %v17459_v63 = vld [vmem:[#allocation20_spill] sm:$0xff] }
0x10fb   :  { %8097 = vmatprep.mubr.msk.bf16.mxu1 %vm454_vm1, %v13902_v5  ;;  %v4351_v26 = vpack.c.bf16 %v4253_v45, %v4252_v4  ;;  %v13938_v23 = vmul.f32 %v13869_v29, %v17445_v38  ;;  %v17446_v38 = vld [vmem:[#allocation59_spill] sm:$0xff]  ;;  %v13958_v34 = vmul.f32 %v13869_v29, %v17447_v16  ;;  %v13962_v4 = vmul.f32 %v13872_v28, %v17449_v57  ;;  %v17451_v45 = vld [vmem:[#allocation156_spill] sm:$0xff] }
0x10fc   :  { %v4237_v24 = vpop.f32.mrb[120].mxu0  ;;  %v13954_v14 = vmul.f32 %v13872_v28, %v17446_v38  ;;  %v13978_v16 = vmul.f32 %v13872_v28, %v17457_v39  ;;  %v17463_v39 = vld [vmem:[#allocation38_spill] sm:$0xff] }
0x10fd   :  { %v13949_v36 = vadd.f32 %v13866_v18, %v4237_v24  ;;  %4399 = vrot.lane.b32.xlu0 %v4351_v26, %s10271_s5  ;;  %v8720_v8 = vpop.f32.mrb[121].mxu0  ;;  %17448 = vst [vmem:[#allocation240_spill] sm:$0xff] %v13958_v34  ;;  %17450 = vst [vmem:[#allocation243_spill] sm:$0xff] %v13962_v4  ;;  %v13966_v24 = vmul.f32 %v13869_v29, %v17451_v45  ;;  %v13970_v26 = vmul.f32 %v13872_v28, %v17453_v54  ;;  %v17461_v54 = vld [vmem:[#allocation30_spill] sm:$0xff] }
0x10fe   :  { %v4240_v55 = vpop.f32.mrb[122].mxu0  ;;  %v17455_v8 = vld [vmem:[#allocation189_spill] sm:$0xff]  ;;  %17458 = vst [vmem:[#allocation247_spill] sm:$0xff] %v13978_v16  ;;  %v17496_v4 = vld [vmem:[#allocation62_spill] sm:$0xff] }
0x10ff   :  { %17452 = vst [vmem:[#allocation242_spill] sm:$0xff] %v13966_v24  ;;  %17454 = vst [vmem:[#allocation245_spill] sm:$0xff] %v13970_v26  ;;  %v13974_v38 = vmul.f32 %v13869_v29, %v17455_v8  ;;  %v13981_v57 = vadd.f32 %v13866_v18, %v4240_v55  ;;  %v8721_v51 = vpop.f32.mrb[123].mxu0  ;;  %v4284_v45 = vmul.f32 %v13949_v36, %v17459_v63  ;;  %v17462_v8 = vld [vmem:[#allocation40_spill] sm:$0xff]  ;;  %v17494_v24 = vld [vmem:[#allocation45_spill] sm:$0xff] }
0x1100   :  { %v13987_v47 = vmul.f32 %v13949_v36, %v17460_v61  ;;  %v13991_v9 = vmul.f32 %v13949_v36, %v17461_v54  ;;  %v13995_v22 = vmul.f32 %v13949_v36, %v17462_v8  ;;  %v13999_v55 = vmul.f32 %v13949_v36, %v17463_v39  ;;  %v17464_v51 = vld [vmem:[#allocation48_spill] sm:$0xff]  ;;  %v17468_v8 = vld [vmem:[#allocation29_spill] sm:$0xff]  ;;  %v17469_v39 = vld [vmem:[#allocation39_spill] sm:$0xff] }
0x1101   :  { %17456 = vst [vmem:[#allocation244_spill] sm:$0xff] %v13974_v38  ;;  %v14003_v11 = vmul.f32 %v13949_v36, %v17464_v51  ;;  %v17465_v63 = vld [vmem:[#allocation56_spill] sm:$0xff]  ;;  %v4285_v54 = vmul.f32 %v13981_v57, %v17466_v53  ;;  %v14013_v42 = vmul.f32 %v13981_v57, %v17467_v25  ;;  %v14017_v30 = vmul.f32 %v13981_v57, %v17468_v8  ;;  %v17470_v51 = vld [vmem:[#allocation37_spill] sm:$0xff]  ;;  %v17472_v53 = vld [vmem:[#allocation55_spill] sm:$0xff] }
0x1102   :  { %v14007_v61 = vmul.f32 %v13949_v36, %v17465_v63  ;;  %v14021_v58 = vmul.f32 %v13981_v57, %v17469_v39  ;;  %v14025_v20 = vmul.f32 %v13981_v57, %v17470_v51  ;;  %v17471_v63 = vld [vmem:[#allocation47_spill] sm:$0xff]  ;;  %v14033_v25 = vmul.f32 %v13981_v57, %v17472_v53  ;;  %v17474_v51 = vld [vmem:[#allocation57_spill] sm:$0xff] }
0x1103   :  { %v14029_v17 = vmul.f32 %v13981_v57, %v17471_v63  ;;  %v4367_v46 = vpack.c.bf16 %v4285_v54, %v4284_v45  ;;  %v4352_v39 = vpack.c.bf16 %v14013_v42, %v13987_v47  ;;  %v17473_v54 = vld [vmem:[#allocation58_spill] sm:$0xff]  ;;  %v14059_v60 = vmul.f32 %v13981_v57, %v17474_v51  ;;  %v17479_v51 = vld [vmem:[#allocation160_spill] sm:$0xff] }
0x1104   :  { %v4245_v0 = vpop.f32.mrb[124].mxu0  ;;  %v14051_v45 = vmul.f32 %v13949_v36, %v17473_v54  ;;  %v14063_v53 = vpack.c.bf16 %v13981_v57, %v13949_v36  ;;  %v14079_v48 = vmul.f32 %v13949_v36, %v17479_v51  ;;  %v17482_v54 = vld [vmem:[#allocation28_spill] sm:$0xff] }
0x1105   :  { %v14054_v42 = vadd.f32 %v13866_v18, %v4245_v0  ;;  %4431 = vrot.lane.b32.xlu0 %v4367_v46, %s10271_s5  ;;  %v8724_v47 = vpop.f32.mrb[125].mxu0  ;;  %v17475_v0 = vld [vmem:[#allocation165_spill] sm:$0xff]  ;;  %v17477_v46 = vld [vmem:[#allocation178_spill] sm:$0xff] }
0x1106   :  { %v4248_v63 = vpop.f32.mrb[126].mxu0  ;;  %v14071_v15 = vmul.f32 %v13949_v36, %v17475_v0  ;;  %v14075_v47 = vmul.f32 %v13981_v57, %v17477_v46  ;;  %17480 = vst [vmem:[#allocation248_spill] sm:$0xff] %v14079_v48  ;;  %v17483_v0 = vld [vmem:[#allocation26_spill] sm:$0xff]  ;;  %v17514_v48 = vld [vmem:[#allocation188_spill] sm:$0xff] }
0x1107   :  { %v14082_v7 = vadd.f32 %v13866_v18, %v4248_v63  ;;  %v8725_v8 = vpop.f32.mrb[127].mxu0  ;;  %v4268_v43 = vmul.f32 %v14054_v42, %v17481_v37  ;;  %v4256_v44 = vmul.f32 %v14054_v42, %v17482_v54  ;;  %v4286_v59 = vmul.f32 %v14054_v42, %v17483_v0  ;;  %v17487_v63 = vld [vmem:[#allocation54_spill] sm:$0xff]  ;;  %v17489_v0 = vld [vmem:[#allocation17_spill] sm:$0xff]  ;;  %v17490_v37 = vld [vmem:[#allocation27_spill] sm:$0xff] }
0x1108   :  { %17476 = vst [vmem:[#allocation246_spill] sm:$0xff] %v14071_v15  ;;  %17478 = vst [vmem:[#allocation249_spill] sm:$0xff] %v14075_v47  ;;  %v4274_v46 = vmul.f32 %v14054_v42, %v17484_v56  ;;  %v14094_v51 = vmul.f32 %v14054_v42, %v17485_v32  ;;  %v14098_v18 = vmul.f32 %v14054_v42, %v17486_v49  ;;  %v17492_v49 = vld [vmem:[#allocation35_spill] sm:$0xff]  ;;  %v17507_v15 = vld [vmem:[#allocation185_spill] sm:$0xff] }
0x1109   :  { %v14102_v8 = vmul.f32 %v14054_v42, %v17487_v63  ;;  %v17488_v54 = vpack.c.bf16 %v13908_v35, %v13878_v3  ;;  %v4269_v56 = vmul.f32 %v14082_v7, %v17489_v0  ;;  %v4257_v32 = vmul.f32 %v14082_v7, %v17490_v37  ;;  %v17495_v35 = vld [vmem:[#allocation53_spill] sm:$0xff]  ;;  %v17501_v37 = vld [vmem:[#allocation175_spill] sm:$0xff] }
0x110a   :  { %v4287_v31 = vmul.f32 %v14082_v7, %v17491_v2  ;;  %v4275_v62 = vmul.f32 %v14082_v7, %v17492_v49  ;;  %v14118_v63 = vmul.f32 %v14082_v7, %v17493_v6  ;;  %v14122_v3 = vmul.f32 %v14082_v7, %v17494_v24  ;;  %v17502_v49 = vld [vmem:[#allocation186_spill] sm:$0xff] }
0x110b   :  { %4417 = vrot.lane.b32.xlu0 %v17488_v54, %s10271_s5  ;;  %v14126_v54 = vmul.f32 %v14082_v7, %v17495_v35  ;;  %v4359_v0 = vpack.c.bf16 %v4269_v56, %v4268_v43  ;;  %v4353_v2 = vpack.c.bf16 %v4257_v32, %v4256_v44  ;;  %v14138_v35 = vmul.f32 %v14054_v42, %v17496_v4  ;;  %v17497_v32 = vld [vmem:[#allocation61_spill] sm:$0xff]  ;;  %v17498_v56 = vld [vmem:[#allocation152_spill] sm:$0xff] }
0x110c   :  { %v4368_v26 = vpack.c.bf16 %v4287_v31, %v4286_v59  ;;  %v4362_v34 = vpack.c.bf16 %v4275_v62, %v4274_v46  ;;  %v14144_v62 = vmul.f32 %v14082_v7, %v17497_v32  ;;  %v14148_v31 = vpack.c.bf16 %v14082_v7, %v14054_v42  ;;  %v17499_v44 = vld [vmem:[#allocation153_spill] sm:$0xff] }
0x110d   :  { %4415 = vrot.lane.b32.xlu1 %v4359_v0, %s10271_s5  ;;  %v14152_v59 = vmul.f32 %v14054_v42, %v17498_v56  ;;  %v14156_v43 = vmul.f32 %v14082_v7, %v17499_v44  ;;  %v14166_v24 = vmul.f32 %v14054_v42, %v17501_v37  ;;  %v14172_v56 = vmul.f32 %v14082_v7, %v17502_v49  ;;  %v17503_v44 = vld [vmem:[#allocation170_spill] sm:$0xff]  ;;  %v17505_v0 = vld [vmem:[#allocation183_spill] sm:$0xff] }
0x110e   :  { %v14176_v32 = vmul.f32 %v13949_v36, %v17503_v44  ;;  %v14180_v4 = vmul.f32 %v13981_v57, %v17505_v0  ;;  %v14188_v6 = vmul.f32 %v14054_v42, %v17507_v15  ;;  %v17509_v49 = vld [vmem:[#allocation190_spill] sm:$0xff]  ;;  %v17511_v0 = vpack.c.bf16 %v13912_v21, %v13882_v41  ;;  %v17512_v44 = vld [vmem:[#allocation180_spill] sm:$0xff]  ;;  %v17515_v21 = vld [vmem:[#allocation187_spill] sm:$0xff] }
0x110f   :  { %4403 = vrot.lane.b32.xlu0 %v4353_v2, %s10271_s5  ;;  %v17500_v2 = vld [vmem:[#allocation173_spill] sm:$0xff]  ;;  %v14192_v47 = vmul.f32 %v14082_v7, %v17509_v49  ;;  %v14205_v15 = vmul.f32 %v14054_v42, %v17512_v44  ;;  %v17520_v49 = vld [vmem:[#allocation198_spill] sm:$0xff] }
0x1110   :  { %v14162_v46 = vmul.f32 %v13981_v57, %v17500_v2  ;;  %17504 = vst [vmem:[#allocation251_spill] sm:$0xff] %v14176_v32  ;;  %17506 = vst [vmem:[#allocation250_spill] sm:$0xff] %v14180_v4  ;;  %v17517_v2 = vld [vmem:[#allocation192_spill] sm:$0xff]  ;;  %v17518_v44 = vld [vmem:[#allocation193_spill] sm:$0xff] }
0x1111   :  { %17508 = vst [vmem:[#allocation253_spill] sm:$0xff] %v14188_v6  ;;  %17510 = vst [vmem:[#allocation252_spill] sm:$0xff] %v14192_v47  ;;  %4401 = vrot.lane.b32.xlu1 %v4352_v39, %s10271_s5  ;;  %v14211_v39 = vmul.f32 %v14082_v7, %v17514_v48  ;;  %v14221_v37 = vmul.f32 %v13872_v28, %v17517_v2  ;;  %v14225_v32 = vmul.f32 %v13949_v36, %v17518_v44  ;;  %v17522_v48 = vld [vmem:[#allocation191_spill] sm:$0xff]  ;;  %v17526_v2 = vld [vmem:[#allocation197_spill] sm:$0xff] }
0x1112   :  { %17513 = vst [vmem:[#allocation255_spill] sm:$0xff] %v14205_v15  ;;  %v14229_v6 = vmul.f32 %v13981_v57, %v17520_v49  ;;  %v14233_v47 = vmul.f32 %v13869_v29, %v17522_v48  ;;  %v14243_v16 = vmul.f32 %v13949_v36, %v17526_v2  ;;  %v17528_v44 = vld [vmem:[#allocation202_spill] sm:$0xff]  ;;  %v17532_v15 = vld [vmem:[#allocation200_spill] sm:$0xff] }
0x1113   :  { %4435 = vrot.lane.b32.xlu0 %v17511_v0, %s10271_s5  ;;  %v14217_v0 = vmul.f32 %v13869_v29, %v17515_v21  ;;  %17519 = vst [vmem:[#allocation257_spill] sm:$0xff] %v14225_v32  ;;  %v17524_v21 = vld [vmem:[#allocation196_spill] sm:$0xff]  ;;  %v14247_v4 = vmul.f32 %v13981_v57, %v17528_v44  ;;  %v17537_v44 = vld [vmem:[#allocation205_spill] sm:$0xff] }
0x1114   :  { %17521 = vst [vmem:[#allocation256_spill] sm:$0xff] %v14229_v6  ;;  %17523 = vst [vmem:[#allocation259_spill] sm:$0xff] %v14233_v47  ;;  %v14239_v38 = vmul.f32 %v13872_v28, %v17524_v21  ;;  %v17530_v21 = vld [vmem:[#allocation195_spill] sm:$0xff]  ;;  %v17536_v2 = vld [vmem:[#allocation204_spill] sm:$0xff] }
0x1115   :  { %17516 = vst [vmem:[#allocation254_spill] sm:$0xff] %v14217_v0  ;;  %17527 = vst [vmem:[#allocation261_spill] sm:$0xff] %v14243_v16  ;;  %4433 = vrot.lane.b32.xlu1 %v4368_v26, %s10271_s5  ;;  %v14257_v49 = vmul.f32 %v13949_v36, %v17530_v21  ;;  %v14265_v26 = vmul.f32 %v13981_v57, %v17532_v15  ;;  %v17534_v0 = vld [vmem:[#allocation206_spill] sm:$0xff]  ;;  %v17535_v21 = vld [vmem:[#allocation199_spill] sm:$0xff]  ;;  %v14281_v47 = vmul.f32 %v14082_v7, %v17536_v2 }
0x1116   :  { %17525 = vst [vmem:[#allocation258_spill] sm:$0xff] %v14239_v38  ;;  %17529 = vst [vmem:[#allocation260_spill] sm:$0xff] %v14247_v4  ;;  %v14273_v41 = vmul.f32 %v14082_v7, %v17534_v0  ;;  %v14277_v32 = vmul.f32 %v14054_v42, %v17535_v21  ;;  %v14285_v15 = vmul.f32 %v13869_v29, %v17537_v44  ;;  %v17539_v16 = vld [vmem:[#allocation210_spill] sm:$0xff]  ;;  %v17540_v0 = vld [vmem:[#allocation203_spill] sm:$0xff] }
0x1117   :  { %4421 = vrot.lane.b32.xlu0 %v4362_v34, %s10271_s5  ;;  %17531 = vst [vmem:[#allocation263_spill] sm:$0xff] %v14257_v49  ;;  %v17533_v34 = vld [vmem:[#allocation201_spill] sm:$0xff]  ;;  %v14291_v4 = vmul.f32 %v13872_v28, %v17539_v16  ;;  %v14295_v38 = vmul.f32 %v14054_v42, %v17540_v0  ;;  %v17542_v21 = vld [vmem:[#allocation208_spill] sm:$0xff]  ;;  %v17544_v44 = vpack.c.bf16 %v14017_v30, %v13991_v9  ;;  %v17550_v16 = vld [vmem:[#allocation214_spill] sm:$0xff] }
0x1118   :  { %v14269_v48 = vmul.f32 %v14054_v42, %v17533_v34  ;;  %17538 = vst [vmem:[#allocation262_spill] sm:$0xff] %v14285_v15  ;;  %v14299_v6 = vmul.f32 %v14082_v7, %v17542_v21  ;;  %v17545_v34 = vpack.c.bf16 %v14021_v58, %v13995_v22  ;;  %v17546_v2 = vld [vmem:[#allocation209_spill] sm:$0xff]  ;;  %v17548_v22 = vld [vmem:[#allocation207_spill] sm:$0xff]  ;;  %v17551_v49 = vld [vmem:[#allocation216_spill] sm:$0xff] }
0x1119   :  { %17541 = vst [vmem:[#allocation265_spill] sm:$0xff] %v14295_v38  ;;  %4419 = vrot.lane.b32.xlu1 %v17544_v44, %s10271_s5  ;;  %v14315_v21 = vmul.f32 %v13869_v29, %v17546_v2  ;;  %v17547_v9 = vld [vmem:[#allocation213_spill] sm:$0xff]  ;;  %v14327_v44 = vmul.f32 %v13869_v29, %v17548_v22  ;;  %v14335_v2 = vmul.f32 %v13949_v36, %v17550_v16  ;;  %v17552_v30 = vld [vmem:[#allocation212_spill] sm:$0xff]  ;;  %v17553_v22 = vld [vmem:[#allocation215_spill] sm:$0xff] }
0x111a   :  { %17543 = vst [vmem:[#allocation264_spill] sm:$0xff] %v14299_v6  ;;  %v14323_v58 = vmul.f32 %v13872_v28, %v17547_v9  ;;  %v14339_v15 = vmul.f32 %v13981_v57, %v17551_v49  ;;  %v14343_v9 = vmul.f32 %v13949_v36, %v17552_v30  ;;  %v14349_v38 = vmul.f32 %v13981_v57, %v17553_v22  ;;  %v17555_v16 = vld [vmem:[#allocation218_spill] sm:$0xff]  ;;  %v17603_v57 = vld [vmem:[#allocation109_spill] sm:$0xff] }
0x111b   :  { %4407 = vrot.lane.b32.xlu0 %v17545_v34, %s10271_s5  ;;  %v17549_v34 = vld [vmem:[#allocation211_spill] sm:$0xff]  ;;  %v14357_v6 = vmul.f32 %v14082_v7, %v17555_v16  ;;  %v17556_v36 = vpack.c.bf16 %v13916_v12, %v13886_v50  ;;  %v17557_v29 = vpack.c.bf16 %v14118_v63, %v14094_v51  ;;  %v17558_v50 = vpack.c.bf16 %v14025_v20, %v13999_v55  ;;  %v17600_v16 = vld [vmem:[#allocation146_spill] sm:$0xff]  ;;  %v17601_v7 = vld [vmem:[#allocation100_spill] sm:$0xff] }
0x111c   :  { %v14331_v0 = vmul.f32 %v13872_v28, %v17549_v34  ;;  %v17554_v28 = vld [vmem:[#allocation217_spill] sm:$0xff]  ;;  %v17559_v12 = vpack.c.bf16 %v14029_v17, %v14003_v11  ;;  %v17560_v51 = vpack.c.bf16 %v13920_v19, %v13890_v52  ;;  %v17561_v63 = vpack.c.bf16 %v13924_v13, %v13894_v27 }
0x111d   :  { %v14353_v34 = vmul.f32 %v14054_v42, %v17554_v28  ;;  %4405 = vrot.lane.b32.xlu1 %v17556_v36, %s10271_s5  ;;  %v17562_v20 = vpack.c.bf16 %v14122_v3, %v14098_v18  ;;  %v17563_v17 = vpack.c.bf16 %v14033_v25, %v14007_v61  ;;  %v17564_v11 = vpack.c.bf16 %v13928_v33, %v13898_v1  ;;  %v17602_v42 = vld [vmem:[#allocation106_spill] sm:$0xff] }
0x111e   :  { %v17565_v52 = vpack.c.bf16 %v13954_v14, %v13938_v23  ;;  %v17566_v27 = vpack.c.bf16 %v14126_v54, %v14102_v8  ;;  %v17567_v25 = vpack.c.bf16 %v14059_v60, %v14051_v45  ;;  %v17568_v61 = vpack.c.bf16 %v14144_v62, %v14138_v35 }
0x111f   :  { %4439 = vrot.lane.b32.xlu0 %v17557_v29, %s10271_s5 }
0x1121   :  { %4437 = vrot.lane.b32.xlu1 %v17558_v50, %s10271_s5 }
0x1123   :  { %4425 = vrot.lane.b32.xlu0 %v17559_v12, %s10271_s5 }
0x1125   :  { %4423 = vrot.lane.b32.xlu1 %v17560_v51, %s10271_s5 }
0x1127   :  { %4411 = vrot.lane.b32.xlu0 %v17561_v63, %s10271_s5 }
0x1129   :  { %4409 = vrot.lane.b32.xlu1 %v17562_v20, %s10271_s5 }
0x112b   :  { %4443 = vrot.lane.b32.xlu0 %v17563_v17, %s10271_s5 }
0x112d   :  { %4441 = vrot.lane.b32.xlu1 %v17564_v11, %s10271_s5 }
0x112f   :  { %4429 = vrot.lane.b32.xlu0 %v17565_v52, %s10271_s5 }
0x1131   :  { %4427 = vrot.lane.b32.xlu1 %v17566_v27, %s10271_s5 }
0x1135   :  { %4413 = vrot.lane.b32.xlu1 %v17567_v25, %s10271_s5 }
0x1139   :  { %4445 = vrot.lane.b32.xlu1 %v17568_v61, %s10271_s5 }
0x116f   :  { %v4400_v1 = vpop.permute.xlu0 %4399 }
0x1170   :  { %v4457_v33 = vsel %vm454_vm1, %v4400_v1, 0 }
0x1177   :  { %v4432_v19 = vpop.permute.xlu0 %4431 }
0x1178   :  { %v4505_v14 = vsel %vm454_vm1, %v4432_v19, 0 }
0x1179   :  { %8727 = vmatpush3.bf16.xpose.msra.mxu0 %v4505_v14 }
0x117a   :  { %8728 = vmatprep.subr.bf16.mxu0 %v17409_v10 }
0x117d   :  { %v4418_v23 = vpop.permute.xlu0 %4417 }
0x117f   :  { %v4416_v13 = vpop.permute.xlu1 %4415 }
0x1180   :  { %9798 = vmatprep.subr.msk.bf16.mxu1 %vm454_vm1, %v4416_v13 }
0x1181   :  { %v4404_v60 = vpop.permute.xlu0 %4403  ;;  %8082 = vmatpush3.bf16.xpose.msra.mxu1 %v4457_v33 }
0x1182   :  { %9799 = vmatprep.subr.msk.bf16.mxu1 %vm454_vm1, %v4418_v23  ;;  %v4463_v29 = vsel %vm454_vm1, %v4404_v60, 0 }
0x1183   :  { %v4402_v55 = vpop.permute.xlu1 %4401 }
0x1184   :  { %v4460_v8 = vsel %vm454_vm1, %v4402_v55, 0 }
0x1185   :  { %v4436_v45 = vpop.permute.xlu0 %4435 }
0x1186   :  { %v4511_v36 = vsel %vm454_vm1, %v4436_v45, 0 }
0x1187   :  { %v4434_v18 = vpop.permute.xlu1 %4433 }
0x1188   :  { %v4508_v3 = vsel %vm454_vm1, %v4434_v18, 0 }
0x1189   :  { %8084 = vmatpush3.bf16.xpose.msra.mxu1 %v4460_v8  ;;  %8729 = vmatpush3.bf16.xpose.msra.mxu0 %v4508_v3  ;;  %v4422_v54 = vpop.permute.xlu0 %4421 }
0x118a   :  { %8730 = vmatprep.subr.bf16.mxu0 %v17409_v10 }
0x118b   :  { %v4420_v35 = vpop.permute.xlu1 %4419 }
0x118c   :  { %9800 = vmatprep.subr.msk.bf16.mxu1 %vm454_vm1, %v4420_v35  ;;  %v17569_v35 = vld [vmem:[#allocation63_spill] sm:$0xff] }
0x118d   :  { %v4408_v50 = vpop.permute.xlu0 %4407 }
0x118e   :  { %v4469_v27 = vsel %vm454_vm1, %v4408_v50, 0  ;;  %v17574_v50 = vld [vmem:[#allocation110_spill] sm:$0xff] }
0x118f   :  { %v4406_v62 = vpop.permute.xlu1 %4405 }
0x1190   :  { %v4466_v63 = vsel %vm454_vm1, %v4406_v62, 0  ;;  %v17571_v62 = vld [vmem:[#allocation64_spill] sm:$0xff] }
0x1191   :  { %8086 = vmatpush3.bf16.xpose.msra.mxu1 %v4463_v29  ;;  %8731 = vmatpush3.bf16.xpose.msra.mxu0 %v4511_v36  ;;  %v4440_v17 = vpop.permute.xlu0 %4439  ;;  %v17572_v29 = vld [vmem:[#allocation108_spill] sm:$0xff]  ;;  %v17573_v36 = vld [vmem:[#allocation65_spill] sm:$0xff] }
0x1192   :  { %9801 = vmatprep.subr.msk.bf16.mxu1 %vm454_vm1, %v4422_v54  ;;  %8732 = vmatprep.subr.bf16.mxu0 %v17409_v10  ;;  %v4517_v25 = vsel %vm454_vm1, %v4440_v17, 0  ;;  %v17570_v54 = vld [vmem:[#allocation101_spill] sm:$0xff]  ;;  %v17580_v17 = vld [vmem:[#allocation118_spill] sm:$0xff] }
0x1193   :  { %v4438_v12 = vpop.permute.xlu1 %4437 }
0x1194   :  { %v4514_v20 = vsel %vm454_vm1, %v4438_v12, 0  ;;  %v17575_v12 = vld [vmem:[#allocation66_spill] sm:$0xff] }
0x1195   :  { %v4426_v52 = vpop.permute.xlu0 %4425 }
0x1197   :  { %v4424_v51 = vpop.permute.xlu1 %4423 }
0x1199   :  { %8088 = vmatpush3.bf16.xpose.msra.mxu1 %v4466_v63  ;;  %8733 = vmatpush3.bf16.xpose.msra.mxu0 %v4514_v20  ;;  %v4412_v1 = vpop.permute.xlu0 %4411  ;;  %v17577_v63 = vld [vmem:[#allocation67_spill] sm:$0xff]  ;;  %v17579_v20 = vld [vmem:[#allocation68_spill] sm:$0xff] }
0x119a   :  { %9802 = vmatprep.subr.msk.bf16.mxu1 %vm454_vm1, %v4424_v51  ;;  %8734 = vmatprep.subr.bf16.mxu0 %v17409_v10  ;;  %v4475_v60 = vsel %vm454_vm1, %v4412_v1, 0  ;;  %v17576_v51 = vld [vmem:[#allocation112_spill] sm:$0xff]  ;;  %v17587_v1 = vld [vmem:[#allocation75_spill] sm:$0xff] }
0x119b   :  { %v4410_v11 = vpop.permute.xlu1 %4409 }
0x119c   :  { %v4472_v19 = vsel %vm454_vm1, %v4410_v11, 0  ;;  %v17581_v11 = vld [vmem:[#allocation69_spill] sm:$0xff] }
0x119d   :  { %v4444_v13 = vpop.permute.xlu0 %4443 }
0x119e   :  { %v4523_v55 = vsel %vm454_vm1, %v4444_v13, 0  ;;  %v17591_v13 = vld [vmem:[#allocation81_spill] sm:$0xff] }
0x119f   :  { %v4442_v61 = vpop.permute.xlu1 %4441 }
0x11a0   :  { %v4520_v14 = vsel %vm454_vm1, %v4442_v61, 0  ;;  %v17585_v61 = vld [vmem:[#allocation71_spill] sm:$0xff] }
0x11a1   :  { %8090 = vmatpush3.bf16.xpose.msra.mxu1 %v4469_v27  ;;  %8735 = vmatpush3.bf16.xpose.msra.mxu0 %v4517_v25  ;;  %v4430_v45 = vpop.permute.xlu0 %4429  ;;  %v17583_v27 = vld [vmem:[#allocation70_spill] sm:$0xff]  ;;  %v17584_v25 = vld [vmem:[#allocation123_spill] sm:$0xff] }
0x11a2   :  { %9803 = vmatprep.subr.msk.bf16.mxu1 %vm454_vm1, %v4426_v52  ;;  %8736 = vmatprep.subr.bf16.mxu0 %v17409_v10  ;;  %v17582_v52 = vld [vmem:[#allocation121_spill] sm:$0xff] }
0x11a3   :  { %v4428_v23 = vpop.permute.xlu1 %4427 }
0x11a7   :  { %v4414_v33 = vpop.permute.xlu1 %4413 }
0x11a8   :  { %v4478_v8 = vsel %vm454_vm1, %v4414_v33, 0  ;;  %v17592_v33 = vld [vmem:[#allocation138_spill] sm:$0xff] }
0x11a9   :  { %8092 = vmatpush3.bf16.xpose.msra.mxu1 %v4472_v19  ;;  %8737 = vmatpush3.bf16.xpose.msra.mxu0 %v4520_v14  ;;  %v17588_v19 = vld [vmem:[#allocation134_spill] sm:$0xff]  ;;  %v17589_v14 = vld [vmem:[#allocation77_spill] sm:$0xff] }
0x11aa   :  { %9804 = vmatprep.subr.msk.bf16.mxu1 %vm454_vm1, %v4428_v23  ;;  %8738 = vmatprep.subr.bf16.mxu0 %v17409_v10  ;;  %v17590_v23 = vld [vmem:[#allocation136_spill] sm:$0xff] }
0x11ab   :  { %v4446_v18 = vpop.permute.xlu1 %4445 }
0x11ac   :  { %v4526_v3 = vsel %vm454_vm1, %v4446_v18, 0  ;;  %v17596_v18 = vld [vmem:[#allocation142_spill] sm:$0xff] }
0x11b1   :  { %8094 = vmatpush3.bf16.xpose.msra.mxu1 %v4475_v60  ;;  %8739 = vmatpush3.bf16.xpose.msra.mxu0 %v4523_v55  ;;  %v17593_v60 = vld [vmem:[#allocation84_spill] sm:$0xff] }
0x11b2   :  { %9805 = vmatprep.subr.msk.bf16.mxu1 %vm454_vm1, %v4430_v45  ;;  %8740 = vmatprep.subr.bf16.mxu0 %v17409_v10  ;;  %v17594_v55 = vld [vmem:[#allocation140_spill] sm:$0xff]  ;;  %v17595_v45 = vld [vmem:[#allocation91_spill] sm:$0xff] }
0x11b9   :  { %8096 = vmatpush3.bf16.xpose.msra.mxu1 %v4478_v8  ;;  %8741 = vmatpush3.bf16.xpose.msra.mxu0 %v4526_v3  ;;  %v17598_v8 = vld [vmem:[#allocation144_spill] sm:$0xff]  ;;  %v17599_v3 = vld [vmem:[#allocation98_spill] sm:$0xff] }
0x11ba   :  { %9358 = vmatprep.subr.bf16.mxu1 %v17569_v35  ;;  %9454 = vmatprep.subr.bf16.mxu0 %v17570_v54 }
0x11c0   :  { %8098 = vmatmul.mubr.msk.bf16.vlgmr.msra.gmra.mrb[116].mxu1 %vm454_vm1, %v13902_v5  ;;  %8743 = vmatmul.mubr.msk.bf16.vlgmr.msra.gmra.mrb[128].mxu0 %vm454_vm1, %v13902_v5  ;;  %v17578_v5 = vld [vmem:[#allocation115_spill] sm:$0xff] }
0x11c1   :  { %8099 = vmatprep.mubr.msk.bf16.mxu1 %vm454_vm1, %v14063_v53  ;;  %8746 = vmatprep.mubr.msk.bf16.mxu0 %vm10269_vm0, %v17409_v10 }
0x11c2   :  { %9360 = vmatpush1.bf16.msra.mxu1 %v17571_v62  ;;  %9456 = vmatpush3.bf16.msra.mxu0 %v17572_v29  ;;  %v17631_v29 = vld [vmem:[#allocation127_spill] sm:$0xff] }
0x11c3   :  { %9362 = vmatprep.subr.bf16.mxu1 %v17573_v36  ;;  %9458 = vmatprep.subr.bf16.mxu0 %v17574_v50 }
0x11c6   :  { %9364 = vmatpush1.bf16.msra.mxu1 %v17575_v12  ;;  %9460 = vmatpush3.bf16.msra.mxu0 %v17576_v51 }
0x11c7   :  { %9366 = vmatprep.subr.bf16.mxu1 %v17577_v63  ;;  %9462 = vmatprep.subr.bf16.mxu0 %v17578_v5 }
0x11c8   :  { %8100 = vmatmul.mubr.msk.bf16.gmra.mrb[120].mxu1 %vm454_vm1, %v14063_v53  ;;  %8747 = vmatmul.mubr.msk.bf16.gmra.mrb[132].mxu0 %vm454_vm1, %v14063_v53  ;;  %v17586_v53 = vld [vmem:[#allocation132_spill] sm:$0xff] }
0x11c9   :  { %8101 = vmatprep.mubr.msk.bf16.mxu1 %vm454_vm1, %v14148_v31  ;;  %8750 = vmatprep.mubr.msk.bf16.mxu0 %vm10269_vm0, %v17409_v10 }
0x11ca   :  { %9368 = vmatpush1.bf16.msra.mxu1 %v17579_v20  ;;  %9464 = vmatpush3.bf16.msra.mxu0 %v17580_v17  ;;  %v17625_v20 = vld [vmem:[#allocation99_spill] sm:$0xff] }
0x11cb   :  { %9370 = vmatprep.subr.bf16.mxu1 %v17581_v11  ;;  %9466 = vmatprep.subr.bf16.mxu0 %v17582_v52 }
0x11ce   :  { %9372 = vmatpush1.bf16.msra.mxu1 %v17583_v27  ;;  %9468 = vmatpush3.bf16.msra.mxu0 %v17584_v25 }
0x11cf   :  { %9374 = vmatprep.subr.bf16.mxu1 %v17585_v61  ;;  %9470 = vmatprep.subr.bf16.mxu0 %v17586_v53  ;;  %v17620_v61 = vld [vmem:[#allocation90_spill] sm:$0xff] }
0x11d0   :  { %8102 = vmatmul.mubr.msk.bf16.gmra.mrb[124].mxu1 %vm454_vm1, %v14148_v31  ;;  %8751 = vmatmul.mubr.msk.bf16.gmra.mrb[136].mxu0 %vm454_vm1, %v14148_v31  ;;  %v17597_v31 = vld [vmem:[#allocation93_spill] sm:$0xff] }
0x11d2   :  { %9376 = vmatpush1.bf16.msra.mxu1 %v17587_v1  ;;  %9472 = vmatpush3.bf16.msra.mxu0 %v17588_v19 }
0x11d3   :  { %9378 = vmatprep.subr.bf16.mxu1 %v17589_v14  ;;  %9474 = vmatprep.subr.bf16.mxu0 %v17590_v23 }
0x11d6   :  { %9380 = vmatpush1.bf16.msra.mxu1 %v17591_v13  ;;  %9476 = vmatpush3.bf16.msra.mxu0 %v17592_v33 }
0x11d7   :  { %9382 = vmatprep.subr.bf16.mxu1 %v17593_v60  ;;  %9478 = vmatprep.subr.bf16.mxu0 %v17594_v55  ;;  %v17604_v55 = vld [vmem:[#allocation111_spill] sm:$0xff]  ;;  %v17612_v60 = vld [vmem:[#allocation137_spill] sm:$0xff] }
0x11da   :  { %9384 = vmatpush1.bf16.msra.mxu1 %v17595_v45  ;;  %9480 = vmatpush3.bf16.msra.mxu0 %v17596_v18  ;;  %v17605_v45 = vld [vmem:[#allocation114_spill] sm:$0xff]  ;;  %v17606_v18 = vld [vmem:[#allocation116_spill] sm:$0xff] }
0x11db   :  { %9386 = vmatprep.subr.bf16.mxu1 %v17597_v31  ;;  %9482 = vmatprep.subr.bf16.mxu0 %v17598_v8  ;;  %v17607_v31 = vld [vmem:[#allocation120_spill] sm:$0xff]  ;;  %v17608_v8 = vld [vmem:[#allocation122_spill] sm:$0xff] }
0x11de   :  { %9388 = vmatpush1.bf16.msra.mxu1 %v17599_v3  ;;  %9484 = vmatpush3.bf16.msra.mxu0 %v17600_v16  ;;  %v17609_v3 = vld [vmem:[#allocation131_spill] sm:$0xff]  ;;  %v17610_v16 = vld [vmem:[#allocation133_spill] sm:$0xff] }
0x11df   :  { %9390 = vmatprep.subr.bf16.mxu1 %v17601_v7  ;;  %9486 = vmatprep.subr.bf16.mxu0 %v17391_v40  ;;  %v17611_v7 = vld [vmem:[#allocation135_spill] sm:$0xff] }
0x11e2   :  { %9392 = vmatpush1.bf16.msra.mxu1 %v17602_v42  ;;  %v17613_v42 = vld [vmem:[#allocation139_spill] sm:$0xff] }
0x11e3   :  { %9394 = vmatprep.subr.bf16.mxu1 %v17603_v57  ;;  %v17614_v57 = vld [vmem:[#allocation141_spill] sm:$0xff] }
0x11e6   :  { %9396 = vmatpush1.bf16.msra.mxu1 %v17604_v55  ;;  %v17615_v55 = vld [vmem:[#allocation143_spill] sm:$0xff] }
0x11e7   :  { %9398 = vmatprep.subr.bf16.mxu1 %v17605_v45  ;;  %v17616_v45 = vld [vmem:[#allocation145_spill] sm:$0xff] }
0x11ea   :  { %9400 = vmatpush1.bf16.msra.mxu1 %v17606_v18  ;;  %v17617_v18 = vld [vmem:[#allocation147_spill] sm:$0xff] }
0x11eb   :  { %9402 = vmatprep.subr.bf16.mxu1 %v17607_v31 }
0x11ee   :  { %9404 = vmatpush1.bf16.msra.mxu1 %v17608_v8 }
0x11ef   :  { %9406 = vmatprep.subr.bf16.mxu1 %v17609_v3 }
0x11f2   :  { %9408 = vmatpush1.bf16.msra.mxu1 %v17610_v16 }
0x11f3   :  { %9410 = vmatprep.subr.bf16.mxu1 %v17611_v7 }
0x11f6   :  { %9412 = vmatpush1.bf16.msra.mxu1 %v17612_v60  ;;  %v17618_v60 = vld [vmem:[#allocation83_spill] sm:$0xff] }
0x11f7   :  { %9414 = vmatprep.subr.bf16.mxu1 %v17613_v42 }
0x11fa   :  { %9416 = vmatpush1.bf16.msra.mxu1 %v17614_v57 }
0x11fb   :  { %9418 = vmatprep.subr.bf16.mxu1 %v17615_v55  ;;  %v17619_v55 = vld [vmem:[#allocation88_spill] sm:$0xff] }
0x11fe   :  { %9420 = vmatpush1.bf16.msra.mxu1 %v17616_v45 }
0x11ff   :  { %9422 = vmatprep.subr.bf16.mxu1 %v17617_v18 }
0x1293   :  { %v4562_v31 = vpop.f32.mrb[116].mxu1  ;;  %v4625_v8 = vpop.f32.mrb[128].mxu0 }
0x1294   :  { %v4648_v33 = vmul.f32 0.5, %v4562_v31  ;;  %v4564_v3 = vpop.f32.mrb[117].mxu1  ;;  %v8744_v13 = vpop.f32.mrb[129].mxu0  ;;  %v4650_v16 = vmul.f32 0.5, %v4625_v8  ;;  %v17621_v31 = vld [vmem:[#allocation89_spill] sm:$0xff] }
0x1295   :  { %v4649_v23 = vmul.f32 0.5, %v4564_v3  ;;  %v4566_v7 = vpop.f32.mrb[118].mxu1  ;;  %v4628_v14 = vpop.f32.mrb[130].mxu0  ;;  %v17622_v3 = vld [vmem:[#allocation94_spill] sm:$0xff] }
0x1296   :  { %v14521_v19 = vadd.f32 %v4648_v33, %v17618_v60  ;;  %v4651_v42 = vmul.f32 0.5, %v4566_v7  ;;  %v4568_v57 = vpop.f32.mrb[119].mxu1  ;;  %v8745_v1 = vpop.f32.mrb[131].mxu0  ;;  %v4653_v45 = vmul.f32 0.5, %v4628_v14  ;;  %v14530_v13 = vadd.f32 %v4650_v16, %v17621_v31  ;;  %v17623_v7 = vld [vmem:[#allocation95_spill] sm:$0xff] }
0x1297   :  { %v14524_v53 = vadd.f32 %v4649_v23, %v17619_v55  ;;  %v4652_v18 = vmul.f32 0.5, %v4568_v57 }
0x1298   :  { %v14527_v25 = vadd.f32 %v4651_v42, %v17620_v61  ;;  %v14538_v60 = vadd.f32 %v4653_v45, %v17623_v7 }
0x1299   :  { %v4684_v8 = vmax.f32 %v14521_v19, %v14524_v53  ;;  %v14535_v33 = vadd.f32 %v4652_v18, %v17622_v3  ;;  %v17624_v3 = vld [vmem:[#allocation97_spill] sm:$0xff] }
0x129b   :  { %v4688_v1 = vmax.f32 %v14527_v25, %v14535_v33  ;;  %v4572_v14 = vpop.f32.mrb[120].mxu1  ;;  %v4633_v57 = vpop.f32.mrb[132].mxu0  ;;  %v4685_v42 = vmax.f32 %v4684_v8, %v14530_v13 }
0x129c   :  { %v4654_v61 = vmul.f32 0.5, %v4572_v14  ;;  %v4574_v23 = vpop.f32.mrb[121].mxu1  ;;  %v8748_v16 = vpop.f32.mrb[133].mxu0  ;;  %v4656_v55 = vmul.f32 0.5, %v4633_v57  ;;  %v17626_v14 = vld [vmem:[#allocation103_spill] sm:$0xff]  ;;  %v17627_v57 = vld [vmem:[#allocation102_spill] sm:$0xff] }
0x129d   :  { %v4655_v31 = vmul.f32 0.5, %v4574_v23  ;;  %v4576_v27 = vpop.f32.mrb[122].mxu1  ;;  %4686 = vmax.xlane.f32.xlu0 %v4685_v42  ;;  %v4636_v52 = vpop.f32.mrb[134].mxu0  ;;  %v4689_v18 = vmax.f32 %v4688_v1, %v14538_v60 }
0x129e   :  { %v14545_v45 = vadd.f32 %v4654_v61, %v17624_v3  ;;  %v4657_v7 = vmul.f32 0.5, %v4576_v27  ;;  %v4578_v11 = vpop.f32.mrb[123].mxu1  ;;  %v8749_v17 = vpop.f32.mrb[135].mxu0  ;;  %v14554_v23 = vadd.f32 %v4656_v55, %v17627_v57  ;;  %v4659_v42 = vmul.f32 0.5, %v4636_v52  ;;  %v17628_v61 = vld [vmem:[#allocation104_spill] sm:$0xff] }
0x129f   :  { %v14548_v5 = vadd.f32 %v4655_v31, %v17625_v20  ;;  %v4658_v8 = vmul.f32 0.5, %v4578_v11  ;;  %4690 = vmax.xlane.f32.xlu1 %v4689_v18 }
0x12a0   :  { %v14551_v16 = vadd.f32 %v4657_v7, %v17626_v14  ;;  %v17629_v14 = vld [vmem:[#allocation124_spill] sm:$0xff] }
0x12a1   :  { %v4692_v1 = vmax.f32 %v14545_v45, %v14548_v5  ;;  %v14559_v3 = vadd.f32 %v4658_v8, %v17628_v61  ;;  %v14565_v55 = vadd.f32 %v4659_v42, %v17629_v14  ;;  %v17630_v8 = vld [vmem:[#allocation125_spill] sm:$0xff]  ;;  %v17632_v42 = vld [vmem:[#allocation128_spill] sm:$0xff] }
0x12a3   :  { %v4696_v17 = vmax.f32 %v14551_v16, %v14559_v3  ;;  %v4582_v20 = vpop.f32.mrb[124].mxu1  ;;  %v4641_v27 = vpop.f32.mrb[136].mxu0  ;;  %v4693_v11 = vmax.f32 %v4692_v1, %v14554_v23 }
0x12a4   :  { %v4660_v31 = vmul.f32 0.5, %v4582_v20  ;;  %v4584_v18 = vpop.f32.mrb[125].mxu1  ;;  %v8752_v7 = vpop.f32.mrb[137].mxu0  ;;  %v4662_v57 = vmul.f32 0.5, %v4641_v27  ;;  %v17633_v27 = vld [vmem:[#allocation126_spill] sm:$0xff] }
0x12a5   :  { %v4661_v63 = vmul.f32 0.5, %v4584_v18  ;;  %v4586_v51 = vpop.f32.mrb[126].mxu1  ;;  %4694 = vmax.xlane.f32.xlu0 %v4693_v11  ;;  %v4644_v52 = vpop.f32.mrb[138].mxu0  ;;  %v4697_v7 = vmax.f32 %v4696_v17, %v14565_v55  ;;  %v17636_v17 = vld [vmem:[#allocation243_spill] sm:$0xff] }
0x12a6   :  { %v14568_v61 = vadd.f32 %v4660_v31, %v17630_v8  ;;  %v4663_v12 = vmul.f32 0.5, %v4586_v51  ;;  %v4588_v50 = vpop.f32.mrb[127].mxu1  ;;  %v8753_v36 = vpop.f32.mrb[139].mxu0  ;;  %v4665_v1 = vmul.f32 0.5, %v4644_v52  ;;  %v14578_v18 = vadd.f32 %v4662_v57, %v17633_v27  ;;  %v17634_v31 = vld [vmem:[#allocation129_spill] sm:$0xff]  ;;  %v17637_v57 = vld [vmem:[#allocation240_spill] sm:$0xff] }
0x12a7   :  { %v14571_v62 = vadd.f32 %v4661_v63, %v17631_v29  ;;  %v4664_v20 = vmul.f32 0.5, %v4588_v50  ;;  %v17635_v36 = vld [vmem:[#allocation130_spill] sm:$0xff]  ;;  %v17638_v52 = vpack.c.bf16 %v17636_v17, %v17637_v57  ;;  %v17639_v8 = vpack.c.bf16 %v14156_v43, %v14152_v59  ;;  %v17653_v17 = vld [vmem:[#allocation253_spill] sm:$0xff] }
0x12a8   :  { %v14575_v14 = vadd.f32 %v4663_v12, %v17632_v42  ;;  %v14586_v29 = vadd.f32 %v4665_v1, %v17635_v36  ;;  %v17640_v1 = vld [vmem:[#allocation245_spill] sm:$0xff]  ;;  %v17644_v27 = vld [vmem:[#allocation246_spill] sm:$0xff]  ;;  %v17648_v59 = vpack.c.bf16 %v14172_v56, %v14166_v24 }
0x12a9   :  { %v4700_v11 = vmax.f32 %v14568_v61, %v14571_v62  ;;  %v14583_v51 = vadd.f32 %v4664_v20, %v17634_v31  ;;  %4698 = vmax.xlane.f32.xlu0 %v4697_v7  ;;  %v17641_v20 = vld [vmem:[#allocation242_spill] sm:$0xff]  ;;  %v17643_v42 = vld [vmem:[#allocation249_spill] sm:$0xff]  ;;  %v17646_v31 = vld [vmem:[#allocation248_spill] sm:$0xff] }
0x12aa   :  { %v17642_v7 = vpack.c.bf16 %v17640_v1, %v17641_v20  ;;  %v17647_v36 = vpack.c.bf16 %v14162_v46, %v17646_v31  ;;  %v17649_v43 = vld [vmem:[#allocation250_spill] sm:$0xff]  ;;  %v17658_v1 = vld [vmem:[#allocation244_spill] sm:$0xff]  ;;  %v17666_v31 = vld [vmem:[#allocation259_spill] sm:$0xff] }
0x12ab   :  { %v4704_v50 = vmax.f32 %v14575_v14, %v14583_v51  ;;  %v4701_v63 = vmax.f32 %v4700_v11, %v14578_v18  ;;  %v17645_v11 = vpack.c.bf16 %v17643_v42, %v17644_v27  ;;  %v17660_v56 = vld [vmem:[#allocation254_spill] sm:$0xff]  ;;  %v17663_v42 = vld [vmem:[#allocation257_spill] sm:$0xff] }
0x12ac   :  { %v17661_v20 = vpack.c.bf16 %v14221_v37, %v17660_v56 }
0x12ad   :  { %4702 = vmax.xlane.f32.xlu0 %v4701_v63  ;;  %v4705_v12 = vmax.f32 %v4704_v50, %v14586_v29  ;;  %v17650_v50 = vld [vmem:[#allocation251_spill] sm:$0xff] }
0x12ae   :  { %v17651_v63 = vpack.c.bf16 %v17649_v43, %v17650_v50  ;;  %v17671_v50 = vld [vmem:[#allocation263_spill] sm:$0xff] }
0x12af   :  { %4706 = vmax.xlane.f32.xlu1 %v4705_v12  ;;  %v17652_v12 = vld [vmem:[#allocation252_spill] sm:$0xff]  ;;  %v17672_v37 = vpack.c.bf16 %v14265_v26, %v17671_v50 }
0x12b0   :  { %v17654_v57 = vpack.c.bf16 %v17652_v12, %v17653_v17  ;;  %v17674_v12 = vpack.c.bf16 %v14281_v47, %v14277_v32  ;;  %v17675_v17 = vld [vmem:[#allocation262_spill] sm:$0xff]  ;;  %v17681_v47 = vpack.c.bf16 %v14331_v0, %v14327_v44  ;;  %v17683_v32 = vpack.c.bf16 %v14349_v38, %v14343_v9 }
0x12c0   :  { %5265 = vrot.lane.b32.xlu1 %v17638_v52, %s10274_s2  ;;  %v17655_v52 = vld [vmem:[#allocation255_spill] sm:$0xff] }
0x12c1   :  { %v17656_v46 = vpack.c.bf16 %v14211_v39, %v17655_v52  ;;  %v17677_v52 = vld [vmem:[#allocation264_spill] sm:$0xff] }
0x12c3   :  { %5281 = vrot.lane.b32.xlu0 %v17639_v8, %s10274_s2  ;;  %v17657_v8 = vld [vmem:[#allocation247_spill] sm:$0xff] }
0x12c4   :  { %5283 = vrot.lane.b32.xlu1 %v17642_v7, %s10274_s2  ;;  %v17659_v24 = vpack.c.bf16 %v17657_v8, %v17658_v1  ;;  %v17662_v7 = vld [vmem:[#allocation256_spill] sm:$0xff] }
0x12c5   :  { %v17664_v27 = vpack.c.bf16 %v17662_v7, %v17663_v42 }
0x12c7   :  { %5267 = vrot.lane.b32.xlu0 %v17645_v11, %s10274_s2  ;;  %v17665_v11 = vld [vmem:[#allocation258_spill] sm:$0xff] }
0x12c8   :  { %5297 = vrot.lane.b32.xlu1 %v17647_v36, %s10274_s2  ;;  %v17667_v39 = vpack.c.bf16 %v17665_v11, %v17666_v31  ;;  %v17668_v36 = vld [vmem:[#allocation260_spill] sm:$0xff] }
0x12c9   :  { %v17685_v31 = vld [vmem:[#allocation72_spill] sm:$0xff] }
0x12cb   :  { %5299 = vrot.lane.b32.xlu0 %v17648_v59, %s10274_s2  ;;  %v17669_v59 = vld [vmem:[#allocation261_spill] sm:$0xff] }
0x12cc   :  { %5285 = vrot.lane.b32.xlu1 %v17651_v63, %s10274_s2  ;;  %v17670_v43 = vpack.c.bf16 %v17668_v36, %v17669_v59  ;;  %v17673_v63 = vpack.c.bf16 %v14273_v41, %v14269_v48  ;;  %v17680_v48 = vpack.c.bf16 %v14323_v58, %v14315_v21  ;;  %v17684_v41 = vpack.c.bf16 %v14357_v6, %v14353_v34 }
0x12cf   :  { %5287 = vrot.lane.b32.xlu0 %v17654_v57, %s10274_s2  ;;  %v17676_v57 = vpack.c.bf16 %v14291_v4, %v17675_v17  ;;  %v17682_v4 = vpack.c.bf16 %v14339_v15, %v14335_v2 }
0x12d0   :  { %5269 = vrot.lane.b32.xlu1 %v17656_v46, %s10274_s2  ;;  %v17678_v46 = vld [vmem:[#allocation265_spill] sm:$0xff] }
0x12d1   :  { %v17679_v26 = vpack.c.bf16 %v17677_v52, %v17678_v46  ;;  %v17688_v46 = vld [vmem:[#allocation149_spill] sm:$0xff] }
0x12d3   :  { %5271 = vrot.lane.b32.xlu0 %v17659_v24, %s10274_s2 }
0x12d4   :  { %5301 = vrot.lane.b32.xlu1 %v17661_v20, %s10274_s2 }
0x12d7   :  { %5303 = vrot.lane.b32.xlu0 %v17664_v27, %s10274_s2 }
0x12d8   :  { %5289 = vrot.lane.b32.xlu1 %v17667_v39, %s10274_s2 }
0x12db   :  { %5291 = vrot.lane.b32.xlu0 %v17670_v43, %s10274_s2 }
0x12dc   :  { %5273 = vrot.lane.b32.xlu1 %v17672_v37, %s10274_s2 }
0x12df   :  { %5275 = vrot.lane.b32.xlu0 %v17673_v63, %s10274_s2 }
0x12e0   :  { %5305 = vrot.lane.b32.xlu1 %v17674_v12, %s10274_s2  ;;  %v17687_v12 = vld [vmem:[#allocation78_spill] sm:$0xff] }
0x12e3   :  { %5307 = vrot.lane.b32.xlu0 %v17676_v57, %s10274_s2 }
0x12e4   :  { %5293 = vrot.lane.b32.xlu1 %v17679_v26, %s10274_s2  ;;  %v17689_v26 = vld [vmem:[#allocation76_spill] sm:$0xff] }
0x12e7   :  { %5295 = vrot.lane.b32.xlu0 %v17680_v48, %s10274_s2 }
0x12e8   :  { %5277 = vrot.lane.b32.xlu1 %v17681_v47, %s10274_s2 }
0x12eb   :  { %5279 = vrot.lane.b32.xlu0 %v17682_v4, %s10274_s2 }
0x12ec   :  { %5309 = vrot.lane.b32.xlu1 %v17683_v32, %s10274_s2  ;;  %v17690_v32 = vld [vmem:[#allocation150_spill] sm:$0xff] }
0x12f0   :  { %5311 = vrot.lane.b32.xlu1 %v17684_v41, %s10274_s2  ;;  %v17691_v41 = vld [vmem:[#allocation151_spill] sm:$0xff] }
0x132a   :  { %v4687_v21 = vpop.xlane.xlu0 %4686 }
0x132b   :  { %v4708_v58 = vsub.f32 %v14521_v19, %v4687_v21  ;;  %v4709_v0 = vsub.f32 %v14524_v53, %v4687_v21  ;;  %v4710_v63 = vsub.f32 %v14530_v13, %v4687_v21  ;;  %v17692_v21 = vld [vmem:[#allocation85_spill] sm:$0xff] }
0x132c   :  { %v14690_v44 = vpop.xlane.xlu1 %4690 }
0x132d   :  { %v4726_v8 = vmul.f32 1.442695, %v4708_v58  ;;  %v4728_v15 = vmul.f32 1.442695, %v4709_v0  ;;  %v4711_v2 = vsub.f32 %v14527_v25, %v14690_v44  ;;  %v4712_v38 = vsub.f32 %v14535_v33, %v14690_v44  ;;  %v17693_v0 = vld [vmem:[#allocation82_spill] sm:$0xff] }
0x132e   :  { %v4730_v4 = vmul.f32 1.442695, %v4710_v63 }
0x132f   :  { %9999 = vpow2.f32 %v4726_v8  ;;  %v4732_v9 = vmul.f32 1.442695, %v4711_v2  ;;  %v4734_v6 = vmul.f32 1.442695, %v4712_v38 }
0x1330   :  { %10001 = vpow2.f32 %v4728_v15  ;;  %v17694_v15 = vld [vmem:[#allocation154_spill] sm:$0xff] }
0x1331   :  { %10003 = vpow2.f32 %v4734_v6  ;;  %v17695_v6 = vld [vmem:[#allocation155_spill] sm:$0xff] }
0x1332   :  { %v14696_v34 = vpop.xlane.xlu0 %4694  ;;  %10005 = vpow2.f32 %v4732_v9 }
0x1333   :  { %v4714_v53 = vsub.f32 %v14545_v45, %v14696_v34  ;;  %v4715_v19 = vsub.f32 %v14548_v5, %v14696_v34 }
0x1335   :  { %v4738_v1 = vmul.f32 1.442695, %v4714_v53  ;;  %v4740_v24 = vmul.f32 1.442695, %v4715_v19  ;;  %v17696_v19 = vld [vmem:[#allocation157_spill] sm:$0xff] }
0x1336   :  { %v14702_v25 = vpop.xlane.xlu0 %4698 }
0x1337   :  { %10007 = vpow2.f32 %v4738_v1  ;;  %v4717_v33 = vsub.f32 %v14551_v16, %v14702_v25  ;;  %v4718_v56 = vsub.f32 %v14559_v3, %v14702_v25  ;;  %v17686_v16 = vld [vmem:[#allocation73_spill] sm:$0xff]  ;;  %v17697_v1 = vld [vmem:[#allocation87_spill] sm:$0xff] }
0x1338   :  { %10009 = vpow2.f32 %v4740_v24 }
0x1339   :  { %v10000_v20 = vpop.eup %9999  ;;  %v4744_v7 = vmul.f32 1.442695, %v4717_v33  ;;  %v4746_v42 = vmul.f32 1.442695, %v4718_v56  ;;  %v17698_v33 = vld [vmem:[#allocation86_spill] sm:$0xff] }
0x133a   :  { %v10002_v45 = vpop.eup %10001  ;;  %v14708_v27 = vpop.xlane.xlu0 %4702  ;;  %v14715_v39 = vmul.f32 %v10000_v20, %v17685_v31  ;;  %v4713_v20 = vsub.f32 %v14538_v60, %v14690_v44  ;;  %v17702_v44 = vld [vmem:[#allocation105_spill] sm:$0xff] }
0x133b   :  { %10011 = vpow2.f32 %v4744_v7  ;;  %v4720_v5 = vsub.f32 %v14568_v61, %v14708_v27  ;;  %v4721_v11 = vsub.f32 %v14571_v62, %v14708_v27  ;;  %v14718_v3 = vmul.f32 %v10002_v45, %v17686_v16  ;;  %v10004_v59 = vpop.eup %10003  ;;  %v17699_v7 = vld [vmem:[#allocation159_spill] sm:$0xff]  ;;  %v17701_v16 = vld [vmem:[#allocation162_spill] sm:$0xff] }
0x133c   :  { %10013 = vpow2.f32 %v4746_v42  ;;  %v14720_v36 = vpop.xlane.xlu1 %4706  ;;  %v10006_v37 = vpop.eup %10005  ;;  %v14732_v17 = vmul.f32 %v10004_v59, %v17687_v12  ;;  %v4722_v12 = vsub.f32 %v14578_v18, %v14708_v27  ;;  %v17708_v27 = vld [vmem:[#allocation169_spill] sm:$0xff] }
0x133d   :  { %v4750_v43 = vmul.f32 1.442695, %v4720_v5  ;;  %v4752_v50 = vmul.f32 1.442695, %v4721_v11  ;;  %4844 = vmatprep.mubr.f32.mxu1 %v14718_v3  ;;  %5046 = vmatprep.mubr.f32.mxu0 %v14718_v3  ;;  %v4723_v62 = vsub.f32 %v14575_v14, %v14720_v36  ;;  %v4724_v61 = vsub.f32 %v14583_v51, %v14720_v36  ;;  %v17700_v11 = vld [vmem:[#allocation161_spill] sm:$0xff] }
0x133e   :  { %4845 = vmatmul.mubr.f32.vlgmr.msra.gmra.mrb[90].mxu1 %v14715_v39  ;;  %5047 = vmatmul.mubr.f32.vlgmr.msra.gmra.mrb[102].mxu0 %v14715_v39  ;;  %v14734_v57 = vpop.permute.xlu0 %5281  ;;  %v14743_v48 = vmul.f32 %v10006_v37, %v17689_v26  ;;  %v4716_v5 = vsub.f32 %v14554_v23, %v14696_v34  ;;  %v4736_v34 = vmul.f32 1.442695, %v4713_v20  ;;  %v17704_v37 = vld [vmem:[#allocation164_spill] sm:$0xff]  ;;  %v4725_v18 = vsub.f32 %v14586_v29, %v14720_v36  ;;  %v17712_v36 = vld [vmem:[#allocation74_spill] sm:$0xff] }
0x133f   :  { %10015 = vpow2.f32 %v4750_v43  ;;  %v4756_v13 = vmul.f32 1.442695, %v4723_v62  ;;  %v4758_v52 = vmul.f32 1.442695, %v4724_v61  ;;  %9424 = vmatpush1.bf16.msra.mxu1 %v17688_v46  ;;  %9488 = vmatpush3.bf16.msra.mxu0 %v17391_v40  ;;  %v17703_v43 = vld [vmem:[#allocation96_spill] sm:$0xff] }
0x1340   :  { %10017 = vpow2.f32 %v4752_v50  ;;  %v14738_v14 = vpop.permute.xlu1 %5265  ;;  %4850 = vmatprep.mubr.f32.mxu1 %v14732_v17  ;;  %5051 = vmatprep.mubr.f32.mxu0 %v14732_v17  ;;  %v4719_v50 = vsub.f32 %v14565_v55, %v14702_v25  ;;  %v4742_v61 = vmul.f32 1.442695, %v4716_v5  ;;  %v17707_v55 = vld [vmem:[#allocation117_spill] sm:$0xff]  ;;  %v17711_v29 = vld [vmem:[#allocation172_spill] sm:$0xff]  ;;  %v4760_v20 = vmul.f32 1.442695, %v4725_v18 }
0x1341   :  { %v10008_v51 = vpop.eup %10007  ;;  %9426 = vmatprep.subr.bf16.mxu1 %v17690_v32  ;;  %9490 = vmatprep.subr.bf16.mxu0 %v17691_v41  ;;  %10019 = vpow2.f32 %v4758_v52  ;;  %v17792_v46 = vld [vmem:[#allocation36_spill] sm:$0xff] }
0x1342   :  { %v10010_v47 = vpop.eup %10009  ;;  %4851 = vmatmul.mubr.f32.gmra.mrb[128].mxu1 %v14743_v48  ;;  %5052 = vmatmul.mubr.f32.gmra.mrb[140].mxu0 %v14743_v48  ;;  %v14753_v8 = vmul.f32 %v10008_v51, %v17693_v0  ;;  %10021 = vpow2.f32 %v4756_v13  ;;  %v14759_v9 = vpop.permute.xlu0 %5267  ;;  %v17705_v13 = vld [vmem:[#allocation166_spill] sm:$0xff]  ;;  %v17706_v51 = vld [vmem:[#allocation167_spill] sm:$0xff] }
0x1343   :  { %v14750_v58 = vmul.f32 %v10010_v47, %v17692_v21  ;;  %9428 = vmatpush1.bf16.msra.mxu1 %v17694_v15  ;;  %9492 = vmatpush3.bf16.msra.mxu0 %v17691_v41  ;;  %10023 = vpow2.f32 %v4730_v4  ;;  %v4748_v47 = vmul.f32 1.442695, %v4719_v50  ;;  %v4754_v21 = vmul.f32 1.442695, %v4722_v12 }
0x1344   :  { %v14757_v2 = vpop.permute.xlu1 %5283  ;;  %9430 = vmatprep.subr.bf16.mxu1 %v17695_v6  ;;  %9494 = vmatprep.subr.bf16.mxu0 %v17696_v19  ;;  %10025 = vpow2.f32 %v4736_v34  ;;  %v17716_v34 = vld [vmem:[#allocation179_spill] sm:$0xff]  ;;  %v17789_v6 = vld [vmem:[#allocation16_spill] sm:$0xff] }
0x1345   :  { %v10012_v38 = vpop.eup %10011  ;;  %4856 = vmatprep.mubr.f32.mxu1 %v14750_v58  ;;  %5056 = vmatprep.mubr.f32.mxu0 %v14750_v58  ;;  %10027 = vpow2.f32 %v4742_v61  ;;  %v17718_v61 = vld [vmem:[#allocation182_spill] sm:$0xff] }
0x1346   :  { %v10014_v53 = vpop.eup %10013  ;;  %4857 = vmatmul.mubr.f32.gmra.mrb[130].mxu1 %v14753_v8  ;;  %5057 = vmatmul.mubr.f32.gmra.mrb[142].mxu0 %v14753_v8  ;;  %v14771_v56 = vmul.f32 %v10012_v38, %v17698_v33  ;;  %v14785_v60 = vpop.permute.xlu0 %5299  ;;  %v17709_v38 = vld [vmem:[#allocation113_spill] sm:$0xff]  ;;  %10029 = vpow2.f32 %v4748_v47  ;;  %v17720_v47 = vld [vmem:[#allocation79_spill] sm:$0xff] }
0x1347   :  { %v14768_v24 = vmul.f32 %v10014_v53, %v17697_v1  ;;  %9432 = vmatpush1.bf16.msra.mxu1 %v17699_v7  ;;  %9496 = vmatpush3.bf16.msra.mxu0 %v17696_v19  ;;  %v17710_v1 = vld [vmem:[#allocation171_spill] sm:$0xff]  ;;  %10031 = vpow2.f32 %v4754_v21 }
0x1348   :  { %v14777_v42 = vpop.permute.xlu1 %5297  ;;  %9434 = vmatprep.subr.bf16.mxu1 %v17700_v11  ;;  %9498 = vmatprep.subr.bf16.mxu0 %v17701_v16  ;;  %10033 = vpow2.f32 %v4760_v20 }
0x1349   :  { %v10016_v45 = vpop.eup %10015  ;;  %4862 = vmatprep.mubr.f32.mxu1 %v14768_v24  ;;  %5061 = vmatprep.mubr.f32.mxu0 %v14768_v24 }
0x134a   :  { %v10018_v31 = vpop.eup %10017  ;;  %4863 = vmatmul.mubr.f32.gmra.mrb[132].mxu1 %v14771_v56  ;;  %5062 = vmatmul.mubr.f32.gmra.mrb[144].mxu0 %v14771_v56  ;;  %v14793_v23 = vmul.f32 %v10016_v45, %v17703_v43  ;;  %v14818_v0 = vpop.permute.xlu0 %5287  ;;  %v17713_v45 = vld [vmem:[#allocation174_spill] sm:$0xff] }
0x134b   :  { %v14790_v59 = vmul.f32 %v10018_v31, %v17702_v44  ;;  %9436 = vmatpush1.bf16.msra.mxu1 %v17704_v37  ;;  %9500 = vmatpush3.bf16.msra.mxu0 %v17701_v16  ;;  %v10020_v62 = vpop.eup %10019  ;;  %v17714_v31 = vld [vmem:[#allocation176_spill] sm:$0xff]  ;;  %v17715_v44 = vld [vmem:[#allocation177_spill] sm:$0xff] }
0x134c   :  { %v14799_v63 = vpop.permute.xlu1 %5285  ;;  %9438 = vmatprep.subr.bf16.mxu1 %v17705_v13  ;;  %v10022_v52 = vpop.eup %10021  ;;  %9502 = vmatprep.subr.bf16.mxu0 %v17706_v51  ;;  %v14808_v25 = vmul.f32 %v10020_v62, %v17707_v55  ;;  %v17717_v62 = vld [vmem:[#allocation181_spill] sm:$0xff]  ;;  %v17719_v55 = vld [vmem:[#allocation184_spill] sm:$0xff] }
0x134d   :  { %4868 = vmatprep.mubr.f32.mxu1 %v14790_v59  ;;  %5066 = vmatprep.mubr.f32.mxu0 %v14790_v59  ;;  %v10024_v26 = vpop.eup %10023  ;;  %v14823_v53 = vmul.f32 %v10022_v52, %v17709_v38 }
0x134e   :  { %4869 = vmatmul.mubr.f32.gmra.mrb[134].mxu1 %v14793_v23  ;;  %5067 = vmatmul.mubr.f32.gmra.mrb[146].mxu0 %v14793_v23  ;;  %v14830_v33 = vmul.f32 %v10024_v26, %v17712_v36  ;;  %v5272_v43 = vpop.permute.xlu0 %5271  ;;  %v10026_v12 = vpop.eup %10025  ;;  %v17721_v36 = vld [vmem:[#allocation80_spill] sm:$0xff] }
0x134f   :  { %9440 = vmatpush1.bf16.msra.mxu1 %v17708_v27  ;;  %9504 = vmatpush3.bf16.msra.mxu0 %v17706_v51  ;;  %v10028_v52 = vpop.eup %10027  ;;  %v14846_v18 = vmul.f32 %v10026_v12, %v17720_v47 }
0x1350   :  { %v14816_v4 = vpop.permute.xlu1 %5269  ;;  %4874 = vmatprep.mubr.f32.mxu1 %v14808_v25  ;;  %5071 = vmatprep.mubr.f32.mxu0 %v14808_v25  ;;  %v10030_v21 = vpop.eup %10029  ;;  %v14850_v20 = vmul.f32 %v10028_v52, %v17721_v36  ;;  %v17723_v52 = vld [vmem:[#allocation107_spill] sm:$0xff] }
0x1351   :  { %9442 = vmatprep.subr.bf16.mxu1 %v17710_v1  ;;  %9506 = vmatprep.subr.bf16.mxu0 %v17711_v29 }
0x1352   :  { %4875 = vmatmul.mubr.f32.gmra.mrb[136].mxu1 %v14823_v53  ;;  %5072 = vmatmul.mubr.f32.gmra.mrb[148].mxu0 %v14823_v53  ;;  %v5304_v26 = vpop.permute.xlu0 %5303 }
0x1353   :  { %9444 = vmatpush1.bf16.msra.mxu1 %v17713_v45  ;;  %9508 = vmatpush3.bf16.msra.mxu0 %v17711_v29 }
0x1354   :  { %v5302_v5 = vpop.permute.xlu1 %5301  ;;  %8786 = vmatprep.mubr.f32.mxu0 %v14830_v33  ;;  %9446 = vmatprep.subr.bf16.mxu1 %v17714_v31 }
0x1355   :  { %9510 = vmatprep.subr.bf16.mxu0 %v17715_v44  ;;  %4945 = vmatprep.mubr.f32.mxu1 %v17409_v10 }
0x1357   :  { %9448 = vmatpush1.bf16.msra.mxu1 %v17716_v34  ;;  %9512 = vmatpush3.bf16.msra.mxu0 %v17715_v44 }
0x1358   :  { %v5290_v50 = vpop.permute.xlu1 %5289  ;;  %9450 = vmatprep.subr.bf16.mxu1 %v17717_v62  ;;  %9514 = vmatprep.subr.bf16.mxu0 %v17718_v61  ;;  %v10032_v62 = vpop.eup %10031 }
0x1359   :  { %v10034_v47 = vpop.eup %10033  ;;  %v14864_v36 = vmul.f32 %v10032_v62, %v17723_v52 }
0x135b   :  { %9452 = vmatpush1.bf16.msra.mxu1 %v17719_v55  ;;  %9516 = vmatpush3.bf16.msra.mxu0 %v17718_v61  ;;  %v5292_v55 = vpop.permute.xlu0 %5291 }
0x135c   :  { %8186 = vmatprep.subr.bf16.mxu0 %v14734_v57  ;;  %8795 = vmatprep.subr.bf16.mxu1 %v17409_v10  ;;  %v5274_v38 = vpop.permute.xlu1 %5273  ;;  %v17722_v57 = vld [vmem:[#allocation92_spill] sm:$0xff] }
0x135d   :  { %v14859_v12 = vmul.f32 %v10030_v21, %v17722_v57 }
0x135e   :  { %4946 = vmatmul.mubr.f32.vlgmr.msra.gmra.mrb[90].mxu1 %v14830_v33  ;;  %8787 = vmatmul.mubr.f32.vlgmr.msra.gmra.mrb[150].mxu0 %v14846_v18 }
0x135f   :  { %8789 = vmatprep.mubr.f32.mxu0 %v14850_v20  ;;  %8187 = vmatpush3.bf16.msra.mxu0 %v14738_v14 }
0x1360   :  { %8796 = vmatpush3.bf16.msra.mxu1 %v14777_v42  ;;  %8188 = vmatprep.subr.bf16.mxu0 %v14757_v2  ;;  %v5306_v14 = vpop.permute.xlu1 %5305  ;;  %v17724_v2 = vld [vmem:[#allocation119_spill] sm:$0xff] }
0x1361   :  { %4951 = vmatprep.mubr.f32.mxu1 %v17409_v10  ;;  %8797 = vmatprep.subr.bf16.mxu1 %v17409_v10  ;;  %v14873_v42 = vmul.f32 %v10034_v47, %v17724_v2 }
0x1362   :  { %4952 = vmatmul.mubr.f32.gmra.mrb[128].mxu1 %v14846_v18  ;;  %8790 = vmatmul.mubr.f32.gmra.mrb[152].mxu0 %v14859_v12 }
0x1363   :  { %8792 = vmatprep.mubr.f32.mxu0 %v14864_v36  ;;  %8189 = vmatpush3.bf16.msra.mxu0 %v14759_v9  ;;  %v5276_v9 = vpop.permute.xlu0 %5275 }
0x1364   :  { %8798 = vmatpush3.bf16.msra.mxu1 %v14785_v60  ;;  %8190 = vmatprep.subr.bf16.mxu0 %v14799_v63  ;;  %v5294_v60 = vpop.permute.xlu1 %5293 }
0x1365   :  { %4957 = vmatprep.mubr.f32.mxu1 %v17409_v10  ;;  %8799 = vmatprep.subr.bf16.mxu1 %v17409_v10 }
0x1366   :  { %4958 = vmatmul.mubr.f32.gmra.mrb[130].mxu1 %v14850_v20  ;;  %8793 = vmatmul.mubr.f32.gmra.mrb[154].mxu0 %v14873_v42 }
0x1367   :  { %8191 = vmatpush3.bf16.msra.mxu0 %v14816_v4  ;;  %4963 = vmatprep.mubr.f32.mxu1 %v17409_v10  ;;  %v5308_v63 = vpop.permute.xlu0 %5307 }
0x1368   :  { %8800 = vmatpush3.bf16.msra.mxu1 %v5302_v5  ;;  %8192 = vmatprep.subr.bf16.mxu0 %v14818_v0  ;;  %v5278_v4 = vpop.permute.xlu1 %5277 }
0x1369   :  { %8801 = vmatprep.subr.bf16.mxu1 %v17409_v10 }
0x136a   :  { %4964 = vmatmul.mubr.f32.gmra.mrb[132].mxu1 %v14859_v12 }
0x136b   :  { %8193 = vmatpush3.bf16.msra.mxu0 %v5272_v43  ;;  %4969 = vmatprep.mubr.f32.mxu1 %v17409_v10  ;;  %v5296_v0 = vpop.permute.xlu0 %5295 }
0x136c   :  { %8802 = vmatpush3.bf16.msra.mxu1 %v5304_v26  ;;  %8194 = vmatprep.subr.bf16.mxu0 %v5290_v50  ;;  %v5310_v5 = vpop.permute.xlu1 %5309 }
0x136d   :  { %8803 = vmatprep.subr.bf16.mxu1 %v17409_v10 }
0x136e   :  { %4970 = vmatmul.mubr.f32.gmra.mrb[134].mxu1 %v14864_v36 }
0x136f   :  { %8195 = vmatpush3.bf16.msra.mxu0 %v5274_v38  ;;  %4975 = vmatprep.mubr.f32.mxu1 %v17409_v10  ;;  %v5280_v43 = vpop.permute.xlu0 %5279 }
0x1370   :  { %8804 = vmatpush3.bf16.msra.mxu1 %v5306_v14  ;;  %8196 = vmatprep.subr.bf16.mxu0 %v5292_v55  ;;  %v5312_v50 = vpop.permute.xlu1 %5311 }
0x1371   :  { %8805 = vmatprep.subr.bf16.mxu1 %v17409_v10 }
0x1372   :  { %4976 = vmatmul.mubr.f32.gmra.mrb[136].mxu1 %v14873_v42 }
0x1373   :  { %8197 = vmatpush3.bf16.msra.mxu0 %v5276_v9  ;;  %8811 = vmatprep.mubr.msk.bf16.mxu1 %vm10269_vm0, %v17409_v10 }
0x1374   :  { %8806 = vmatpush3.bf16.msra.mxu1 %v5308_v63  ;;  %8198 = vmatprep.subr.bf16.mxu0 %v5294_v60 }
0x1375   :  { %8807 = vmatprep.subr.bf16.mxu1 %v17409_v10 }
0x1377   :  { %8199 = vmatpush3.bf16.msra.mxu0 %v5278_v4 }
0x1378   :  { %8808 = vmatpush3.bf16.msra.mxu1 %v5310_v5  ;;  %8200 = vmatprep.subr.bf16.mxu0 %v5296_v0 }
0x1379   :  { %8809 = vmatprep.subr.bf16.mxu1 %v17409_v10 }
0x137b   :  { %8201 = vmatpush3.bf16.msra.mxu0 %v5280_v43 }
0x137c   :  { %8810 = vmatpush3.bf16.msra.mxu1 %v5312_v50  ;;  %8823 = vmatprep.subr.bf16.mxu0 %v17409_v10 }
0x137d   :  { %8839 = vmatprep.subr.bf16.mxu1 %v17409_v10 }
0x1411   :  { %v8146_v62 = vpop.f32.mrb[102].mxu0 }
0x1412   :  { %v8147_v55 = vpop.f32.mrb[103].mxu0 }
0x1413   :  { %v8148_v26 = vadd.f32 %v8147_v55, %v8146_v62 }
0x1415   :  { %v8149_v21 = vpop.f32.mrb[140].mxu0  ;;  %v5049_v34 = vadd.f32 1e-09, %v8148_v26 }
0x1416   :  { %v8150_v38 = vpop.f32.mrb[141].mxu0 }
0x1417   :  { %v8151_v57 = vadd.f32 %v8150_v38, %v8149_v21 }
0x1419   :  { %v8152_v47 = vpop.f32.mrb[142].mxu0  ;;  %v5054_v61 = vadd.f32 1e-09, %v8151_v57 }
0x141a   :  { %v8153_v52 = vpop.f32.mrb[143].mxu0 }
0x141b   :  { %v8154_v14 = vadd.f32 %v8153_v52, %v8152_v47 }
0x141d   :  { %v8155_v2 = vpop.f32.mrb[144].mxu0  ;;  %v5059_v52 = vadd.f32 1e-09, %v8154_v14 }
0x141e   :  { %v8156_v9 = vpop.f32.mrb[145].mxu0 }
0x141f   :  { %v8157_v60 = vadd.f32 %v8156_v9, %v8155_v2 }
0x1421   :  { %v8158_v63 = vpop.f32.mrb[146].mxu0  ;;  %v5064_v47 = vadd.f32 1e-09, %v8157_v60 }
0x1422   :  { %v8159_v4 = vpop.f32.mrb[147].mxu0 }
0x1423   :  { %v8160_v0 = vadd.f32 %v8159_v4, %v8158_v63 }
0x1425   :  { %v8161_v5 = vpop.f32.mrb[148].mxu0 }
0x1426   :  { %v8162_v43 = vpop.f32.mrb[149].mxu0 }
0x1427   :  { %v8163_v50 = vadd.f32 %v8162_v43, %v8161_v5 }
0x1431   :  { %v4947_v44 = vpop.f32.mrb[90].mxu1  ;;  %v8788_v31 = vpop.f32.mrb[150].mxu0 }
0x1432   :  { %v9710_v62 = vadd.f32 1e-09, %v4947_v44  ;;  %v5149_v55 = vadd.f32 %v8788_v31, %v5054_v61  ;;  %v4949_v45 = vpop.f32.mrb[91].mxu1  ;;  %v5143_v21 = vpop.f32.mrb[151].mxu0  ;;  %v5074_v44 = vadd.f32 1e-09, %v8163_v50 }
0x1433   :  { %v9711_v38 = vadd.f32 1e-09, %v4949_v45  ;;  %v5144_v29 = vadd.f32 %v5143_v21, %v5049_v34  ;;  %v5069_v31 = vadd.f32 1e-09, %v8160_v0 }
0x1434   :  { %10035 = vrcp.f32 %v9710_v62 }
0x1435   :  { %10037 = vrcp.f32 %v5149_v55  ;;  %v4953_v2 = vpop.f32.mrb[128].mxu1  ;;  %v8791_v9 = vpop.f32.mrb[152].mxu0 }
0x1436   :  { %10039 = vrcp.f32 %v9711_v38  ;;  %v9712_v63 = vadd.f32 1e-09, %v4953_v2  ;;  %v5159_v4 = vadd.f32 %v8791_v9, %v5064_v47  ;;  %v4955_v5 = vpop.f32.mrb[129].mxu1  ;;  %v5153_v57 = vpop.f32.mrb[153].mxu0 }
0x1437   :  { %10041 = vrcp.f32 %v5144_v29  ;;  %v9713_v26 = vadd.f32 1e-09, %v4955_v5  ;;  %v5154_v43 = vadd.f32 %v5153_v57, %v5059_v52 }
0x1438   :  { %10043 = vrcp.f32 %v9712_v63 }
0x1439   :  { %10045 = vrcp.f32 %v5159_v4  ;;  %v4959_v45 = vpop.f32.mrb[130].mxu1  ;;  %v8794_v34 = vpop.f32.mrb[154].mxu0 }
0x143a   :  { %10047 = vrcp.f32 %v9713_v26  ;;  %v9714_v61 = vadd.f32 1e-09, %v4959_v45  ;;  %v5169_v14 = vadd.f32 %v8794_v34, %v5074_v44  ;;  %v4961_v60 = vpop.f32.mrb[131].mxu1  ;;  %v5163_v62 = vpop.f32.mrb[155].mxu0 }
0x143b   :  { %10049 = vrcp.f32 %v5154_v43  ;;  %v9715_v55 = vadd.f32 1e-09, %v4961_v60  ;;  %v5164_v21 = vadd.f32 %v5163_v62, %v5069_v31 }
0x143c   :  { %10051 = vrcp.f32 %v9714_v61 }
0x143d   :  { %10053 = vrcp.f32 %v5169_v14  ;;  %v4965_v38 = vpop.f32.mrb[132].mxu1 }
0x143e   :  { %v10036_v29 = vpop.eup %10035  ;;  %10055 = vrcp.f32 %v9715_v55  ;;  %v9716_v47 = vadd.f32 1e-09, %v4965_v38  ;;  %v4967_v50 = vpop.f32.mrb[133].mxu1 }
0x143f   :  { %v10038_v52 = vpop.eup %10037  ;;  %10057 = vrcp.f32 %v5164_v21  ;;  %v9717_v0 = vadd.f32 1e-09, %v4967_v50  ;;  %v5190_v31 = vmul.f32 %v10036_v29, %v14715_v39 }
0x1440   :  { %v10040_v2 = vpop.eup %10039  ;;  %v5195_v9 = vmul.f32 %v10038_v52, %v14846_v18  ;;  %10059 = vrcp.f32 %v9716_v47  ;;  %v7696_v18 = vld [vmem:[%s16288_s10 + $0x40] sm:$0xff] }
0x1441   :  { %v10042_v63 = vpop.eup %10041  ;;  %10061 = vrcp.f32 %v9717_v0  ;;  %v4971_v4 = vpop.f32.mrb[134].mxu1  ;;  %v5191_v21 = vmul.f32 %v10040_v2, %v14718_v3 }
0x1442   :  { %v10044_v5 = vpop.eup %10043  ;;  %v5192_v57 = vmul.f32 %v10042_v63, %v14830_v33  ;;  %v9718_v26 = vadd.f32 1e-09, %v4971_v4  ;;  %v4973_v43 = vpop.f32.mrb[135].mxu1  ;;  %v7697_v33 = vld [vmem:[%s16288_s10 + $0x48] sm:$0xff] }
0x1443   :  { %v10046_v44 = vpop.eup %10045  ;;  %v5193_v45 = vmul.f32 %v10044_v5, %v14743_v48  ;;  %v9719_v34 = vadd.f32 1e-09, %v4973_v43 }
0x1444   :  { %v10048_v61 = vpop.eup %10047  ;;  %v5210_v14 = vpack.c.bf16 %v5195_v9, %v5192_v57  ;;  %v5201_v60 = vmul.f32 %v10046_v44, %v14859_v12  ;;  %10063 = vrcp.f32 %v9718_v26  ;;  %v5459_v9 = vpack.c.bf16 %v7697_v33, %v7696_v18  ;;  %v7706_v33 = vld [vmem:[%s16286_s8 + $0x68] sm:$0xff] }
0x1445   :  { %v10050_v62 = vpop.eup %10049  ;;  %v4977_v55 = vpop.f32.mrb[136].mxu1  ;;  %v5194_v39 = vmul.f32 %v10048_v61, %v14732_v17  ;;  %v5208_v48 = vpack.c.bf16 %v5193_v45, %v5190_v31  ;;  %10065 = vrcp.f32 %v9719_v34 }
0x1446   :  { %v10052_v38 = vpop.eup %10051  ;;  %8812 = vmatmul.mubr.bf16.vlgmr.msra.gmra.mrb[140].mxu1 %v5210_v14  ;;  %v9720_v29 = vadd.f32 1e-09, %v4977_v55  ;;  %v4979_v12 = vpop.f32.mrb[137].mxu1  ;;  %v5198_v47 = vmul.f32 %v10050_v62, %v14850_v20  ;;  %v7707_v62 = vld [vmem:[%s16286_s8 + $0x70] sm:$0xff] }
0x1447   :  { %v10054_v50 = vpop.eup %10053  ;;  %v9721_v52 = vadd.f32 1e-09, %v4979_v12  ;;  %v5209_v0 = vpack.c.bf16 %v5194_v39, %v5191_v21  ;;  %8815 = vmatprep.mubr.msk.bf16.mxu1 %vm10269_vm0, %v17409_v10  ;;  %v5196_v57 = vmul.f32 %v10052_v38, %v14753_v8  ;;  %v7708_v21 = vld [vmem:[%s16286_s8 + $0x78] sm:$0xff] }
0x1448   :  { %v10056_v63 = vpop.eup %10055  ;;  %10067 = vrcp.f32 %v9720_v29  ;;  %v5213_v3 = vpack.c.bf16 %v5201_v60, %v5198_v47  ;;  %v5207_v17 = vmul.f32 %v10054_v50, %v14873_v42  ;;  %v5550_v39 = vpack.c.bf16 %v7708_v21, %v7707_v62 }
0x1449   :  { %v10058_v2 = vpop.eup %10057  ;;  %10069 = vrcp.f32 %v9721_v52  ;;  %5369 = vmatprep.mubr.bf16.mxu0 %v5209_v0  ;;  %v5197_v43 = vmul.f32 %v10056_v63, %v14750_v58 }
0x144a   :  { %v10060_v4 = vpop.eup %10059  ;;  %5370 = vmatmul.mubr.bf16.vlgmr.msra.gmra.mrb[156].mxu0 %v5208_v48  ;;  %v5204_v20 = vmul.f32 %v10058_v2, %v14864_v36 }
0x144b   :  { %v10062_v5 = vpop.eup %10061  ;;  %v5199_v26 = vmul.f32 %v10060_v4, %v14771_v56  ;;  %8824 = vmatpush3.bf16.msra.mxu0 %v5459_v9 }
0x144c   :  { %v5200_v44 = vmul.f32 %v10062_v5, %v14768_v24  ;;  %v5216_v31 = vpack.c.bf16 %v5207_v17, %v5204_v20  ;;  %8825 = vmatprep.subr.bf16.mxu0 %v17409_v10 }
0x144d   :  { %v5211_v42 = vpack.c.bf16 %v5199_v26, %v5196_v57 }
0x144e   :  { %8816 = vmatmul.mubr.bf16.gmra.mrb[144].mxu1 %v5213_v3  ;;  %v5212_v45 = vpack.c.bf16 %v5200_v44, %v5197_v43  ;;  %v10064_v36 = vpop.eup %10063 }
0x144f   :  { %8819 = vmatprep.mubr.msk.bf16.mxu1 %vm10269_vm0, %v17409_v10  ;;  %v10066_v34 = vpop.eup %10065  ;;  %v5202_v61 = vmul.f32 %v10064_v36, %v14793_v23  ;;  %v7698_v23 = vld [vmem:[%s16288_s10 + $0x50] sm:$0xff] }
0x1450   :  { %5377 = vmatprep.mubr.bf16.mxu0 %v5212_v45  ;;  %v5203_v24 = vmul.f32 %v10066_v34, %v14790_v59  ;;  %v7699_v59 = vld [vmem:[%s16288_s10 + $0x58] sm:$0xff] }
0x1452   :  { %v10068_v8 = vpop.eup %10067  ;;  %5378 = vmatmul.mubr.bf16.gmra.mrb[160].mxu0 %v5211_v42 }
0x1453   :  { %v10070_v56 = vpop.eup %10069  ;;  %v5205_v58 = vmul.f32 %v10068_v8, %v14823_v53  ;;  %v7705_v53 = vld [vmem:[%s16286_s8 + $0x60] sm:$0xff] }
0x1454   :  { %v5206_v14 = vmul.f32 %v10070_v56, %v14808_v25  ;;  %v5460_v25 = vpack.c.bf16 %v7699_v59, %v7698_v23  ;;  %v5549_v55 = vpack.c.bf16 %v7706_v33, %v7705_v53 }
0x1455   :  { %v5214_v60 = vpack.c.bf16 %v5205_v58, %v5202_v61 }
0x1456   :  { %8820 = vmatmul.mubr.bf16.gmra.mrb[148].mxu1 %v5216_v31  ;;  %v5215_v18 = vpack.c.bf16 %v5206_v14, %v5203_v24  ;;  %8826 = vmatpush3.bf16.msra.mxu0 %v5460_v25 }
0x1457   :  { %8843 = vmatprep.mubr.msk.bf16.mxu1 %vm10269_vm0, %v17409_v10  ;;  %8840 = vmatpush3.bf16.msra.mxu1 %v5549_v55  ;;  %v7701_v55 = vld [vmem:[%s16289_s11 + $0x2] ss:$0 sm:$0xff] }
0x1458   :  { %5385 = vmatprep.mubr.bf16.mxu0 %v5215_v18  ;;  %8841 = vmatprep.subr.bf16.mxu1 %v17409_v10 }
0x145a   :  { %5386 = vmatmul.mubr.bf16.gmra.mrb[164].mxu0 %v5214_v60 }
0x145b   :  { %8827 = vmatprep.mubr.msk.bf16.mxu0 %vm10269_vm0, %v17409_v10  ;;  %8842 = vmatpush3.bf16.msra.mxu1 %v5550_v39 }
0x145c   :  { %8855 = vmatprep.subr.bf16.mxu1 %v17409_v10 }
0x1519   :  { %v5428_v48 = vpop.f32.mrb[140].mxu1 }
0x151a   :  { %v8813_v38 = vpop.f32.mrb[141].mxu1 }
0x151b   :  { %v5431_v29 = vpop.f32.mrb[142].mxu1 }
0x151c   :  { %v8814_v12 = vpop.f32.mrb[143].mxu1 }
0x151d   :  { %v8202_v47 = vpop.f32.mrb[156].mxu0 }
0x151e   :  { %v8203_v50 = vpop.f32.mrb[157].mxu0 }
0x151f   :  { %v8204_v52 = vadd.f32 %v8203_v50, %v8202_v47  ;;  %v8205_v0 = vpop.f32.mrb[158].mxu0  ;;  %v17725_v47 = vld [vmem:[#allocation233_spill] sm:$0xff] }
0x1520   :  { %v8206_v9 = vpop.f32.mrb[159].mxu0 }
0x1521   :  { %v5429_v63 = vadd.f32 %v8204_v52, %v5428_v48  ;;  %v8207_v3 = vadd.f32 %v8206_v9, %v8205_v0  ;;  %v5436_v17 = vpop.f32.mrb[144].mxu1  ;;  %v17727_v52 = vld [vmem:[#allocation232_spill] sm:$0xff] }
0x1522   :  { %v8817_v2 = vpop.f32.mrb[145].mxu1 }
0x1523   :  { %v5432_v4 = vadd.f32 %v8207_v3, %v5431_v29  ;;  %v5439_v20 = vpop.f32.mrb[146].mxu1 }
0x1524   :  { %v8818_v5 = vpop.f32.mrb[147].mxu1 }
0x1525   :  { %v5456_v57 = vpack.c.bf16 %v5432_v4, %v5429_v63  ;;  %v8208_v26 = vpop.f32.mrb[160].mxu0  ;;  %v17729_v5 = vld [vmem:[#allocation235_spill] sm:$0xff] }
0x1526   :  { %v8209_v43 = vpop.f32.mrb[161].mxu0 }
0x1527   :  { %v8210_v44 = vadd.f32 %v8209_v43, %v8208_v26  ;;  %v8211_v31 = vpop.f32.mrb[162].mxu0  ;;  %8828 = vmatmul.mubr.msk.bf16.vlgmr.msra.gmra.mrb[168].mxu0 %vm454_vm1, %v5456_v57  ;;  %v17731_v26 = vld [vmem:[#allocation234_spill] sm:$0xff] }
0x1528   :  { %v8212_v42 = vpop.f32.mrb[163].mxu0  ;;  %8831 = vmatprep.mubr.msk.bf16.mxu0 %vm10269_vm0, %v17409_v10 }
0x1529   :  { %v5437_v45 = vadd.f32 %v8210_v44, %v5436_v17  ;;  %v8213_v36 = vadd.f32 %v8212_v42, %v8211_v31  ;;  %v5444_v34 = vpop.f32.mrb[148].mxu1 }
0x152a   :  { %v8821_v8 = vpop.f32.mrb[149].mxu1 }
0x152b   :  { %v5440_v56 = vadd.f32 %v8213_v36, %v5439_v20  ;;  %v5447_v61 = vpop.f32.mrb[150].mxu1 }
0x152c   :  { %v8822_v58 = vpop.f32.mrb[151].mxu1 }
0x152d   :  { %v5457_v24 = vpack.c.bf16 %v5440_v56, %v5437_v45  ;;  %v8214_v14 = vpop.f32.mrb[164].mxu0  ;;  %v17733_v56 = vld [vmem:[#allocation236_spill] sm:$0xff]  ;;  %v17735_v58 = vld [vmem:[#allocation241_spill] sm:$0xff] }
0x152e   :  { %v8215_v60 = vpop.f32.mrb[165].mxu0 }
0x152f   :  { %v8216_v18 = vadd.f32 %v8215_v60, %v8214_v14  ;;  %v8217_v23 = vpop.f32.mrb[166].mxu0  ;;  %8832 = vmatmul.mubr.msk.bf16.gmra.mrb[172].mxu0 %vm454_vm1, %v5457_v24  ;;  %v14995_v60 = vld [vmem:[%s16287_s9 + $0x3] ss:$0 sm:$0xff] }
0x1530   :  { %v8218_v59 = vpop.f32.mrb[167].mxu0  ;;  %8835 = vmatprep.mubr.msk.bf16.mxu0 %vm10269_vm0, %v17409_v10 }
0x1531   :  { %v5445_v25 = vadd.f32 %v8216_v18, %v5444_v34  ;;  %v8219_v53 = vadd.f32 %v8218_v59, %v8217_v23 }
0x1533   :  { %v5448_v33 = vadd.f32 %v8219_v53, %v5447_v61 }
0x1535   :  { %v5458_v62 = vpack.c.bf16 %v5448_v33, %v5445_v25 }
0x1537   :  { %8836 = vmatmul.mubr.msk.bf16.gmra.mrb[176].mxu0 %vm454_vm1, %v5458_v62  ;;  %v17737_v62 = vld [vmem:[#allocation18_spill] sm:$0xff] }
0x15fa   :  { %v5512_v21 = vpop.f32.mrb[168].mxu0 }
0x15fb   :  { %v5513_v39 = vadd.f32 %v7701_v55, %v5512_v21  ;;  %v8829_v48 = vpop.f32.mrb[169].mxu0  ;;  %v17738_v21 = vld [vmem:[#allocation24_spill] sm:$0xff] }
0x15fc   :  { %v5515_v38 = vpop.f32.mrb[170].mxu0  ;;  %v17739_v48 = vld [vmem:[#allocation32_spill] sm:$0xff] }
0x15fd   :  { %v5516_v29 = vadd.f32 %v7701_v55, %v5515_v38  ;;  %v8830_v12 = vpop.f32.mrb[171].mxu0  ;;  %v14960_v50 = vadd.f32 %v5513_v39, %v17725_v47  ;;  %v17741_v47 = vld [vmem:[#allocation42_spill] sm:$0xff] }
0x15ff   :  { %17726 = vst [vmem:[#allocation267_spill] sm:$0xff] %v14960_v50  ;;  %v14963_v0 = vadd.f32 %v5516_v29, %v17727_v52  ;;  %v17740_v29 = vld [vmem:[#allocation34_spill] sm:$0xff] }
0x1601   :  { %17728 = vst [vmem:[#allocation266_spill] sm:$0xff] %v14963_v0  ;;  %v5546_v9 = vpack.c.bf16 %v14963_v0, %v14960_v50 }
0x1602   :  { %v5520_v63 = vpop.f32.mrb[172].mxu0 }
0x1603   :  { %v5521_v3 = vadd.f32 %v7701_v55, %v5520_v63  ;;  %v8833_v17 = vpop.f32.mrb[173].mxu0  ;;  %8844 = vmatmul.mubr.msk.bf16.vlgmr.msra.gmra.mrb[152].mxu1 %vm454_vm1, %v5546_v9  ;;  %v17742_v9 = vld [vmem:[#allocation52_spill] sm:$0xff] }
0x1604   :  { %v5523_v2 = vpop.f32.mrb[174].mxu0  ;;  %8847 = vmatprep.mubr.msk.bf16.mxu1 %vm10269_vm0, %v17409_v10 }
0x1605   :  { %v5524_v4 = vadd.f32 %v7701_v55, %v5523_v2  ;;  %v8834_v20 = vpop.f32.mrb[175].mxu0  ;;  %v14971_v57 = vadd.f32 %v5521_v3, %v17729_v5  ;;  %v17743_v3 = vld [vmem:[#allocation50_spill] sm:$0xff]  ;;  %v17746_v5 = vld [vmem:[#allocation23_spill] sm:$0xff] }
0x1607   :  { %17730 = vst [vmem:[#allocation219_spill] sm:$0xff] %v14971_v57  ;;  %v14974_v43 = vadd.f32 %v5524_v4, %v17731_v26  ;;  %v17745_v4 = vld [vmem:[#allocation15_spill] sm:$0xff] }
0x1609   :  { %17732 = vst [vmem:[#allocation220_spill] sm:$0xff] %v14974_v43  ;;  %v5547_v44 = vpack.c.bf16 %v14974_v43, %v14971_v57  ;;  %v17773_v43 = vld [vmem:[#allocation19_spill] sm:$0xff]  ;;  %v17774_v57 = vld [vmem:[#allocation21_spill] sm:$0xff] }
0x160a   :  { %v5528_v31 = vpop.f32.mrb[176].mxu0 }
0x160b   :  { %v5529_v42 = vadd.f32 %v7701_v55, %v5528_v31  ;;  %v8837_v45 = vpop.f32.mrb[177].mxu0  ;;  %8848 = vmatmul.mubr.msk.bf16.gmra.mrb[156].mxu1 %vm454_vm1, %v5547_v44  ;;  %v17747_v44 = vld [vmem:[#allocation31_spill] sm:$0xff] }
0x160c   :  { %v5531_v36 = vpop.f32.mrb[178].mxu0  ;;  %8851 = vmatprep.mubr.msk.bf16.mxu1 %vm10269_vm0, %v17409_v10 }
0x160d   :  { %v5532_v34 = vadd.f32 %v7701_v55, %v5531_v36  ;;  %v8838_v8 = vpop.f32.mrb[179].mxu0  ;;  %v14982_v61 = vadd.f32 %v5529_v42, %v17733_v56  ;;  %v17748_v42 = vld [vmem:[#allocation33_spill] sm:$0xff] }
0x160e   :  { %v17749_v36 = vld [vmem:[#allocation41_spill] sm:$0xff]  ;;  %v17750_v8 = vld [vmem:[#allocation51_spill] sm:$0xff] }
0x160f   :  { %17734 = vst [vmem:[#allocation221_spill] sm:$0xff] %v14982_v61  ;;  %v14985_v24 = vadd.f32 %v5532_v34, %v17735_v58  ;;  %v17751_v58 = vld [vmem:[#allocation49_spill] sm:$0xff] }
0x1611   :  { %17736 = vst [vmem:[#allocation222_spill] sm:$0xff] %v14985_v24  ;;  %v5548_v14 = vpack.c.bf16 %v14985_v24, %v14982_v61 }
0x1613   :  { %8852 = vmatmul.mubr.msk.bf16.gmra.mrb[160].mxu1 %vm454_vm1, %v5548_v14 }
0x1614   :  { %8871 = vmatprep.mubr.msk.bf16.mxu1 %vm10269_vm0, %v17409_v10  ;;  %v17804_v10 = vld [vmem:[#allocation62_spill] sm:$0xff] }
0x16d6   :  { %v5602_v18 = vpop.f32.mrb[152].mxu1 }
0x16d7   :  { %v14998_v23 = vadd.f32 %v14995_v60, %v5602_v18  ;;  %v8845_v59 = vpop.f32.mrb[153].mxu1 }
0x16d8   :  { %v5605_v25 = vpop.f32.mrb[154].mxu1 }
0x16d9   :  { %v15001_v53 = vadd.f32 %v14995_v60, %v5605_v25  ;;  %v8846_v33 = vpop.f32.mrb[155].mxu1  ;;  %v5625_v55 = vmul.f32 %v14998_v23, %v17737_v62  ;;  %v15007_v39 = vmul.f32 %v14998_v23, %v17738_v21  ;;  %v15011_v38 = vmul.f32 %v14998_v23, %v17739_v48  ;;  %v17767_v48 = vld [vmem:[#allocation22_spill] sm:$0xff] }
0x16da   :  { %v15015_v12 = vmul.f32 %v14998_v23, %v17740_v29  ;;  %v15019_v52 = vmul.f32 %v14998_v23, %v17741_v47  ;;  %v15023_v63 = vmul.f32 %v14998_v23, %v17742_v9  ;;  %v15027_v17 = vmul.f32 %v14998_v23, %v17743_v3  ;;  %v17752_v33 = vld [vmem:[#allocation60_spill] sm:$0xff]  ;;  %v17764_v47 = vld [vmem:[#allocation194_spill] sm:$0xff] }
0x16db   :  { %v15031_v2 = vpack.c.bf16 %v15001_v53, %v14998_v23  ;;  %v5626_v20 = vmul.f32 %v15001_v53, %v17745_v4  ;;  %v15037_v26 = vmul.f32 %v15001_v53, %v17746_v5  ;;  %v15041_v31 = vmul.f32 %v15001_v53, %v17747_v44  ;;  %v17753_v4 = vld [vmem:[#allocation59_spill] sm:$0xff]  ;;  %v17754_v5 = vld [vmem:[#allocation158_spill] sm:$0xff]  ;;  %v17766_v29 = vld [vmem:[#allocation20_spill] sm:$0xff] }
0x16dc   :  { %v15045_v45 = vmul.f32 %v15001_v53, %v17748_v42  ;;  %v15049_v34 = vmul.f32 %v15001_v53, %v17749_v36  ;;  %v15053_v56 = vmul.f32 %v15001_v53, %v17750_v8  ;;  %v15057_v14 = vmul.f32 %v15001_v53, %v17751_v58  ;;  %v17756_v42 = vld [vmem:[#allocation163_spill] sm:$0xff]  ;;  %v17758_v58 = vld [vmem:[#allocation156_spill] sm:$0xff] }
0x16dd   :  { %17744 = vst [vmem:[#allocation223_spill] sm:$0xff] %v15031_v2  ;;  %8257 = vmatprep.mubr.msk.bf16.mxu0 %vm454_vm1, %v15031_v2  ;;  %v5724_v18 = vpack.c.bf16 %v5626_v20, %v5625_v55  ;;  %v15067_v62 = vmul.f32 %v14998_v23, %v17752_v33  ;;  %v15083_v20 = vmul.f32 %v15001_v53, %v17753_v4  ;;  %v17802_v2 = vld [vmem:[#allocation45_spill] sm:$0xff] }
0x16de   :  { %v5610_v21 = vpop.f32.mrb[156].mxu1  ;;  %v15087_v44 = vmul.f32 %v14998_v23, %v17754_v5  ;;  %v15091_v36 = vmul.f32 %v15001_v53, %v17756_v42  ;;  %v15095_v33 = vmul.f32 %v14998_v23, %v17758_v58  ;;  %v15107_v5 = vmul.f32 %v15001_v53, %v17764_v47  ;;  %v17770_v47 = vld [vmem:[#allocation38_spill] sm:$0xff] }
0x16df   :  { %v15078_v9 = vadd.f32 %v14995_v60, %v5610_v21  ;;  %5772 = vrot.lane.b32.xlu0 %v5724_v18, %s10271_s5  ;;  %v8849_v3 = vpop.f32.mrb[157].mxu1  ;;  %v17760_v21 = vld [vmem:[#allocation168_spill] sm:$0xff] }
0x16e0   :  { %17755 = vst [vmem:[#allocation224_spill] sm:$0xff] %v15087_v44  ;;  %17757 = vst [vmem:[#allocation216_spill] sm:$0xff] %v15091_v36  ;;  %v5613_v8 = vpop.f32.mrb[158].mxu1  ;;  %v15099_v18 = vmul.f32 %v15001_v53, %v17760_v21  ;;  %v17762_v3 = vld [vmem:[#allocation189_spill] sm:$0xff]  ;;  %v17768_v21 = vld [vmem:[#allocation30_spill] sm:$0xff] }
0x16e1   :  { %17759 = vst [vmem:[#allocation212_spill] sm:$0xff] %v15095_v33  ;;  %v15103_v4 = vmul.f32 %v14998_v23, %v17762_v3  ;;  %17765 = vst [vmem:[#allocation83_spill] sm:$0xff] %v15107_v5  ;;  %v15110_v42 = vadd.f32 %v14995_v60, %v5613_v8  ;;  %v8850_v55 = vpop.f32.mrb[159].mxu1  ;;  %v5657_v58 = vmul.f32 %v15078_v9, %v17766_v29  ;;  %v17769_v3 = vld [vmem:[#allocation40_spill] sm:$0xff]  ;;  %v17799_v44 = vld [vmem:[#allocation25_spill] sm:$0xff] }
0x16e2   :  { %17761 = vst [vmem:[#allocation215_spill] sm:$0xff] %v15099_v18  ;;  %v15116_v25 = vmul.f32 %v15078_v9, %v17767_v48  ;;  %v15120_v59 = vmul.f32 %v15078_v9, %v17768_v21  ;;  %v15124_v24 = vmul.f32 %v15078_v9, %v17769_v3  ;;  %v15128_v8 = vmul.f32 %v15078_v9, %v17770_v47  ;;  %v17771_v55 = vld [vmem:[#allocation48_spill] sm:$0xff]  ;;  %v17775_v3 = vld [vmem:[#allocation29_spill] sm:$0xff]  ;;  %v17776_v47 = vld [vmem:[#allocation39_spill] sm:$0xff] }
0x16e3   :  { %17763 = vst [vmem:[#allocation217_spill] sm:$0xff] %v15103_v4  ;;  %v15132_v61 = vmul.f32 %v15078_v9, %v17771_v55  ;;  %v17772_v29 = vld [vmem:[#allocation56_spill] sm:$0xff]  ;;  %v5658_v21 = vmul.f32 %v15110_v42, %v17773_v43  ;;  %v15142_v0 = vmul.f32 %v15110_v42, %v17774_v57  ;;  %v15146_v50 = vmul.f32 %v15110_v42, %v17775_v3  ;;  %v17777_v55 = vld [vmem:[#allocation37_spill] sm:$0xff]  ;;  %v17779_v43 = vld [vmem:[#allocation55_spill] sm:$0xff] }
0x16e4   :  { %v15136_v48 = vmul.f32 %v15078_v9, %v17772_v29  ;;  %v15150_v1 = vmul.f32 %v15110_v42, %v17776_v47  ;;  %v15154_v27 = vmul.f32 %v15110_v42, %v17777_v55  ;;  %v17778_v29 = vld [vmem:[#allocation47_spill] sm:$0xff]  ;;  %v15162_v57 = vmul.f32 %v15110_v42, %v17779_v43  ;;  %v17781_v55 = vld [vmem:[#allocation57_spill] sm:$0xff]  ;;  %v17793_v33 = vld [vmem:[#allocation44_spill] sm:$0xff] }
0x16e5   :  { %v15158_v51 = vmul.f32 %v15110_v42, %v17778_v29  ;;  %v5740_v13 = vpack.c.bf16 %v5658_v21, %v5657_v58  ;;  %v5725_v47 = vpack.c.bf16 %v15142_v0, %v15116_v25  ;;  %v17780_v58 = vld [vmem:[#allocation58_spill] sm:$0xff]  ;;  %v15188_v37 = vmul.f32 %v15110_v42, %v17781_v55  ;;  %v17787_v55 = vld [vmem:[#allocation160_spill] sm:$0xff] }
0x16e6   :  { %v5618_v16 = vpop.f32.mrb[160].mxu1  ;;  %v15180_v21 = vmul.f32 %v15078_v9, %v17780_v58  ;;  %v15192_v43 = vpack.c.bf16 %v15110_v42, %v15078_v9  ;;  %v15208_v7 = vmul.f32 %v15078_v9, %v17787_v55  ;;  %v17790_v58 = vld [vmem:[#allocation28_spill] sm:$0xff]  ;;  %v17794_v18 = vld [vmem:[#allocation46_spill] sm:$0xff] }
0x16e7   :  { %v15183_v0 = vadd.f32 %v14995_v60, %v5618_v16  ;;  %5804 = vrot.lane.b32.xlu0 %v5740_v13, %s10271_s5  ;;  %v8853_v25 = vpop.f32.mrb[161].mxu1  ;;  %v17783_v16 = vld [vmem:[#allocation165_spill] sm:$0xff]  ;;  %v17785_v13 = vld [vmem:[#allocation178_spill] sm:$0xff] }
0x16e8   :  { %17782 = vst [vmem:[#allocation88_spill] sm:$0xff] %v15192_v43  ;;  %v5621_v29 = vpop.f32.mrb[162].mxu1  ;;  %v15200_v11 = vmul.f32 %v15078_v9, %v17783_v16  ;;  %v15204_v25 = vmul.f32 %v15110_v42, %v17785_v13  ;;  %17788 = vst [vmem:[#allocation94_spill] sm:$0xff] %v15208_v7  ;;  %v17791_v16 = vld [vmem:[#allocation26_spill] sm:$0xff]  ;;  %v17801_v43 = vld [vmem:[#allocation43_spill] sm:$0xff] }
0x16e9   :  { %v15211_v19 = vadd.f32 %v14995_v60, %v5621_v29  ;;  %v8854_v3 = vpop.f32.mrb[163].mxu1  ;;  %v5641_v15 = vmul.f32 %v15183_v0, %v17789_v6  ;;  %v5629_v41 = vmul.f32 %v15183_v0, %v17790_v58  ;;  %v5659_v32 = vmul.f32 %v15183_v0, %v17791_v16  ;;  %v17797_v58 = vld [vmem:[#allocation17_spill] sm:$0xff]  ;;  %v17798_v16 = vld [vmem:[#allocation27_spill] sm:$0xff]  ;;  %v17822_v7 = vld [vmem:[#allocation188_spill] sm:$0xff] }
0x16ea   :  { %17784 = vst [vmem:[#allocation90_spill] sm:$0xff] %v15200_v11  ;;  %17786 = vst [vmem:[#allocation89_spill] sm:$0xff] %v15204_v25  ;;  %v5647_v13 = vmul.f32 %v15183_v0, %v17792_v46  ;;  %v15223_v55 = vmul.f32 %v15183_v0, %v17793_v33  ;;  %v15227_v60 = vmul.f32 %v15183_v0, %v17794_v18  ;;  %v17795_v3 = vld [vmem:[#allocation54_spill] sm:$0xff]  ;;  %v17800_v18 = vld [vmem:[#allocation35_spill] sm:$0xff] }
0x16eb   :  { %v15231_v6 = vmul.f32 %v15183_v0, %v17795_v3  ;;  %v17796_v29 = vpack.c.bf16 %v15037_v26, %v15007_v39  ;;  %v5642_v46 = vmul.f32 %v15211_v19, %v17797_v58  ;;  %v5630_v33 = vmul.f32 %v15211_v19, %v17798_v16  ;;  %v17803_v26 = vld [vmem:[#allocation53_spill] sm:$0xff] }
0x16ec   :  { %v5660_v36 = vmul.f32 %v15211_v19, %v17799_v44  ;;  %v5648_v40 = vmul.f32 %v15211_v19, %v17800_v18  ;;  %v15247_v3 = vmul.f32 %v15211_v19, %v17801_v43  ;;  %v15251_v39 = vmul.f32 %v15211_v19, %v17802_v2  ;;  %v17815_v11 = vld [vmem:[#allocation185_spill] sm:$0xff] }
0x16ed   :  { %5790 = vrot.lane.b32.xlu0 %v17796_v29, %s10271_s5  ;;  %v15255_v29 = vmul.f32 %v15211_v19, %v17803_v26  ;;  %v5732_v16 = vpack.c.bf16 %v5642_v46, %v5641_v15  ;;  %v5726_v44 = vpack.c.bf16 %v5630_v33, %v5629_v41  ;;  %v15267_v26 = vmul.f32 %v15183_v0, %v17804_v10  ;;  %v17805_v41 = vld [vmem:[#allocation61_spill] sm:$0xff]  ;;  %v17806_v15 = vld [vmem:[#allocation152_spill] sm:$0xff]  ;;  %v17813_v46 = vld [vmem:[#allocation183_spill] sm:$0xff] }
0x16ee   :  { %v5741_v54 = vpack.c.bf16 %v5660_v36, %v5659_v32  ;;  %v5735_v35 = vpack.c.bf16 %v5648_v40, %v5647_v13  ;;  %v15273_v40 = vmul.f32 %v15211_v19, %v17805_v41  ;;  %v15277_v32 = vpack.c.bf16 %v15211_v19, %v15183_v0  ;;  %v17807_v13 = vld [vmem:[#allocation153_spill] sm:$0xff] }
0x16ef   :  { %5788 = vrot.lane.b32.xlu1 %v5732_v16, %s10271_s5  ;;  %v15281_v36 = vmul.f32 %v15183_v0, %v17806_v15  ;;  %v15285_v10 = vmul.f32 %v15211_v19, %v17807_v13  ;;  %v17808_v33 = vld [vmem:[#allocation173_spill] sm:$0xff]  ;;  %v17810_v15 = vld [vmem:[#allocation186_spill] sm:$0xff]  ;;  %v15309_v18 = vmul.f32 %v15110_v42, %v17813_v46  ;;  %v15317_v58 = vmul.f32 %v15183_v0, %v17815_v11 }
0x16f0   :  { %v15291_v16 = vmul.f32 %v15110_v42, %v17808_v33  ;;  %v15301_v2 = vmul.f32 %v15211_v19, %v17810_v15  ;;  %v17811_v13 = vld [vmem:[#allocation170_spill] sm:$0xff]  ;;  %v17819_v46 = vpack.c.bf16 %v15041_v31, %v15011_v38  ;;  %v17820_v33 = vld [vmem:[#allocation180_spill] sm:$0xff]  ;;  %v17823_v31 = vld [vmem:[#allocation187_spill] sm:$0xff] }
0x16f1   :  { %5776 = vrot.lane.b32.xlu0 %v5726_v44, %s10271_s5  ;;  %v17809_v44 = vld [vmem:[#allocation175_spill] sm:$0xff]  ;;  %v15305_v43 = vmul.f32 %v15078_v9, %v17811_v13  ;;  %17814 = vst [vmem:[#allocation97_spill] sm:$0xff] %v15309_v18  ;;  %17816 = vst [vmem:[#allocation99_spill] sm:$0xff] %v15317_v58  ;;  %v17817_v15 = vld [vmem:[#allocation190_spill] sm:$0xff]  ;;  %v15334_v11 = vmul.f32 %v15183_v0, %v17820_v33 }
0x16f2   :  { %v15295_v41 = vmul.f32 %v15183_v0, %v17809_v44  ;;  %v15321_v25 = vmul.f32 %v15211_v19, %v17817_v15  ;;  %v17825_v13 = vld [vmem:[#allocation192_spill] sm:$0xff]  ;;  %v17826_v33 = vld [vmem:[#allocation193_spill] sm:$0xff]  ;;  %v17828_v15 = vld [vmem:[#allocation198_spill] sm:$0xff] }
0x16f3   :  { %17812 = vst [vmem:[#allocation95_spill] sm:$0xff] %v15305_v43  ;;  %5774 = vrot.lane.b32.xlu1 %v5725_v47, %s10271_s5  ;;  %17821 = vst [vmem:[#allocation102_spill] sm:$0xff] %v15334_v11  ;;  %v15340_v47 = vmul.f32 %v15211_v19, %v17822_v7  ;;  %v15350_v44 = vmul.f32 %v15001_v53, %v17825_v13  ;;  %v15354_v43 = vmul.f32 %v15078_v9, %v17826_v33  ;;  %v17830_v7 = vld [vmem:[#allocation191_spill] sm:$0xff]  ;;  %v17832_v38 = vld [vmem:[#allocation196_spill] sm:$0xff] }
0x16f4   :  { %17818 = vst [vmem:[#allocation103_spill] sm:$0xff] %v15321_v25  ;;  %v15358_v58 = vmul.f32 %v15110_v42, %v17828_v15  ;;  %v15362_v25 = vmul.f32 %v14998_v23, %v17830_v7  ;;  %v15368_v4 = vmul.f32 %v15001_v53, %v17832_v38  ;;  %v17834_v13 = vld [vmem:[#allocation197_spill] sm:$0xff]  ;;  %v17836_v33 = vld [vmem:[#allocation202_spill] sm:$0xff]  ;;  %v17838_v38 = vld [vmem:[#allocation195_spill] sm:$0xff] }
0x16f5   :  { %5808 = vrot.lane.b32.xlu0 %v17819_v46, %s10271_s5  ;;  %v15346_v46 = vmul.f32 %v14998_v23, %v17823_v31  ;;  %17827 = vst [vmem:[#allocation124_spill] sm:$0xff] %v15354_v43  ;;  %v15372_v5 = vmul.f32 %v15078_v9, %v17834_v13  ;;  %v15376_v18 = vmul.f32 %v15110_v42, %v17836_v33  ;;  %v17840_v11 = vld [vmem:[#allocation200_spill] sm:$0xff]  ;;  %v17845_v33 = vld [vmem:[#allocation205_spill] sm:$0xff] }
0x16f6   :  { %17829 = vst [vmem:[#allocation125_spill] sm:$0xff] %v15358_v58  ;;  %17831 = vst [vmem:[#allocation127_spill] sm:$0xff] %v15362_v25  ;;  %v15386_v31 = vmul.f32 %v15078_v9, %v17838_v38  ;;  %v17843_v38 = vld [vmem:[#allocation199_spill] sm:$0xff]  ;;  %v17844_v13 = vld [vmem:[#allocation204_spill] sm:$0xff] }
0x16f7   :  { %17824 = vst [vmem:[#allocation104_spill] sm:$0xff] %v15346_v46  ;;  %17833 = vst [vmem:[#allocation128_spill] sm:$0xff] %v15368_v4  ;;  %5806 = vrot.lane.b32.xlu1 %v5741_v54, %s10271_s5  ;;  %v15394_v54 = vmul.f32 %v15110_v42, %v17840_v11  ;;  %v17842_v46 = vld [vmem:[#allocation206_spill] sm:$0xff]  ;;  %v15406_v43 = vmul.f32 %v15183_v0, %v17843_v38  ;;  %v15410_v25 = vmul.f32 %v15211_v19, %v17844_v13  ;;  %v17848_v38 = vld [vmem:[#allocation208_spill] sm:$0xff] }
0x16f8   :  { %17835 = vst [vmem:[#allocation126_spill] sm:$0xff] %v15372_v5  ;;  %17837 = vst [vmem:[#allocation129_spill] sm:$0xff] %v15376_v18  ;;  %v15402_v7 = vmul.f32 %v15211_v19, %v17842_v46  ;;  %v15414_v11 = vmul.f32 %v14998_v23, %v17845_v33  ;;  %v17846_v5 = vld [vmem:[#allocation210_spill] sm:$0xff]  ;;  %v17847_v46 = vld [vmem:[#allocation203_spill] sm:$0xff]  ;;  %v15428_v58 = vmul.f32 %v15211_v19, %v17848_v38 }
0x16f9   :  { %5794 = vrot.lane.b32.xlu0 %v5735_v35, %s10271_s5  ;;  %17839 = vst [vmem:[#allocation130_spill] sm:$0xff] %v15386_v31  ;;  %v17841_v35 = vld [vmem:[#allocation201_spill] sm:$0xff]  ;;  %v15420_v18 = vmul.f32 %v15001_v53, %v17846_v5  ;;  %v15424_v4 = vmul.f32 %v15183_v0, %v17847_v46  ;;  %v17849_v13 = vpack.c.bf16 %v15146_v50, %v15120_v59 }
0x16fa   :  { %v15398_v15 = vmul.f32 %v15183_v0, %v17841_v35  ;;  %v17850_v33 = vpack.c.bf16 %v15150_v1, %v15124_v24  ;;  %v17851_v35 = vld [vmem:[#allocation209_spill] sm:$0xff]  ;;  %v17853_v24 = vld [vmem:[#allocation207_spill] sm:$0xff]  ;;  %v15468_v31 = vmul.f32 %v15110_v42, %v17551_v49  ;;  %v17857_v49 = vpack.c.bf16 %v15045_v45, %v15015_v12 }
0x16fb   :  { %5792 = vrot.lane.b32.xlu1 %v17849_v13, %s10271_s5  ;;  %v15444_v38 = vmul.f32 %v14998_v23, %v17851_v35  ;;  %v6604_v50 = vpack.c.bf16 %v15428_v58, %v15424_v4  ;;  %v17852_v59 = vld [vmem:[#allocation213_spill] sm:$0xff]  ;;  %v15456_v13 = vmul.f32 %v14998_v23, %v17853_v24  ;;  %v17855_v35 = vld [vmem:[#allocation214_spill] sm:$0xff]  ;;  %v15478_v24 = vmul.f32 %v15110_v42, %v17553_v22 }
0x16fc   :  { %v15452_v1 = vmul.f32 %v15001_v53, %v17852_v59  ;;  %v15464_v5 = vmul.f32 %v15078_v9, %v17855_v35  ;;  %v15472_v59 = vmul.f32 %v15078_v9, %v17552_v30  ;;  %v17858_v30 = vpack.c.bf16 %v15247_v3, %v15223_v55 }
0x16fd   :  { %5780 = vrot.lane.b32.xlu0 %v17850_v33, %s10271_s5  ;;  %v17854_v33 = vld [vmem:[#allocation211_spill] sm:$0xff]  ;;  %v17859_v12 = vpack.c.bf16 %v15154_v27, %v15128_v8  ;;  %v17860_v45 = vpack.c.bf16 %v15158_v51, %v15132_v61  ;;  %v17861_v42 = vpack.c.bf16 %v15049_v34, %v15019_v52  ;;  %v17863_v27 = vpack.c.bf16 %v15251_v39, %v15227_v60 }
0x16fe   :  { %v15460_v46 = vmul.f32 %v15001_v53, %v17854_v33  ;;  %v6605_v23 = vpack.c.bf16 %v15452_v1, %v15444_v38  ;;  %v15482_v53 = vmul.f32 %v15183_v0, %v17554_v28  ;;  %v17856_v33 = vld [vmem:[#allocation218_spill] sm:$0xff]  ;;  %v17862_v0 = vpack.c.bf16 %v15053_v56, %v15023_v63 }
0x16ff   :  { %v15486_v35 = vmul.f32 %v15211_v19, %v17856_v33  ;;  %5778 = vrot.lane.b32.xlu1 %v17857_v49, %s10271_s5  ;;  %v17864_v51 = vpack.c.bf16 %v15162_v57, %v15136_v48  ;;  %v17865_v61 = vpack.c.bf16 %v15057_v14, %v15027_v17  ;;  %v17866_v52 = vpack.c.bf16 %v15083_v20, %v15067_v62  ;;  %v17936_v19 = vld [vmem:[#allocation290_spill] sm:$0xff] }
0x1700   :  { %v6596_v22 = vpack.c.bf16 %v15460_v46, %v15456_v13  ;;  %v17867_v63 = vpack.c.bf16 %v15255_v29, %v15231_v6  ;;  %v17868_v34 = vpack.c.bf16 %v15188_v37, %v15180_v21  ;;  %v17869_v17 = vpack.c.bf16 %v15273_v40, %v15267_v26 }
0x1701   :  { %5812 = vrot.lane.b32.xlu0 %v17858_v30, %s10271_s5  ;;  %v17870_v20 = vmov 0.0   ;;  %v17982_v4 = vpack.c.bf16 %v15478_v24, %v15472_v59  ;;  %v17983_v58 = vpack.c.bf16 %v15486_v35, %v15482_v53 }
0x1703   :  { %5810 = vrot.lane.b32.xlu1 %v17859_v12, %s10271_s5 }
0x1705   :  { %5798 = vrot.lane.b32.xlu0 %v17860_v45, %s10271_s5 }
0x1707   :  { %5796 = vrot.lane.b32.xlu1 %v17861_v42, %s10271_s5 }
0x1709   :  { %5784 = vrot.lane.b32.xlu0 %v17862_v0, %s10271_s5 }
0x170b   :  { %5782 = vrot.lane.b32.xlu1 %v17863_v27, %s10271_s5 }
0x170d   :  { %5816 = vrot.lane.b32.xlu0 %v17864_v51, %s10271_s5 }
0x170f   :  { %5814 = vrot.lane.b32.xlu1 %v17865_v61, %s10271_s5 }
0x1711   :  { %5802 = vrot.lane.b32.xlu0 %v17866_v52, %s10271_s5 }
0x1713   :  { %5800 = vrot.lane.b32.xlu1 %v17867_v63, %s10271_s5 }
0x1717   :  { %5786 = vrot.lane.b32.xlu1 %v17868_v34, %s10271_s5 }
0x171b   :  { %5818 = vrot.lane.b32.xlu1 %v17869_v17, %s10271_s5 }
0x1751   :  { %v5773_v56 = vpop.permute.xlu0 %5772 }
0x1752   :  { %v5830_v57 = vsel %vm454_vm1, %v5773_v56, 0 }
0x1759   :  { %v5805_v14 = vpop.permute.xlu0 %5804 }
0x175a   :  { %v5878_v62 = vsel %vm454_vm1, %v5805_v14, 0 }
0x175b   :  { %8856 = vmatpush3.bf16.xpose.msra.mxu1 %v5878_v62 }
0x175c   :  { %8857 = vmatprep.subr.bf16.mxu1 %v17870_v20 }
0x175f   :  { %v5791_v8 = vpop.permute.xlu0 %5790 }
0x1761   :  { %v5789_v48 = vpop.permute.xlu1 %5788 }
0x1762   :  { %9806 = vmatprep.subr.msk.bf16.mxu0 %vm454_vm1, %v5789_v48 }
0x1763   :  { %v5777_v37 = vpop.permute.xlu0 %5776  ;;  %8242 = vmatpush3.bf16.xpose.msra.mxu0 %v5830_v57 }
0x1764   :  { %9807 = vmatprep.subr.msk.bf16.mxu0 %vm454_vm1, %v5791_v8  ;;  %v5836_v40 = vsel %vm454_vm1, %v5777_v37, 0 }
0x1765   :  { %v5775_v21 = vpop.permute.xlu1 %5774 }
0x1766   :  { %v5833_v6 = vsel %vm454_vm1, %v5775_v21, 0 }
0x1767   :  { %v5809_v55 = vpop.permute.xlu0 %5808 }
0x1768   :  { %v5884_v33 = vsel %vm454_vm1, %v5809_v55, 0 }
0x1769   :  { %v5807_v60 = vpop.permute.xlu1 %5806 }
0x176a   :  { %v5881_v3 = vsel %vm454_vm1, %v5807_v60, 0 }
0x176b   :  { %8244 = vmatpush3.bf16.xpose.msra.mxu0 %v5833_v6  ;;  %8858 = vmatpush3.bf16.xpose.msra.mxu1 %v5881_v3  ;;  %v5795_v29 = vpop.permute.xlu0 %5794  ;;  %v17871_v6 = vld [vmem:[#allocation63_spill] sm:$0xff]  ;;  %v17872_v3 = vld [vmem:[#allocation101_spill] sm:$0xff] }
0x176c   :  { %8859 = vmatprep.subr.bf16.mxu1 %v17870_v20 }
0x176d   :  { %v5793_v39 = vpop.permute.xlu1 %5792 }
0x176e   :  { %9808 = vmatprep.subr.msk.bf16.mxu0 %vm454_vm1, %v5793_v39  ;;  %v17873_v39 = vld [vmem:[#allocation223_spill] sm:$0xff] }
0x176f   :  { %v5781_v49 = vpop.permute.xlu0 %5780 }
0x1770   :  { %v5842_v61 = vsel %vm454_vm1, %v5781_v49, 0  ;;  %v17878_v49 = vld [vmem:[#allocation110_spill] sm:$0xff] }
0x1771   :  { %v5779_v26 = vpop.permute.xlu1 %5778 }
0x1772   :  { %v5839_v45 = vsel %vm454_vm1, %v5779_v26, 0  ;;  %v17875_v26 = vld [vmem:[#allocation64_spill] sm:$0xff] }
0x1773   :  { %8246 = vmatpush3.bf16.xpose.msra.mxu0 %v5836_v40  ;;  %8860 = vmatpush3.bf16.xpose.msra.mxu1 %v5884_v33  ;;  %v5813_v0 = vpop.permute.xlu0 %5812  ;;  %v17876_v40 = vld [vmem:[#allocation108_spill] sm:$0xff]  ;;  %v17877_v33 = vld [vmem:[#allocation65_spill] sm:$0xff] }
0x1774   :  { %9809 = vmatprep.subr.msk.bf16.mxu0 %vm454_vm1, %v5795_v29  ;;  %8861 = vmatprep.subr.bf16.mxu1 %v17870_v20  ;;  %v5890_v52 = vsel %vm454_vm1, %v5813_v0, 0  ;;  %v17874_v29 = vld [vmem:[#allocation88_spill] sm:$0xff] }
0x1775   :  { %v5811_v30 = vpop.permute.xlu1 %5810  ;;  %v17883_v0 = vld [vmem:[#allocation68_spill] sm:$0xff] }
0x1776   :  { %v5887_v42 = vsel %vm454_vm1, %v5811_v30, 0  ;;  %v17879_v30 = vld [vmem:[#allocation66_spill] sm:$0xff] }
0x1777   :  { %v5799_v51 = vpop.permute.xlu0 %5798 }
0x1779   :  { %v5797_v12 = vpop.permute.xlu1 %5796 }
0x177b   :  { %8248 = vmatpush3.bf16.xpose.msra.mxu0 %v5839_v45  ;;  %8862 = vmatpush3.bf16.xpose.msra.mxu1 %v5887_v42  ;;  %v5785_v34 = vpop.permute.xlu0 %5784  ;;  %v17881_v45 = vld [vmem:[#allocation67_spill] sm:$0xff] }
0x177c   :  { %9810 = vmatprep.subr.msk.bf16.mxu0 %vm454_vm1, %v5797_v12  ;;  %8863 = vmatprep.subr.bf16.mxu1 %v17870_v20  ;;  %v5848_v48 = vsel %vm454_vm1, %v5785_v34, 0  ;;  %v17880_v12 = vld [vmem:[#allocation112_spill] sm:$0xff]  ;;  %v17882_v42 = vld [vmem:[#allocation115_spill] sm:$0xff] }
0x177d   :  { %v5783_v27 = vpop.permute.xlu1 %5782  ;;  %v17889_v34 = vld [vmem:[#allocation71_spill] sm:$0xff] }
0x177e   :  { %v5845_v17 = vsel %vm454_vm1, %v5783_v27, 0  ;;  %v17884_v27 = vld [vmem:[#allocation118_spill] sm:$0xff] }
0x177f   :  { %v5817_v62 = vpop.permute.xlu0 %5816 }
0x1780   :  { %v5896_v57 = vsel %vm454_vm1, %v5817_v62, 0  ;;  %v17893_v62 = vld [vmem:[#allocation77_spill] sm:$0xff] }
0x1781   :  { %v5815_v63 = vpop.permute.xlu1 %5814 }
0x1782   :  { %v5893_v56 = vsel %vm454_vm1, %v5815_v63, 0  ;;  %v17888_v63 = vld [vmem:[#allocation123_spill] sm:$0xff] }
0x1783   :  { %8250 = vmatpush3.bf16.xpose.msra.mxu0 %v5842_v61  ;;  %8864 = vmatpush3.bf16.xpose.msra.mxu1 %v5890_v52  ;;  %v5803_v37 = vpop.permute.xlu0 %5802  ;;  %v17886_v61 = vld [vmem:[#allocation121_spill] sm:$0xff]  ;;  %v17887_v52 = vld [vmem:[#allocation70_spill] sm:$0xff] }
0x1784   :  { %9811 = vmatprep.subr.msk.bf16.mxu0 %vm454_vm1, %v5799_v51  ;;  %8865 = vmatprep.subr.bf16.mxu1 %v17870_v20  ;;  %v17885_v51 = vld [vmem:[#allocation69_spill] sm:$0xff] }
0x1785   :  { %v5801_v14 = vpop.permute.xlu1 %5800 }
0x1789   :  { %v5787_v8 = vpop.permute.xlu1 %5786 }
0x178a   :  { %v5851_v55 = vsel %vm454_vm1, %v5787_v8, 0  ;;  %v17894_v8 = vld [vmem:[#allocation136_spill] sm:$0xff] }
0x178b   :  { %8252 = vmatpush3.bf16.xpose.msra.mxu0 %v5845_v17  ;;  %8866 = vmatpush3.bf16.xpose.msra.mxu1 %v5893_v56  ;;  %v17890_v17 = vld [vmem:[#allocation132_spill] sm:$0xff]  ;;  %v17891_v56 = vld [vmem:[#allocation75_spill] sm:$0xff] }
0x178c   :  { %9812 = vmatprep.subr.msk.bf16.mxu0 %vm454_vm1, %v5801_v14  ;;  %8867 = vmatprep.subr.bf16.mxu1 %v17870_v20  ;;  %v17892_v14 = vld [vmem:[#allocation134_spill] sm:$0xff] }
0x178d   :  { %v5819_v21 = vpop.permute.xlu1 %5818 }
0x178e   :  { %v5899_v60 = vsel %vm454_vm1, %v5819_v21, 0  ;;  %v17898_v21 = vld [vmem:[#allocation140_spill] sm:$0xff] }
0x1793   :  { %8254 = vmatpush3.bf16.xpose.msra.mxu0 %v5848_v48  ;;  %8868 = vmatpush3.bf16.xpose.msra.mxu1 %v5896_v57  ;;  %v17895_v48 = vld [vmem:[#allocation81_spill] sm:$0xff]  ;;  %v17896_v57 = vld [vmem:[#allocation138_spill] sm:$0xff] }
0x1794   :  { %9813 = vmatprep.subr.msk.bf16.mxu0 %vm454_vm1, %v5803_v37  ;;  %8869 = vmatprep.subr.bf16.mxu1 %v17870_v20  ;;  %v17897_v37 = vld [vmem:[#allocation84_spill] sm:$0xff] }
0x179b   :  { %8256 = vmatpush3.bf16.xpose.msra.mxu0 %v5851_v55  ;;  %8870 = vmatpush3.bf16.xpose.msra.mxu1 %v5899_v60  ;;  %v17899_v55 = vld [vmem:[#allocation91_spill] sm:$0xff]  ;;  %v17900_v60 = vld [vmem:[#allocation142_spill] sm:$0xff] }
0x179c   :  { %9518 = vmatprep.subr.bf16.mxu0 %v17871_v6  ;;  %9614 = vmatprep.subr.bf16.mxu1 %v17872_v3  ;;  %v17902_v6 = vld [vmem:[#allocation144_spill] sm:$0xff]  ;;  %v17903_v3 = vld [vmem:[#allocation98_spill] sm:$0xff] }
0x17a2   :  { %8258 = vmatmul.mubr.msk.bf16.vlgmr.msra.gmra.mrb[180].mxu0 %vm454_vm1, %v17873_v39  ;;  %8872 = vmatmul.mubr.msk.bf16.vlgmr.msra.gmra.mrb[164].mxu1 %vm454_vm1, %v17873_v39  ;;  %v17904_v39 = vld [vmem:[#allocation146_spill] sm:$0xff] }
0x17a3   :  { %8259 = vmatprep.mubr.msk.bf16.mxu0 %vm454_vm1, %v17874_v29  ;;  %8875 = vmatprep.mubr.msk.bf16.mxu1 %vm10269_vm0, %v17870_v20 }
0x17a4   :  { %9520 = vmatpush1.bf16.msra.mxu0 %v17875_v26  ;;  %9616 = vmatpush3.bf16.msra.mxu1 %v17876_v40  ;;  %v17906_v26 = vld [vmem:[#allocation148_spill] sm:$0xff]  ;;  %v17907_v40 = vld [vmem:[#allocation106_spill] sm:$0xff] }
0x17a5   :  { %9522 = vmatprep.subr.bf16.mxu0 %v17877_v33  ;;  %9618 = vmatprep.subr.bf16.mxu1 %v17878_v49  ;;  %v17908_v33 = vld [vmem:[#allocation109_spill] sm:$0xff]  ;;  %v17909_v49 = vld [vmem:[#allocation111_spill] sm:$0xff] }
0x17a8   :  { %9524 = vmatpush1.bf16.msra.mxu0 %v17879_v30  ;;  %9620 = vmatpush3.bf16.msra.mxu1 %v17880_v12  ;;  %v17910_v30 = vld [vmem:[#allocation114_spill] sm:$0xff]  ;;  %v17911_v12 = vld [vmem:[#allocation116_spill] sm:$0xff] }
0x17a9   :  { %9526 = vmatprep.subr.bf16.mxu0 %v17881_v45  ;;  %9622 = vmatprep.subr.bf16.mxu1 %v17882_v42  ;;  %v17912_v45 = vld [vmem:[#allocation120_spill] sm:$0xff]  ;;  %v17913_v42 = vld [vmem:[#allocation122_spill] sm:$0xff] }
0x17aa   :  { %8260 = vmatmul.mubr.msk.bf16.gmra.mrb[184].mxu0 %vm454_vm1, %v17874_v29  ;;  %8876 = vmatmul.mubr.msk.bf16.gmra.mrb[168].mxu1 %vm454_vm1, %v17874_v29  ;;  %v17905_v29 = vld [vmem:[#allocation100_spill] sm:$0xff] }
0x17ab   :  { %8261 = vmatprep.mubr.msk.bf16.mxu0 %vm454_vm1, %v15277_v32  ;;  %8879 = vmatprep.mubr.msk.bf16.mxu1 %vm10269_vm0, %v17870_v20 }
0x17ac   :  { %9528 = vmatpush1.bf16.msra.mxu0 %v17883_v0  ;;  %9624 = vmatpush3.bf16.msra.mxu1 %v17884_v27  ;;  %v17914_v0 = vld [vmem:[#allocation131_spill] sm:$0xff]  ;;  %v17915_v27 = vld [vmem:[#allocation133_spill] sm:$0xff] }
0x17ad   :  { %9530 = vmatprep.subr.bf16.mxu0 %v17885_v51  ;;  %9626 = vmatprep.subr.bf16.mxu1 %v17886_v61  ;;  %v17916_v51 = vld [vmem:[#allocation135_spill] sm:$0xff]  ;;  %v17917_v61 = vld [vmem:[#allocation137_spill] sm:$0xff] }
0x17b0   :  { %9532 = vmatpush1.bf16.msra.mxu0 %v17887_v52  ;;  %9628 = vmatpush3.bf16.msra.mxu1 %v17888_v63  ;;  %v17918_v52 = vld [vmem:[#allocation139_spill] sm:$0xff]  ;;  %v17919_v63 = vld [vmem:[#allocation141_spill] sm:$0xff] }
0x17b1   :  { %9534 = vmatprep.subr.bf16.mxu0 %v17889_v34  ;;  %9630 = vmatprep.subr.bf16.mxu1 %v17890_v17  ;;  %v17920_v34 = vld [vmem:[#allocation143_spill] sm:$0xff]  ;;  %v17921_v17 = vld [vmem:[#allocation145_spill] sm:$0xff] }
0x17b2   :  { %8262 = vmatmul.mubr.msk.bf16.gmra.mrb[188].mxu0 %vm454_vm1, %v15277_v32  ;;  %8880 = vmatmul.mubr.msk.bf16.gmra.mrb[172].mxu1 %vm454_vm1, %v15277_v32  ;;  %v17901_v32 = vld [vmem:[#allocation93_spill] sm:$0xff] }
0x17b4   :  { %9536 = vmatpush1.bf16.msra.mxu0 %v17891_v56  ;;  %9632 = vmatpush3.bf16.msra.mxu1 %v17892_v14  ;;  %v17922_v56 = vld [vmem:[#allocation147_spill] sm:$0xff] }
0x17b5   :  { %9538 = vmatprep.subr.bf16.mxu0 %v17893_v62  ;;  %9634 = vmatprep.subr.bf16.mxu1 %v17894_v8 }
0x17b8   :  { %9540 = vmatpush1.bf16.msra.mxu0 %v17895_v48  ;;  %9636 = vmatpush3.bf16.msra.mxu1 %v17896_v57 }
0x17b9   :  { %9542 = vmatprep.subr.bf16.mxu0 %v17897_v37  ;;  %9638 = vmatprep.subr.bf16.mxu1 %v17898_v21 }
0x17bc   :  { %9544 = vmatpush1.bf16.msra.mxu0 %v17899_v55  ;;  %9640 = vmatpush3.bf16.msra.mxu1 %v17900_v60 }
0x17bd   :  { %9546 = vmatprep.subr.bf16.mxu0 %v17901_v32  ;;  %9642 = vmatprep.subr.bf16.mxu1 %v17902_v6  ;;  %v17923_v32 = vld [vmem:[#allocation227_spill] sm:$0xff] }
0x17c0   :  { %9548 = vmatpush1.bf16.msra.mxu0 %v17903_v3  ;;  %9644 = vmatpush3.bf16.msra.mxu1 %v17904_v39 }
0x17c1   :  { %9550 = vmatprep.subr.bf16.mxu0 %v17905_v29  ;;  %9646 = vmatprep.subr.bf16.mxu1 %v17906_v26 }
0x17c4   :  { %9552 = vmatpush1.bf16.msra.mxu0 %v17907_v40  ;;  %v17924_v40 = vld [vmem:[#allocation269_spill] sm:$0xff] }
0x17c5   :  { %9554 = vmatprep.subr.bf16.mxu0 %v17908_v33 }
0x17c8   :  { %9556 = vmatpush1.bf16.msra.mxu0 %v17909_v49 }
0x17c9   :  { %9558 = vmatprep.subr.bf16.mxu0 %v17910_v30 }
0x17cc   :  { %9560 = vmatpush1.bf16.msra.mxu0 %v17911_v12  ;;  %v17925_v12 = vld [vmem:[#allocation271_spill] sm:$0xff] }
0x17cd   :  { %9562 = vmatprep.subr.bf16.mxu0 %v17912_v45 }
0x17d0   :  { %9564 = vmatpush1.bf16.msra.mxu0 %v17913_v42  ;;  %v17926_v42 = vld [vmem:[#allocation270_spill] sm:$0xff] }
0x17d1   :  { %9566 = vmatprep.subr.bf16.mxu0 %v17914_v0 }
0x17d4   :  { %9568 = vmatpush1.bf16.msra.mxu0 %v17915_v27 }
0x17d5   :  { %9570 = vmatprep.subr.bf16.mxu0 %v17916_v51  ;;  %v17927_v51 = vld [vmem:[#allocation275_spill] sm:$0xff] }
0x17d8   :  { %9572 = vmatpush1.bf16.msra.mxu0 %v17917_v61 }
0x17d9   :  { %9574 = vmatprep.subr.bf16.mxu0 %v17918_v52  ;;  %v17928_v52 = vld [vmem:[#allocation274_spill] sm:$0xff] }
0x17dc   :  { %9576 = vmatpush1.bf16.msra.mxu0 %v17919_v63 }
0x17dd   :  { %9578 = vmatprep.subr.bf16.mxu0 %v17920_v34 }
0x17e0   :  { %9580 = vmatpush1.bf16.msra.mxu0 %v17921_v17 }
0x17e1   :  { %9582 = vmatprep.subr.bf16.mxu0 %v17922_v56 }
0x1875   :  { %v5935_v14 = vpop.f32.mrb[180].mxu0  ;;  %v5998_v62 = vpop.f32.mrb[164].mxu1 }
0x1876   :  { %v6021_v8 = vmul.f32 0.5, %v5935_v14  ;;  %v5937_v48 = vpop.f32.mrb[181].mxu0  ;;  %v8873_v57 = vpop.f32.mrb[165].mxu1  ;;  %v6023_v37 = vmul.f32 0.5, %v5998_v62 }
0x1877   :  { %v6022_v21 = vmul.f32 0.5, %v5937_v48  ;;  %v5939_v55 = vpop.f32.mrb[182].mxu0  ;;  %v6001_v60 = vpop.f32.mrb[166].mxu1 }
0x1878   :  { %v15650_v6 = vadd.f32 %v6021_v8, %v17923_v32  ;;  %v6024_v3 = vmul.f32 0.5, %v5939_v55  ;;  %v5941_v39 = vpop.f32.mrb[183].mxu0  ;;  %v8874_v29 = vpop.f32.mrb[167].mxu1  ;;  %v6026_v49 = vmul.f32 0.5, %v6001_v60  ;;  %v15659_v0 = vadd.f32 %v6023_v37, %v17926_v42  ;;  %v17929_v32 = vld [vmem:[#allocation276_spill] sm:$0xff]  ;;  %v17931_v42 = vld [vmem:[#allocation281_spill] sm:$0xff] }
0x1879   :  { %v15653_v33 = vadd.f32 %v6022_v21, %v17924_v40  ;;  %v6025_v30 = vmul.f32 0.5, %v5941_v39 }
0x187a   :  { %v15656_v45 = vadd.f32 %v6024_v3, %v17925_v12  ;;  %v15667_v63 = vadd.f32 %v6026_v49, %v17928_v52  ;;  %v17930_v49 = vld [vmem:[#allocation278_spill] sm:$0xff] }
0x187b   :  { %v6057_v27 = vmax.f32 %v15650_v6, %v15653_v33  ;;  %v15664_v61 = vadd.f32 %v6025_v30, %v17927_v51  ;;  %v17932_v51 = vld [vmem:[#allocation280_spill] sm:$0xff] }
0x187d   :  { %v6061_v34 = vmax.f32 %v15656_v45, %v15664_v61  ;;  %v5945_v17 = vpop.f32.mrb[184].mxu0  ;;  %v6006_v56 = vpop.f32.mrb[168].mxu1  ;;  %v6058_v14 = vmax.f32 %v6057_v27, %v15659_v0 }
0x187e   :  { %v6027_v62 = vmul.f32 0.5, %v5945_v17  ;;  %v5947_v8 = vpop.f32.mrb[185].mxu0  ;;  %v8877_v48 = vpop.f32.mrb[169].mxu1  ;;  %v6029_v57 = vmul.f32 0.5, %v6006_v56  ;;  %v17933_v56 = vld [vmem:[#allocation282_spill] sm:$0xff] }
0x187f   :  { %v6028_v37 = vmul.f32 0.5, %v5947_v8  ;;  %v5949_v21 = vpop.f32.mrb[186].mxu0  ;;  %6059 = vmax.xlane.f32.xlu0 %v6058_v14  ;;  %v6009_v55 = vpop.f32.mrb[170].mxu1  ;;  %v6062_v60 = vmax.f32 %v6061_v34, %v15667_v63 }
0x1880   :  { %v15674_v3 = vadd.f32 %v6027_v62, %v17929_v32  ;;  %v6030_v39 = vmul.f32 0.5, %v5949_v21  ;;  %v5951_v29 = vpop.f32.mrb[187].mxu0  ;;  %v8878_v40 = vpop.f32.mrb[171].mxu1  ;;  %v15683_v52 = vadd.f32 %v6029_v57, %v17932_v51  ;;  %v6032_v17 = vmul.f32 0.5, %v6009_v55 }
0x1881   :  { %v15677_v30 = vadd.f32 %v6028_v37, %v17930_v49  ;;  %v6031_v12 = vmul.f32 0.5, %v5951_v29  ;;  %6063 = vmax.xlane.f32.xlu1 %v6062_v60 }
0x1882   :  { %v15680_v27 = vadd.f32 %v6030_v39, %v17931_v42  ;;  %v17934_v39 = vld [vmem:[#allocation287_spill] sm:$0xff] }
0x1883   :  { %v6065_v34 = vmax.f32 %v15674_v3, %v15677_v30  ;;  %v15688_v14 = vadd.f32 %v6031_v12, %v17933_v56  ;;  %v15694_v57 = vadd.f32 %v6032_v17, %v17934_v39  ;;  %v17935_v12 = vld [vmem:[#allocation288_spill] sm:$0xff]  ;;  %v17937_v17 = vld [vmem:[#allocation291_spill] sm:$0xff] }
0x1885   :  { %v6069_v62 = vmax.f32 %v15680_v27, %v15688_v14  ;;  %v5955_v8 = vpop.f32.mrb[188].mxu0  ;;  %v6014_v48 = vpop.f32.mrb[172].mxu1  ;;  %v6066_v37 = vmax.f32 %v6065_v34, %v15683_v52 }
0x1886   :  { %v6033_v21 = vmul.f32 0.5, %v5955_v8  ;;  %v5957_v60 = vpop.f32.mrb[189].mxu0  ;;  %v8881_v32 = vpop.f32.mrb[173].mxu1  ;;  %v6035_v29 = vmul.f32 0.5, %v6014_v48  ;;  %v17938_v48 = vld [vmem:[#allocation289_spill] sm:$0xff] }
0x1887   :  { %v6034_v40 = vmul.f32 0.5, %v5957_v60  ;;  %v5959_v49 = vpop.f32.mrb[190].mxu0  ;;  %6067 = vmax.xlane.f32.xlu0 %v6066_v37  ;;  %v6017_v55 = vpop.f32.mrb[174].mxu1  ;;  %v6070_v32 = vmax.f32 %v6069_v62, %v15694_v57 }
0x1888   :  { %v15697_v42 = vadd.f32 %v6033_v21, %v17935_v12  ;;  %v6036_v51 = vmul.f32 0.5, %v5959_v49  ;;  %v5961_v56 = vpop.f32.mrb[191].mxu0  ;;  %v8882_v9 = vpop.f32.mrb[175].mxu1  ;;  %v6038_v34 = vmul.f32 0.5, %v6017_v55  ;;  %v15707_v60 = vadd.f32 %v6035_v29, %v17938_v48  ;;  %v17939_v21 = vld [vmem:[#allocation292_spill] sm:$0xff]  ;;  %v17949_v48 = vld [vmem:[#allocation90_spill] sm:$0xff] }
0x1889   :  { %v15700_v28 = vadd.f32 %v6034_v40, %v17936_v19  ;;  %v6037_v8 = vmul.f32 0.5, %v5961_v56  ;;  %v17940_v9 = vld [vmem:[#allocation293_spill] sm:$0xff]  ;;  %v17941_v29 = vld [vmem:[#allocation216_spill] sm:$0xff]  ;;  %v17944_v56 = vpack.c.bf16 %v15285_v10, %v15281_v36  ;;  %v17953_v36 = vpack.c.bf16 %v15301_v2, %v15295_v41 }
0x188a   :  { %v15704_v39 = vadd.f32 %v6036_v51, %v17937_v17  ;;  %v15715_v19 = vadd.f32 %v6038_v34, %v17940_v9  ;;  %v17942_v12 = vld [vmem:[#allocation224_spill] sm:$0xff]  ;;  %v17945_v34 = vld [vmem:[#allocation215_spill] sm:$0xff]  ;;  %v17948_v17 = vld [vmem:[#allocation89_spill] sm:$0xff] }
0x188b   :  { %v6073_v37 = vmax.f32 %v15697_v42, %v15700_v28  ;;  %v15712_v49 = vadd.f32 %v6037_v8, %v17939_v21  ;;  %6071 = vmax.xlane.f32.xlu0 %v6070_v32  ;;  %v17943_v51 = vpack.c.bf16 %v17941_v29, %v17942_v12  ;;  %v17946_v8 = vld [vmem:[#allocation212_spill] sm:$0xff]  ;;  %v17951_v21 = vld [vmem:[#allocation94_spill] sm:$0xff]  ;;  %v17954_v10 = vld [vmem:[#allocation97_spill] sm:$0xff] }
0x188c   :  { %v17947_v32 = vpack.c.bf16 %v17945_v34, %v17946_v8  ;;  %v17952_v9 = vpack.c.bf16 %v15291_v16, %v17951_v21  ;;  %v17958_v29 = vld [vmem:[#allocation99_spill] sm:$0xff]  ;;  %v17963_v34 = vld [vmem:[#allocation217_spill] sm:$0xff]  ;;  %v17965_v41 = vld [vmem:[#allocation104_spill] sm:$0xff] }
0x188d   :  { %v6077_v40 = vmax.f32 %v15704_v39, %v15712_v49  ;;  %v6074_v62 = vmax.f32 %v6073_v37, %v15707_v60  ;;  %v17950_v37 = vpack.c.bf16 %v17948_v17, %v17949_v48  ;;  %v17966_v8 = vpack.c.bf16 %v15350_v44, %v17965_v41  ;;  %v17968_v17 = vld [vmem:[#allocation124_spill] sm:$0xff]  ;;  %v17971_v21 = vld [vmem:[#allocation127_spill] sm:$0xff] }
0x188f   :  { %6075 = vmax.xlane.f32.xlu0 %v6074_v62  ;;  %v6078_v55 = vmax.f32 %v6077_v40, %v15715_v19  ;;  %v17955_v40 = vld [vmem:[#allocation95_spill] sm:$0xff] }
0x1890   :  { %v17956_v62 = vpack.c.bf16 %v17954_v10, %v17955_v40  ;;  %v17976_v40 = vld [vmem:[#allocation130_spill] sm:$0xff] }
0x1891   :  { %6079 = vmax.xlane.f32.xlu1 %v6078_v55  ;;  %v17957_v55 = vld [vmem:[#allocation103_spill] sm:$0xff]  ;;  %v17977_v44 = vpack.c.bf16 %v15394_v54, %v17976_v40  ;;  %v17989_v40 = vld [vmem:[#allocation150_spill] sm:$0xff] }
0x1892   :  { %v17959_v12 = vpack.c.bf16 %v17957_v55, %v17958_v29  ;;  %v17979_v55 = vpack.c.bf16 %v15410_v25, %v15406_v43  ;;  %v17980_v29 = vpack.c.bf16 %v15420_v18, %v15414_v11  ;;  %v17981_v25 = vpack.c.bf16 %v15468_v31, %v15464_v5 }
0x18a2   :  { %6638 = vrot.lane.b32.xlu1 %v17943_v51, %s10274_s2  ;;  %v17960_v51 = vld [vmem:[#allocation102_spill] sm:$0xff] }
0x18a3   :  { %v17961_v16 = vpack.c.bf16 %v15340_v47, %v17960_v51 }
0x18a5   :  { %6654 = vrot.lane.b32.xlu0 %v17944_v56, %s10274_s2  ;;  %v17962_v56 = vld [vmem:[#allocation83_spill] sm:$0xff] }
0x18a6   :  { %6656 = vrot.lane.b32.xlu1 %v17947_v32, %s10274_s2  ;;  %v17964_v2 = vpack.c.bf16 %v17962_v56, %v17963_v34  ;;  %v17967_v32 = vld [vmem:[#allocation125_spill] sm:$0xff] }
0x18a7   :  { %v17969_v48 = vpack.c.bf16 %v17967_v32, %v17968_v17  ;;  %v17986_v32 = vld [vmem:[#allocation229_spill] sm:$0xff] }
0x18a9   :  { %6640 = vrot.lane.b32.xlu0 %v17950_v37, %s10274_s2  ;;  %v17970_v37 = vld [vmem:[#allocation128_spill] sm:$0xff] }
0x18aa   :  { %6670 = vrot.lane.b32.xlu1 %v17952_v9, %s10274_s2  ;;  %v17972_v47 = vpack.c.bf16 %v17970_v37, %v17971_v21  ;;  %v17973_v9 = vld [vmem:[#allocation129_spill] sm:$0xff] }
0x18ab   :  { %v17987_v21 = vld [vmem:[#allocation149_spill] sm:$0xff] }
0x18ad   :  { %6672 = vrot.lane.b32.xlu0 %v17953_v36, %s10274_s2  ;;  %v17974_v36 = vld [vmem:[#allocation126_spill] sm:$0xff] }
0x18ae   :  { %6658 = vrot.lane.b32.xlu1 %v17956_v62, %s10274_s2  ;;  %v17975_v10 = vpack.c.bf16 %v17973_v9, %v17974_v36  ;;  %v17978_v62 = vpack.c.bf16 %v15402_v7, %v15398_v15 }
0x18b1   :  { %6660 = vrot.lane.b32.xlu0 %v17959_v12, %s10274_s2  ;;  %v17984_v12 = vld [vmem:[#allocation228_spill] sm:$0xff] }
0x18b2   :  { %6642 = vrot.lane.b32.xlu1 %v17961_v16, %s10274_s2 }
0x18b5   :  { %6644 = vrot.lane.b32.xlu0 %v17964_v2, %s10274_s2 }
0x18b6   :  { %6674 = vrot.lane.b32.xlu1 %v17966_v8, %s10274_s2 }
0x18b9   :  { %6676 = vrot.lane.b32.xlu0 %v17969_v48, %s10274_s2 }
0x18ba   :  { %6662 = vrot.lane.b32.xlu1 %v17972_v47, %s10274_s2  ;;  %v17988_v47 = vld [vmem:[#allocation237_spill] sm:$0xff] }
0x18bd   :  { %6664 = vrot.lane.b32.xlu0 %v17975_v10, %s10274_s2 }
0x18be   :  { %6646 = vrot.lane.b32.xlu1 %v17977_v44, %s10274_s2  ;;  %v17990_v44 = vld [vmem:[#allocation151_spill] sm:$0xff] }
0x18c1   :  { %6648 = vrot.lane.b32.xlu0 %v17978_v62, %s10274_s2 }
0x18c2   :  { %6678 = vrot.lane.b32.xlu1 %v17979_v55, %s10274_s2  ;;  %v17992_v55 = vld [vmem:[#allocation231_spill] sm:$0xff] }
0x18c5   :  { %6680 = vrot.lane.b32.xlu0 %v17980_v29, %s10274_s2 }
0x18c6   :  { %6666 = vrot.lane.b32.xlu1 %v6604_v50, %s10274_s2 }
0x18c9   :  { %6668 = vrot.lane.b32.xlu0 %v6605_v23, %s10274_s2 }
0x18ca   :  { %6650 = vrot.lane.b32.xlu1 %v6596_v22, %s10274_s2 }
0x18cd   :  { %6652 = vrot.lane.b32.xlu0 %v17981_v25, %s10274_s2  ;;  %v17993_v25 = vld [vmem:[#allocation154_spill] sm:$0xff] }
0x18ce   :  { %6682 = vrot.lane.b32.xlu1 %v17982_v4, %s10274_s2 }
0x18d2   :  { %6684 = vrot.lane.b32.xlu1 %v17983_v58, %s10274_s2 }
0x190c   :  { %v6060_v18 = vpop.xlane.xlu0 %6059 }
0x190d   :  { %v6081_v43 = vsub.f32 %v15650_v6, %v6060_v18  ;;  %v6082_v15 = vsub.f32 %v15653_v33, %v6060_v18  ;;  %v6083_v8 = vsub.f32 %v15659_v0, %v6060_v18 }
0x190e   :  { %v15819_v7 = vpop.xlane.xlu1 %6063 }
0x190f   :  { %v6099_v54 = vmul.f32 1.442695, %v6081_v43  ;;  %v6101_v31 = vmul.f32 1.442695, %v6082_v15  ;;  %v6084_v11 = vsub.f32 %v15656_v45, %v15819_v7  ;;  %v6085_v5 = vsub.f32 %v15664_v61, %v15819_v7  ;;  %v17994_v43 = vld [vmem:[#allocation155_spill] sm:$0xff] }
0x1910   :  { %v6103_v10 = vmul.f32 1.442695, %v6083_v8 }
0x1911   :  { %10071 = vpow2.f32 %v6099_v54  ;;  %v6105_v46 = vmul.f32 1.442695, %v6084_v11  ;;  %v6107_v38 = vmul.f32 1.442695, %v6085_v5  ;;  %v17995_v54 = vld [vmem:[#allocation157_spill] sm:$0xff]  ;;  %v17997_v5 = vld [vmem:[#allocation272_spill] sm:$0xff] }
0x1912   :  { %10073 = vpow2.f32 %v6101_v31  ;;  %v17996_v31 = vld [vmem:[#allocation273_spill] sm:$0xff] }
0x1913   :  { %10075 = vpow2.f32 %v6107_v38  ;;  %v6086_v38 = vsub.f32 %v15667_v63, %v15819_v7  ;;  %v18001_v7 = vld [vmem:[#allocation279_spill] sm:$0xff] }
0x1914   :  { %v15825_v50 = vpop.xlane.xlu0 %6067  ;;  %10077 = vpow2.f32 %v6105_v46 }
0x1915   :  { %v6087_v1 = vsub.f32 %v15674_v3, %v15825_v50  ;;  %v6088_v13 = vsub.f32 %v15677_v30, %v15825_v50 }
0x1917   :  { %v6111_v59 = vmul.f32 1.442695, %v6087_v1  ;;  %v6113_v23 = vmul.f32 1.442695, %v6088_v13  ;;  %v17998_v1 = vld [vmem:[#allocation159_spill] sm:$0xff] }
0x1918   :  { %v15831_v24 = vpop.xlane.xlu0 %6071 }
0x1919   :  { %10079 = vpow2.f32 %v6111_v59  ;;  %v6090_v53 = vsub.f32 %v15680_v27, %v15831_v24  ;;  %v6091_v35 = vsub.f32 %v15688_v14, %v15831_v24  ;;  %v17985_v27 = vld [vmem:[#allocation225_spill] sm:$0xff] }
0x191a   :  { %10081 = vpow2.f32 %v6113_v23  ;;  %v6089_v23 = vsub.f32 %v15683_v52, %v15825_v50  ;;  %v6109_v50 = vmul.f32 1.442695, %v6086_v38 }
0x191b   :  { %v10072_v22 = vpop.eup %10071  ;;  %v6117_v6 = vmul.f32 1.442695, %v6090_v53  ;;  %v6119_v33 = vmul.f32 1.442695, %v6091_v35  ;;  %v17999_v53 = vld [vmem:[#allocation161_spill] sm:$0xff] }
0x191c   :  { %v10074_v45 = vpop.eup %10073  ;;  %v15837_v61 = vpop.xlane.xlu0 %6075  ;;  %v15844_v51 = vmul.f32 %v10072_v22, %v17984_v12  ;;  %v18000_v22 = vld [vmem:[#allocation162_spill] sm:$0xff] }
0x191d   :  { %10083 = vpow2.f32 %v6117_v6  ;;  %v6093_v3 = vsub.f32 %v15697_v42, %v15837_v61  ;;  %v6094_v30 = vsub.f32 %v15700_v28, %v15837_v61  ;;  %v15847_v14 = vmul.f32 %v10074_v45, %v17985_v27  ;;  %v10076_v56 = vpop.eup %10075 }
0x191e   :  { %10085 = vpow2.f32 %v6119_v33  ;;  %v15849_v16 = vpop.xlane.xlu1 %6079  ;;  %v10078_v41 = vpop.eup %10077  ;;  %v15861_v17 = vmul.f32 %v10076_v56, %v17986_v32  ;;  %v18002_v33 = vld [vmem:[#allocation277_spill] sm:$0xff]  ;;  %v6092_v45 = vsub.f32 %v15694_v57, %v15831_v24  ;;  %v6115_v27 = vmul.f32 1.442695, %v6089_v23 }
0x191f   :  { %v6123_v34 = vmul.f32 1.442695, %v6093_v3  ;;  %v6125_v2 = vmul.f32 1.442695, %v6094_v30  ;;  %6217 = vmatprep.mubr.f32.mxu0 %v15847_v14  ;;  %6419 = vmatprep.mubr.f32.mxu1 %v15847_v14  ;;  %v6096_v28 = vsub.f32 %v15704_v39, %v15849_v16  ;;  %v6097_v42 = vsub.f32 %v15712_v49, %v15849_v16  ;;  %v18003_v3 = vld [vmem:[#allocation164_spill] sm:$0xff]  ;;  %v18006_v57 = vld [vmem:[#allocation285_spill] sm:$0xff] }
0x1920   :  { %6218 = vmatmul.mubr.f32.vlgmr.msra.gmra.mrb[192].mxu0 %v15844_v51  ;;  %6420 = vmatmul.mubr.f32.vlgmr.msra.gmra.mrb[138].mxu1 %v15844_v51  ;;  %v15863_v48 = vpop.permute.xlu0 %6654  ;;  %v15872_v9 = vmul.f32 %v10078_v41, %v17988_v47  ;;  %v6095_v56 = vsub.f32 %v15707_v60, %v15837_v61  ;;  %v18005_v41 = vld [vmem:[#allocation167_spill] sm:$0xff]  ;;  %v6098_v60 = vsub.f32 %v15715_v19, %v15849_v16  ;;  %v18007_v61 = vld [vmem:[#allocation169_spill] sm:$0xff]  ;;  %v18010_v19 = vld [vmem:[#allocation172_spill] sm:$0xff] }
0x1921   :  { %10087 = vpow2.f32 %v6123_v34  ;;  %v6129_v0 = vmul.f32 1.442695, %v6096_v28  ;;  %v6131_v37 = vmul.f32 1.442695, %v6097_v42  ;;  %9584 = vmatpush1.bf16.msra.mxu0 %v17987_v21  ;;  %9648 = vmatpush3.bf16.msra.mxu1 %v17906_v26  ;;  %v17991_v26 = vld [vmem:[#allocation239_spill] sm:$0xff]  ;;  %v18004_v34 = vld [vmem:[#allocation166_spill] sm:$0xff] }
0x1922   :  { %10089 = vpow2.f32 %v6125_v2  ;;  %v15867_v39 = vpop.permute.xlu1 %6638  ;;  %6223 = vmatprep.mubr.f32.mxu0 %v15861_v17  ;;  %6424 = vmatprep.mubr.f32.mxu1 %v15861_v17  ;;  %v6121_v28 = vmul.f32 1.442695, %v6092_v45  ;;  %v6127_v32 = vmul.f32 1.442695, %v6095_v56  ;;  %v18011_v16 = vld [vmem:[#allocation238_spill] sm:$0xff]  ;;  %v18022_v45 = vld [vmem:[#allocation283_spill] sm:$0xff] }
0x1923   :  { %v10080_v49 = vpop.eup %10079  ;;  %9586 = vmatprep.subr.bf16.mxu0 %v17989_v40  ;;  %9650 = vmatprep.subr.bf16.mxu1 %v17990_v44  ;;  %10091 = vpow2.f32 %v6131_v37  ;;  %v18008_v37 = vld [vmem:[#allocation284_spill] sm:$0xff] }
0x1924   :  { %v10082_v36 = vpop.eup %10081  ;;  %6224 = vmatmul.mubr.f32.gmra.mrb[194].mxu0 %v15872_v9  ;;  %6425 = vmatmul.mubr.f32.gmra.mrb[176].mxu1 %v15872_v9  ;;  %v15882_v29 = vmul.f32 %v10080_v49, %v17992_v55  ;;  %10093 = vpow2.f32 %v6129_v0  ;;  %v15888_v18 = vpop.permute.xlu0 %6640  ;;  %v18009_v49 = vld [vmem:[#allocation171_spill] sm:$0xff] }
0x1925   :  { %v15879_v62 = vmul.f32 %v10082_v36, %v17991_v26  ;;  %9588 = vmatpush1.bf16.msra.mxu0 %v17993_v25  ;;  %9652 = vmatpush3.bf16.msra.mxu1 %v17990_v44  ;;  %10095 = vpow2.f32 %v6103_v10  ;;  %v6133_v36 = vmul.f32 1.442695, %v6098_v60  ;;  %v18012_v10 = vld [vmem:[#allocation174_spill] sm:$0xff]  ;;  %v18013_v44 = vld [vmem:[#allocation176_spill] sm:$0xff]  ;;  %v18014_v26 = vld [vmem:[#allocation177_spill] sm:$0xff] }
0x1926   :  { %v15886_v4 = vpop.permute.xlu1 %6656  ;;  %9590 = vmatprep.subr.bf16.mxu0 %v17994_v43  ;;  %9654 = vmatprep.subr.bf16.mxu1 %v17995_v54  ;;  %10097 = vpow2.f32 %v6109_v50  ;;  %v18015_v25 = vld [vmem:[#allocation179_spill] sm:$0xff]  ;;  %v18016_v43 = vld [vmem:[#allocation181_spill] sm:$0xff] }
0x1927   :  { %v10084_v58 = vpop.eup %10083  ;;  %6229 = vmatprep.mubr.f32.mxu0 %v15879_v62  ;;  %6429 = vmatprep.mubr.f32.mxu1 %v15879_v62  ;;  %10099 = vpow2.f32 %v6115_v27 }
0x1928   :  { %v10086_v15 = vpop.eup %10085  ;;  %6230 = vmatmul.mubr.f32.gmra.mrb[196].mxu0 %v15882_v29  ;;  %6430 = vmatmul.mubr.f32.gmra.mrb[178].mxu1 %v15882_v29  ;;  %v15900_v46 = vmul.f32 %v10084_v58, %v17997_v5  ;;  %v15914_v63 = vpop.permute.xlu0 %6672  ;;  %10101 = vpow2.f32 %v6121_v28  ;;  %v18018_v5 = vld [vmem:[#allocation184_spill] sm:$0xff] }
0x1929   :  { %v15897_v11 = vmul.f32 %v10086_v15, %v17996_v31  ;;  %9592 = vmatpush1.bf16.msra.mxu0 %v17998_v1  ;;  %9656 = vmatpush3.bf16.msra.mxu1 %v17995_v54  ;;  %10103 = vpow2.f32 %v6127_v32  ;;  %v18017_v15 = vld [vmem:[#allocation182_spill] sm:$0xff] }
0x192a   :  { %v15906_v13 = vpop.permute.xlu1 %6670  ;;  %9594 = vmatprep.subr.bf16.mxu0 %v17999_v53  ;;  %9658 = vmatprep.subr.bf16.mxu1 %v18000_v22  ;;  %10105 = vpow2.f32 %v6133_v36  ;;  %v18019_v1 = vld [vmem:[#allocation226_spill] sm:$0xff] }
0x192b   :  { %v10088_v59 = vpop.eup %10087  ;;  %6235 = vmatprep.mubr.f32.mxu0 %v15897_v11  ;;  %6434 = vmatprep.mubr.f32.mxu1 %v15897_v11 }
0x192c   :  { %v10090_v35 = vpop.eup %10089  ;;  %6236 = vmatmul.mubr.f32.gmra.mrb[198].mxu0 %v15900_v46  ;;  %6435 = vmatmul.mubr.f32.gmra.mrb[180].mxu1 %v15900_v46  ;;  %v15922_v52 = vmul.f32 %v10088_v59, %v18002_v33  ;;  %v15947_v0 = vpop.permute.xlu0 %6660 }
0x192d   :  { %v15919_v6 = vmul.f32 %v10090_v35, %v18001_v7  ;;  %9596 = vmatpush1.bf16.msra.mxu0 %v18003_v3  ;;  %9660 = vmatpush3.bf16.msra.mxu1 %v18000_v22  ;;  %v10092_v12 = vpop.eup %10091  ;;  %v18020_v35 = vld [vmem:[#allocation230_spill] sm:$0xff] }
0x192e   :  { %v15928_v30 = vpop.permute.xlu1 %6658  ;;  %9598 = vmatprep.subr.bf16.mxu0 %v18004_v34  ;;  %v10094_v2 = vpop.eup %10093  ;;  %9662 = vmatprep.subr.bf16.mxu1 %v18005_v41  ;;  %v15937_v24 = vmul.f32 %v10092_v12, %v18006_v57 }
0x192f   :  { %6241 = vmatprep.mubr.f32.mxu0 %v15919_v6  ;;  %6439 = vmatprep.mubr.f32.mxu1 %v15919_v6  ;;  %v10096_v8 = vpop.eup %10095  ;;  %v15952_v21 = vmul.f32 %v10094_v2, %v18008_v37 }
0x1930   :  { %6242 = vmatmul.mubr.f32.gmra.mrb[200].mxu0 %v15922_v52  ;;  %6440 = vmatmul.mubr.f32.gmra.mrb[182].mxu1 %v15922_v52  ;;  %v15959_v47 = vmul.f32 %v10096_v8, %v18011_v16  ;;  %v6645_v55 = vpop.permute.xlu0 %6644  ;;  %v10098_v54 = vpop.eup %10097 }
0x1931   :  { %9600 = vmatpush1.bf16.msra.mxu0 %v18007_v61  ;;  %9664 = vmatpush3.bf16.msra.mxu1 %v18005_v41  ;;  %v10100_v31 = vpop.eup %10099  ;;  %v15975_v59 = vmul.f32 %v10098_v54, %v18019_v1 }
0x1932   :  { %v15945_v42 = vpop.permute.xlu1 %6642  ;;  %6247 = vmatprep.mubr.f32.mxu0 %v15937_v24  ;;  %6444 = vmatprep.mubr.f32.mxu1 %v15937_v24  ;;  %v10102_v23 = vpop.eup %10101  ;;  %v15979_v22 = vmul.f32 %v10100_v31, %v18020_v35 }
0x1933   :  { %9602 = vmatprep.subr.bf16.mxu0 %v18009_v49  ;;  %9666 = vmatprep.subr.bf16.mxu1 %v18010_v19  ;;  %v10104_v7 = vpop.eup %10103 }
0x1934   :  { %6248 = vmatmul.mubr.f32.gmra.mrb[202].mxu0 %v15952_v21  ;;  %6445 = vmatmul.mubr.f32.gmra.mrb[184].mxu1 %v15952_v21  ;;  %v6677_v38 = vpop.permute.xlu0 %6676  ;;  %v10106_v50 = vpop.eup %10105  ;;  %v15993_v3 = vmul.f32 %v10104_v7, %v18022_v45 }
0x1935   :  { %9604 = vmatpush1.bf16.msra.mxu0 %v18012_v10  ;;  %9668 = vmatpush3.bf16.msra.mxu1 %v18010_v19 }
0x1936   :  { %v6675_v40 = vpop.permute.xlu1 %6674  ;;  %8915 = vmatprep.mubr.f32.mxu1 %v15959_v47  ;;  %9606 = vmatprep.subr.bf16.mxu0 %v18013_v44 }
0x1937   :  { %9670 = vmatprep.subr.bf16.mxu1 %v18014_v26  ;;  %6318 = vmatprep.mubr.f32.mxu0 %v17870_v20 }
0x1938   :  { %v6665_v12 = vpop.permute.xlu0 %6664 }
0x1939   :  { %9608 = vmatpush1.bf16.msra.mxu0 %v18015_v25  ;;  %9672 = vmatpush3.bf16.msra.mxu1 %v18014_v26 }
0x193a   :  { %v6663_v58 = vpop.permute.xlu1 %6662  ;;  %9610 = vmatprep.subr.bf16.mxu0 %v18016_v43  ;;  %9674 = vmatprep.subr.bf16.mxu1 %v18017_v15 }
0x193d   :  { %9612 = vmatpush1.bf16.msra.mxu0 %v18018_v5  ;;  %9676 = vmatpush3.bf16.msra.mxu1 %v18017_v15 }
0x193e   :  { %8346 = vmatprep.subr.bf16.mxu1 %v15863_v48  ;;  %8924 = vmatprep.subr.bf16.mxu0 %v17870_v20  ;;  %v6647_v53 = vpop.permute.xlu1 %6646  ;;  %v18021_v48 = vld [vmem:[#allocation268_spill] sm:$0xff] }
0x193f   :  { %v15988_v33 = vmul.f32 %v10102_v23, %v18021_v48 }
0x1940   :  { %6319 = vmatmul.mubr.f32.vlgmr.msra.gmra.mrb[192].mxu0 %v15959_v47  ;;  %8916 = vmatmul.mubr.f32.vlgmr.msra.gmra.mrb[186].mxu1 %v15975_v59 }
0x1941   :  { %8918 = vmatprep.mubr.f32.mxu1 %v15979_v22  ;;  %8347 = vmatpush3.bf16.msra.mxu1 %v15867_v39 }
0x1942   :  { %8925 = vmatpush3.bf16.msra.mxu0 %v15906_v13  ;;  %8348 = vmatprep.subr.bf16.mxu1 %v15886_v4  ;;  %v6679_v39 = vpop.permute.xlu1 %6678  ;;  %v18023_v4 = vld [vmem:[#allocation286_spill] sm:$0xff] }
0x1943   :  { %6324 = vmatprep.mubr.f32.mxu0 %v17870_v20  ;;  %8926 = vmatprep.subr.bf16.mxu0 %v17870_v20  ;;  %v16002_v13 = vmul.f32 %v10106_v50, %v18023_v4 }
0x1944   :  { %6325 = vmatmul.mubr.f32.gmra.mrb[194].mxu0 %v15975_v59  ;;  %8919 = vmatmul.mubr.f32.gmra.mrb[188].mxu1 %v15988_v33 }
0x1945   :  { %8921 = vmatprep.mubr.f32.mxu1 %v15993_v3  ;;  %8349 = vmatpush3.bf16.msra.mxu1 %v15888_v18  ;;  %v6649_v18 = vpop.permute.xlu0 %6648 }
0x1946   :  { %8927 = vmatpush3.bf16.msra.mxu0 %v15914_v63  ;;  %8350 = vmatprep.subr.bf16.mxu1 %v15928_v30  ;;  %v6667_v63 = vpop.permute.xlu1 %6666 }
0x1947   :  { %6330 = vmatprep.mubr.f32.mxu0 %v17870_v20  ;;  %8928 = vmatprep.subr.bf16.mxu0 %v17870_v20 }
0x1948   :  { %6331 = vmatmul.mubr.f32.gmra.mrb[196].mxu0 %v15979_v22  ;;  %8922 = vmatmul.mubr.f32.gmra.mrb[190].mxu1 %v16002_v13 }
0x1949   :  { %8351 = vmatpush3.bf16.msra.mxu1 %v15945_v42  ;;  %6336 = vmatprep.mubr.f32.mxu0 %v17870_v20  ;;  %v6681_v30 = vpop.permute.xlu0 %6680 }
0x194a   :  { %8929 = vmatpush3.bf16.msra.mxu0 %v6675_v40  ;;  %8352 = vmatprep.subr.bf16.mxu1 %v15947_v0  ;;  %v6651_v27 = vpop.permute.xlu1 %6650 }
0x194b   :  { %8930 = vmatprep.subr.bf16.mxu0 %v17870_v20 }
0x194c   :  { %6337 = vmatmul.mubr.f32.gmra.mrb[198].mxu0 %v15988_v33 }
0x194d   :  { %8353 = vmatpush3.bf16.msra.mxu1 %v6645_v55  ;;  %6342 = vmatprep.mubr.f32.mxu0 %v17870_v20  ;;  %v6669_v56 = vpop.permute.xlu0 %6668 }
0x194e   :  { %8931 = vmatpush3.bf16.msra.mxu0 %v6677_v38  ;;  %8354 = vmatprep.subr.bf16.mxu1 %v6663_v58  ;;  %v6683_v34 = vpop.permute.xlu1 %6682 }
0x194f   :  { %8932 = vmatprep.subr.bf16.mxu0 %v17870_v20 }
0x1950   :  { %6343 = vmatmul.mubr.f32.gmra.mrb[200].mxu0 %v15993_v3 }
0x1951   :  { %8355 = vmatpush3.bf16.msra.mxu1 %v6647_v53  ;;  %6348 = vmatprep.mubr.f32.mxu0 %v17870_v20  ;;  %v6653_v2 = vpop.permute.xlu0 %6652 }
0x1952   :  { %8933 = vmatpush3.bf16.msra.mxu0 %v6679_v39  ;;  %8356 = vmatprep.subr.bf16.mxu1 %v6665_v12  ;;  %v6685_v41 = vpop.permute.xlu1 %6684 }
0x1953   :  { %8934 = vmatprep.subr.bf16.mxu0 %v17870_v20 }
0x1954   :  { %6349 = vmatmul.mubr.f32.gmra.mrb[202].mxu0 %v16002_v13 }
0x1955   :  { %8357 = vmatpush3.bf16.msra.mxu1 %v6649_v18  ;;  %8940 = vmatprep.mubr.msk.bf16.mxu0 %vm10269_vm0, %v17870_v20 }
0x1956   :  { %8935 = vmatpush3.bf16.msra.mxu0 %v6681_v30  ;;  %8358 = vmatprep.subr.bf16.mxu1 %v6667_v63 }
0x1957   :  { %8936 = vmatprep.subr.bf16.mxu0 %v17870_v20 }
0x1959   :  { %8359 = vmatpush3.bf16.msra.mxu1 %v6651_v27 }
0x195a   :  { %8937 = vmatpush3.bf16.msra.mxu0 %v6683_v34  ;;  %8360 = vmatprep.subr.bf16.mxu1 %v6669_v56 }
0x195b   :  { %8938 = vmatprep.subr.bf16.mxu0 %v17870_v20 }
0x195d   :  { %8361 = vmatpush3.bf16.msra.mxu1 %v6653_v2 }
0x195e   :  { %8939 = vmatpush3.bf16.msra.mxu0 %v6685_v41  ;;  %8952 = vmatprep.subr.bf16.mxu1 %v17870_v20 }
0x195f   :  { %8968 = vmatprep.subr.bf16.mxu0 %v17870_v20 }
0x19f3   :  { %v8306_v57 = vpop.f32.mrb[138].mxu1 }
0x19f4   :  { %v8307_v8 = vpop.f32.mrb[139].mxu1 }
0x19f5   :  { %v8308_v28 = vadd.f32 %v8307_v8, %v8306_v57 }
0x19f7   :  { %v8309_v60 = vpop.f32.mrb[176].mxu1  ;;  %v6422_v58 = vadd.f32 1e-09, %v8308_v28 }
0x19f8   :  { %v8310_v61 = vpop.f32.mrb[177].mxu1 }
0x19f9   :  { %v8311_v42 = vadd.f32 %v8310_v61, %v8309_v60 }
0x19fb   :  { %v8312_v32 = vpop.f32.mrb[178].mxu1  ;;  %v6427_v25 = vadd.f32 1e-09, %v8311_v42 }
0x19fc   :  { %v8313_v0 = vpop.f32.mrb[179].mxu1 }
0x19fd   :  { %v8314_v37 = vadd.f32 %v8313_v0, %v8312_v32 }
0x19ff   :  { %v8315_v49 = vpop.f32.mrb[180].mxu1  ;;  %v6432_v35 = vadd.f32 1e-09, %v8314_v37 }
0x1a00   :  { %v8316_v19 = vpop.f32.mrb[181].mxu1 }
0x1a01   :  { %v8317_v16 = vadd.f32 %v8316_v19, %v8315_v49 }
0x1a03   :  { %v8318_v36 = vpop.f32.mrb[182].mxu1  ;;  %v6437_v53 = vadd.f32 1e-09, %v8317_v16 }
0x1a04   :  { %v8319_v10 = vpop.f32.mrb[183].mxu1 }
0x1a05   :  { %v8320_v40 = vadd.f32 %v8319_v10, %v8318_v36 }
0x1a07   :  { %v8321_v44 = vpop.f32.mrb[184].mxu1  ;;  %v6442_v30 = vadd.f32 1e-09, %v8320_v40 }
0x1a08   :  { %v8322_v26 = vpop.f32.mrb[185].mxu1 }
0x1a09   :  { %v8323_v55 = vadd.f32 %v8322_v26, %v8321_v44 }
0x1a0b   :  { %v6447_v63 = vadd.f32 1e-09, %v8323_v55 }
0x1a13   :  { %v6320_v43 = vpop.f32.mrb[192].mxu0  ;;  %v8917_v15 = vpop.f32.mrb[186].mxu1 }
0x1a14   :  { %v9722_v54 = vadd.f32 1e-09, %v6320_v43  ;;  %v6522_v31 = vadd.f32 %v8917_v15, %v6427_v25  ;;  %v6322_v5 = vpop.f32.mrb[193].mxu0  ;;  %v6516_v38 = vpop.f32.mrb[187].mxu1 }
0x1a15   :  { %v9723_v1 = vadd.f32 1e-09, %v6322_v5  ;;  %v6517_v23 = vadd.f32 %v6516_v38, %v6422_v58 }
0x1a16   :  { %10107 = vrcp.f32 %v9722_v54 }
0x1a17   :  { %10109 = vrcp.f32 %v6522_v31  ;;  %v6326_v7 = vpop.f32.mrb[194].mxu0  ;;  %v8920_v48 = vpop.f32.mrb[188].mxu1 }
0x1a18   :  { %10111 = vrcp.f32 %v9723_v1  ;;  %v9724_v50 = vadd.f32 1e-09, %v6326_v7  ;;  %v6532_v45 = vadd.f32 %v8920_v48, %v6437_v53  ;;  %v6328_v12 = vpop.f32.mrb[195].mxu0  ;;  %v6526_v39 = vpop.f32.mrb[189].mxu1 }
0x1a19   :  { %10113 = vrcp.f32 %v6517_v23  ;;  %v9725_v4 = vadd.f32 1e-09, %v6328_v12  ;;  %v6527_v18 = vadd.f32 %v6526_v39, %v6432_v35 }
0x1a1a   :  { %10115 = vrcp.f32 %v9724_v50 }
0x1a1b   :  { %10117 = vrcp.f32 %v6532_v45  ;;  %v6332_v27 = vpop.f32.mrb[196].mxu0  ;;  %v8923_v56 = vpop.f32.mrb[190].mxu1 }
0x1a1c   :  { %10119 = vrcp.f32 %v9725_v4  ;;  %v9726_v34 = vadd.f32 1e-09, %v6332_v27  ;;  %v6542_v2 = vadd.f32 %v8923_v56, %v6447_v63  ;;  %v6334_v41 = vpop.f32.mrb[197].mxu0  ;;  %v6536_v57 = vpop.f32.mrb[191].mxu1 }
0x1a1d   :  { %10121 = vrcp.f32 %v6527_v18  ;;  %v9727_v8 = vadd.f32 1e-09, %v6334_v41  ;;  %v6537_v28 = vadd.f32 %v6536_v57, %v6442_v30 }
0x1a1e   :  { %10123 = vrcp.f32 %v9726_v34 }
0x1a1f   :  { %10125 = vrcp.f32 %v6542_v2  ;;  %v6338_v60 = vpop.f32.mrb[198].mxu0 }
0x1a20   :  { %v10108_v61 = vpop.eup %10107  ;;  %10127 = vrcp.f32 %v9727_v8  ;;  %v9728_v42 = vadd.f32 1e-09, %v6338_v60  ;;  %v6340_v32 = vpop.f32.mrb[199].mxu0 }
0x1a21   :  { %v10110_v0 = vpop.eup %10109  ;;  %10129 = vrcp.f32 %v6537_v28  ;;  %v9729_v37 = vadd.f32 1e-09, %v6340_v32  ;;  %v6563_v25 = vmul.f32 %v10108_v61, %v15844_v51 }
0x1a22   :  { %v10112_v49 = vpop.eup %10111  ;;  %v6568_v19 = vmul.f32 %v10110_v0, %v15975_v59  ;;  %10131 = vrcp.f32 %v9728_v42  ;;  %v7720_v59 = vld [vmem:[%s16288_s10 + $0x60] sm:$0xff] }
0x1a23   :  { %v10114_v16 = vpop.eup %10113  ;;  %10133 = vrcp.f32 %v9729_v37  ;;  %v6344_v36 = vpop.f32.mrb[200].mxu0  ;;  %v6564_v1 = vmul.f32 %v10112_v49, %v15847_v14 }
0x1a24   :  { %v10116_v10 = vpop.eup %10115  ;;  %v6565_v40 = vmul.f32 %v10114_v16, %v15959_v47  ;;  %v9730_v44 = vadd.f32 1e-09, %v6344_v36  ;;  %v6346_v26 = vpop.f32.mrb[201].mxu0  ;;  %v7721_v47 = vld [vmem:[%s16288_s10 + $0x68] sm:$0xff] }
0x1a25   :  { %v10118_v55 = vpop.eup %10117  ;;  %v6566_v58 = vmul.f32 %v10116_v10, %v15872_v9  ;;  %v9731_v43 = vadd.f32 1e-09, %v6346_v26  ;;  %v6832_v45 = vpack.c.bf16 %v7721_v47, %v7720_v59 }
0x1a26   :  { %v10120_v15 = vpop.eup %10119  ;;  %v6583_v54 = vpack.c.bf16 %v6568_v19, %v6565_v40  ;;  %v6574_v31 = vmul.f32 %v10118_v55, %v15988_v33  ;;  %10135 = vrcp.f32 %v9730_v44 }
0x1a27   :  { %v10122_v5 = vpop.eup %10121  ;;  %v6350_v38 = vpop.f32.mrb[202].mxu0  ;;  %v6567_v51 = vmul.f32 %v10120_v15, %v15861_v17  ;;  %v6581_v9 = vpack.c.bf16 %v6566_v58, %v6563_v25  ;;  %10137 = vrcp.f32 %v9731_v43 }
0x1a28   :  { %v10124_v23 = vpop.eup %10123  ;;  %8941 = vmatmul.mubr.bf16.vlgmr.msra.gmra.mrb[204].mxu0 %v6583_v54  ;;  %v9732_v53 = vadd.f32 1e-09, %v6350_v38  ;;  %v6352_v33 = vpop.f32.mrb[203].mxu0  ;;  %v6571_v35 = vmul.f32 %v10122_v5, %v15979_v22 }
0x1a29   :  { %v10126_v7 = vpop.eup %10125  ;;  %v9733_v48 = vadd.f32 1e-09, %v6352_v33  ;;  %v6582_v50 = vpack.c.bf16 %v6567_v51, %v6564_v1  ;;  %8944 = vmatprep.mubr.msk.bf16.mxu0 %vm10269_vm0, %v17870_v20  ;;  %v6569_v63 = vmul.f32 %v10124_v23, %v15882_v29 }
0x1a2a   :  { %v10128_v12 = vpop.eup %10127  ;;  %10139 = vrcp.f32 %v9732_v53  ;;  %v6586_v14 = vpack.c.bf16 %v6574_v31, %v6571_v35  ;;  %v6580_v17 = vmul.f32 %v10126_v7, %v16002_v13 }
0x1a2b   :  { %v10130_v39 = vpop.eup %10129  ;;  %10141 = vrcp.f32 %v9733_v48  ;;  %6742 = vmatprep.mubr.bf16.mxu1 %v6582_v50  ;;  %v6570_v27 = vmul.f32 %v10128_v12, %v15879_v62 }
0x1a2c   :  { %v10132_v4 = vpop.eup %10131  ;;  %6743 = vmatmul.mubr.bf16.vlgmr.msra.gmra.mrb[192].mxu1 %v6581_v9  ;;  %v6577_v22 = vmul.f32 %v10130_v39, %v15993_v3  ;;  %v7725_v39 = vld [vmem:[%s16289_s11 + $0x3] ss:$0 sm:$0xff] }
0x1a2d   :  { %v10134_v18 = vpop.eup %10133  ;;  %v6572_v30 = vmul.f32 %v10132_v4, %v15900_v46  ;;  %8953 = vmatpush3.bf16.msra.mxu1 %v6832_v45 }
0x1a2e   :  { %v6573_v56 = vmul.f32 %v10134_v18, %v15897_v11  ;;  %v6589_v34 = vpack.c.bf16 %v6580_v17, %v6577_v22  ;;  %8954 = vmatprep.subr.bf16.mxu1 %v17870_v20 }
0x1a2f   :  { %v6584_v13 = vpack.c.bf16 %v6572_v30, %v6569_v63  ;;  %v18024_v30 = vld [vmem:[#allocation267_spill] sm:$0xff] }
0x1a30   :  { %8945 = vmatmul.mubr.bf16.gmra.mrb[208].mxu0 %v6586_v14  ;;  %v6585_v2 = vpack.c.bf16 %v6573_v56, %v6570_v27  ;;  %v10136_v3 = vpop.eup %10135 }
0x1a31   :  { %8948 = vmatprep.mubr.msk.bf16.mxu0 %vm10269_vm0, %v17870_v20  ;;  %v10138_v41 = vpop.eup %10137  ;;  %v6575_v57 = vmul.f32 %v10136_v3, %v15922_v52  ;;  %v7722_v52 = vld [vmem:[%s16288_s10 + $0x70] sm:$0xff] }
0x1a32   :  { %6750 = vmatprep.mubr.bf16.mxu1 %v6585_v2  ;;  %v6576_v11 = vmul.f32 %v10138_v41, %v15919_v6  ;;  %v7723_v6 = vld [vmem:[%s16288_s10 + $0x78] sm:$0xff]  ;;  %v18026_v3 = vld [vmem:[#allocation9_spill] sm:$0xff] }
0x1a34   :  { %v10140_v29 = vpop.eup %10139  ;;  %6751 = vmatmul.mubr.bf16.gmra.mrb[196].mxu1 %v6584_v13  ;;  %v18025_v13 = vld [vmem:[#allocation266_spill] sm:$0xff] }
0x1a35   :  { %v10142_v46 = vpop.eup %10141  ;;  %v6578_v62 = vmul.f32 %v10140_v29, %v15952_v21 }
0x1a36   :  { %v6579_v8 = vmul.f32 %v10142_v46, %v15937_v24  ;;  %v6833_v24 = vpack.c.bf16 %v7723_v6, %v7722_v52  ;;  %v18027_v46 = vld [vmem:[#allocation10_spill] sm:$0xff]  ;;  %v18028_v52 = vld [vmem:[#allocation219_spill] sm:$0xff] }
0x1a37   :  { %v6587_v28 = vpack.c.bf16 %v6578_v62, %v6575_v57 }
0x1a38   :  { %8949 = vmatmul.mubr.bf16.gmra.mrb[212].mxu0 %v6589_v34  ;;  %v6588_v60 = vpack.c.bf16 %v6579_v8, %v6576_v11  ;;  %8955 = vmatpush3.bf16.msra.mxu1 %v6833_v24 }
0x1a39   :  { %8972 = vmatprep.mubr.msk.bf16.mxu0 %vm10269_vm0, %v17870_v20  ;;  %8984 = vmatprep.subr.bf16.mxu1 %v17870_v20 }
0x1a3a   :  { %6758 = vmatprep.mubr.bf16.mxu1 %v6588_v60 }
0x1a3c   :  { %6759 = vmatmul.mubr.bf16.gmra.mrb[200].mxu1 %v6587_v28 }
0x1a3d   :  { %8956 = vmatprep.mubr.msk.bf16.mxu1 %vm10269_vm0, %v17870_v20 }
0x1afb   :  { %v6801_v21 = vpop.f32.mrb[204].mxu0 }
0x1afc   :  { %v8942_v61 = vpop.f32.mrb[205].mxu0 }
0x1afd   :  { %v6804_v42 = vpop.f32.mrb[206].mxu0  ;;  %v18029_v61 = vld [vmem:[#allocation220_spill] sm:$0xff] }
0x1afe   :  { %v8943_v32 = vpop.f32.mrb[207].mxu0 }
0x1aff   :  { %v8362_v0 = vpop.f32.mrb[192].mxu1  ;;  %v18030_v32 = vld [vmem:[#allocation11_spill] sm:$0xff] }
0x1b00   :  { %v8363_v37 = vpop.f32.mrb[193].mxu1 }
0x1b01   :  { %v8364_v49 = vadd.f32 %v8363_v37, %v8362_v0  ;;  %v8365_v19 = vpop.f32.mrb[194].mxu1 }
0x1b02   :  { %v8366_v16 = vpop.f32.mrb[195].mxu1 }
0x1b03   :  { %v6802_v36 = vadd.f32 %v8364_v49, %v6801_v21  ;;  %v8367_v10 = vadd.f32 %v8366_v16, %v8365_v19  ;;  %v6809_v40 = vpop.f32.mrb[208].mxu0  ;;  %v18031_v49 = vld [vmem:[#allocation12_spill] sm:$0xff] }
0x1b04   :  { %v8946_v44 = vpop.f32.mrb[209].mxu0 }
0x1b05   :  { %v6805_v26 = vadd.f32 %v8367_v10, %v6804_v42  ;;  %v6812_v55 = vpop.f32.mrb[210].mxu0  ;;  %v18032_v44 = vld [vmem:[#allocation221_spill] sm:$0xff] }
0x1b06   :  { %v8947_v25 = vpop.f32.mrb[211].mxu0 }
0x1b07   :  { %v6829_v58 = vpack.c.bf16 %v6805_v26, %v6802_v36  ;;  %v8368_v43 = vpop.f32.mrb[196].mxu1 }
0x1b08   :  { %v8369_v15 = vpop.f32.mrb[197].mxu1 }
0x1b09   :  { %v8370_v54 = vadd.f32 %v8369_v15, %v8368_v43  ;;  %v8371_v31 = vpop.f32.mrb[198].mxu1  ;;  %8957 = vmatmul.mubr.msk.bf16.vlgmr.msra.gmra.mrb[204].mxu1 %vm454_vm1, %v6829_v58  ;;  %v18033_v43 = vld [vmem:[#allocation222_spill] sm:$0xff] }
0x1b0a   :  { %v8372_v59 = vpop.f32.mrb[199].mxu1  ;;  %8960 = vmatprep.mubr.msk.bf16.mxu1 %vm10269_vm0, %v17870_v20 }
0x1b0b   :  { %v6810_v47 = vadd.f32 %v8370_v54, %v6809_v40  ;;  %v8373_v5 = vadd.f32 %v8372_v59, %v8371_v31  ;;  %v6817_v38 = vpop.f32.mrb[212].mxu0  ;;  %v18034_v54 = vld [vmem:[#allocation13_spill] sm:$0xff] }
0x1b0c   :  { %v8950_v1 = vpop.f32.mrb[213].mxu0 }
0x1b0d   :  { %v6813_v51 = vadd.f32 %v8373_v5, %v6812_v55  ;;  %v6820_v9 = vpop.f32.mrb[214].mxu0 }
0x1b0e   :  { %v8951_v23 = vpop.f32.mrb[215].mxu0 }
0x1b0f   :  { %v6830_v53 = vpack.c.bf16 %v6813_v51, %v6810_v47  ;;  %v8374_v33 = vpop.f32.mrb[200].mxu1  ;;  %v18035_v47 = vld [vmem:[#allocation14_spill] sm:$0xff] }
0x1b10   :  { %v8375_v35 = vpop.f32.mrb[201].mxu1 }
0x1b11   :  { %v8376_v7 = vadd.f32 %v8375_v35, %v8374_v33  ;;  %v8377_v48 = vpop.f32.mrb[202].mxu1  ;;  %8961 = vmatmul.mubr.msk.bf16.gmra.mrb[208].mxu1 %vm454_vm1, %v6830_v53 }
0x1b12   :  { %v8378_v50 = vpop.f32.mrb[203].mxu1  ;;  %8964 = vmatprep.mubr.msk.bf16.mxu1 %vm10269_vm0, %v17870_v20 }
0x1b13   :  { %v6818_v45 = vadd.f32 %v8376_v7, %v6817_v38  ;;  %v8379_v12 = vadd.f32 %v8378_v50, %v8377_v48 }
0x1b15   :  { %v6821_v14 = vadd.f32 %v8379_v12, %v6820_v9 }
0x1b17   :  { %v6831_v17 = vpack.c.bf16 %v6821_v14, %v6818_v45 }
0x1b19   :  { %8965 = vmatmul.mubr.msk.bf16.gmra.mrb[212].mxu1 %vm454_vm1, %v6831_v17 }
0x1b1a   :  { %8986 = vmatprep.mubr.msk.bf16.mxu1 %vm10269_vm0, %v17870_v20 }
0x1bdc   :  { %v6885_v4 = vpop.f32.mrb[204].mxu1 }
0x1bdd   :  { %v6886_v22 = vadd.f32 %v7725_v39, %v6885_v4  ;;  %v8958_v18 = vpop.f32.mrb[205].mxu1 }
0x1bde   :  { %v6888_v63 = vpop.f32.mrb[206].mxu1 }
0x1bdf   :  { %v6908_v27 = vadd.f32 %v6886_v22, %v18024_v30  ;;  %v6889_v56 = vadd.f32 %v7725_v39, %v6888_v63  ;;  %v8959_v34 = vpop.f32.mrb[207].mxu1 }
0x1be1   :  { %v6909_v2 = vadd.f32 %v6889_v56, %v18025_v13  ;;  %v6914_v41 = vadd.f32 %v6908_v27, %v18026_v3 }
0x1be3   :  { %v6922_v29 = vsel %vm454_vm1, %v6914_v41, 0.0  ;;  %v6915_v57 = vadd.f32 %v6909_v2, %v18027_v46 }
0x1be4   :  { %6923 = vadd.xlane.f32.xlu0 %v6922_v29  ;;  %v6893_v62 = vpop.f32.mrb[208].mxu1 }
0x1be5   :  { %v6894_v11 = vadd.f32 %v7725_v39, %v6893_v62  ;;  %v8962_v8 = vpop.f32.mrb[209].mxu1  ;;  %v6925_v28 = vsel %vm454_vm1, %v6915_v57, 0.0  ;;  %v7030_v62 = vld [vmem:[%s16292_s14] sm:$0xff] }
0x1be6   :  { %6926 = vadd.xlane.f32.xlu1 %v6925_v28  ;;  %v6896_v60 = vpop.f32.mrb[210].mxu1  ;;  %v7032_v28 = vld [vmem:[%s16292_s14 + $0x10] sm:$0xff] }
0x1be7   :  { %v6910_v6 = vadd.f32 %v6894_v11, %v18028_v52  ;;  %v6897_v24 = vadd.f32 %v7725_v39, %v6896_v60  ;;  %v8963_v21 = vpop.f32.mrb[211].mxu1  ;;  %v7031_v11 = vld [vmem:[%s16292_s14 + $0x8] sm:$0xff]  ;;  %v7033_v60 = vld [vmem:[%s16292_s14 + $0x18] sm:$0xff] }
0x1be8   :  { %v7037_v8 = vpack.c.bf16 %v7031_v11, %v7030_v62  ;;  %v7038_v52 = vpack.c.bf16 %v7033_v60, %v7032_v28 }
0x1be9   :  { %v6911_v42 = vadd.f32 %v6897_v24, %v18029_v61  ;;  %v6916_v0 = vadd.f32 %v6910_v6, %v18030_v32  ;;  %v7118_v6 = vld [vmem:[%s16294_s16] sm:$0xff]  ;;  %v7119_v24 = vld [vmem:[%s16294_s16 + $0x8] sm:$0xff] }
0x1bea   :  { %8969 = vmatpush3.bf16.msra.mxu0 %v7037_v8  ;;  %v7123_v21 = vpack.c.bf16 %v7119_v24, %v7118_v6 }
0x1beb   :  { %v6928_v37 = vsel %vm454_vm1, %v6916_v0, 0.0  ;;  %v6917_v19 = vadd.f32 %v6911_v42, %v18031_v49  ;;  %8970 = vmatprep.subr.bf16.mxu0 %v17870_v20 }
0x1bec   :  { %6929 = vadd.xlane.f32.xlu0 %v6928_v37  ;;  %v6901_v16 = vpop.f32.mrb[212].mxu1  ;;  %8985 = vmatpush3.bf16.msra.mxu1 %v7123_v21 }
0x1bed   :  { %v6902_v36 = vadd.f32 %v7725_v39, %v6901_v16  ;;  %v8966_v10 = vpop.f32.mrb[213].mxu1  ;;  %v6931_v58 = vsel %vm454_vm1, %v6917_v19, 0.0 }
0x1bee   :  { %v6904_v40 = vpop.f32.mrb[214].mxu1  ;;  %8971 = vmatpush3.bf16.msra.mxu0 %v7038_v52 }
0x1bef   :  { %v6912_v26 = vadd.f32 %v6902_v36, %v18032_v44  ;;  %v6905_v55 = vadd.f32 %v7725_v39, %v6904_v40  ;;  %v8967_v25 = vpop.f32.mrb[215].mxu1  ;;  %8998 = vmatprep.subr.bf16.mxu0 %v17870_v20 }
0x1bf0   :  { %6932 = vadd.xlane.f32.xlu0 %v6931_v58 }
0x1bf1   :  { %v6913_v15 = vadd.f32 %v6905_v55, %v18033_v43  ;;  %v6918_v31 = vadd.f32 %v6912_v26, %v18034_v54  ;;  %v7729_v26 = vld [vmem:[%s16290_s12] ss:$0 sm:$0xff] }
0x1bf3   :  { %v6934_v59 = vsel %vm454_vm1, %v6918_v31, 0.0  ;;  %v6919_v5 = vadd.f32 %v6913_v15, %v18035_v47  ;;  %v7730_v47 = vld [vmem:[%s16291_s13] ss:$0 sm:$0xff] }
0x1bf4   :  { %6935 = vadd.xlane.f32.xlu0 %v6934_v59 }
0x1bf5   :  { %v6937_v38 = vsel %vm454_vm1, %v6919_v5, 0.0 }
0x1bf6   :  { %6938 = vadd.xlane.f32.xlu1 %v6937_v38 }
0x1c71   :  { %v6924_v1 = vpop.xlane.xlu0 %6923 }
0x1c72   :  { %v6940_v51 = vmul.f32 0.03125, %v6924_v1 }
0x1c73   :  { %v6927_v9 = vpop.xlane.xlu1 %6926 }
0x1c74   :  { %v16095_v23 = vsub.f32 %v6914_v41, %v6940_v51  ;;  %v6941_v53 = vmul.f32 0.03125, %v6927_v9  ;;  %v7197_v51 = vld [vmem:[%s16296_s18] sm:$0xff]  ;;  %v7198_v9 = vld [vmem:[%s16296_s18 + $0x8] sm:$0xff] }
0x1c76   :  { %v16097_v33 = vsub.f32 %v6915_v57, %v6941_v53  ;;  %v6952_v35 = vmul.f32 %v16095_v23, %v16095_v23 }
0x1c78   :  { %v6958_v7 = vsel %vm454_vm1, %v6952_v35, 0.0  ;;  %v6953_v48 = vmul.f32 %v16097_v33, %v16097_v33 }
0x1c79   :  { %v6930_v50 = vpop.xlane.xlu0 %6929  ;;  %6959 = vadd.xlane.f32.xlu0 %v6958_v7  ;;  %v7201_v7 = vpack.c.bf16 %v7198_v9, %v7197_v51 }
0x1c7a   :  { %v6942_v45 = vmul.f32 0.03125, %v6930_v50  ;;  %v6961_v12 = vsel %vm454_vm1, %v6953_v48, 0.0 }
0x1c7b   :  { %6962 = vadd.xlane.f32.xlu1 %v6961_v12  ;;  %v7200_v12 = vld [vmem:[%s16296_s18 + $0x18] sm:$0xff] }
0x1c7c   :  { %v16105_v14 = vsub.f32 %v6916_v0, %v6942_v45  ;;  %v7199_v45 = vld [vmem:[%s16296_s18 + $0x10] sm:$0xff] }
0x1c7d   :  { %v6933_v17 = vpop.xlane.xlu0 %6932 }
0x1c7e   :  { %v6943_v39 = vmul.f32 0.03125, %v6933_v17  ;;  %v6954_v4 = vmul.f32 %v16105_v14, %v16105_v14 }
0x1c80   :  { %v16109_v22 = vsub.f32 %v6917_v19, %v6943_v39  ;;  %v6964_v18 = vsel %vm454_vm1, %v6954_v4, 0.0  ;;  %v7202_v39 = vpack.c.bf16 %v7200_v12, %v7199_v45 }
0x1c81   :  { %6965 = vadd.xlane.f32.xlu0 %v6964_v18  ;;  %v6936_v63 = vpop.xlane.xlu0 %6935 }
0x1c82   :  { %v6944_v30 = vmul.f32 0.03125, %v6936_v63  ;;  %v6955_v27 = vmul.f32 %v16109_v22, %v16109_v22 }
0x1c83   :  { %v6939_v56 = vpop.xlane.xlu1 %6938 }
0x1c84   :  { %v16114_v34 = vsub.f32 %v6918_v31, %v6944_v30  ;;  %v6945_v13 = vmul.f32 0.03125, %v6939_v56  ;;  %v6967_v2 = vsel %vm454_vm1, %v6955_v27, 0.0 }
0x1c85   :  { %6968 = vadd.xlane.f32.xlu1 %v6967_v2 }
0x1c86   :  { %v16117_v3 = vsub.f32 %v6919_v5, %v6945_v13  ;;  %v6956_v41 = vmul.f32 %v16114_v34, %v16114_v34 }
0x1c88   :  { %v6970_v29 = vsel %vm454_vm1, %v6956_v41, 0.0  ;;  %v6957_v46 = vmul.f32 %v16117_v3, %v16117_v3 }
0x1c89   :  { %6971 = vadd.xlane.f32.xlu0 %v6970_v29 }
0x1c8a   :  { %v6973_v57 = vsel %vm454_vm1, %v6957_v46, 0.0 }
0x1c8b   :  { %6974 = vadd.xlane.f32.xlu1 %v6973_v57 }
0x1d06   :  { %v6960_v61 = vpop.xlane.xlu0 %6959 }
0x1d07   :  { %v6976_v42 = vmul.f32 0.03125, %v6960_v61 }
0x1d08   :  { %v6963_v32 = vpop.xlane.xlu1 %6962 }
0x1d09   :  { %v6982_v0 = vadd.f32 1e-05, %v6976_v42  ;;  %v6977_v37 = vmul.f32 0.03125, %v6963_v32 }
0x1d0b   :  { %10143 = vrsqrt.f32 %v6982_v0  ;;  %v6983_v49 = vadd.f32 1e-05, %v6977_v37 }
0x1d0d   :  { %10145 = vrsqrt.f32 %v6983_v49 }
0x1d0e   :  { %v6966_v19 = vpop.xlane.xlu0 %6965 }
0x1d0f   :  { %v6978_v16 = vmul.f32 0.03125, %v6966_v19 }
0x1d11   :  { %v6984_v36 = vadd.f32 1e-05, %v6978_v16 }
0x1d12   :  { %v6969_v10 = vpop.xlane.xlu1 %6968 }
0x1d13   :  { %10147 = vrsqrt.f32 %v6984_v36  ;;  %v6979_v40 = vmul.f32 0.03125, %v6969_v10 }
0x1d15   :  { %v10144_v44 = vpop.eup %10143  ;;  %v6985_v55 = vadd.f32 1e-05, %v6979_v40 }
0x1d16   :  { %v6994_v25 = vmul.f32 %v10144_v44, %v16095_v23  ;;  %v6972_v58 = vpop.xlane.xlu0 %6971 }
0x1d17   :  { %v10146_v43 = vpop.eup %10145  ;;  %10149 = vrsqrt.f32 %v6985_v55  ;;  %v6980_v15 = vmul.f32 0.03125, %v6972_v58 }
0x1d18   :  { %v7006_v54 = vmul.f32 %v7729_v26, %v6994_v25  ;;  %v6995_v31 = vmul.f32 %v10146_v43, %v16097_v33  ;;  %v6975_v59 = vpop.xlane.xlu1 %6974 }
0x1d19   :  { %v6986_v5 = vadd.f32 1e-05, %v6980_v15  ;;  %v6981_v38 = vmul.f32 0.03125, %v6975_v59 }
0x1d1a   :  { %v7007_v1 = vmul.f32 %v7729_v26, %v6995_v31  ;;  %v7018_v53 = vadd.f32 %v7730_v47, %v7006_v54  ;;  %v7739_v54 = vld [vmem:[%s16297_s19] ss:$0 sm:$0xff] }
0x1d1b   :  { %10151 = vrsqrt.f32 %v6986_v5  ;;  %v6987_v23 = vadd.f32 1e-05, %v6981_v38 }
0x1d1c   :  { %v7019_v33 = vadd.f32 %v7730_v47, %v7007_v1 }
0x1d1d   :  { %v10148_v35 = vpop.eup %10147  ;;  %10153 = vrsqrt.f32 %v6987_v23 }
0x1d1e   :  { %v6996_v48 = vmul.f32 %v10148_v35, %v16105_v14  ;;  %v7034_v50 = vpack.c.bf16 %v7019_v33, %v7018_v53 }
0x1d20   :  { %8973 = vmatmul.mubr.msk.bf16.vlgmr.msra.gmra.mrb[216].mxu0 %vm454_vm1, %v7034_v50  ;;  %v7008_v14 = vmul.f32 %v7729_v26, %v6996_v48 }
0x1d21   :  { %v10150_v17 = vpop.eup %10149  ;;  %8976 = vmatprep.mubr.msk.bf16.mxu0 %vm10269_vm0, %v17870_v20  ;;  %8999 = vmatpush3.bf16.msra.mxu0 %v7201_v7 }
0x1d22   :  { %v6997_v4 = vmul.f32 %v10150_v17, %v16109_v22  ;;  %9000 = vmatprep.subr.bf16.mxu0 %v17870_v20  ;;  %v7020_v27 = vadd.f32 %v7730_v47, %v7008_v14 }
0x1d24   :  { %v7009_v18 = vmul.f32 %v7729_v26, %v6997_v4 }
0x1d25   :  { %v10152_v63 = vpop.eup %10151  ;;  %9001 = vmatpush3.bf16.msra.mxu0 %v7202_v39 }
0x1d26   :  { %v6998_v30 = vmul.f32 %v10152_v63, %v16114_v34  ;;  %v7021_v56 = vadd.f32 %v7730_v47, %v7009_v18  ;;  %v10277_v34 = vmov 0.0|0.0  }
0x1d27   :  { %v10154_v13 = vpop.eup %10153  ;;  %9677 = vmatprep.subr.bf16.mxu1 %v10277_v34 }
0x1d28   :  { %v6999_v2 = vmul.f32 %v10154_v13, %v16117_v3  ;;  %v7035_v41 = vpack.c.bf16 %v7021_v56, %v7020_v27  ;;  %v7010_v29 = vmul.f32 %v7729_v26, %v6998_v30  ;;  %v7731_v3 = vld [vmem:[%s16293_s15] ss:$0 sm:$0xff] }
0x1d2a   :  { %8977 = vmatmul.mubr.msk.bf16.gmra.mrb[220].mxu0 %vm454_vm1, %v7035_v41  ;;  %v7011_v46 = vmul.f32 %v7729_v26, %v6999_v2  ;;  %v7022_v57 = vadd.f32 %v7730_v47, %v7010_v29  ;;  %v7735_v29 = vld [vmem:[#allocation2] ss:$0 sm:$0xff] }
0x1d2b   :  { %8980 = vmatprep.mubr.msk.bf16.mxu0 %vm10269_vm0, %v17870_v20 }
0x1d2c   :  { %v7023_v22 = vadd.f32 %v7730_v47, %v7011_v46 }
0x1d2e   :  { %v7036_v62 = vpack.c.bf16 %v7023_v22, %v7022_v57 }
0x1d32   :  { %8981 = vmatmul.mubr.msk.bf16.gmra.mrb[224].mxu0 %vm454_vm1, %v7036_v62 }
0x1d33   :  { %9002 = vmatprep.mubr.msk.bf16.mxu0 %vm10269_vm0, %v17870_v20 }
0x1d3a   :  { %9003 = vmatmul.mubr.msk.bf16.vlgmr.msra.gmra.mrb[228].mxu0 %vm454_vm1, %v7034_v50 }
0x1d3b   :  { %9006 = vmatprep.mubr.msk.bf16.mxu0 %vm10269_vm0, %v17870_v20 }
0x1d42   :  { %9007 = vmatmul.mubr.msk.bf16.gmra.mrb[232].mxu0 %vm454_vm1, %v7035_v41  ;;  %v10278_v41 = vmov 0  }
0x1d43   :  { %9010 = vmatprep.mubr.msk.bf16.mxu0 %vm10269_vm0, %v17870_v20  ;;  %9829 = vset.pattern.permute.xlu0 %v10278_v41 }
0x1d44   :  { %9830 = vset.pattern.permute.xlu1 %v10278_v41 }
0x1d4a   :  { %9011 = vmatmul.mubr.msk.bf16.gmra.mrb[236].mxu0 %vm454_vm1, %v7036_v62 }
0x1df3   :  { %v7089_v11 = vpop.f32.mrb[216].mxu0 }
0x1df4   :  { %v7090_v8 = vadd.f32 %v7731_v3, %v7089_v11  ;;  %v8974_v28 = vpop.f32.mrb[217].mxu0 }
0x1df5   :  { %v7092_v60 = vpop.f32.mrb[218].mxu0 }
0x1df6   :  { %v7093_v52 = vadd.f32 %v7731_v3, %v7092_v60  ;;  %v8975_v6 = vpop.f32.mrb[219].mxu0  ;;  %v7112_v24 = vmax.f32 %v7090_v8, 0.0 }
0x1df8   :  { %v7113_v21 = vmax.f32 %v7093_v52, 0.0 }
0x1dfa   :  { %v7120_v61 = vpack.c.bf16 %v7113_v21, %v7112_v24 }
0x1dfc   :  { %8987 = vmatmul.mubr.msk.bf16.vlgmr.msra.gmra.mrb[216].mxu1 %vm433_vm2, %v7120_v61 }
0x1dfd   :  { %v7097_v42 = vpop.f32.mrb[220].mxu0  ;;  %8990 = vmatprep.mubr.msk.bf16.mxu1 %vm10269_vm0, %v17870_v20 }
0x1dfe   :  { %v7098_v32 = vadd.f32 %v7731_v3, %v7097_v42  ;;  %v8978_v0 = vpop.f32.mrb[221].mxu0 }
0x1dff   :  { %v7100_v37 = vpop.f32.mrb[222].mxu0 }
0x1e00   :  { %v7101_v49 = vadd.f32 %v7731_v3, %v7100_v37  ;;  %v8979_v19 = vpop.f32.mrb[223].mxu0  ;;  %v7114_v16 = vmax.f32 %v7098_v32, 0.0 }
0x1e01   :  { %v7025_v19 = vld [vmem:[%s18036_s1 + $0x8] sm:$0xff] }
0x1e02   :  { %v7115_v36 = vmax.f32 %v7101_v49, 0.0  ;;  %vm7274_vm8 = vcmp.gt.f32.partialorder %v7025_v19, 0.0 }
0x1e04   :  { %v7121_v10 = vpack.c.bf16 %v7115_v36, %v7114_v16  ;;  %v16208_v16 = vld [vmem:[%s18036_s1 + $0x20] sm:$0xff] }
0x1e05   :  { %v7105_v40 = vpop.f32.mrb[224].mxu0  ;;  %v7024_v36 = vld [vmem:[%s18036_s1] sm:$0xff]  ;;  %vm7277_vm9 = vcmp.gt.f32.partialorder %v16208_v16, 0.0 }
0x1e06   :  { %v7106_v44 = vadd.f32 %v7731_v3, %v7105_v40  ;;  %v8982_v26 = vpop.f32.mrb[225].mxu0  ;;  %8991 = vmatmul.mubr.msk.bf16.gmra.mrb[220].mxu1 %vm433_vm2, %v7121_v10  ;;  %v16216_v10 = vld [vmem:[%s18036_s1 + $0x28] sm:$0xff]  ;;  %vm7273_vm10 = vcmp.gt.f32.partialorder %v7024_v36, 0.0 }
0x1e07   :  { %v7108_v55 = vpop.f32.mrb[226].mxu0  ;;  %8994 = vmatprep.mubr.msk.bf16.mxu1 %vm10269_vm0, %v17870_v20  ;;  %vm7278_vm11 = vcmp.gt.f32.partialorder %v16216_v10, 0.0 }
0x1e08   :  { %v7109_v25 = vadd.f32 %v7731_v3, %v7108_v55  ;;  %v8983_v58 = vpop.f32.mrb[227].mxu0  ;;  %v7116_v43 = vmax.f32 %v7106_v44, 0.0  ;;  %v7026_v44 = vld [vmem:[%s18036_s1 + $0x10] sm:$0xff] }
0x1e09   :  { %v7027_v58 = vld [vmem:[%s18036_s1 + $0x18] sm:$0xff]  ;;  %vm7275_vm12 = vcmp.gt.f32.partialorder %v7026_v44, 0.0 }
0x1e0a   :  { %v7117_v15 = vmax.f32 %v7109_v25, 0.0  ;;  %vm7276_vm14 = vcmp.gt.f32.partialorder %v7027_v58, 0.0 }
0x1e0c   :  { %v7122_v31 = vpack.c.bf16 %v7117_v15, %v7116_v43 }
0x1e0d   :  { %v7244_v59 = vpop.f32.mrb[228].mxu0 }
0x1e0e   :  { %v7245_v47 = vadd.f32 %v7739_v54, %v7244_v59  ;;  %8995 = vmatmul.mubr.msk.bf16.gmra.mrb[224].mxu1 %vm433_vm2, %v7122_v31  ;;  %v9004_v5 = vpop.f32.mrb[229].mxu0 }
0x1e0f   :  { %v7247_v38 = vpop.f32.mrb[230].mxu0  ;;  %9026 = vmatprep.mubr.msk.f32.mxu1 %vm10269_vm0, %v17870_v20 }
0x1e10   :  { %v7248_v1 = vadd.f32 %v7739_v54, %v7247_v38  ;;  %v9005_v51 = vpop.f32.mrb[231].mxu0  ;;  %v7267_v9 = vmax.f32 %v7245_v47, 0.0 }
0x1e12   :  { %v7268_v23 = vmax.f32 %v7248_v1, 0.0 }
0x1e14   :  { %v9678_v53 = vpack.c.bf16 %v7268_v23, %v7267_v9 }
0x1e15   :  { %v7252_v33 = vpop.f32.mrb[232].mxu0 }
0x1e16   :  { %v7253_v35 = vadd.f32 %v7739_v54, %v7252_v33  ;;  %v9008_v7 = vpop.f32.mrb[233].mxu0  ;;  %9679 = vmatpush3.bf16.msra.mxu1 %v9678_v53 }
0x1e17   :  { %v7255_v48 = vpop.f32.mrb[234].mxu0  ;;  %9680 = vmatprep.subr.bf16.mxu1 %v10277_v34 }
0x1e18   :  { %v7256_v50 = vadd.f32 %v7739_v54, %v7255_v48  ;;  %v9009_v45 = vpop.f32.mrb[235].mxu0  ;;  %v7269_v12 = vmax.f32 %v7253_v35, 0.0 }
0x1e1a   :  { %v7270_v17 = vmax.f32 %v7256_v50, 0.0 }
0x1e1c   :  { %v9681_v39 = vpack.c.bf16 %v7270_v17, %v7269_v12 }
0x1e1d   :  { %v7260_v4 = vpop.f32.mrb[236].mxu0 }
0x1e1e   :  { %v7261_v14 = vadd.f32 %v7739_v54, %v7260_v4  ;;  %v9012_v18 = vpop.f32.mrb[237].mxu0  ;;  %9682 = vmatpush3.bf16.msra.mxu1 %v9681_v39 }
0x1e1f   :  { %v7263_v63 = vpop.f32.mrb[238].mxu0  ;;  %9683 = vmatprep.subr.bf16.mxu1 %v10277_v34 }
0x1e20   :  { %v7264_v30 = vadd.f32 %v7739_v54, %v7263_v63  ;;  %v9013_v27 = vpop.f32.mrb[239].mxu0  ;;  %v7271_v56 = vmax.f32 %v7261_v14, 0.0 }
0x1e22   :  { %v7272_v13 = vmax.f32 %v7264_v30, 0.0 }
0x1e24   :  { %v9684_v2 = vpack.c.bf16 %v7272_v13, %v7271_v56 }
0x1e26   :  { %9685 = vmatpush3.bf16.msra.mxu1 %v9684_v2 }
0x1e27   :  { %9029 = vmatprep.subr.bf16.mxu1 %v17870_v20 }
0x1ecf   :  { %v7174_v46 = vpop.f32.mrb[216].mxu1 }
0x1ed0   :  { %v7175_v22 = vadd.f32 %v7735_v29, %v7174_v46  ;;  %v8988_v57 = vpop.f32.mrb[217].mxu1 }
0x1ed1   :  { %v7177_v62 = vpop.f32.mrb[218].mxu1 }
0x1ed2   :  { %v7178_v3 = vadd.f32 %v7735_v29, %v7177_v62  ;;  %7281 = vperm.xlu0 %9829, %v7175_v22   ;;  %v8989_v11 = vpop.f32.mrb[219].mxu1 }
0x1ed4   :  { %7286 = vperm.xlu1 %9830, %v7178_v3  }
0x1ed9   :  { %v7182_v34 = vpop.f32.mrb[220].mxu1 }
0x1eda   :  { %v7183_v8 = vadd.f32 %v7735_v29, %v7182_v34  ;;  %v8992_v28 = vpop.f32.mrb[221].mxu1 }
0x1edb   :  { %v7185_v60 = vpop.f32.mrb[222].mxu1 }
0x1edc   :  { %7291 = vperm.xlu1 %9830, %v7183_v8   ;;  %v8993_v52 = vpop.f32.mrb[223].mxu1  ;;  %v7186_v0 = vadd.f32 %v7735_v29, %v7185_v60 }
0x1ee1   :  { %v7190_v6 = vpop.f32.mrb[224].mxu1 }
0x1ee2   :  { %v7191_v24 = vadd.f32 %v7735_v29, %v7190_v6  ;;  %v8996_v21 = vpop.f32.mrb[225].mxu1 }
0x1ee3   :  { %v7193_v61 = vpop.f32.mrb[226].mxu1 }
0x1ee4   :  { %7301 = vperm.xlu1 %9830, %v7191_v24   ;;  %v8997_v42 = vpop.f32.mrb[227].mxu1  ;;  %v7194_v32 = vadd.f32 %v7735_v29, %v7193_v61 }
0x1ee8   :  { %7306 = vperm.xlu1 %9830, %v7194_v32  }
0x1eec   :  { %7296 = vperm.xlu1 %9830, %v7186_v0  }
0x1f51   :  { %v7282_v26 = vpop.permute.xlu0 %7281 }
0x1f52   :  { %v7309_v15 = vsel %vm7273_vm10, %v7282_v26, -1e+09 }
0x1f53   :  { %v7287_v37 = vpop.permute.xlu1 %7286  ;;  %v7316_v1 = vsel %vm7315_vm13, %v7309_v15, -inf }
0x1f54   :  { %v7310_v55 = vsel %vm7274_vm8, %v7287_v37, -1e+09 }
0x1f55   :  { %v7317_v31 = vsel %vm7315_vm13, %v7310_v55, -inf }
0x1f5b   :  { %v7292_v49 = vpop.permute.xlu1 %7291 }
0x1f5c   :  { %v7311_v5 = vsel %vm7275_vm12, %v7292_v49, -1e+09 }
0x1f5d   :  { %v7318_v53 = vsel %vm7315_vm13, %v7311_v5, -inf }
0x1f63   :  { %v7302_v40 = vpop.permute.xlu1 %7301 }
0x1f64   :  { %v7313_v25 = vsel %vm7277_vm9, %v7302_v40, -1e+09 }
0x1f65   :  { %v7320_v59 = vsel %vm7315_vm13, %v7313_v25, -inf }
0x1f66   :  { %v7321_v9 = vmax.f32 %v7316_v1, %v7320_v59 }
0x1f67   :  { %v7307_v43 = vpop.permute.xlu1 %7306 }
0x1f68   :  { %v7314_v54 = vsel %vm7278_vm11, %v7307_v43, -1e+09 }
0x1f69   :  { %v7322_v47 = vsel %vm7315_vm13, %v7314_v54, -inf }
0x1f6a   :  { %v7323_v38 = vmax.f32 %v7317_v31, %v7322_v47 }
0x1f6b   :  { %v7297_v51 = vpop.permute.xlu1 %7296 }
0x1f6c   :  { %v7312_v23 = vsel %vm7276_vm14, %v7297_v51, -1e+09  ;;  %v7324_v35 = vmax.f32 %v7321_v9, %v7323_v38  ;;  %v7492_v9 = vld [vmem:[%s16298_s20] sm:$0xff] }
0x1f6d   :  { %v7319_v33 = vsel %vm7315_vm13, %v7312_v23, -inf }
0x1f6e   :  { %v7325_v7 = vmax.f32 %v7318_v53, %v7319_v33  ;;  %v7494_v53 = vld [vmem:[%s16298_s20 + $0x10] sm:$0xff] }
0x1f70   :  { %v7326_v48 = vmax.f32 %v7324_v35, %v7325_v7  ;;  %v7495_v35 = vld [vmem:[%s16298_s20 + $0x18] sm:$0xff] }
0x1f71   :  { %v7498_v7 = vpack.c.bf16 %v7495_v35, %v7494_v53 }
0x1f72   :  { %v7327_v50 = vrot.slane %v7326_v48, 4 }
0x1f74   :  { %v7328_v45 = vmax.f32 %v7326_v48, %v7327_v50  ;;  %v7487_v48 = vlaneseq }
0x1f76   :  { %v7329_v12 = vrot.slane %v7328_v45, 2  ;;  %v7488_v50 = vshrl.u32 %v7487_v48, 7 }
0x1f78   :  { %v7330_v17 = vmax.f32 %v7328_v45, %v7329_v12  ;;  %v7489_v45 = vsub.s32 0, %v7488_v50 }
0x1f7a   :  { %v7331_v39 = vrot.slane %v7330_v17, 1 }
0x1f7c   :  { %v7332_v4 = vmax.f32 %v7330_v17, %v7331_v39 }
0x1f7e   :  { %v7333_v14 = vsub.f32 %v7309_v15, %v7332_v4  ;;  %v7334_v18 = vsub.f32 %v7310_v55, %v7332_v4  ;;  %v7335_v63 = vsub.f32 %v7311_v5, %v7332_v4  ;;  %v7336_v30 = vsub.f32 %v7312_v23, %v7332_v4  ;;  %v7493_v23 = vld [vmem:[%s16298_s20 + $0x8] sm:$0xff] }
0x1f7f   :  { %v7337_v27 = vsub.f32 %v7313_v25, %v7332_v4  ;;  %v7338_v56 = vsub.f32 %v7314_v54, %v7332_v4  ;;  %v7497_v33 = vpack.c.bf16 %v7493_v23, %v7492_v9 }
0x1f80   :  { %v7339_v13 = vmul.f32 1.442695, %v7333_v14  ;;  %v7341_v2 = vmul.f32 1.442695, %v7334_v18  ;;  %v7343_v41 = vmul.f32 1.442695, %v7335_v63 }
0x1f81   :  { %v7345_v29 = vmul.f32 1.442695, %v7336_v30  ;;  %v7347_v46 = vmul.f32 1.442695, %v7337_v27  ;;  %v7349_v22 = vmul.f32 1.442695, %v7338_v56 }
0x1f82   :  { %10155 = vpow2.f32 %v7339_v13 }
0x1f83   :  { %10157 = vpow2.f32 %v7341_v2 }
0x1f84   :  { %10159 = vpow2.f32 %v7343_v41 }
0x1f85   :  { %10161 = vpow2.f32 %v7345_v29 }
0x1f86   :  { %10163 = vpow2.f32 %v7347_v46 }
0x1f87   :  { %10165 = vpow2.f32 %v7349_v22 }
0x1f8c   :  { %v10156_v57 = vpop.eup %10155 }
0x1f8d   :  { %v10158_v62 = vpop.eup %10157  ;;  %v7351_v3 = vmul.f32 %v10156_v57, %v7024_v36 }
0x1f8e   :  { %v10160_v11 = vpop.eup %10159  ;;  %v7352_v34 = vmul.f32 %v10158_v62, %v7025_v19 }
0x1f8f   :  { %v10162_v8 = vpop.eup %10161  ;;  %v7353_v28 = vmul.f32 %v10160_v11, %v7026_v44  ;;  %v7357_v60 = vsel %vm7315_vm13, %v7351_v3, 0.0 }
0x1f90   :  { %v10164_v52 = vpop.eup %10163  ;;  %v7354_v6 = vmul.f32 %v10162_v8, %v7027_v58  ;;  %v7358_v24 = vsel %vm7315_vm13, %v7352_v34, 0.0 }
0x1f91   :  { %v10166_v21 = vpop.eup %10165  ;;  %v7359_v61 = vadd.f32 %v7358_v24, %v7357_v60  ;;  %v7355_v42 = vmul.f32 %v10164_v52, %v16208_v16  ;;  %v7360_v32 = vsel %vm7315_vm13, %v7353_v28, 0.0 }
0x1f92   :  { %v7356_v37 = vmul.f32 %v10166_v21, %v16216_v10  ;;  %v7362_v49 = vsel %vm7315_vm13, %v7354_v6, 0.0 }
0x1f93   :  { %v7361_v0 = vadd.f32 %v7360_v32, %v7359_v61  ;;  %v7364_v36 = vsel %vm7315_vm13, %v7355_v42, 0.0 }
0x1f94   :  { %v7366_v44 = vsel %vm7315_vm13, %v7356_v37, 0.0 }
0x1f95   :  { %v7363_v19 = vadd.f32 %v7362_v49, %v7361_v0 }
0x1f97   :  { %v7365_v40 = vadd.f32 %v7364_v36, %v7363_v19 }
0x1f99   :  { %v7367_v26 = vadd.f32 %v7366_v44, %v7365_v40 }
0x1f9b   :  { %v7368_v55 = vrot.slane %v7367_v26, 4 }
0x1f9d   :  { %v7369_v25 = vadd.f32 %v7368_v55, %v7367_v26 }
0x1f9f   :  { %v7370_v58 = vrot.slane %v7369_v25, 2 }
0x1fa1   :  { %v7371_v43 = vadd.f32 %v7370_v58, %v7369_v25 }
0x1fa3   :  { %v7372_v15 = vrot.slane %v7371_v43, 1 }
0x1fa5   :  { %v7373_v16 = vadd.f32 %v7372_v15, %v7371_v43 }
0x1fa7   :  { %v7374_v54 = vadd.f32 1e-09, %v7373_v16 }
0x1fa9   :  { %10167 = vrcp.f32 %v7374_v54 }
0x1fb3   :  { %v10168_v31 = vpop.eup %10167 }
0x1fb4   :  { %v7376_v59 = vmul.f32 %v10168_v31, %v7351_v3  ;;  %v7377_v10 = vmul.f32 %v10168_v31, %v7352_v34  ;;  %v7378_v47 = vmul.f32 %v10168_v31, %v7353_v28  ;;  %v7379_v5 = vmul.f32 %v10168_v31, %v7354_v6 }
0x1fb5   :  { %v7380_v38 = vmul.f32 %v10168_v31, %v7355_v42  ;;  %v7381_v1 = vmul.f32 %v10168_v31, %v7356_v37 }
0x1fb6   :  { %7382 = vxpose.xlu1.b32.start [1/6] (short) (narrow) %v7376_v59, 8 }
0x1fba   :  { %7383 = vxpose.xlu1.b32.cont [2/6] (short) (narrow) %v7377_v10, 8 }
0x1fbe   :  { %7384 = vxpose.xlu1.b32.cont [3/6] (short) (narrow) %v7378_v47, 8 }
0x1fc2   :  { %7385 = vxpose.xlu1.b32.cont [4/6] (short) (narrow) %v7379_v5, 8 }
0x1fc6   :  { %7386 = vxpose.xlu1.b32.cont [5/6] (short) (narrow) %v7380_v38, 8 }
0x1fca   :  { %7387 = vxpose.xlu1.b32.end [6/6] (short) (narrow) %v7381_v1, 8 }
0x2036   :  { %v7398_v51 = vpop.trf.xlu1 }
0x2037   :  { %9027 = vmatmul.mubr.msk.f32.vlgmr.msra.gmra.mrb[228].mxu1 %vm419_vm3, %v7398_v51 }
0x2038   :  { %9033 = vmatprep.mubr.msk.bf16.mxu1 %vm10269_vm0, %v17870_v20  ;;  %9030 = vmatpush3.bf16.msra.mxu1 %v7497_v33  ;;  %vm7575_vm0 = vcmask 1041408  }
0x2039   :  { %9031 = vmatprep.subr.bf16.mxu1 %v17870_v20  ;;  %v7744_v20 = vld [vmem:[%s16299_s21] ss:$0 sm:$0xff] }
0x203c   :  { %9032 = vmatpush3.bf16.msra.mxu1 %v7498_v7 }
0x210a   :  { %v7483_v12 = vpop.f32.mrb[228].mxu1 }
0x210b   :  { %v7490_v17 = vrot.slane %v7483_v12, %v7489_v45  ;;  %v7557_v39 = vrot.slane %v7483_v12, 1  ;;  %v9028_v4 = vpop.f32.mrb[229].mxu1 }
0x210d   :  { %v7491_v14 = vsub.f32 %v7490_v17, %v7483_v12  ;;  %7558 = vrot.lane.b32.xlu0 %v7557_v39, %s10270_s29  ;;  %s10279_s29 = smov [#allocation6]  }
0x210f   :  { %v7496_v18 = vpack.c.bf16 %v7491_v14, %v7491_v14  ;;  %v7562_v63 = vrot.slane %v7491_v14, 1 }
0x2111   :  { %v7509_v30 = vshll.u32 %v7496_v18, 16  ;;  %7563 = vrot.lane.b32.xlu0 %v7562_v63, %s10274_s2  ;;  %v7507_v27 = vshrl.u32 %v7496_v18, 16  ;;  %s7584_s2 = sshll.u32 %s10279_s29, 4  ;;  %s7585_s2 = int_to_ptr.vmem [resolvable:$true] %s7584_s2 }
0x2112   :  { %s10239_s21 = scalar_lea.vmem %s7585_s2, 128  ;;  %p10244_p9 = scmp.lt.s32.totalorder %s7585_s2, %s7585_s2 }
0x2113   :  { %v7511_v56 = vrot.slane %v7509_v30, 1  ;;  %p10240_p8 = scmp.ne.s32.totalorder %s7585_s2, %s10239_s21  ;;  %p10245_p10 = scmp.lt.s32.totalorder %s10239_s21, %s10239_s21 }
0x2115   :  { %v7512_v13 = vor.u32 %v7511_v56, %v7507_v27  ;;  %p10246_p11 = por %p10245_p10, %p10244_p9 }
0x2117   :  { %9034 = vmatmul.mubr.msk.bf16.vlgmr.msra.gmra.mrb[232].mxu1 %vm454_vm1, %v7512_v13  ;;  %p10247_p12 = pnand %p10246_p11, %p10240_p8 }
0x217f   :  { %v7559_v57 = vpop.permute.xlu0 %7558 }
0x2180   :  { %v7570_v3 = vsel %vm454_vm1, %v7490_v17, %v7559_v57 }
0x2183   :  { %v7564_v62 = vpop.permute.xlu0 %7563 }
0x2184   :  { %v7571_v11 = vsel %vm440_vm4, %v7570_v3, %v7564_v62 }
0x21ea   :  { %v7550_v2 = vpop.f32.mrb[232].mxu1 }
0x21eb   :  { %v7551_v41 = vadd.f32 %v7744_v20, %v7550_v2  ;;  %v9035_v29 = vpop.f32.mrb[233].mxu1 }
0x21ec   :  { %v7553_v46 = vpop.f32.mrb[234].mxu1 }
0x21ed   :  { %7567 = vrot.lane.b32.xlu0 %v7551_v41, %s10271_s5  ;;  %v9036_v22 = vpop.f32.mrb[235].mxu1 }
0x225f   :  { %v7568_v34 = vpop.permute.xlu0 %7567 }
0x2260   :  { %v7572_v8 = vsel %vm426_vm5, %v7571_v11, %v7568_v34 }
0x2261   :  { %v7574_v28 = vsel %vm7573_vm15, %v7572_v8, 0.0 }
0x2262   :  { %v7576_v60 = vsel %vm7575_vm0, %v7574_v28, 0.0 }
0x2263   :  { %7577 = vst [vmem:[#allocation6] sm:$0xff] %v7576_v60 }
0x2264   :  { %10250 = shalt.err (!%p10247_p12)
}
0x2265   :  { %s10251_s15 = scalar_lea.hbm %s16300_s22, 128 }
0x2266   :  { %p10252_p13 = scmp.ne.s32.totalorder %s16300_s22, %s10251_s15  ;;  %p10255_p0 = scmp.lt.u32.totalorder %s10251_s15, %s16300_s22 }
0x2268   :  { %p10257_p1 = pnand %p10255_p0, %p10252_p13 }
0x226a   :  { %10260 = shalt.err (!%p10257_p1)
}
0x226b   :  { %7587 = dma.vmem_to_hbm [thread:$0]  %s7585_s2, 128, %s16300_s22, [#allocation5]  }
0x226c   :  { %10263 = dma.done.wait [#allocation5], 128  }
0x226d   :  { %10264 = vsyncadd [#allocation5], 4294967168 }
0x226e   :  { %7591 = vsyncpa [#allocation4], 1 }
0x226f   :  { %7592 = vsyncpa [#allocation5], 1 }

</bundles_post_ra>
